<compile_context>
chip_gen: v7x
topology: tpu7x:2x2x1
jax: 0.10.0
libtpu: 0.0.40
codegen_flags: <defaults>
</compile_context>

<pallas_src>
import jax
import jax.numpy as jnp
from jax.experimental import pallas as pl
from jax.experimental.pallas import tpu as pltpu

_BN_EPS = 1e-5
_MIB = 1024 * 1024
_OFFSETS = tuple((dy, dx) for dy in range(3) for dx in range(3))


# ---------------------------------------------------------------------------
# Hardware-aware sizing helpers (trace-time only)
# ---------------------------------------------------------------------------
def _vmem_capacity_bytes():
    try:
        return int(pltpu.get_tpu_info().vmem_capacity_bytes)
    except Exception:
        return 64 * _MIB          # conservative (v7x-sized) fallback


def _pick_tb(N, H, W, Cin, Cout):
    """Largest divisor of N whose per-step working set fits the VMEM budget."""
    cap = _vmem_capacity_bytes()
    budget = max(cap // 8, 4 * _MIB)
    per_img = (2 * H * W * Cin * 2             # bf16 input block, double-buffered
               + 2 * H * W * Cout * 2          # bf16 output block, double-buffered
               + (H + 2) * (W + 2) * Cin * 4   # f32 pad scratch
               + 9 * H * W * Cin * 2           # bf16 patch scratch (worst case)
               + H * W * Cout * 4)             # f32 accumulator temporaries
    tb_max = max(1, budget // max(per_img, 1))
    tb = 1
    for d in range(1, N + 1):
        if N % d == 0 and d <= tb_max:
            tb = d
    return tb


def _compiler_params(vmem_estimate_bytes):
    cap = _vmem_capacity_bytes()
    ceiling = (cap * 3) // 4                   # leave headroom for compiler scratch
    floor = min(32 * _MIB, ceiling)
    limit = int(min(max(int(1.5 * vmem_estimate_bytes), floor), ceiling))
    return pltpu.CompilerParams(
        dimension_semantics=("parallel",),
        vmem_limit_bytes=limit,
    )


# ---------------------------------------------------------------------------
# Kernels
# ---------------------------------------------------------------------------
def _conv3x3_tail(x_val, w_ref, o_ref, sum_ref, ssq_ref, pad_ref, patch_ref):
    """Shared conv tail: halo-only zero pad, 3x3 conv on the MXU, raw (pre-BN)
    bf16 output + per-tile per-channel f32 sum / sum-of-squares.

    x_val    : (TB, H, W, Cin)       value (already BN+ReLU'd for stage 2)
    w_ref    : (9*Cin, Cout)         bf16 reshaped conv weights
    o_ref    : (TB, H, W, Cout)      bf16 raw conv output
    sum_ref  : (1, 1, Cout)          f32 per-tile channel sums
    ssq_ref  : (1, 1, Cout)          f32 per-tile channel sums of squares
    pad_ref  : (TB, H+2, W+2, Cin)   f32 scratch with zero halo
    patch_ref: (TB*H*W, 9*Cin) bf16  scratch, or None -> 9-matmul path
    """
    TB, H, W, Cin = x_val.shape
    Cout = o_ref.shape[-1]
    M = TB * H * W

    # Zero only the 1-wide halo; the interior is fully overwritten below.
    zrow = jnp.zeros((TB, 1, W + 2, Cin), pad_ref.dtype)
    zcol = jnp.zeros((TB, H + 2, 1, Cin), pad_ref.dtype)
    pad_ref[:, 0:1, :, :] = zrow
    pad_ref[:, H + 1:H + 2, :, :] = zrow
    pad_ref[:, :, 0:1, :] = zcol
    pad_ref[:, :, W + 1:W + 2, :] = zcol
    pad_ref[:, 1:H + 1, 1:W + 1, :] = x_val.astype(pad_ref.dtype)

    xp = pad_ref[...]   # load once; slice the value (vreg shuffles, no re-DMA)

    if patch_ref is not None:
        # Lane-aligned Cin: slice-assign the nine shifted slabs into a bf16
        # patch scratch (no concatenate copy), then one K = 9*Cin contraction.
        for k, (dy, dx) in enumerate(_OFFSETS):
            patch_ref[:, k * Cin:(k + 1) * Cin] = (
                xp[:, dy:dy + H, dx:dx + W, :].reshape(M, Cin).astype(jnp.bfloat16))
        acc = jnp.dot(patch_ref[...], w_ref[...],
                      preferred_element_type=jnp.float32)
    else:
        # Small / unaligned Cin (copy-bound regime): skip im2col entirely and
        # accumulate nine K = Cin MXU matmuls in f32.
        acc = None
        for k, (dy, dx) in enumerate(_OFFSETS):
            slab = xp[:, dy:dy + H, dx:dx + W, :].reshape(M, Cin).astype(jnp.bfloat16)
            part = jnp.dot(slab, w_ref[k * Cin:(k + 1) * Cin, :],
                           preferred_element_type=jnp.float32)
            acc = part if acc is None else acc + part

    o_ref[...] = acc.reshape(TB, H, W, Cout).astype(o_ref.dtype)
    # Batch stats from the f32 accumulator (stage 2 reads the bf16-rounded a;
    # the resulting mean/var difference is O(bf16 eps) and intended).
    sum_ref[...] = jnp.sum(acc, axis=0).reshape(1, 1, Cout)
    ssq_ref[...] = jnp.sum(acc * acc, axis=0).reshape(1, 1, Cout)


def _conv_stats_kernel(x_ref, w_ref, o_ref, sum_ref, ssq_ref, pad_ref, *scratch):
    """Stage 1: conv of the (bf16) input + batch-stat partials."""
    patch_ref = scratch[0] if scratch else None
    _conv3x3_tail(x_ref[...], w_ref, o_ref, sum_ref, ssq_ref, pad_ref, patch_ref)


def _bnrelu_conv_stats_kernel(a_ref, sc_ref, sh_ref, w_ref,
                              o_ref, sum_ref, ssq_ref, pad_ref, *scratch):
    """Fused stage boundary: single-pass BN(scale/shift)+ReLU of the previous
    raw conv output, then the next conv + batch-stat partials."""
    patch_ref = scratch[0] if scratch else None
    TB, H, W, C = a_ref.shape
    a = a_ref[...].astype(jnp.float32).reshape(TB * H * W, C)
    y = jnp.maximum(a * sc_ref[...] + sh_ref[...], 0.0)
    _conv3x3_tail(y.reshape(TB, H, W, C), w_ref, o_ref, sum_ref, ssq_ref,
                  pad_ref, patch_ref)


def _bnrelu_kernel(a_ref, sc_ref, sh_ref, o_ref):
    """Final epilogue: y = max(a*scale + shift, 0) in one fused pass."""
    TB, H, W, C = a_ref.shape
    a = a_ref[...].astype(jnp.float32).reshape(TB * H * W, C)
    y = jnp.maximum(a * sc_ref[...] + sh_ref[...], 0.0)
    o_ref[...] = y.reshape(TB, H, W, C)


# ---------------------------------------------------------------------------
# pallas_call wrappers
# ---------------------------------------------------------------------------
def _conv_stage(x_nhwc, w_kc, prev_scale=None, prev_shift=None):
    """One pallas_call: [optional fused BN+ReLU of the incoming raw conv output]
    + 3x3 conv + per-tile batch-stat partials.  Grid = batch / TB."""
    N, H, W, Cin = x_nhwc.shape
    K, Cout = w_kc.shape
    TB = _pick_tb(N, H, W, Cin, Cout)
    G = N // TB
    use_im2col = (Cin % 128 == 0)

    img_in = pl.BlockSpec((TB, H, W, Cin), lambda b: (b, 0, 0, 0))
    img_out = pl.BlockSpec((TB, H, W, Cout), lambda b: (b, 0, 0, 0))
    stat_spec = pl.BlockSpec((1, 1, Cout), lambda b: (b, 0, 0))
    w_spec = pl.BlockSpec((K, Cout), lambda b: (0, 0))
    vec_spec = pl.BlockSpec((1, Cin), lambda b: (0, 0))

    out_shape = (
        jax.ShapeDtypeStruct((N, H, W, Cout), jnp.bfloat16),  # raw conv out (bf16)
        jax.ShapeDtypeStruct((G, 1, Cout), jnp.float32),      # per-tile sum
        jax.ShapeDtypeStruct((G, 1, Cout), jnp.float32),      # per-tile sum of sq
    )
    out_specs = (img_out, stat_spec, stat_spec)

    scratch = [pltpu.VMEM((TB, H + 2, W + 2, Cin), jnp.float32)]
    if use_im2col:
        scratch.append(pltpu.VMEM((TB * H * W, K), jnp.bfloat16))

    bpe_in = jnp.dtype(x_nhwc.dtype).itemsize
    vmem_est = (2 * TB * H * W * Cin * bpe_in          # input (double-buffered)
                + 2 * TB * H * W * Cout * 2            # bf16 output (double-buffered)
                + TB * (H + 2) * (W + 2) * Cin * 4     # f32 pad scratch
                + (TB * H * W * K * 2 if use_im2col else 0)
                + TB * H * W * Cout * 4                # f32 acc temporaries
                + 2 * K * Cout * 2 + 8 * Cin * 4)      # weights + scale/shift
    flops = 2 * N * H * W * K * Cout
    bytes_acc = int(N * H * W * (Cin * bpe_in + Cout * 2)
                    + 2 * K * Cout + 8 * G * Cout + 8 * Cin)
    cost = pl.CostEstimate(flops=int(flops), transcendentals=0,
                           bytes_accessed=bytes_acc)

    if prev_scale is None:
        return pl.pallas_call(
            _conv_stats_kernel,
            grid=(G,),
            in_specs=[img_in, w_spec],
            out_specs=out_specs,
            out_shape=out_shape,
            scratch_shapes=scratch,
            compiler_params=_compiler_params(vmem_est),
            cost_estimate=cost,
        )(x_nhwc, w_kc)

    return pl.pallas_call(
        _bnrelu_conv_stats_kernel,
        grid=(G,),
        in_specs=[img_in, vec_spec, vec_spec, w_spec],
        out_specs=out_specs,
        out_shape=out_shape,
        scratch_shapes=scratch,
        compiler_params=_compiler_params(vmem_est),
        cost_estimate=cost,
    )(x_nhwc, prev_scale, prev_shift, w_kc)


def _bnrelu_stage(a_nhwc, scale, shift):
    """Final pallas_call: normalize + ReLU of the last raw conv output (f32 out)."""
    N, H, W, C = a_nhwc.shape
    TB = _pick_tb(N, H, W, C, C)
    G = N // TB
    img_spec = pl.BlockSpec((TB, H, W, C), lambda b: (b, 0, 0, 0))
    vec_spec = pl.BlockSpec((1, C), lambda b: (0, 0))
    vmem_est = 2 * TB * H * W * C * (2 + 4) + 16 * C
    cost = pl.CostEstimate(flops=int(3 * N * H * W * C), transcendentals=0,
                           bytes_accessed=int(6 * N * H * W * C))
    return pl.pallas_call(
        _bnrelu_kernel,
        grid=(G,),
        in_specs=[img_spec, vec_spec, vec_spec],
        out_specs=img_spec,
        out_shape=jax.ShapeDtypeStruct((N, H, W, C), jnp.float32),
        compiler_params=_compiler_params(vmem_est),
        cost_estimate=cost,
    )(a_nhwc, scale, shift)


# ---------------------------------------------------------------------------
# BN statistics -> per-channel scale/shift (plain JAX, tiny)
# ---------------------------------------------------------------------------
def _bn_scale_shift(sum_t, ssq_t, gamma, beta, count, eps=_BN_EPS):
    # TODO(synk): E[x^2]-E[x]^2 in f32 can lose precision for huge images /
    # large-mean channels; a shifted-mean two-pass scheme would be more robust.
    s = jnp.sum(sum_t, axis=(0, 1))                       # (C,)
    ss = jnp.sum(ssq_t, axis=(0, 1))                      # (C,)
    mean = s / count
    var = jnp.maximum(ss / count - mean * mean, 0.0)      # biased var (train-mode BN)
    scale = gamma * jax.lax.rsqrt(var + eps)
    shift = beta - mean * scale
    return (scale.reshape(1, -1).astype(jnp.float32),
            shift.reshape(1, -1).astype(jnp.float32))


# ---------------------------------------------------------------------------
# Forward (NCHW in / NCHW out, matching the PyTorch module)
# ---------------------------------------------------------------------------
@jax.jit
def conv_block_forward(x_nchw, params):
    # NCHW -> NHWC in bf16 (halves both the transpose write and the stage-1 read).
    x = jnp.transpose(x_nchw.astype(jnp.bfloat16), (0, 2, 3, 1))
    N, H, W, _ = x.shape
    count = N * H * W
    cout = params["w1"].shape[-1]

    # HWIO (3,3,Cin,Cout) -> (9*Cin, Cout), bf16 operands for the MXU
    # (accumulation and all BN statistics stay f32).
    w1 = params["w1"].reshape(-1, cout).astype(jnp.bfloat16)
    w2 = params["w2"].reshape(-1, cout).astype(jnp.bfloat16)
    # Conv biases (params["b1"], params["b2"]) are cancelled exactly by the
    # train-mode BatchNorm mean subtraction, so they are intentionally unused.

    a1, s1, ss1 = _conv_stage(x, w1)
    scale1, shift1 = _bn_scale_shift(s1, ss1, params["g1"], params["beta1"], count)

    a2, s2, ss2 = _conv_stage(a1, w2, scale1, shift1)     # fused BN1+ReLU1+conv2
    scale2, shift2 = _bn_scale_shift(s2, ss2, params["g2"], params["beta2"], count)

    y = _bnrelu_stage(a2, scale2, shift2)                 # BN2+ReLU2 (f32)
    return jnp.transpose(y, (0, 3, 1, 2))                 # NHWC -> NCHW


def init_conv_block_params(key, ch_in, ch_out):
    """Deterministic init mimicking nn.Conv2d default (uniform +/- 1/sqrt(fan_in))
    and nn.BatchNorm2d default (gamma=1, beta=0)."""
    k1, k2, k3, k4 = jax.random.split(key, 4)
    fan1 = ch_in * 3 * 3
    fan2 = ch_out * 3 * 3
    bound1 = 1.0 / jnp.sqrt(fan1)
    bound2 = 1.0 / jnp.sqrt(fan2)
    return {
        # conv weights stored HWIO (3, 3, Cin, Cout)
        "w1": jax.random.uniform(k1, (3, 3, ch_in, ch_out), jnp.float32,
                                 -bound1, bound1),
        "b1": jax.random.uniform(k2, (ch_out,), jnp.float32, -bound1, bound1),
        "g1": jnp.ones((ch_out,), jnp.float32),
        "beta1": jnp.zeros((ch_out,), jnp.float32),
        "w2": jax.random.uniform(k3, (3, 3, ch_out, ch_out), jnp.float32,
                                 -bound2, bound2),
        "b2": jax.random.uniform(k4, (ch_out,), jnp.float32, -bound2, bound2),
        "g2": jnp.ones((ch_out,), jnp.float32),
        "beta2": jnp.zeros((ch_out,), jnp.float32),
    }


if __name__ == "__main__":
    key = jax.random.PRNGKey(0)
    k_x, k_p = jax.random.split(key)

    N, CH_IN, CH_OUT, H, W = 2, 4, 8, 16, 16
    x = jax.random.normal(k_x, (N, CH_IN, H, W), jnp.float32)  # NCHW like PyTorch
    params = init_conv_block_params(k_p, CH_IN, CH_OUT)

    out = conv_block_forward(x, params)
    jax.block_until_ready(out)

    assert out.shape == (N, CH_OUT, H, W), out.shape
    assert out.dtype == jnp.float32
    assert bool(jnp.all(jnp.isfinite(out)))
    assert bool(jnp.all(out >= 0.0))   # ReLU output
    print("KERNEL_OK")
</pallas_src>

<mosaic_0001>
module attributes {stable_mosaic.version = 11 : i64} {
  func.func @_bnrelu_conv_stats_kernel(%arg0: i32, %arg1: memref<2x16x16x8xbf16, #tpu.memory_space<vmem>>, %arg2: memref<1x8xf32, #tpu.memory_space<vmem>>, %arg3: memref<1x8xf32, #tpu.memory_space<vmem>>, %arg4: memref<72x8xbf16, #tpu.memory_space<vmem>>, %arg5: memref<2x16x16x8xbf16, #tpu.memory_space<vmem>>, %arg6: memref<1x1x8xf32, #tpu.memory_space<vmem>>, %arg7: memref<1x1x8xf32, #tpu.memory_space<vmem>>, %arg8: memref<2x18x18x8xf32, #tpu.memory_space<vmem>>) attributes {dimension_semantics = [#tpu.dimension_semantics<parallel>], iteration_bounds = array<i64: 1>, scalar_prefetch = 0 : i64, scratch_operands = 1 : i64, tpu.core_type = #tpu.core_type<tc>, window_params = [{transform_indices = @transform_0, window_bounds = array<i64: 2, 16, 16, 8>}, {pipeline_mode = #tpu.pipeline_mode<synchronous>, transform_indices = @transform_1, window_bounds = array<i64: 1, 8>}, {pipeline_mode = #tpu.pipeline_mode<synchronous>, transform_indices = @transform_2, window_bounds = array<i64: 1, 8>}, {pipeline_mode = #tpu.pipeline_mode<synchronous>, transform_indices = @transform_3, window_bounds = array<i64: 72, 8>}, {transform_indices = @transform_4, window_bounds = array<i64: 2, 16, 16, 8>}, {transform_indices = @transform_5, window_bounds = array<i64: 1, 1, 8>}, {transform_indices = @transform_6, window_bounds = array<i64: 1, 1, 8>}]} {
    %c0 = arith.constant 0 : index
    %c0_0 = arith.constant 0 : index
    %c0_1 = arith.constant 0 : index
    %c0_2 = arith.constant 0 : index
    %0 = vector.load %arg1[%c0, %c0_0, %c0_1, %c0_2] : memref<2x16x16x8xbf16, #tpu.memory_space<vmem>>, vector<2x16x16x8xbf16>
    %1 = arith.extf %0 : vector<2x16x16x8xbf16> to vector<2x16x16x8xf32>
    %2 = vector.shape_cast %1 : vector<2x16x16x8xf32> to vector<512x8xf32>
    %c0_3 = arith.constant 0 : index
    %c0_4 = arith.constant 0 : index
    %3 = vector.load %arg2[%c0_3, %c0_4] : memref<1x8xf32, #tpu.memory_space<vmem>>, vector<1x8xf32>
    %4 = vector.broadcast %3 : vector<1x8xf32> to vector<512x8xf32>
    %5 = arith.mulf %2, %4 : vector<512x8xf32>
    %c0_5 = arith.constant 0 : index
    %c0_6 = arith.constant 0 : index
    %6 = vector.load %arg3[%c0_5, %c0_6] : memref<1x8xf32, #tpu.memory_space<vmem>>, vector<1x8xf32>
    %7 = vector.broadcast %6 : vector<1x8xf32> to vector<512x8xf32>
    %8 = arith.addf %5, %7 : vector<512x8xf32>
    %cst = arith.constant 0.000000e+00 : f32
    %9 = vector.broadcast %cst : f32 to vector<512x8xf32>
    %10 = arith.maximumf %8, %9 : vector<512x8xf32>
    %11 = vector.shape_cast %10 : vector<512x8xf32> to vector<2x16x16x8xf32>
    %cst_7 = arith.constant 0.000000e+00 : f32
    %12 = vector.broadcast %cst_7 : f32 to vector<2x1x18x8xf32>
    %cst_8 = arith.constant 0.000000e+00 : f32
    %13 = vector.broadcast %cst_8 : f32 to vector<2x18x1x8xf32>
    %c0_9 = arith.constant 0 : index
    %c0_10 = arith.constant 0 : index
    %c0_11 = arith.constant 0 : index
    %c0_12 = arith.constant 0 : index
    %14 = vector.load %arg8[%c0_9, %c0_10, %c0_11, %c0_12] : memref<2x18x18x8xf32, #tpu.memory_space<vmem>>, vector<2x1x18x8xf32>
    tpu.vector_store %arg8[%c0_9, %c0_10, %c0_11, %c0_12], %12 {strides = array<i32>} : memref<2x18x18x8xf32, #tpu.memory_space<vmem>>, vector<2x1x18x8xf32>,
    %c0_13 = arith.constant 0 : index
    %c17 = arith.constant 17 : index
    %c0_14 = arith.constant 0 : index
    %c0_15 = arith.constant 0 : index
    %15 = vector.load %arg8[%c0_13, %c17, %c0_14, %c0_15] : memref<2x18x18x8xf32, #tpu.memory_space<vmem>>, vector<2x1x18x8xf32>
    tpu.vector_store %arg8[%c0_13, %c17, %c0_14, %c0_15], %12 {strides = array<i32>} : memref<2x18x18x8xf32, #tpu.memory_space<vmem>>, vector<2x1x18x8xf32>,
    %c0_16 = arith.constant 0 : index
    %c0_17 = arith.constant 0 : index
    %c0_18 = arith.constant 0 : index
    %c0_19 = arith.constant 0 : index
    %16 = vector.load %arg8[%c0_16, %c0_17, %c0_18, %c0_19] : memref<2x18x18x8xf32, #tpu.memory_space<vmem>>, vector<2x18x1x8xf32>
    tpu.vector_store %arg8[%c0_16, %c0_17, %c0_18, %c0_19], %13 {strides = array<i32>} : memref<2x18x18x8xf32, #tpu.memory_space<vmem>>, vector<2x18x1x8xf32>,
    %c0_20 = arith.constant 0 : index
    %c0_21 = arith.constant 0 : index
    %c17_22 = arith.constant 17 : index
    %c0_23 = arith.constant 0 : index
    %17 = vector.load %arg8[%c0_20, %c0_21, %c17_22, %c0_23] : memref<2x18x18x8xf32, #tpu.memory_space<vmem>>, vector<2x18x1x8xf32>
    tpu.vector_store %arg8[%c0_20, %c0_21, %c17_22, %c0_23], %13 {strides = array<i32>} : memref<2x18x18x8xf32, #tpu.memory_space<vmem>>, vector<2x18x1x8xf32>,
    %c0_24 = arith.constant 0 : index
    %c1 = arith.constant 1 : index
    %c1_25 = arith.constant 1 : index
    %c0_26 = arith.constant 0 : index
    %18 = vector.load %arg8[%c0_24, %c1, %c1_25, %c0_26] : memref<2x18x18x8xf32, #tpu.memory_space<vmem>>, vector<2x16x16x8xf32>
    tpu.vector_store %arg8[%c0_24, %c1, %c1_25, %c0_26], %11 {strides = array<i32>} : memref<2x18x18x8xf32, #tpu.memory_space<vmem>>, vector<2x16x16x8xf32>,
    %c0_27 = arith.constant 0 : index
    %c0_28 = arith.constant 0 : index
    %c0_29 = arith.constant 0 : index
    %c0_30 = arith.constant 0 : index
    %19 = vector.load %arg8[%c0_27, %c0_28, %c0_29, %c0_30] : memref<2x18x18x8xf32, #tpu.memory_space<vmem>>, vector<2x18x18x8xf32>
    %20 = vector.extract_strided_slice %19 {offsets = [0, 0, 0, 0], sizes = [2, 16, 16, 8], strides = [1, 1, 1, 1]} : vector<2x18x18x8xf32> to vector<2x16x16x8xf32>
    %21 = vector.shape_cast %20 : vector<2x16x16x8xf32> to vector<512x8xf32>
    %22 = arith.truncf %21 : vector<512x8xf32> to vector<512x8xbf16>
    %c0_31 = arith.constant 0 : index
    %c0_32 = arith.constant 0 : index
    %23 = vector.load %arg4[%c0_31, %c0_32] : memref<72x8xbf16, #tpu.memory_space<vmem>>, vector<8x8xbf16>
    %cst_33 = arith.constant dense<0.000000e+00> : vector<512x8xf32>
    %24 = tpu.matmul %22, %23, %cst_33 {dimension_numbers = #tpu.dot_dimension_numbers<[1], [0], [0], [1], [0, 0, 1, 1], [], []>} : vector<512x8xbf16>, vector<8x8xbf16>, vector<512x8xf32> -> vector<512x8xf32>
    %25 = vector.extract_strided_slice %19 {offsets = [0, 0, 1, 0], sizes = [2, 16, 16, 8], strides = [1, 1, 1, 1]} : vector<2x18x18x8xf32> to vector<2x16x16x8xf32>
    %26 = vector.shape_cast %25 : vector<2x16x16x8xf32> to vector<512x8xf32>
    %27 = arith.truncf %26 : vector<512x8xf32> to vector<512x8xbf16>
    %c8 = arith.constant 8 : index
    %c0_34 = arith.constant 0 : index
    %28 = vector.load %arg4[%c8, %c0_34] : memref<72x8xbf16, #tpu.memory_space<vmem>>, vector<8x8xbf16>
    %cst_35 = arith.constant dense<0.000000e+00> : vector<512x8xf32>
    %29 = tpu.matmul %27, %28, %cst_35 {dimension_numbers = #tpu.dot_dimension_numbers<[1], [0], [0], [1], [0, 0, 1, 1], [], []>} : vector<512x8xbf16>, vector<8x8xbf16>, vector<512x8xf32> -> vector<512x8xf32>
    %30 = arith.addf %24, %29 : vector<512x8xf32>
    %31 = vector.extract_strided_slice %19 {offsets = [0, 0, 2, 0], sizes = [2, 16, 16, 8], strides = [1, 1, 1, 1]} : vector<2x18x18x8xf32> to vector<2x16x16x8xf32>
    %32 = vector.shape_cast %31 : vector<2x16x16x8xf32> to vector<512x8xf32>
    %33 = arith.truncf %32 : vector<512x8xf32> to vector<512x8xbf16>
    %c16 = arith.constant 16 : index
    %c0_36 = arith.constant 0 : index
    %34 = vector.load %arg4[%c16, %c0_36] : memref<72x8xbf16, #tpu.memory_space<vmem>>, vector<8x8xbf16>
    %cst_37 = arith.constant dense<0.000000e+00> : vector<512x8xf32>
    %35 = tpu.matmul %33, %34, %cst_37 {dimension_numbers = #tpu.dot_dimension_numbers<[1], [0], [0], [1], [0, 0, 1, 1], [], []>} : vector<512x8xbf16>, vector<8x8xbf16>, vector<512x8xf32> -> vector<512x8xf32>
    %36 = arith.addf %30, %35 : vector<512x8xf32>
    %37 = vector.extract_strided_slice %19 {offsets = [0, 1, 0, 0], sizes = [2, 16, 16, 8], strides = [1, 1, 1, 1]} : vector<2x18x18x8xf32> to vector<2x16x16x8xf32>
    %38 = vector.shape_cast %37 : vector<2x16x16x8xf32> to vector<512x8xf32>
    %39 = arith.truncf %38 : vector<512x8xf32> to vector<512x8xbf16>
    %c24 = arith.constant 24 : index
    %c0_38 = arith.constant 0 : index
    %40 = vector.load %arg4[%c24, %c0_38] : memref<72x8xbf16, #tpu.memory_space<vmem>>, vector<8x8xbf16>
    %cst_39 = arith.constant dense<0.000000e+00> : vector<512x8xf32>
    %41 = tpu.matmul %39, %40, %cst_39 {dimension_numbers = #tpu.dot_dimension_numbers<[1], [0], [0], [1], [0, 0, 1, 1], [], []>} : vector<512x8xbf16>, vector<8x8xbf16>, vector<512x8xf32> -> vector<512x8xf32>
    %42 = arith.addf %36, %41 : vector<512x8xf32>
    %43 = vector.extract_strided_slice %19 {offsets = [0, 1, 1, 0], sizes = [2, 16, 16, 8], strides = [1, 1, 1, 1]} : vector<2x18x18x8xf32> to vector<2x16x16x8xf32>
    %44 = vector.shape_cast %43 : vector<2x16x16x8xf32> to vector<512x8xf32>
    %45 = arith.truncf %44 : vector<512x8xf32> to vector<512x8xbf16>
    %c32 = arith.constant 32 : index
    %c0_40 = arith.constant 0 : index
    %46 = vector.load %arg4[%c32, %c0_40] : memref<72x8xbf16, #tpu.memory_space<vmem>>, vector<8x8xbf16>
    %cst_41 = arith.constant dense<0.000000e+00> : vector<512x8xf32>
    %47 = tpu.matmul %45, %46, %cst_41 {dimension_numbers = #tpu.dot_dimension_numbers<[1], [0], [0], [1], [0, 0, 1, 1], [], []>} : vector<512x8xbf16>, vector<8x8xbf16>, vector<512x8xf32> -> vector<512x8xf32>
    %48 = arith.addf %42, %47 : vector<512x8xf32>
    %49 = vector.extract_strided_slice %19 {offsets = [0, 1, 2, 0], sizes = [2, 16, 16, 8], strides = [1, 1, 1, 1]} : vector<2x18x18x8xf32> to vector<2x16x16x8xf32>
    %50 = vector.shape_cast %49 : vector<2x16x16x8xf32> to vector<512x8xf32>
    %51 = arith.truncf %50 : vector<512x8xf32> to vector<512x8xbf16>
    %c40 = arith.constant 40 : index
    %c0_42 = arith.constant 0 : index
    %52 = vector.load %arg4[%c40, %c0_42] : memref<72x8xbf16, #tpu.memory_space<vmem>>, vector<8x8xbf16>
    %cst_43 = arith.constant dense<0.000000e+00> : vector<512x8xf32>
    %53 = tpu.matmul %51, %52, %cst_43 {dimension_numbers = #tpu.dot_dimension_numbers<[1], [0], [0], [1], [0, 0, 1, 1], [], []>} : vector<512x8xbf16>, vector<8x8xbf16>, vector<512x8xf32> -> vector<512x8xf32>
    %54 = arith.addf %48, %53 : vector<512x8xf32>
    %55 = vector.extract_strided_slice %19 {offsets = [0, 2, 0, 0], sizes = [2, 16, 16, 8], strides = [1, 1, 1, 1]} : vector<2x18x18x8xf32> to vector<2x16x16x8xf32>
    %56 = vector.shape_cast %55 : vector<2x16x16x8xf32> to vector<512x8xf32>
    %57 = arith.truncf %56 : vector<512x8xf32> to vector<512x8xbf16>
    %c48 = arith.constant 48 : index
    %c0_44 = arith.constant 0 : index
    %58 = vector.load %arg4[%c48, %c0_44] : memref<72x8xbf16, #tpu.memory_space<vmem>>, vector<8x8xbf16>
    %cst_45 = arith.constant dense<0.000000e+00> : vector<512x8xf32>
    %59 = tpu.matmul %57, %58, %cst_45 {dimension_numbers = #tpu.dot_dimension_numbers<[1], [0], [0], [1], [0, 0, 1, 1], [], []>} : vector<512x8xbf16>, vector<8x8xbf16>, vector<512x8xf32> -> vector<512x8xf32>
    %60 = arith.addf %54, %59 : vector<512x8xf32>
    %61 = vector.extract_strided_slice %19 {offsets = [0, 2, 1, 0], sizes = [2, 16, 16, 8], strides = [1, 1, 1, 1]} : vector<2x18x18x8xf32> to vector<2x16x16x8xf32>
    %62 = vector.shape_cast %61 : vector<2x16x16x8xf32> to vector<512x8xf32>
    %63 = arith.truncf %62 : vector<512x8xf32> to vector<512x8xbf16>
    %c56 = arith.constant 56 : index
    %c0_46 = arith.constant 0 : index
    %64 = vector.load %arg4[%c56, %c0_46] : memref<72x8xbf16, #tpu.memory_space<vmem>>, vector<8x8xbf16>
    %cst_47 = arith.constant dense<0.000000e+00> : vector<512x8xf32>
    %65 = tpu.matmul %63, %64, %cst_47 {dimension_numbers = #tpu.dot_dimension_numbers<[1], [0], [0], [1], [0, 0, 1, 1], [], []>} : vector<512x8xbf16>, vector<8x8xbf16>, vector<512x8xf32> -> vector<512x8xf32>
    %66 = arith.addf %60, %65 : vector<512x8xf32>
    %67 = vector.extract_strided_slice %19 {offsets = [0, 2, 2, 0], sizes = [2, 16, 16, 8], strides = [1, 1, 1, 1]} : vector<2x18x18x8xf32> to vector<2x16x16x8xf32>
    %68 = vector.shape_cast %67 : vector<2x16x16x8xf32> to vector<512x8xf32>
    %69 = arith.truncf %68 : vector<512x8xf32> to vector<512x8xbf16>
    %c64 = arith.constant 64 : index
    %c0_48 = arith.constant 0 : index
    %70 = vector.load %arg4[%c64, %c0_48] : memref<72x8xbf16, #tpu.memory_space<vmem>>, vector<8x8xbf16>
    %cst_49 = arith.constant dense<0.000000e+00> : vector<512x8xf32>
    %71 = tpu.matmul %69, %70, %cst_49 {dimension_numbers = #tpu.dot_dimension_numbers<[1], [0], [0], [1], [0, 0, 1, 1], [], []>} : vector<512x8xbf16>, vector<8x8xbf16>, vector<512x8xf32> -> vector<512x8xf32>
    %72 = arith.addf %66, %71 : vector<512x8xf32>
    %73 = vector.shape_cast %72 : vector<512x8xf32> to vector<2x16x16x8xf32>
    %74 = arith.truncf %73 : vector<2x16x16x8xf32> to vector<2x16x16x8xbf16>
    %c0_50 = arith.constant 0 : index
    %c0_51 = arith.constant 0 : index
    %c0_52 = arith.constant 0 : index
    %c0_53 = arith.constant 0 : index
    %75 = vector.load %arg5[%c0_50, %c0_51, %c0_52, %c0_53] : memref<2x16x16x8xbf16, #tpu.memory_space<vmem>>, vector<2x16x16x8xbf16>
    tpu.vector_store %arg5[%c0_50, %c0_51, %c0_52, %c0_53], %74 {strides = array<i32>} : memref<2x16x16x8xbf16, #tpu.memory_space<vmem>>, vector<2x16x16x8xbf16>,
    %cst_54 = arith.constant dense<0.000000e+00> : vector<8xf32>
    %76 = vector.multi_reduction <add>, %72, %cst_54 [0] : vector<512x8xf32> to vector<8xf32>
    %77 = vector.shape_cast %76 : vector<8xf32> to vector<1x1x8xf32>
    %c0_55 = arith.constant 0 : index
    %c0_56 = arith.constant 0 : index
    %c0_57 = arith.constant 0 : index
    %78 = vector.load %arg6[%c0_55, %c0_56, %c0_57] : memref<1x1x8xf32, #tpu.memory_space<vmem>>, vector<1x1x8xf32>
    tpu.vector_store %arg6[%c0_55, %c0_56, %c0_57], %77 {strides = array<i32>} : memref<1x1x8xf32, #tpu.memory_space<vmem>>, vector<1x1x8xf32>,
    %79 = arith.mulf %72, %72 : vector<512x8xf32>
    %cst_58 = arith.constant dense<0.000000e+00> : vector<8xf32>
    %80 = vector.multi_reduction <add>, %79, %cst_58 [0] : vector<512x8xf32> to vector<8xf32>
    %81 = vector.shape_cast %80 : vector<8xf32> to vector<1x1x8xf32>
    %c0_59 = arith.constant 0 : index
    %c0_60 = arith.constant 0 : index
    %c0_61 = arith.constant 0 : index
    %82 = vector.load %arg7[%c0_59, %c0_60, %c0_61] : memref<1x1x8xf32, #tpu.memory_space<vmem>>, vector<1x1x8xf32>
    tpu.vector_store %arg7[%c0_59, %c0_60, %c0_61], %81 {strides = array<i32>} : memref<1x1x8xf32, #tpu.memory_space<vmem>>, vector<1x1x8xf32>,
    return
  }
  func.func @transform_0(%arg0: i32) -> (i32, i32, i32, i32) {
    %c0_i32 = arith.constant 0 : i32
    %c0_i32_0 = arith.constant 0 : i32
    %c0_i32_1 = arith.constant 0 : i32
    %c0_i32_2 = arith.constant 0 : i32
    return %arg0, %c0_i32, %c0_i32_0, %c0_i32_1 : i32, i32, i32, i32
  }
  func.func @transform_1(%arg0: i32) -> (i32, i32) {
    %c0_i32 = arith.constant 0 : i32
    %c0_i32_0 = arith.constant 0 : i32
    %c0_i32_1 = arith.constant 0 : i32
    return %c0_i32, %c0_i32_0 : i32, i32
  }
  func.func @transform_2(%arg0: i32) -> (i32, i32) {
    %c0_i32 = arith.constant 0 : i32
    %c0_i32_0 = arith.constant 0 : i32
    %c0_i32_1 = arith.constant 0 : i32
    return %c0_i32, %c0_i32_0 : i32, i32
  }
  func.func @transform_3(%arg0: i32) -> (i32, i32) {
    %c0_i32 = arith.constant 0 : i32
    %c0_i32_0 = arith.constant 0 : i32
    %c0_i32_1 = arith.constant 0 : i32
    return %c0_i32, %c0_i32_0 : i32, i32
  }
  func.func @transform_4(%arg0: i32) -> (i32, i32, i32, i32) {
    %c0_i32 = arith.constant 0 : i32
    %c0_i32_0 = arith.constant 0 : i32
    %c0_i32_1 = arith.constant 0 : i32
    %c0_i32_2 = arith.constant 0 : i32
    return %arg0, %c0_i32, %c0_i32_0, %c0_i32_1 : i32, i32, i32, i32
  }
  func.func @transform_5(%arg0: i32) -> (i32, i32, i32) {
    %c0_i32 = arith.constant 0 : i32
    %c0_i32_0 = arith.constant 0 : i32
    %c0_i32_1 = arith.constant 0 : i32
    return %arg0, %c0_i32, %c0_i32_0 : i32, i32, i32
  }
  func.func @transform_6(%arg0: i32) -> (i32, i32, i32) {
    %c0_i32 = arith.constant 0 : i32
    %c0_i32_0 = arith.constant 0 : i32
    %c0_i32_1 = arith.constant 0 : i32
    return %arg0, %c0_i32, %c0_i32_0 : i32, i32, i32
  }
}

module attributes {stable_mosaic.version = 11 : i64} {
  func.func @_bnrelu_kernel(%arg0: i32, %arg1: memref<2x16x16x8xbf16, #tpu.memory_space<vmem>>, %arg2: memref<1x8xf32, #tpu.memory_space<vmem>>, %arg3: memref<1x8xf32, #tpu.memory_space<vmem>>, %arg4: memref<2x16x16x8xf32, #tpu.memory_space<vmem>>) attributes {dimension_semantics = [#tpu.dimension_semantics<parallel>], iteration_bounds = array<i64: 1>, scalar_prefetch = 0 : i64, scratch_operands = 0 : i64, tpu.core_type = #tpu.core_type<tc>, window_params = [{transform_indices = @transform_0, window_bounds = array<i64: 2, 16, 16, 8>}, {pipeline_mode = #tpu.pipeline_mode<synchronous>, transform_indices = @transform_1, window_bounds = array<i64: 1, 8>}, {pipeline_mode = #tpu.pipeline_mode<synchronous>, transform_indices = @transform_2, window_bounds = array<i64: 1, 8>}, {transform_indices = @transform_3, window_bounds = array<i64: 2, 16, 16, 8>}]} {
    %c0 = arith.constant 0 : index
    %c0_0 = arith.constant 0 : index
    %c0_1 = arith.constant 0 : index
    %c0_2 = arith.constant 0 : index
    %0 = vector.load %arg1[%c0, %c0_0, %c0_1, %c0_2] : memref<2x16x16x8xbf16, #tpu.memory_space<vmem>>, vector<2x16x16x8xbf16>
    %1 = arith.extf %0 : vector<2x16x16x8xbf16> to vector<2x16x16x8xf32>
    %2 = vector.shape_cast %1 : vector<2x16x16x8xf32> to vector<512x8xf32>
    %c0_3 = arith.constant 0 : index
    %c0_4 = arith.constant 0 : index
    %3 = vector.load %arg2[%c0_3, %c0_4] : memref<1x8xf32, #tpu.memory_space<vmem>>, vector<1x8xf32>
    %4 = vector.broadcast %3 : vector<1x8xf32> to vector<512x8xf32>
    %5 = arith.mulf %2, %4 : vector<512x8xf32>
    %c0_5 = arith.constant 0 : index
    %c0_6 = arith.constant 0 : index
    %6 = vector.load %arg3[%c0_5, %c0_6] : memref<1x8xf32, #tpu.memory_space<vmem>>, vector<1x8xf32>
    %7 = vector.broadcast %6 : vector<1x8xf32> to vector<512x8xf32>
    %8 = arith.addf %5, %7 : vector<512x8xf32>
    %cst = arith.constant 0.000000e+00 : f32
    %9 = vector.broadcast %cst : f32 to vector<512x8xf32>
    %10 = arith.maximumf %8, %9 : vector<512x8xf32>
    %11 = vector.shape_cast %10 : vector<512x8xf32> to vector<2x16x16x8xf32>
    %c0_7 = arith.constant 0 : index
    %c0_8 = arith.constant 0 : index
    %c0_9 = arith.constant 0 : index
    %c0_10 = arith.constant 0 : index
    %12 = vector.load %arg4[%c0_7, %c0_8, %c0_9, %c0_10] : memref<2x16x16x8xf32, #tpu.memory_space<vmem>>, vector<2x16x16x8xf32>
    tpu.vector_store %arg4[%c0_7, %c0_8, %c0_9, %c0_10], %11 {strides = array<i32>} : memref<2x16x16x8xf32, #tpu.memory_space<vmem>>, vector<2x16x16x8xf32>,
    return
  }
  func.func @transform_0(%arg0: i32) -> (i32, i32, i32, i32) {
    %c0_i32 = arith.constant 0 : i32
    %c0_i32_0 = arith.constant 0 : i32
    %c0_i32_1 = arith.constant 0 : i32
    %c0_i32_2 = arith.constant 0 : i32
    return %arg0, %c0_i32, %c0_i32_0, %c0_i32_1 : i32, i32, i32, i32
  }
  func.func @transform_1(%arg0: i32) -> (i32, i32) {
    %c0_i32 = arith.constant 0 : i32
    %c0_i32_0 = arith.constant 0 : i32
    %c0_i32_1 = arith.constant 0 : i32
    return %c0_i32, %c0_i32_0 : i32, i32
  }
  func.func @transform_2(%arg0: i32) -> (i32, i32) {
    %c0_i32 = arith.constant 0 : i32
    %c0_i32_0 = arith.constant 0 : i32
    %c0_i32_1 = arith.constant 0 : i32
    return %c0_i32, %c0_i32_0 : i32, i32
  }
  func.func @transform_3(%arg0: i32) -> (i32, i32, i32, i32) {
    %c0_i32 = arith.constant 0 : i32
    %c0_i32_0 = arith.constant 0 : i32
    %c0_i32_1 = arith.constant 0 : i32
    %c0_i32_2 = arith.constant 0 : i32
    return %arg0, %c0_i32, %c0_i32_0, %c0_i32_1 : i32, i32, i32, i32
  }
}

module attributes {stable_mosaic.version = 11 : i64} {
  func.func @_conv_stats_kernel(%arg0: i32, %arg1: memref<2x16x16x4xbf16, #tpu.memory_space<vmem>>, %arg2: memref<36x8xbf16, #tpu.memory_space<vmem>>, %arg3: memref<2x16x16x8xbf16, #tpu.memory_space<vmem>>, %arg4: memref<1x1x8xf32, #tpu.memory_space<vmem>>, %arg5: memref<1x1x8xf32, #tpu.memory_space<vmem>>, %arg6: memref<2x18x18x4xf32, #tpu.memory_space<vmem>>) attributes {dimension_semantics = [#tpu.dimension_semantics<parallel>], iteration_bounds = array<i64: 1>, scalar_prefetch = 0 : i64, scratch_operands = 1 : i64, tpu.core_type = #tpu.core_type<tc>, window_params = [{transform_indices = @transform_0, window_bounds = array<i64: 2, 16, 16, 4>}, {pipeline_mode = #tpu.pipeline_mode<synchronous>, transform_indices = @transform_1, window_bounds = array<i64: 36, 8>}, {transform_indices = @transform_2, window_bounds = array<i64: 2, 16, 16, 8>}, {transform_indices = @transform_3, window_bounds = array<i64: 1, 1, 8>}, {transform_indices = @transform_4, window_bounds = array<i64: 1, 1, 8>}]} {
    %c0 = arith.constant 0 : index
    %c0_0 = arith.constant 0 : index
    %c0_1 = arith.constant 0 : index
    %c0_2 = arith.constant 0 : index
    %0 = vector.load %arg1[%c0, %c0_0, %c0_1, %c0_2] : memref<2x16x16x4xbf16, #tpu.memory_space<vmem>>, vector<2x16x16x4xbf16>
    %cst = arith.constant 0.000000e+00 : f32
    %1 = vector.broadcast %cst : f32 to vector<2x1x18x4xf32>
    %cst_3 = arith.constant 0.000000e+00 : f32
    %2 = vector.broadcast %cst_3 : f32 to vector<2x18x1x4xf32>
    %c0_4 = arith.constant 0 : index
    %c0_5 = arith.constant 0 : index
    %c0_6 = arith.constant 0 : index
    %c0_7 = arith.constant 0 : index
    %3 = vector.load %arg6[%c0_4, %c0_5, %c0_6, %c0_7] : memref<2x18x18x4xf32, #tpu.memory_space<vmem>>, vector<2x1x18x4xf32>
    tpu.vector_store %arg6[%c0_4, %c0_5, %c0_6, %c0_7], %1 {strides = array<i32>} : memref<2x18x18x4xf32, #tpu.memory_space<vmem>>, vector<2x1x18x4xf32>,
    %c0_8 = arith.constant 0 : index
    %c17 = arith.constant 17 : index
    %c0_9 = arith.constant 0 : index
    %c0_10 = arith.constant 0 : index
    %4 = vector.load %arg6[%c0_8, %c17, %c0_9, %c0_10] : memref<2x18x18x4xf32, #tpu.memory_space<vmem>>, vector<2x1x18x4xf32>
    tpu.vector_store %arg6[%c0_8, %c17, %c0_9, %c0_10], %1 {strides = array<i32>} : memref<2x18x18x4xf32, #tpu.memory_space<vmem>>, vector<2x1x18x4xf32>,
    %c0_11 = arith.constant 0 : index
    %c0_12 = arith.constant 0 : index
    %c0_13 = arith.constant 0 : index
    %c0_14 = arith.constant 0 : index
    %5 = vector.load %arg6[%c0_11, %c0_12, %c0_13, %c0_14] : memref<2x18x18x4xf32, #tpu.memory_space<vmem>>, vector<2x18x1x4xf32>
    tpu.vector_store %arg6[%c0_11, %c0_12, %c0_13, %c0_14], %2 {strides = array<i32>} : memref<2x18x18x4xf32, #tpu.memory_space<vmem>>, vector<2x18x1x4xf32>,
    %c0_15 = arith.constant 0 : index
    %c0_16 = arith.constant 0 : index
    %c17_17 = arith.constant 17 : index
    %c0_18 = arith.constant 0 : index
    %6 = vector.load %arg6[%c0_15, %c0_16, %c17_17, %c0_18] : memref<2x18x18x4xf32, #tpu.memory_space<vmem>>, vector<2x18x1x4xf32>
    tpu.vector_store %arg6[%c0_15, %c0_16, %c17_17, %c0_18], %2 {strides = array<i32>} : memref<2x18x18x4xf32, #tpu.memory_space<vmem>>, vector<2x18x1x4xf32>,
    %7 = arith.extf %0 : vector<2x16x16x4xbf16> to vector<2x16x16x4xf32>
    %c0_19 = arith.constant 0 : index
    %c1 = arith.constant 1 : index
    %c1_20 = arith.constant 1 : index
    %c0_21 = arith.constant 0 : index
    %8 = vector.load %arg6[%c0_19, %c1, %c1_20, %c0_21] : memref<2x18x18x4xf32, #tpu.memory_space<vmem>>, vector<2x16x16x4xf32>
    tpu.vector_store %arg6[%c0_19, %c1, %c1_20, %c0_21], %7 {strides = array<i32>} : memref<2x18x18x4xf32, #tpu.memory_space<vmem>>, vector<2x16x16x4xf32>,
    %c0_22 = arith.constant 0 : index
    %c0_23 = arith.constant 0 : index
    %c0_24 = arith.constant 0 : index
    %c0_25 = arith.constant 0 : index
    %9 = vector.load %arg6[%c0_22, %c0_23, %c0_24, %c0_25] : memref<2x18x18x4xf32, #tpu.memory_space<vmem>>, vector<2x18x18x4xf32>
    %10 = vector.extract_strided_slice %9 {offsets = [0, 0, 0, 0], sizes = [2, 16, 16, 4], strides = [1, 1, 1, 1]} : vector<2x18x18x4xf32> to vector<2x16x16x4xf32>
    %11 = vector.shape_cast %10 : vector<2x16x16x4xf32> to vector<512x4xf32>
    %12 = arith.truncf %11 : vector<512x4xf32> to vector<512x4xbf16>
    %c0_26 = arith.constant 0 : index
    %c0_27 = arith.constant 0 : index
    %13 = vector.load %arg2[%c0_26, %c0_27] : memref<36x8xbf16, #tpu.memory_space<vmem>>, vector<4x8xbf16>
    %cst_28 = arith.constant dense<0.000000e+00> : vector<512x8xf32>
    %14 = tpu.matmul %12, %13, %cst_28 {dimension_numbers = #tpu.dot_dimension_numbers<[1], [0], [0], [1], [0, 0, 1, 1], [], []>} : vector<512x4xbf16>, vector<4x8xbf16>, vector<512x8xf32> -> vector<512x8xf32>
    %15 = vector.extract_strided_slice %9 {offsets = [0, 0, 1, 0], sizes = [2, 16, 16, 4], strides = [1, 1, 1, 1]} : vector<2x18x18x4xf32> to vector<2x16x16x4xf32>
    %16 = vector.shape_cast %15 : vector<2x16x16x4xf32> to vector<512x4xf32>
    %17 = arith.truncf %16 : vector<512x4xf32> to vector<512x4xbf16>
    %c4 = arith.constant 4 : index
    %c0_29 = arith.constant 0 : index
    %18 = vector.load %arg2[%c4, %c0_29] : memref<36x8xbf16, #tpu.memory_space<vmem>>, vector<4x8xbf16>
    %cst_30 = arith.constant dense<0.000000e+00> : vector<512x8xf32>
    %19 = tpu.matmul %17, %18, %cst_30 {dimension_numbers = #tpu.dot_dimension_numbers<[1], [0], [0], [1], [0, 0, 1, 1], [], []>} : vector<512x4xbf16>, vector<4x8xbf16>, vector<512x8xf32> -> vector<512x8xf32>
    %20 = arith.addf %14, %19 : vector<512x8xf32>
    %21 = vector.extract_strided_slice %9 {offsets = [0, 0, 2, 0], sizes = [2, 16, 16, 4], strides = [1, 1, 1, 1]} : vector<2x18x18x4xf32> to vector<2x16x16x4xf32>
    %22 = vector.shape_cast %21 : vector<2x16x16x4xf32> to vector<512x4xf32>
    %23 = arith.truncf %22 : vector<512x4xf32> to vector<512x4xbf16>
    %c8 = arith.constant 8 : index
    %c0_31 = arith.constant 0 : index
    %24 = vector.load %arg2[%c8, %c0_31] : memref<36x8xbf16, #tpu.memory_space<vmem>>, vector<4x8xbf16>
    %cst_32 = arith.constant dense<0.000000e+00> : vector<512x8xf32>
    %25 = tpu.matmul %23, %24, %cst_32 {dimension_numbers = #tpu.dot_dimension_numbers<[1], [0], [0], [1], [0, 0, 1, 1], [], []>} : vector<512x4xbf16>, vector<4x8xbf16>, vector<512x8xf32> -> vector<512x8xf32>
    %26 = arith.addf %20, %25 : vector<512x8xf32>
    %27 = vector.extract_strided_slice %9 {offsets = [0, 1, 0, 0], sizes = [2, 16, 16, 4], strides = [1, 1, 1, 1]} : vector<2x18x18x4xf32> to vector<2x16x16x4xf32>
    %28 = vector.shape_cast %27 : vector<2x16x16x4xf32> to vector<512x4xf32>
    %29 = arith.truncf %28 : vector<512x4xf32> to vector<512x4xbf16>
    %c12 = arith.constant 12 : index
    %c0_33 = arith.constant 0 : index
    %30 = vector.load %arg2[%c12, %c0_33] : memref<36x8xbf16, #tpu.memory_space<vmem>>, vector<4x8xbf16>
    %cst_34 = arith.constant dense<0.000000e+00> : vector<512x8xf32>
    %31 = tpu.matmul %29, %30, %cst_34 {dimension_numbers = #tpu.dot_dimension_numbers<[1], [0], [0], [1], [0, 0, 1, 1], [], []>} : vector<512x4xbf16>, vector<4x8xbf16>, vector<512x8xf32> -> vector<512x8xf32>
    %32 = arith.addf %26, %31 : vector<512x8xf32>
    %33 = vector.extract_strided_slice %9 {offsets = [0, 1, 1, 0], sizes = [2, 16, 16, 4], strides = [1, 1, 1, 1]} : vector<2x18x18x4xf32> to vector<2x16x16x4xf32>
    %34 = vector.shape_cast %33 : vector<2x16x16x4xf32> to vector<512x4xf32>
    %35 = arith.truncf %34 : vector<512x4xf32> to vector<512x4xbf16>
    %c16 = arith.constant 16 : index
    %c0_35 = arith.constant 0 : index
    %36 = vector.load %arg2[%c16, %c0_35] : memref<36x8xbf16, #tpu.memory_space<vmem>>, vector<4x8xbf16>
    %cst_36 = arith.constant dense<0.000000e+00> : vector<512x8xf32>
    %37 = tpu.matmul %35, %36, %cst_36 {dimension_numbers = #tpu.dot_dimension_numbers<[1], [0], [0], [1], [0, 0, 1, 1], [], []>} : vector<512x4xbf16>, vector<4x8xbf16>, vector<512x8xf32> -> vector<512x8xf32>
    %38 = arith.addf %32, %37 : vector<512x8xf32>
    %39 = vector.extract_strided_slice %9 {offsets = [0, 1, 2, 0], sizes = [2, 16, 16, 4], strides = [1, 1, 1, 1]} : vector<2x18x18x4xf32> to vector<2x16x16x4xf32>
    %40 = vector.shape_cast %39 : vector<2x16x16x4xf32> to vector<512x4xf32>
    %41 = arith.truncf %40 : vector<512x4xf32> to vector<512x4xbf16>
    %c20 = arith.constant 20 : index
    %c0_37 = arith.constant 0 : index
    %42 = vector.load %arg2[%c20, %c0_37] : memref<36x8xbf16, #tpu.memory_space<vmem>>, vector<4x8xbf16>
    %cst_38 = arith.constant dense<0.000000e+00> : vector<512x8xf32>
    %43 = tpu.matmul %41, %42, %cst_38 {dimension_numbers = #tpu.dot_dimension_numbers<[1], [0], [0], [1], [0, 0, 1, 1], [], []>} : vector<512x4xbf16>, vector<4x8xbf16>, vector<512x8xf32> -> vector<512x8xf32>
    %44 = arith.addf %38, %43 : vector<512x8xf32>
    %45 = vector.extract_strided_slice %9 {offsets = [0, 2, 0, 0], sizes = [2, 16, 16, 4], strides = [1, 1, 1, 1]} : vector<2x18x18x4xf32> to vector<2x16x16x4xf32>
    %46 = vector.shape_cast %45 : vector<2x16x16x4xf32> to vector<512x4xf32>
    %47 = arith.truncf %46 : vector<512x4xf32> to vector<512x4xbf16>
    %c24 = arith.constant 24 : index
    %c0_39 = arith.constant 0 : index
    %48 = vector.load %arg2[%c24, %c0_39] : memref<36x8xbf16, #tpu.memory_space<vmem>>, vector<4x8xbf16>
    %cst_40 = arith.constant dense<0.000000e+00> : vector<512x8xf32>
    %49 = tpu.matmul %47, %48, %cst_40 {dimension_numbers = #tpu.dot_dimension_numbers<[1], [0], [0], [1], [0, 0, 1, 1], [], []>} : vector<512x4xbf16>, vector<4x8xbf16>, vector<512x8xf32> -> vector<512x8xf32>
    %50 = arith.addf %44, %49 : vector<512x8xf32>
    %51 = vector.extract_strided_slice %9 {offsets = [0, 2, 1, 0], sizes = [2, 16, 16, 4], strides = [1, 1, 1, 1]} : vector<2x18x18x4xf32> to vector<2x16x16x4xf32>
    %52 = vector.shape_cast %51 : vector<2x16x16x4xf32> to vector<512x4xf32>
    %53 = arith.truncf %52 : vector<512x4xf32> to vector<512x4xbf16>
    %c28 = arith.constant 28 : index
    %c0_41 = arith.constant 0 : index
    %54 = vector.load %arg2[%c28, %c0_41] : memref<36x8xbf16, #tpu.memory_space<vmem>>, vector<4x8xbf16>
    %cst_42 = arith.constant dense<0.000000e+00> : vector<512x8xf32>
    %55 = tpu.matmul %53, %54, %cst_42 {dimension_numbers = #tpu.dot_dimension_numbers<[1], [0], [0], [1], [0, 0, 1, 1], [], []>} : vector<512x4xbf16>, vector<4x8xbf16>, vector<512x8xf32> -> vector<512x8xf32>
    %56 = arith.addf %50, %55 : vector<512x8xf32>
    %57 = vector.extract_strided_slice %9 {offsets = [0, 2, 2, 0], sizes = [2, 16, 16, 4], strides = [1, 1, 1, 1]} : vector<2x18x18x4xf32> to vector<2x16x16x4xf32>
    %58 = vector.shape_cast %57 : vector<2x16x16x4xf32> to vector<512x4xf32>
    %59 = arith.truncf %58 : vector<512x4xf32> to vector<512x4xbf16>
    %c32 = arith.constant 32 : index
    %c0_43 = arith.constant 0 : index
    %60 = vector.load %arg2[%c32, %c0_43] : memref<36x8xbf16, #tpu.memory_space<vmem>>, vector<4x8xbf16>
    %cst_44 = arith.constant dense<0.000000e+00> : vector<512x8xf32>
    %61 = tpu.matmul %59, %60, %cst_44 {dimension_numbers = #tpu.dot_dimension_numbers<[1], [0], [0], [1], [0, 0, 1, 1], [], []>} : vector<512x4xbf16>, vector<4x8xbf16>, vector<512x8xf32> -> vector<512x8xf32>
    %62 = arith.addf %56, %61 : vector<512x8xf32>
    %63 = vector.shape_cast %62 : vector<512x8xf32> to vector<2x16x16x8xf32>
    %64 = arith.truncf %63 : vector<2x16x16x8xf32> to vector<2x16x16x8xbf16>
    %c0_45 = arith.constant 0 : index
    %c0_46 = arith.constant 0 : index
    %c0_47 = arith.constant 0 : index
    %c0_48 = arith.constant 0 : index
    %65 = vector.load %arg3[%c0_45, %c0_46, %c0_47, %c0_48] : memref<2x16x16x8xbf16, #tpu.memory_space<vmem>>, vector<2x16x16x8xbf16>
    tpu.vector_store %arg3[%c0_45, %c0_46, %c0_47, %c0_48], %64 {strides = array<i32>} : memref<2x16x16x8xbf16, #tpu.memory_space<vmem>>, vector<2x16x16x8xbf16>,
    %cst_49 = arith.constant dense<0.000000e+00> : vector<8xf32>
    %66 = vector.multi_reduction <add>, %62, %cst_49 [0] : vector<512x8xf32> to vector<8xf32>
    %67 = vector.shape_cast %66 : vector<8xf32> to vector<1x1x8xf32>
    %c0_50 = arith.constant 0 : index
    %c0_51 = arith.constant 0 : index
    %c0_52 = arith.constant 0 : index
    %68 = vector.load %arg4[%c0_50, %c0_51, %c0_52] : memref<1x1x8xf32, #tpu.memory_space<vmem>>, vector<1x1x8xf32>
    tpu.vector_store %arg4[%c0_50, %c0_51, %c0_52], %67 {strides = array<i32>} : memref<1x1x8xf32, #tpu.memory_space<vmem>>, vector<1x1x8xf32>,
    %69 = arith.mulf %62, %62 : vector<512x8xf32>
    %cst_53 = arith.constant dense<0.000000e+00> : vector<8xf32>
    %70 = vector.multi_reduction <add>, %69, %cst_53 [0] : vector<512x8xf32> to vector<8xf32>
    %71 = vector.shape_cast %70 : vector<8xf32> to vector<1x1x8xf32>
    %c0_54 = arith.constant 0 : index
    %c0_55 = arith.constant 0 : index
    %c0_56 = arith.constant 0 : index
    %72 = vector.load %arg5[%c0_54, %c0_55, %c0_56] : memref<1x1x8xf32, #tpu.memory_space<vmem>>, vector<1x1x8xf32>
    tpu.vector_store %arg5[%c0_54, %c0_55, %c0_56], %71 {strides = array<i32>} : memref<1x1x8xf32, #tpu.memory_space<vmem>>, vector<1x1x8xf32>,
    return
  }
  func.func @transform_0(%arg0: i32) -> (i32, i32, i32, i32) {
    %c0_i32 = arith.constant 0 : i32
    %c0_i32_0 = arith.constant 0 : i32
    %c0_i32_1 = arith.constant 0 : i32
    %c0_i32_2 = arith.constant 0 : i32
    return %arg0, %c0_i32, %c0_i32_0, %c0_i32_1 : i32, i32, i32, i32
  }
  func.func @transform_1(%arg0: i32) -> (i32, i32) {
    %c0_i32 = arith.constant 0 : i32
    %c0_i32_0 = arith.constant 0 : i32
    %c0_i32_1 = arith.constant 0 : i32
    return %c0_i32, %c0_i32_0 : i32, i32
  }
  func.func @transform_2(%arg0: i32) -> (i32, i32, i32, i32) {
    %c0_i32 = arith.constant 0 : i32
    %c0_i32_0 = arith.constant 0 : i32
    %c0_i32_1 = arith.constant 0 : i32
    %c0_i32_2 = arith.constant 0 : i32
    return %arg0, %c0_i32, %c0_i32_0, %c0_i32_1 : i32, i32, i32, i32
  }
  func.func @transform_3(%arg0: i32) -> (i32, i32, i32) {
    %c0_i32 = arith.constant 0 : i32
    %c0_i32_0 = arith.constant 0 : i32
    %c0_i32_1 = arith.constant 0 : i32
    return %arg0, %c0_i32, %c0_i32_0 : i32, i32, i32
  }
  func.func @transform_4(%arg0: i32) -> (i32, i32, i32) {
    %c0_i32 = arith.constant 0 : i32
    %c0_i32_0 = arith.constant 0 : i32
    %c0_i32_1 = arith.constant 0 : i32
    return %arg0, %c0_i32, %c0_i32_0 : i32, i32, i32
  }
}

</mosaic_0001>

<bundles_post_ra>
// kernel: conv_block_forward.5
= control target key start
LH: loop header
LB: loop body
LE: loop exit
PB: predicated region body
PF: predicated region fallthrough
CT: control target
= control target key end

     0   :  { %vm348_vm0 = vcmask 64512   ;;  %s1088_s0 = inlined_call_operand.vmem [shape: bf16[2,16,16,8], index: 0, kind: input, shape index: {}]   ;;  %s1089_s1 = inlined_call_operand.vmem [shape: f32[1,8], index: 1, kind: input, shape index: {}]   ;;  %s1090_s2 = inlined_call_operand.vmem [shape: f32[1,8], index: 2, kind: input, shape index: {}]   ;;  %s1091_s3 = inlined_call_operand.vmem [shape: f32[2,16,16,8], index: 3, kind: output, shape index: {}]  }
   0x1   :  { %v420_v0 = vld [vmem:[%s1088_s0] sm:$0xff]   ;;  %v547_v4 = vld [vmem:[%s1088_s0 + $0x8] sm:$0xff]   ;;  %v548_v5 = vld [vmem:[%s1088_s0 + $0x10] sm:$0xff]  }
   0x2   :  { %v604_v1 = vld [vmem:[%s1089_s1] ss:$0 sm:$0xff]  ;;  %v421_v2 = vunpack.c.l.bf16 %v420_v0  ;;  %v422_v3 = vunpack.c.h.bf16 %v420_v0  ;;  %v549_v6 = vld [vmem:[%s1088_s0 + $0x18] sm:$0xff]   ;;  %v425_v8 = vunpack.c.l.bf16 %v547_v4  ;;  %v426_v9 = vunpack.c.h.bf16 %v547_v4  ;;  %v551_v33 = vld [vmem:[%s1088_s0 + $0x28] sm:$0xff]  }
   0x3   :  { %v618_v7 = vld [vmem:[%s1090_s2] ss:$0 sm:$0xff]  ;;  %v429_v10 = vunpack.c.l.bf16 %v548_v5  ;;  %v430_v11 = vunpack.c.h.bf16 %v548_v5  ;;  %v433_v14 = vunpack.c.l.bf16 %v549_v6  ;;  %v434_v15 = vunpack.c.h.bf16 %v549_v6  ;;  %v552_v34 = vld [vmem:[%s1088_s0 + $0x30] sm:$0xff]   ;;  %v553_v39 = vld [vmem:[%s1088_s0 + $0x38] sm:$0xff]  }
   0x4   :  { %v149_v12 = vmul.f32 %v421_v2, %v604_v1  ;;  %v150_v13 = vmul.f32 %v422_v3, %v604_v1  ;;  %v151_v16 = vmul.f32 %v425_v8, %v604_v1  ;;  %v152_v17 = vmul.f32 %v426_v9, %v604_v1  ;;  %v550_v28 = vld [vmem:[%s1088_s0 + $0x20] sm:$0xff]   ;;  %v555_v6 = vld [vmem:[%s1088_s0 + $0x48] sm:$0xff]   ;;  %v556_v8 = vld [vmem:[%s1088_s0 + $0x50] sm:$0xff]  }
   0x5   :  { %v153_v18 = vmul.f32 %v429_v10, %v604_v1  ;;  %v154_v19 = vmul.f32 %v430_v11, %v604_v1  ;;  %v155_v22 = vmul.f32 %v433_v14, %v604_v1  ;;  %v156_v23 = vmul.f32 %v434_v15, %v604_v1  ;;  %v554_v0 = vld [vmem:[%s1088_s0 + $0x40] sm:$0xff]  }
   0x6   :  { %v220_v20 = vadd.f32 %v618_v7, %v149_v12  ;;  %v221_v21 = vadd.f32 %v618_v7, %v150_v13  ;;  %v222_v24 = vadd.f32 %v618_v7, %v151_v16  ;;  %v223_v25 = vadd.f32 %v618_v7, %v152_v17  ;;  %v557_v13 = vld [vmem:[%s1088_s0 + $0x58] sm:$0xff]  }
   0x7   :  { %v224_v26 = vadd.f32 %v618_v7, %v153_v18  ;;  %v225_v27 = vadd.f32 %v618_v7, %v154_v19  ;;  %v226_v31 = vadd.f32 %v618_v7, %v155_v22  ;;  %v227_v32 = vadd.f32 %v618_v7, %v156_v23 }
   0x8   :  { %v284_v29 = vmax.f32 %v220_v20, 0.0  ;;  %v285_v30 = vmax.f32 %v221_v21, 0.0  ;;  %v286_v35 = vmax.f32 %v222_v24, 0.0  ;;  %v287_v36 = vmax.f32 %v223_v25, 0.0 }
   0x9   :  { %v288_v37 = vmax.f32 %v224_v26, 0.0  ;;  %v289_v38 = vmax.f32 %v225_v27, 0.0  ;;  %v290_v40 = vmax.f32 %v226_v31, 0.0  ;;  %v291_v41 = vmax.f32 %v227_v32, 0.0 }
   0xa   :  { %349 = vst.msk [vmem:[%s1091_s3] sm:$0xff] %vm348_vm0, %v284_v29  ;;  %350 = vst.msk [vmem:[%s1091_s3 + $0x8] sm:$0xff] %vm348_vm0, %v285_v30  ;;  %v437_v42 = vunpack.c.l.bf16 %v550_v28  ;;  %v438_v43 = vunpack.c.h.bf16 %v550_v28  ;;  %v441_v44 = vunpack.c.l.bf16 %v551_v33  ;;  %v442_v45 = vunpack.c.h.bf16 %v551_v33 }
   0xb   :  { %351 = vst.msk [vmem:[%s1091_s3 + $0x10] sm:$0xff] %vm348_vm0, %v286_v35  ;;  %352 = vst.msk [vmem:[%s1091_s3 + $0x18] sm:$0xff] %vm348_vm0, %v287_v36  ;;  %v445_v46 = vunpack.c.l.bf16 %v552_v34  ;;  %v446_v47 = vunpack.c.h.bf16 %v552_v34  ;;  %v449_v50 = vunpack.c.l.bf16 %v553_v39  ;;  %v450_v51 = vunpack.c.h.bf16 %v553_v39 }
   0xc   :  { %353 = vst.msk [vmem:[%s1091_s3 + $0x20] sm:$0xff] %vm348_vm0, %v288_v37  ;;  %354 = vst.msk [vmem:[%s1091_s3 + $0x28] sm:$0xff] %vm348_vm0, %v289_v38  ;;  %v157_v48 = vmul.f32 %v437_v42, %v604_v1  ;;  %v158_v49 = vmul.f32 %v438_v43, %v604_v1  ;;  %v159_v52 = vmul.f32 %v441_v44, %v604_v1  ;;  %v453_v16 = vunpack.c.l.bf16 %v554_v0  ;;  %v558_v38 = vld [vmem:[%s1088_s0 + $0x60] sm:$0xff]   ;;  %v559_v43 = vld [vmem:[%s1088_s0 + $0x68] sm:$0xff]  }
   0xd   :  { %355 = vst.msk [vmem:[%s1091_s3 + $0x30] sm:$0xff] %vm348_vm0, %v290_v40  ;;  %356 = vst.msk [vmem:[%s1091_s3 + $0x38] sm:$0xff] %vm348_vm0, %v291_v41  ;;  %v160_v53 = vmul.f32 %v442_v45, %v604_v1  ;;  %v161_v54 = vmul.f32 %v445_v46, %v604_v1  ;;  %v162_v55 = vmul.f32 %v446_v47, %v604_v1  ;;  %v454_v17 = vunpack.c.h.bf16 %v554_v0  ;;  %v560_v44 = vld [vmem:[%s1088_s0 + $0x70] sm:$0xff]  }
   0xe   :  { %v228_v56 = vadd.f32 %v618_v7, %v157_v48  ;;  %v229_v57 = vadd.f32 %v618_v7, %v158_v49  ;;  %v163_v58 = vmul.f32 %v449_v50, %v604_v1  ;;  %v164_v59 = vmul.f32 %v450_v51, %v604_v1  ;;  %v561_v49 = vld [vmem:[%s1088_s0 + $0x78] sm:$0xff]  }
   0xf   :  { %v230_v60 = vadd.f32 %v618_v7, %v159_v52  ;;  %v231_v61 = vadd.f32 %v618_v7, %v160_v53  ;;  %v232_v62 = vadd.f32 %v618_v7, %v161_v54  ;;  %v233_v63 = vadd.f32 %v618_v7, %v162_v55 }
  0x10   :  { %v292_v2 = vmax.f32 %v228_v56, 0.0  ;;  %v293_v3 = vmax.f32 %v229_v57, 0.0  ;;  %v234_v4 = vadd.f32 %v618_v7, %v163_v58  ;;  %v235_v5 = vadd.f32 %v618_v7, %v164_v59 }
  0x11   :  { %v294_v9 = vmax.f32 %v230_v60, 0.0  ;;  %v295_v10 = vmax.f32 %v231_v61, 0.0  ;;  %v296_v11 = vmax.f32 %v232_v62, 0.0  ;;  %v297_v12 = vmax.f32 %v233_v63, 0.0 }
  0x12   :  { %357 = vst.msk [vmem:[%s1091_s3 + $0x40] sm:$0xff] %vm348_vm0, %v292_v2  ;;  %358 = vst.msk [vmem:[%s1091_s3 + $0x48] sm:$0xff] %vm348_vm0, %v293_v3  ;;  %v298_v14 = vmax.f32 %v234_v4, 0.0  ;;  %v299_v15 = vmax.f32 %v235_v5, 0.0  ;;  %v457_v18 = vunpack.c.l.bf16 %v555_v6  ;;  %v458_v19 = vunpack.c.h.bf16 %v555_v6 }
  0x13   :  { %359 = vst.msk [vmem:[%s1091_s3 + $0x50] sm:$0xff] %vm348_vm0, %v294_v9  ;;  %360 = vst.msk [vmem:[%s1091_s3 + $0x58] sm:$0xff] %vm348_vm0, %v295_v10  ;;  %v461_v20 = vunpack.c.l.bf16 %v556_v8  ;;  %v462_v21 = vunpack.c.h.bf16 %v556_v8  ;;  %v165_v22 = vmul.f32 %v453_v16, %v604_v1  ;;  %v166_v23 = vmul.f32 %v454_v17, %v604_v1  ;;  %v563_v17 = vld [vmem:[%s1088_s0 + $0x88] sm:$0xff]  }
  0x14   :  { %361 = vst.msk [vmem:[%s1091_s3 + $0x60] sm:$0xff] %vm348_vm0, %v296_v11  ;;  %362 = vst.msk [vmem:[%s1091_s3 + $0x68] sm:$0xff] %vm348_vm0, %v297_v12  ;;  %v465_v24 = vunpack.c.l.bf16 %v557_v13  ;;  %v466_v25 = vunpack.c.h.bf16 %v557_v13  ;;  %v167_v26 = vmul.f32 %v457_v18, %v604_v1  ;;  %v168_v27 = vmul.f32 %v458_v19, %v604_v1  ;;  %v562_v12 = vld [vmem:[%s1088_s0 + $0x80] sm:$0xff]   ;;  %v564_v18 = vld [vmem:[%s1088_s0 + $0x90] sm:$0xff]  }
  0x15   :  { %363 = vst.msk [vmem:[%s1091_s3 + $0x70] sm:$0xff] %vm348_vm0, %v298_v14  ;;  %364 = vst.msk [vmem:[%s1091_s3 + $0x78] sm:$0xff] %vm348_vm0, %v299_v15  ;;  %v169_v28 = vmul.f32 %v461_v20, %v604_v1  ;;  %v170_v29 = vmul.f32 %v462_v21, %v604_v1  ;;  %v236_v30 = vadd.f32 %v618_v7, %v165_v22  ;;  %v469_v52 = vunpack.c.l.bf16 %v558_v38 }
  0x16   :  { %v237_v31 = vadd.f32 %v618_v7, %v166_v23  ;;  %v171_v32 = vmul.f32 %v465_v24, %v604_v1  ;;  %v172_v33 = vmul.f32 %v466_v25, %v604_v1  ;;  %v238_v34 = vadd.f32 %v618_v7, %v167_v26  ;;  %v565_v23 = vld [vmem:[%s1088_s0 + $0x98] sm:$0xff]  }
  0x17   :  { %v239_v35 = vadd.f32 %v618_v7, %v168_v27  ;;  %v240_v36 = vadd.f32 %v618_v7, %v169_v28  ;;  %v241_v37 = vadd.f32 %v618_v7, %v170_v29  ;;  %v300_v39 = vmax.f32 %v236_v30, 0.0 }
  0x18   :  { %v301_v40 = vmax.f32 %v237_v31, 0.0  ;;  %v242_v41 = vadd.f32 %v618_v7, %v171_v32  ;;  %v243_v42 = vadd.f32 %v618_v7, %v172_v33  ;;  %v302_v45 = vmax.f32 %v238_v34, 0.0 }
  0x19   :  { %v303_v46 = vmax.f32 %v239_v35, 0.0  ;;  %v304_v47 = vmax.f32 %v240_v36, 0.0  ;;  %v305_v48 = vmax.f32 %v241_v37, 0.0  ;;  %365 = vst.msk [vmem:[%s1091_s3 + $0x80] sm:$0xff] %vm348_vm0, %v300_v39  ;;  %v470_v53 = vunpack.c.h.bf16 %v558_v38 }
  0x1a   :  { %366 = vst.msk [vmem:[%s1091_s3 + $0x88] sm:$0xff] %vm348_vm0, %v301_v40  ;;  %v306_v50 = vmax.f32 %v242_v41, 0.0  ;;  %v307_v51 = vmax.f32 %v243_v42, 0.0  ;;  %367 = vst.msk [vmem:[%s1091_s3 + $0x90] sm:$0xff] %vm348_vm0, %v302_v45  ;;  %v473_v54 = vunpack.c.l.bf16 %v559_v43  ;;  %v474_v55 = vunpack.c.h.bf16 %v559_v43 }
  0x1b   :  { %368 = vst.msk [vmem:[%s1091_s3 + $0x98] sm:$0xff] %vm348_vm0, %v303_v46  ;;  %369 = vst.msk [vmem:[%s1091_s3 + $0xa0] sm:$0xff] %vm348_vm0, %v304_v47  ;;  %v477_v56 = vunpack.c.l.bf16 %v560_v44  ;;  %v478_v57 = vunpack.c.h.bf16 %v560_v44  ;;  %v173_v58 = vmul.f32 %v469_v52, %v604_v1  ;;  %v174_v59 = vmul.f32 %v470_v53, %v604_v1  ;;  %v567_v53 = vld [vmem:[%s1088_s0 + $0xa8] sm:$0xff]  }
  0x1c   :  { %370 = vst.msk [vmem:[%s1091_s3 + $0xa8] sm:$0xff] %vm348_vm0, %v305_v48  ;;  %371 = vst.msk [vmem:[%s1091_s3 + $0xb0] sm:$0xff] %vm348_vm0, %v306_v50  ;;  %v481_v60 = vunpack.c.l.bf16 %v561_v49  ;;  %v482_v61 = vunpack.c.h.bf16 %v561_v49  ;;  %v175_v62 = vmul.f32 %v473_v54, %v604_v1  ;;  %v176_v63 = vmul.f32 %v474_v55, %v604_v1  ;;  %v566_v48 = vld [vmem:[%s1088_s0 + $0xa0] sm:$0xff]   ;;  %v568_v54 = vld [vmem:[%s1088_s0 + $0xb0] sm:$0xff]  }
  0x1d   :  { %372 = vst.msk [vmem:[%s1091_s3 + $0xb8] sm:$0xff] %vm348_vm0, %v307_v51  ;;  %v177_v0 = vmul.f32 %v477_v56, %v604_v1  ;;  %v178_v2 = vmul.f32 %v478_v57, %v604_v1  ;;  %v244_v3 = vadd.f32 %v618_v7, %v173_v58  ;;  %v245_v4 = vadd.f32 %v618_v7, %v174_v59  ;;  %v569_v59 = vld [vmem:[%s1088_s0 + $0xb8] sm:$0xff]  }
  0x1e   :  { %v179_v5 = vmul.f32 %v481_v60, %v604_v1  ;;  %v180_v6 = vmul.f32 %v482_v61, %v604_v1  ;;  %v246_v8 = vadd.f32 %v618_v7, %v175_v62  ;;  %v247_v9 = vadd.f32 %v618_v7, %v176_v63 }
  0x1f   :  { %v248_v10 = vadd.f32 %v618_v7, %v177_v0  ;;  %v249_v11 = vadd.f32 %v618_v7, %v178_v2  ;;  %v308_v13 = vmax.f32 %v244_v3, 0.0  ;;  %v309_v14 = vmax.f32 %v245_v4, 0.0 }
  0x20   :  { %v250_v15 = vadd.f32 %v618_v7, %v179_v5  ;;  %v251_v16 = vadd.f32 %v618_v7, %v180_v6  ;;  %v310_v19 = vmax.f32 %v246_v8, 0.0  ;;  %v311_v20 = vmax.f32 %v247_v9, 0.0 }
  0x21   :  { %v312_v21 = vmax.f32 %v248_v10, 0.0  ;;  %v313_v22 = vmax.f32 %v249_v11, 0.0  ;;  %373 = vst.msk [vmem:[%s1091_s3 + $0xc0] sm:$0xff] %vm348_vm0, %v308_v13  ;;  %374 = vst.msk [vmem:[%s1091_s3 + $0xc8] sm:$0xff] %vm348_vm0, %v309_v14  ;;  %v485_v26 = vunpack.c.l.bf16 %v562_v12  ;;  %v486_v27 = vunpack.c.h.bf16 %v562_v12 }
  0x22   :  { %v314_v24 = vmax.f32 %v250_v15, 0.0  ;;  %v315_v25 = vmax.f32 %v251_v16, 0.0  ;;  %375 = vst.msk [vmem:[%s1091_s3 + $0xd0] sm:$0xff] %vm348_vm0, %v310_v19  ;;  %376 = vst.msk [vmem:[%s1091_s3 + $0xd8] sm:$0xff] %vm348_vm0, %v311_v20  ;;  %v489_v28 = vunpack.c.l.bf16 %v563_v17  ;;  %v490_v29 = vunpack.c.h.bf16 %v563_v17 }
  0x23   :  { %377 = vst.msk [vmem:[%s1091_s3 + $0xe0] sm:$0xff] %vm348_vm0, %v312_v21  ;;  %378 = vst.msk [vmem:[%s1091_s3 + $0xe8] sm:$0xff] %vm348_vm0, %v313_v22  ;;  %v493_v30 = vunpack.c.l.bf16 %v564_v18  ;;  %v494_v31 = vunpack.c.h.bf16 %v564_v18  ;;  %v181_v32 = vmul.f32 %v485_v26, %v604_v1  ;;  %v182_v33 = vmul.f32 %v486_v27, %v604_v1  ;;  %v570_v22 = vld [vmem:[%s1088_s0 + $0xc0] sm:$0xff]   ;;  %v571_v27 = vld [vmem:[%s1088_s0 + $0xc8] sm:$0xff]  }
  0x24   :  { %379 = vst.msk [vmem:[%s1091_s3 + $0xf0] sm:$0xff] %vm348_vm0, %v314_v24  ;;  %380 = vst.msk [vmem:[%s1091_s3 + $0xf8] sm:$0xff] %vm348_vm0, %v315_v25  ;;  %v497_v34 = vunpack.c.l.bf16 %v565_v23  ;;  %v498_v35 = vunpack.c.h.bf16 %v565_v23  ;;  %v183_v36 = vmul.f32 %v489_v28, %v604_v1  ;;  %v184_v37 = vmul.f32 %v490_v29, %v604_v1  ;;  %v572_v28 = vld [vmem:[%s1088_s0 + $0xd0] sm:$0xff]  }
  0x25   :  { %v185_v38 = vmul.f32 %v493_v30, %v604_v1  ;;  %v186_v39 = vmul.f32 %v494_v31, %v604_v1  ;;  %v252_v40 = vadd.f32 %v618_v7, %v181_v32  ;;  %v253_v41 = vadd.f32 %v618_v7, %v182_v33  ;;  %v573_v33 = vld [vmem:[%s1088_s0 + $0xd8] sm:$0xff]  }
  0x26   :  { %v187_v42 = vmul.f32 %v497_v34, %v604_v1  ;;  %v188_v43 = vmul.f32 %v498_v35, %v604_v1  ;;  %v254_v44 = vadd.f32 %v618_v7, %v183_v36  ;;  %v255_v45 = vadd.f32 %v618_v7, %v184_v37 }
  0x27   :  { %v256_v46 = vadd.f32 %v618_v7, %v185_v38  ;;  %v257_v47 = vadd.f32 %v618_v7, %v186_v39  ;;  %v316_v49 = vmax.f32 %v252_v40, 0.0  ;;  %v317_v50 = vmax.f32 %v253_v41, 0.0 }
  0x28   :  { %v258_v51 = vadd.f32 %v618_v7, %v187_v42  ;;  %v259_v52 = vadd.f32 %v618_v7, %v188_v43  ;;  %v318_v55 = vmax.f32 %v254_v44, 0.0  ;;  %v319_v56 = vmax.f32 %v255_v45, 0.0 }
  0x29   :  { %v320_v57 = vmax.f32 %v256_v46, 0.0  ;;  %v321_v58 = vmax.f32 %v257_v47, 0.0  ;;  %381 = vst.msk [vmem:[%s1091_s3 + $0x100] sm:$0xff] %vm348_vm0, %v316_v49  ;;  %382 = vst.msk [vmem:[%s1091_s3 + $0x108] sm:$0xff] %vm348_vm0, %v317_v50  ;;  %v501_v62 = vunpack.c.l.bf16 %v566_v48  ;;  %v502_v63 = vunpack.c.h.bf16 %v566_v48 }
  0x2a   :  { %v322_v60 = vmax.f32 %v258_v51, 0.0  ;;  %v323_v61 = vmax.f32 %v259_v52, 0.0  ;;  %383 = vst.msk [vmem:[%s1091_s3 + $0x110] sm:$0xff] %vm348_vm0, %v318_v55  ;;  %384 = vst.msk [vmem:[%s1091_s3 + $0x118] sm:$0xff] %vm348_vm0, %v319_v56  ;;  %v505_v0 = vunpack.c.l.bf16 %v567_v53  ;;  %v506_v2 = vunpack.c.h.bf16 %v567_v53 }
  0x2b   :  { %385 = vst.msk [vmem:[%s1091_s3 + $0x120] sm:$0xff] %vm348_vm0, %v320_v57  ;;  %386 = vst.msk [vmem:[%s1091_s3 + $0x128] sm:$0xff] %vm348_vm0, %v321_v58  ;;  %v509_v3 = vunpack.c.l.bf16 %v568_v54  ;;  %v510_v4 = vunpack.c.h.bf16 %v568_v54  ;;  %v189_v5 = vmul.f32 %v501_v62, %v604_v1  ;;  %v190_v6 = vmul.f32 %v502_v63, %v604_v1  ;;  %v574_v58 = vld [vmem:[%s1088_s0 + $0xe0] sm:$0xff]   ;;  %v575_v63 = vld [vmem:[%s1088_s0 + $0xe8] sm:$0xff]  }
  0x2c   :  { %387 = vst.msk [vmem:[%s1091_s3 + $0x130] sm:$0xff] %vm348_vm0, %v322_v60  ;;  %388 = vst.msk [vmem:[%s1091_s3 + $0x138] sm:$0xff] %vm348_vm0, %v323_v61  ;;  %v513_v8 = vunpack.c.l.bf16 %v569_v59  ;;  %v514_v9 = vunpack.c.h.bf16 %v569_v59  ;;  %v191_v10 = vmul.f32 %v505_v0, %v604_v1  ;;  %v192_v11 = vmul.f32 %v506_v2, %v604_v1  ;;  %v576_v0 = vld [vmem:[%s1088_s0 + $0xf0] sm:$0xff]  }
  0x2d   :  { %v193_v12 = vmul.f32 %v509_v3, %v604_v1  ;;  %v194_v13 = vmul.f32 %v510_v4, %v604_v1  ;;  %v260_v14 = vadd.f32 %v618_v7, %v189_v5  ;;  %v261_v15 = vadd.f32 %v618_v7, %v190_v6  ;;  %v577_v6 = vld [vmem:[%s1088_s0 + $0xf8] sm:$0xff]  }
  0x2e   :  { %v195_v16 = vmul.f32 %v513_v8, %v604_v1  ;;  %v196_v17 = vmul.f32 %v514_v9, %v604_v1  ;;  %v262_v18 = vadd.f32 %v618_v7, %v191_v10  ;;  %v263_v19 = vadd.f32 %v618_v7, %v192_v11 }
  0x2f   :  { %v264_v20 = vadd.f32 %v618_v7, %v193_v12  ;;  %v265_v21 = vadd.f32 %v618_v7, %v194_v13  ;;  %v324_v23 = vmax.f32 %v260_v14, 0.0  ;;  %v325_v24 = vmax.f32 %v261_v15, 0.0 }
  0x30   :  { %v266_v25 = vadd.f32 %v618_v7, %v195_v16  ;;  %v267_v26 = vadd.f32 %v618_v7, %v196_v17  ;;  %v326_v29 = vmax.f32 %v262_v18, 0.0  ;;  %v327_v30 = vmax.f32 %v263_v19, 0.0 }
  0x31   :  { %v328_v31 = vmax.f32 %v264_v20, 0.0  ;;  %v329_v32 = vmax.f32 %v265_v21, 0.0  ;;  %389 = vst.msk [vmem:[%s1091_s3 + $0x140] sm:$0xff] %vm348_vm0, %v324_v23  ;;  %390 = vst.msk [vmem:[%s1091_s3 + $0x148] sm:$0xff] %vm348_vm0, %v325_v24  ;;  %v517_v36 = vunpack.c.l.bf16 %v570_v22  ;;  %v518_v37 = vunpack.c.h.bf16 %v570_v22 }
  0x32   :  { %v330_v34 = vmax.f32 %v266_v25, 0.0  ;;  %v331_v35 = vmax.f32 %v267_v26, 0.0  ;;  %391 = vst.msk [vmem:[%s1091_s3 + $0x150] sm:$0xff] %vm348_vm0, %v326_v29  ;;  %392 = vst.msk [vmem:[%s1091_s3 + $0x158] sm:$0xff] %vm348_vm0, %v327_v30  ;;  %v521_v38 = vunpack.c.l.bf16 %v571_v27  ;;  %v522_v39 = vunpack.c.h.bf16 %v571_v27 }
  0x33   :  { %393 = vst.msk [vmem:[%s1091_s3 + $0x160] sm:$0xff] %vm348_vm0, %v328_v31  ;;  %394 = vst.msk [vmem:[%s1091_s3 + $0x168] sm:$0xff] %vm348_vm0, %v329_v32  ;;  %v525_v40 = vunpack.c.l.bf16 %v572_v28  ;;  %v526_v41 = vunpack.c.h.bf16 %v572_v28  ;;  %v197_v42 = vmul.f32 %v517_v36, %v604_v1  ;;  %v198_v43 = vmul.f32 %v518_v37, %v604_v1 }
  0x34   :  { %395 = vst.msk [vmem:[%s1091_s3 + $0x170] sm:$0xff] %vm348_vm0, %v330_v34  ;;  %396 = vst.msk [vmem:[%s1091_s3 + $0x178] sm:$0xff] %vm348_vm0, %v331_v35  ;;  %v529_v44 = vunpack.c.l.bf16 %v573_v33  ;;  %v530_v45 = vunpack.c.h.bf16 %v573_v33  ;;  %v199_v46 = vmul.f32 %v521_v38, %v604_v1  ;;  %v200_v47 = vmul.f32 %v522_v39, %v604_v1 }
  0x35   :  { %v201_v48 = vmul.f32 %v525_v40, %v604_v1  ;;  %v202_v49 = vmul.f32 %v526_v41, %v604_v1  ;;  %v268_v50 = vadd.f32 %v618_v7, %v197_v42  ;;  %v269_v51 = vadd.f32 %v618_v7, %v198_v43 }
  0x36   :  { %v203_v52 = vmul.f32 %v529_v44, %v604_v1  ;;  %v204_v53 = vmul.f32 %v530_v45, %v604_v1  ;;  %v270_v54 = vadd.f32 %v618_v7, %v199_v46  ;;  %v271_v55 = vadd.f32 %v618_v7, %v200_v47 }
  0x37   :  { %v272_v56 = vadd.f32 %v618_v7, %v201_v48  ;;  %v273_v57 = vadd.f32 %v618_v7, %v202_v49  ;;  %v332_v59 = vmax.f32 %v268_v50, 0.0  ;;  %v333_v60 = vmax.f32 %v269_v51, 0.0 }
  0x38   :  { %v274_v61 = vadd.f32 %v618_v7, %v203_v52  ;;  %v275_v62 = vadd.f32 %v618_v7, %v204_v53  ;;  %v334_v2 = vmax.f32 %v270_v54, 0.0  ;;  %v335_v3 = vmax.f32 %v271_v55, 0.0 }
  0x39   :  { %v336_v4 = vmax.f32 %v272_v56, 0.0  ;;  %v337_v5 = vmax.f32 %v273_v57, 0.0  ;;  %397 = vst.msk [vmem:[%s1091_s3 + $0x180] sm:$0xff] %vm348_vm0, %v332_v59  ;;  %398 = vst.msk [vmem:[%s1091_s3 + $0x188] sm:$0xff] %vm348_vm0, %v333_v60  ;;  %v533_v10 = vunpack.c.l.bf16 %v574_v58  ;;  %v534_v11 = vunpack.c.h.bf16 %v574_v58 }
  0x3a   :  { %v338_v8 = vmax.f32 %v274_v61, 0.0  ;;  %v339_v9 = vmax.f32 %v275_v62, 0.0  ;;  %399 = vst.msk [vmem:[%s1091_s3 + $0x190] sm:$0xff] %vm348_vm0, %v334_v2  ;;  %400 = vst.msk [vmem:[%s1091_s3 + $0x198] sm:$0xff] %vm348_vm0, %v335_v3  ;;  %v537_v12 = vunpack.c.l.bf16 %v575_v63  ;;  %v538_v13 = vunpack.c.h.bf16 %v575_v63 }
  0x3b   :  { %401 = vst.msk [vmem:[%s1091_s3 + $0x1a0] sm:$0xff] %vm348_vm0, %v336_v4  ;;  %402 = vst.msk [vmem:[%s1091_s3 + $0x1a8] sm:$0xff] %vm348_vm0, %v337_v5  ;;  %v541_v14 = vunpack.c.l.bf16 %v576_v0  ;;  %v542_v15 = vunpack.c.h.bf16 %v576_v0  ;;  %v205_v16 = vmul.f32 %v533_v10, %v604_v1  ;;  %v206_v17 = vmul.f32 %v534_v11, %v604_v1 }
  0x3c   :  { %403 = vst.msk [vmem:[%s1091_s3 + $0x1b0] sm:$0xff] %vm348_vm0, %v338_v8  ;;  %404 = vst.msk [vmem:[%s1091_s3 + $0x1b8] sm:$0xff] %vm348_vm0, %v339_v9  ;;  %v545_v18 = vunpack.c.l.bf16 %v577_v6  ;;  %v546_v19 = vunpack.c.h.bf16 %v577_v6  ;;  %v207_v20 = vmul.f32 %v537_v12, %v604_v1  ;;  %v208_v21 = vmul.f32 %v538_v13, %v604_v1 }
  0x3d   :  { %v209_v22 = vmul.f32 %v541_v14, %v604_v1  ;;  %v210_v23 = vmul.f32 %v542_v15, %v604_v1  ;;  %v276_v24 = vadd.f32 %v618_v7, %v205_v16  ;;  %v277_v25 = vadd.f32 %v618_v7, %v206_v17 }
  0x3e   :  { %v211_v26 = vmul.f32 %v545_v18, %v604_v1  ;;  %v212_v27 = vmul.f32 %v546_v19, %v604_v1  ;;  %v278_v28 = vadd.f32 %v618_v7, %v207_v20  ;;  %v279_v29 = vadd.f32 %v618_v7, %v208_v21 }
  0x3f   :  { %v280_v30 = vadd.f32 %v618_v7, %v209_v22  ;;  %v281_v31 = vadd.f32 %v618_v7, %v210_v23  ;;  %v340_v32 = vmax.f32 %v276_v24, 0.0  ;;  %v341_v33 = vmax.f32 %v277_v25, 0.0 }
  0x40   :  { %v282_v34 = vadd.f32 %v618_v7, %v211_v26  ;;  %v283_v35 = vadd.f32 %v618_v7, %v212_v27  ;;  %v342_v36 = vmax.f32 %v278_v28, 0.0  ;;  %v343_v37 = vmax.f32 %v279_v29, 0.0 }
  0x41   :  { %v344_v38 = vmax.f32 %v280_v30, 0.0  ;;  %v345_v39 = vmax.f32 %v281_v31, 0.0  ;;  %405 = vst.msk [vmem:[%s1091_s3 + $0x1c0] sm:$0xff] %vm348_vm0, %v340_v32  ;;  %406 = vst.msk [vmem:[%s1091_s3 + $0x1c8] sm:$0xff] %vm348_vm0, %v341_v33 }
  0x42   :  { %v346_v1 = vmax.f32 %v282_v34, 0.0  ;;  %v347_v40 = vmax.f32 %v283_v35, 0.0  ;;  %407 = vst.msk [vmem:[%s1091_s3 + $0x1d0] sm:$0xff] %vm348_vm0, %v342_v36  ;;  %408 = vst.msk [vmem:[%s1091_s3 + $0x1d8] sm:$0xff] %vm348_vm0, %v343_v37 }
  0x43   :  { %409 = vst.msk [vmem:[%s1091_s3 + $0x1e0] sm:$0xff] %vm348_vm0, %v344_v38  ;;  %410 = vst.msk [vmem:[%s1091_s3 + $0x1e8] sm:$0xff] %vm348_vm0, %v345_v39 }
  0x44   :  { %411 = vst.msk [vmem:[%s1091_s3 + $0x1f0] sm:$0xff] %vm348_vm0, %v346_v1  ;;  %412 = vst.msk [vmem:[%s1091_s3 + $0x1f8] sm:$0xff] %vm348_vm0, %v347_v40 }

// kernel: conv_block_forward.3
= control target key start
LH: loop header
LB: loop body
LE: loop exit
PB: predicated region body
PF: predicated region fallthrough
CT: control target
= control target key end

     0   :  { %vm891_vm0 = vcmask 1041408   ;;  %vm79_vm1 = vcmask 31744   ;;  %vm82_vm2 = vcmask 25600   ;;  %v7258_v1 = vmov 0.0   ;;  %s9556_s1 = inlined_call_operand.vmem [shape: bf16[36,8], index: 1, kind: input, shape index: {}]   ;;  %s9557_s0 = inlined_call_operand.vmem [shape: bf16[2,16,16,4], index: 0, kind: input, shape index: {}]   ;;  %s9558_s2 = inlined_call_operand.vmem [shape: bf16[2,16,16,8], index: 2, kind: output, shape index: {0}]   ;;  %s9559_s3 = inlined_call_operand.vmem [shape: f32[1,1,8], index: 3, kind: output, shape index: {1}]   ;;  %s9560_s4 = inlined_call_operand.vmem [shape: f32[1,1,8], index: 4, kind: output, shape index: {2}]  }
   0x1   :  { %v7287_v0 = vld [vmem:[%s9556_s1] ss:$0 sps:$4 sm:$0xcc]   ;;  %80 = vst.msk [vmem:[#allocation2] sm:$0xff] %vm79_vm1, %v7258_v1  ;;  %81 = vst.msk [vmem:[#allocation2 + $0x8] sm:$0xff] %vm79_vm1, %v7258_v1  ;;  %vm94_vm3 = vcmask 24576  }
   0x2   :  { %83 = vst.msk [vmem:[#allocation2 + $0x10] sm:$0x3] %vm82_vm2, %v7258_v1  ;;  %86 = vst.msk [vmem:[#allocation2 + $0x1c0] sm:$0x3] %vm82_vm2, %v7258_v1  ;;  %v7316_v2 = vld [vmem:[%s9556_s1 + $0x8] sm:$0x3] }
   0x3   :  { %84 = vst.msk [vmem:[#allocation2 + $0x1b0] sm:$0xff] %vm79_vm1, %v7258_v1  ;;  %85 = vst.msk [vmem:[#allocation2 + $0x1b8] sm:$0xff] %vm79_vm1, %v7258_v1  ;;  %v5640_v3 = vld [vmem:[%s9557_s0] sm:$0xff]   ;;  %v794_v5 = vrot.slane %v7287_v0, 2  ;;  %7207 = vmatprep.subr.msk.bf16.mxu0 %vm891_vm0, %v7316_v2  ;;  %v7475_v6 = vsel %vm891_vm0, %v7316_v2, 0  ;;  %v5767_v9 = vld [vmem:[%s9557_s0 + $0x8] sm:$0xff]  }
   0x4   :  { %88 = vst.msk [vmem:[#allocation2 + $0x198] sm:$0xff] %vm79_vm1, %v7258_v1  ;;  %89 = vst.msk [vmem:[#allocation2 + $0x1a0] sm:$0xff] %vm79_vm1, %v7258_v1  ;;  %v7468_v4 = vld [vmem:[%s9556_s1] sm:$0x3]  ;;  %v5641_v7 = vunpack.c.l.bf16 %v5640_v3  ;;  %v5642_v8 = vunpack.c.h.bf16 %v5640_v3  ;;  %v5768_v10 = vld [vmem:[%s9557_s0 + $0x10] sm:$0xff]   ;;  %6360 = vmatpush3.bf16.msra.mxu0 %v7475_v6  ;;  %v5645_v12 = vunpack.c.l.bf16 %v5767_v9  ;;  %v5646_v13 = vunpack.c.h.bf16 %v5767_v9 }
   0x5   :  { %90 = vst.msk [vmem:[#allocation2 + $0x1a8] sm:$0x3] %vm82_vm2, %v7258_v1  ;;  %93 = vst.msk [vmem:[#allocation2 + $0x358] sm:$0x3] %vm82_vm2, %v7258_v1  ;;  %v5649_v14 = vunpack.c.l.bf16 %v5768_v10  ;;  %v5769_v15 = vld [vmem:[%s9557_s0 + $0x18] sm:$0xff]   ;;  %v5770_v16 = vld [vmem:[%s9557_s0 + $0x20] sm:$0xff]   ;;  %7203 = vmatprep.subr.msk.bf16.mxu1 %vm891_vm0, %v794_v5  ;;  %v5650_v18 = vunpack.c.h.bf16 %v5768_v10 }
   0x6   :  { %91 = vst.msk [vmem:[#allocation2 + $0x348] sm:$0xff] %vm79_vm1, %v7258_v1  ;;  %92 = vst.msk [vmem:[#allocation2 + $0x350] sm:$0xff] %vm79_vm1, %v7258_v1  ;;  %v7487_v11 = vld [vmem:[%s9556_s1 + $0x8] ss:$0 sps:$4 sm:$0xcc]   ;;  %v893_v17 = vsel %vm891_vm0, %v794_v5, 0  ;;  %v5653_v19 = vunpack.c.l.bf16 %v5769_v15  ;;  %v5654_v20 = vunpack.c.h.bf16 %v5769_v15  ;;  %v5657_v25 = vunpack.c.l.bf16 %v5770_v16 }
   0x7   :  { %95 = vst.msk [vmem:[#allocation2] sm:$0x1] %vm94_vm3, %v7258_v1  ;;  %131 = vst.msk [vmem:[#allocation2 + $0x11] sm:$0x1] %vm94_vm3, %v7258_v1  ;;  %v5771_v21 = vld [vmem:[%s9557_s0 + $0x28] sm:$0xff]   ;;  %v5772_v22 = vld [vmem:[%s9557_s0 + $0x30] sm:$0xff]   ;;  %6096 = vmatpush3.bf16.msra.mxu1 %v893_v17  ;;  %v5658_v26 = vunpack.c.h.bf16 %v5770_v16 }
   0x8   :  { %96 = vst.msk [vmem:[#allocation2 + $0x18] sm:$0x1] %vm94_vm3, %v7258_v1  ;;  %97 = vst.msk [vmem:[#allocation2 + $0x30] sm:$0x1] %vm94_vm3, %v7258_v1  ;;  %v5773_v23 = vld [vmem:[%s9557_s0 + $0x38] sm:$0xff]   ;;  %v3056_v24 = vrot.slane %v7487_v11, 2  ;;  %v5661_v27 = vunpack.c.l.bf16 %v5771_v21  ;;  %7204 = vmatprep.subr.msk.bf16.mxu1 %vm891_vm0, %v7468_v4  ;;  %v5662_v30 = vunpack.c.h.bf16 %v5771_v21  ;;  %v5665_v31 = vunpack.c.l.bf16 %v5772_v22 }
   0x9   :  { %98 = vst.msk [vmem:[#allocation2 + $0x48] sm:$0x1] %vm94_vm3, %v7258_v1  ;;  %99 = vst.msk [vmem:[#allocation2 + $0x60] sm:$0x1] %vm94_vm3, %v7258_v1  ;;  %v5774_v28 = vld [vmem:[%s9557_s0 + $0x40] sm:$0xff]   ;;  %v5775_v29 = vld [vmem:[%s9557_s0 + $0x48] sm:$0xff]   ;;  %v5666_v32 = vunpack.c.h.bf16 %v5772_v22  ;;  %v5669_v33 = vunpack.c.l.bf16 %v5773_v23  ;;  %v5670_v35 = vunpack.c.h.bf16 %v5773_v23 }
   0xa   :  { %100 = vst.msk [vmem:[#allocation2 + $0x78] sm:$0x1] %vm94_vm3, %v7258_v1  ;;  %101 = vst.msk [vmem:[#allocation2 + $0x90] sm:$0x1] %vm94_vm3, %v7258_v1  ;;  %v297_v34 = vld [vmem:[#allocation2 + $0x8] sm:$0xff]  ;;  %7209 = vmatprep.subr.msk.bf16.mxu0 %vm891_vm0, %v3056_v24  ;;  %v5673_v36 = vunpack.c.l.bf16 %v5774_v28  ;;  %v5674_v37 = vunpack.c.h.bf16 %v5774_v28  ;;  %v5776_v38 = vld [vmem:[%s9557_s0 + $0x50] sm:$0xff]   ;;  %v5677_v43 = vunpack.c.l.bf16 %v5775_v29  ;;  %v5678_v44 = vunpack.c.h.bf16 %v5775_v29 }
   0xb   :  { %102 = vst.msk [vmem:[#allocation2 + $0xa8] sm:$0x1] %vm94_vm3, %v7258_v1  ;;  %103 = vst.msk [vmem:[#allocation2 + $0xc0] sm:$0x1] %vm94_vm3, %v7258_v1  ;;  %v5777_v39 = vld [vmem:[%s9557_s0 + $0x58] sm:$0xff]   ;;  %vm533_vm4 = vcmask 1046528   ;;  %v5681_v48 = vunpack.c.l.bf16 %v5776_v38  ;;  %v5682_v49 = vunpack.c.h.bf16 %v5776_v38 }
   0xc   :  { %104 = vst.msk [vmem:[#allocation2 + $0xd8] sm:$0x1] %vm94_vm3, %v7258_v1  ;;  %105 = vst.msk [vmem:[#allocation2 + $0xf0] sm:$0x1] %vm94_vm3, %v7258_v1  ;;  %v535_v42 = vrot.slane %v297_v34, 1  ;;  %v5778_v45 = vld [vmem:[%s9557_s0 + $0x60] sm:$0xff]   ;;  %v5685_v50 = vunpack.c.l.bf16 %v5777_v39  ;;  %v5686_v51 = vunpack.c.h.bf16 %v5777_v39 }
   0xd   :  { %106 = vst.msk [vmem:[#allocation2 + $0x108] sm:$0x1] %vm94_vm3, %v7258_v1  ;;  %107 = vst.msk [vmem:[#allocation2 + $0x120] sm:$0x1] %vm94_vm3, %v7258_v1  ;;  %v5689_v57 = vunpack.c.l.bf16 %v5778_v45  ;;  %v5690_v58 = vunpack.c.h.bf16 %v5778_v45  ;;  %v1281_v2 = vsel %vm891_vm0, %v7468_v4, 0  ;;  %v3064_v4 = vsel %vm891_vm0, %v3056_v24, 0 }
   0xe   :  { %108 = vst.msk [vmem:[#allocation2 + $0x138] sm:$0x1] %vm94_vm3, %v7258_v1  ;;  %109 = vst.msk [vmem:[#allocation2 + $0x150] sm:$0x1] %vm94_vm3, %v7258_v1  ;;  %v296_v40 = vld [vmem:[#allocation2] sm:$0xff]  ;;  %vm1572_vm5 = vcmask 1045504  }
   0xf   :  { %110 = vst.msk [vmem:[#allocation2 + $0x168] sm:$0x1] %vm94_vm3, %v7258_v1  ;;  %111 = vst.msk [vmem:[#allocation2 + $0x180] sm:$0x1] %vm94_vm3, %v7258_v1  ;;  %v298_v41 = vld [vmem:[#allocation2 + $0x10] sm:$0x3] }
  0x10   :  { %114 = vst.msk [vmem:[#allocation2 + $0x1c8] sm:$0x1] %vm94_vm3, %v7258_v1  ;;  %115 = vst.msk [vmem:[#allocation2 + $0x1e0] sm:$0x1] %vm94_vm3, %v7258_v1  ;;  %v534_v46 = vrot.slane %v296_v40, 1  ;;  %v537_v47 = vrot.slane %v298_v41, 1 }
  0x11   :  { %116 = vst.msk [vmem:[#allocation2 + $0x1f8] sm:$0x1] %vm94_vm3, %v7258_v1  ;;  %117 = vst.msk [vmem:[#allocation2 + $0x210] sm:$0x1] %vm94_vm3, %v7258_v1  ;;  %v7619_v34 = vld [vmem:[%s9556_s1 + $0xc] sm:$0x3] }
  0x12   :  { %118 = vst.msk [vmem:[#allocation2 + $0x228] sm:$0x1] %vm94_vm3, %v7258_v1  ;;  %119 = vst.msk [vmem:[#allocation2 + $0x240] sm:$0x1] %vm94_vm3, %v7258_v1  ;;  %v536_v52 = vsel %vm533_vm4, %v534_v46, %v535_v42  ;;  %v538_v53 = vsel %vm533_vm4, %v535_v42, %v537_v47  ;;  %vm4808_vm6 = vcmask 60416   ;;  %vm4873_vm7 = vcmask 64512  }
  0x13   :  { %120 = vst.msk [vmem:[#allocation2 + $0x258] sm:$0x1] %vm94_vm3, %v7258_v1  ;;  %121 = vst.msk [vmem:[#allocation2 + $0x270] sm:$0x1] %vm94_vm3, %v7258_v1  ;;  %v758_v59 = vpack.c.bf16 %v538_v53, %v536_v52  ;;  %vm5007_vm8 = vcmask 57344  }
  0x14   :  { %122 = vst.msk [vmem:[#allocation2 + $0x288] sm:$0x1] %vm94_vm3, %v7258_v1  ;;  %123 = vst.msk [vmem:[#allocation2 + $0x2a0] sm:$0x1] %vm94_vm3, %v7258_v1 }
  0x15   :  { %124 = vst.msk [vmem:[#allocation2 + $0x2b8] sm:$0x1] %vm94_vm3, %v7258_v1  ;;  %125 = vst.msk [vmem:[#allocation2 + $0x2d0] sm:$0x1] %vm94_vm3, %v7258_v1  ;;  %6097 = vmatprep.mubr.msk.bf16.mxu1 %vm79_vm1, %v758_v59 }
  0x16   :  { %126 = vst.msk [vmem:[#allocation2 + $0x2e8] sm:$0x1] %vm94_vm3, %v7258_v1  ;;  %127 = vst.msk [vmem:[#allocation2 + $0x300] sm:$0x1] %vm94_vm3, %v7258_v1 }
  0x17   :  { %128 = vst.msk [vmem:[#allocation2 + $0x318] sm:$0x1] %vm94_vm3, %v7258_v1  ;;  %129 = vst.msk [vmem:[#allocation2 + $0x330] sm:$0x1] %vm94_vm3, %v7258_v1 }
  0x18   :  { %132 = vst.msk [vmem:[#allocation2 + $0x29] sm:$0x1] %vm94_vm3, %v7258_v1  ;;  %133 = vst.msk [vmem:[#allocation2 + $0x41] sm:$0x1] %vm94_vm3, %v7258_v1 }
  0x19   :  { %134 = vst.msk [vmem:[#allocation2 + $0x59] sm:$0x1] %vm94_vm3, %v7258_v1  ;;  %135 = vst.msk [vmem:[#allocation2 + $0x71] sm:$0x1] %vm94_vm3, %v7258_v1 }
  0x1a   :  { %136 = vst.msk [vmem:[#allocation2 + $0x89] sm:$0x1] %vm94_vm3, %v7258_v1  ;;  %137 = vst.msk [vmem:[#allocation2 + $0xa1] sm:$0x1] %vm94_vm3, %v7258_v1 }
  0x1b   :  { %138 = vst.msk [vmem:[#allocation2 + $0xb9] sm:$0x1] %vm94_vm3, %v7258_v1  ;;  %139 = vst.msk [vmem:[#allocation2 + $0xd1] sm:$0x1] %vm94_vm3, %v7258_v1 }
  0x1c   :  { %140 = vst.msk [vmem:[#allocation2 + $0xe9] sm:$0x1] %vm94_vm3, %v7258_v1  ;;  %141 = vst.msk [vmem:[#allocation2 + $0x101] sm:$0x1] %vm94_vm3, %v7258_v1 }
  0x1d   :  { %142 = vst.msk [vmem:[#allocation2 + $0x119] sm:$0x1] %vm94_vm3, %v7258_v1  ;;  %143 = vst.msk [vmem:[#allocation2 + $0x131] sm:$0x1] %vm94_vm3, %v7258_v1 }
  0x1e   :  { %144 = vst.msk [vmem:[#allocation2 + $0x149] sm:$0x1] %vm94_vm3, %v7258_v1  ;;  %145 = vst.msk [vmem:[#allocation2 + $0x161] sm:$0x1] %vm94_vm3, %v7258_v1 }
  0x1f   :  { %146 = vst.msk [vmem:[#allocation2 + $0x179] sm:$0x1] %vm94_vm3, %v7258_v1  ;;  %147 = vst.msk [vmem:[#allocation2 + $0x191] sm:$0x1] %vm94_vm3, %v7258_v1 }
  0x20   :  { %150 = vst.msk [vmem:[#allocation2 + $0x1d9] sm:$0x1] %vm94_vm3, %v7258_v1  ;;  %151 = vst.msk [vmem:[#allocation2 + $0x1f1] sm:$0x1] %vm94_vm3, %v7258_v1 }
  0x21   :  { %152 = vst.msk [vmem:[#allocation2 + $0x209] sm:$0x1] %vm94_vm3, %v7258_v1  ;;  %153 = vst.msk [vmem:[#allocation2 + $0x221] sm:$0x1] %vm94_vm3, %v7258_v1 }
  0x22   :  { %154 = vst.msk [vmem:[#allocation2 + $0x239] sm:$0x1] %vm94_vm3, %v7258_v1  ;;  %155 = vst.msk [vmem:[#allocation2 + $0x251] sm:$0x1] %vm94_vm3, %v7258_v1 }
  0x23   :  { %156 = vst.msk [vmem:[#allocation2 + $0x269] sm:$0x1] %vm94_vm3, %v7258_v1  ;;  %157 = vst.msk [vmem:[#allocation2 + $0x281] sm:$0x1] %vm94_vm3, %v7258_v1 }
  0x24   :  { %158 = vst.msk [vmem:[#allocation2 + $0x299] sm:$0x1] %vm94_vm3, %v7258_v1  ;;  %159 = vst.msk [vmem:[#allocation2 + $0x2b1] sm:$0x1] %vm94_vm3, %v7258_v1 }
  0x25   :  { %160 = vst.msk [vmem:[#allocation2 + $0x2c9] sm:$0x1] %vm94_vm3, %v7258_v1  ;;  %161 = vst.msk [vmem:[#allocation2 + $0x2e1] sm:$0x1] %vm94_vm3, %v7258_v1 }
  0x26   :  { %162 = vst.msk [vmem:[#allocation2 + $0x2f9] sm:$0x1] %vm94_vm3, %v7258_v1  ;;  %163 = vst.msk [vmem:[#allocation2 + $0x311] sm:$0x1] %vm94_vm3, %v7258_v1 }
  0x27   :  { %164 = vst.msk [vmem:[#allocation2 + $0x329] sm:$0x1] %vm94_vm3, %v7258_v1  ;;  %165 = vst.msk [vmem:[#allocation2 + $0x341] sm:$0x1] %vm94_vm3, %v7258_v1 }
  0x28   :  { %112 = vst.msk [vmem:[#allocation2 + $0x198] sm:$0x1] %vm94_vm3, %v7258_v1  ;;  %113 = vst.msk [vmem:[#allocation2 + $0x1b0] sm:$0x1] %vm94_vm3, %v7258_v1 }
  0x29   :  { %130 = vst.msk [vmem:[#allocation2 + $0x348] sm:$0x1] %vm94_vm3, %v7258_v1  ;;  %148 = vst.msk [vmem:[#allocation2 + $0x1a9] sm:$0x1] %vm94_vm3, %v7258_v1 }
  0x2a   :  { %149 = vst.msk [vmem:[#allocation2 + $0x1c1] sm:$0x1] %vm94_vm3, %v7258_v1  ;;  %166 = vst.msk [vmem:[#allocation2 + $0x359] sm:$0x1] %vm94_vm3, %v7258_v1 }
  0x2b   :  { %9668 = vst [vmem:[#allocation3_spill] sm:$0xff] %v7475_v6  ;;  %232 = vst.msk [vmem:[#allocation2 + $0x19] sm:$0xff] %vm79_vm1, %v5641_v7  ;;  %v5787_v6 = vld [vmem:[%s9557_s0 + $0xa8] sm:$0xff]  }
  0x2c   :  { %233 = vst.msk [vmem:[#allocation2 + $0x21] sm:$0xff] %vm79_vm1, %v5642_v8  ;;  %234 = vst.msk [vmem:[#allocation2 + $0x31] sm:$0xff] %vm79_vm1, %v5645_v12 }
  0x2d   :  { %235 = vst.msk [vmem:[#allocation2 + $0x39] sm:$0xff] %vm79_vm1, %v5646_v13  ;;  %236 = vst.msk [vmem:[#allocation2 + $0x49] sm:$0xff] %vm79_vm1, %v5649_v14 }
  0x2e   :  { %237 = vst.msk [vmem:[#allocation2 + $0x51] sm:$0xff] %vm79_vm1, %v5650_v18  ;;  %238 = vst.msk [vmem:[#allocation2 + $0x61] sm:$0xff] %vm79_vm1, %v5653_v19 }
  0x2f   :  { %239 = vst.msk [vmem:[#allocation2 + $0x69] sm:$0xff] %vm79_vm1, %v5654_v20  ;;  %240 = vst.msk [vmem:[#allocation2 + $0x79] sm:$0xff] %vm79_vm1, %v5657_v25 }
  0x30   :  { %241 = vst.msk [vmem:[#allocation2 + $0x81] sm:$0xff] %vm79_vm1, %v5658_v26  ;;  %242 = vst.msk [vmem:[#allocation2 + $0x91] sm:$0xff] %vm79_vm1, %v5661_v27 }
  0x31   :  { %243 = vst.msk [vmem:[#allocation2 + $0x99] sm:$0xff] %vm79_vm1, %v5662_v30  ;;  %244 = vst.msk [vmem:[#allocation2 + $0xa9] sm:$0xff] %vm79_vm1, %v5665_v31 }
  0x32   :  { %245 = vst.msk [vmem:[#allocation2 + $0xb1] sm:$0xff] %vm79_vm1, %v5666_v32  ;;  %246 = vst.msk [vmem:[#allocation2 + $0xc1] sm:$0xff] %vm79_vm1, %v5669_v33  ;;  %v7549_v54 = vld [vmem:[#allocation2 + $0x18] sm:$0xff] }
  0x33   :  { %247 = vst.msk [vmem:[#allocation2 + $0xc9] sm:$0xff] %vm79_vm1, %v5670_v35  ;;  %248 = vst.msk [vmem:[#allocation2 + $0xd9] sm:$0xff] %vm79_vm1, %v5673_v36  ;;  %v7551_v55 = vld [vmem:[#allocation2 + $0x20] sm:$0xff]  ;;  %v7553_v56 = vld [vmem:[#allocation2 + $0x28] sm:$0x3]  ;;  %v539_v60 = vrot.slane %v7549_v54, 1 }
  0x34   :  { %249 = vst.msk [vmem:[#allocation2 + $0xe1] sm:$0xff] %vm79_vm1, %v5674_v37  ;;  %250 = vst.msk [vmem:[#allocation2 + $0xf1] sm:$0xff] %vm79_vm1, %v5677_v43  ;;  %v540_v61 = vrot.slane %v7551_v55, 1  ;;  %v542_v62 = vrot.slane %v7553_v56, 1  ;;  %v7558_v63 = vld [vmem:[#allocation2 + $0x30] sm:$0xff]  ;;  %v7560_v0 = vld [vmem:[#allocation2 + $0x38] sm:$0xff] }
  0x35   :  { %251 = vst.msk [vmem:[#allocation2 + $0xf9] sm:$0xff] %vm79_vm1, %v5678_v44  ;;  %v7562_v1 = vld [vmem:[#allocation2 + $0x48] sm:$0xff]  ;;  %252 = vst.msk [vmem:[#allocation2 + $0x109] sm:$0xff] %vm79_vm1, %v5681_v48  ;;  %v7570_v3 = vld [vmem:[#allocation2 + $0x40] sm:$0x3]  ;;  %v544_v5 = vrot.slane %v7558_v63, 1 }
  0x36   :  { %253 = vst.msk [vmem:[#allocation2 + $0x111] sm:$0xff] %vm79_vm1, %v5682_v49  ;;  %254 = vst.msk [vmem:[#allocation2 + $0x121] sm:$0xff] %vm79_vm1, %v5685_v50  ;;  %v545_v7 = vrot.slane %v7560_v0, 1  ;;  %v541_v8 = vsel %vm533_vm4, %v539_v60, %v540_v61  ;;  %v543_v9 = vsel %vm533_vm4, %v540_v61, %v542_v62  ;;  %v547_v10 = vrot.slane %v7570_v3, 1  ;;  %v7583_v12 = vld [vmem:[#allocation2 + $0x50] sm:$0xff]  ;;  %v7587_v14 = vld [vmem:[#allocation2 + $0x60] sm:$0xff] }
  0x37   :  { %255 = vst.msk [vmem:[#allocation2 + $0x129] sm:$0xff] %vm79_vm1, %v5686_v51  ;;  %256 = vst.msk [vmem:[#allocation2 + $0x139] sm:$0xff] %vm79_vm1, %v5689_v57  ;;  %v7585_v13 = vld [vmem:[#allocation2 + $0x58] sm:$0x3]  ;;  %v759_v15 = vpack.c.bf16 %v543_v9, %v541_v8  ;;  %v549_v17 = vrot.slane %v7562_v1, 1  ;;  %v550_v18 = vrot.slane %v7583_v12, 1 }
  0x38   :  { %257 = vst.msk [vmem:[#allocation2 + $0x141] sm:$0xff] %vm79_vm1, %v5690_v58  ;;  %v546_v16 = vsel %vm533_vm4, %v544_v5, %v545_v7  ;;  %v7592_v19 = vld [vmem:[#allocation2 + $0x68] sm:$0xff]  ;;  %v7594_v20 = vld [vmem:[#allocation2 + $0x70] sm:$0x3]  ;;  %v7596_v11 = vld [vmem:[#allocation2 + $0x78] sm:$0xff]  ;;  %v548_v21 = vsel %vm533_vm4, %v545_v7, %v547_v10  ;;  %v552_v22 = vrot.slane %v7585_v13, 1 }
  0x39   :  { %v554_v23 = vrot.slane %v7587_v14, 1  ;;  %v555_v24 = vrot.slane %v7592_v19, 1  ;;  %v7602_v25 = vld [vmem:[#allocation2 + $0x80] sm:$0xff]  ;;  %v7604_v26 = vld [vmem:[#allocation2 + $0x88] sm:$0x3]  ;;  %6098 = vmatmul.mubr.msk.bf16.vlgmr.msra.gmra.mrb[0].mxu1 %vm79_vm1, %v759_v15  ;;  %6361 = vmatprep.mubr.msk.bf16.mxu0 %vm79_vm1, %v759_v15  ;;  %v7608_v27 = vpack.c.bf16 %v548_v21, %v546_v16  ;;  %v551_v28 = vsel %vm533_vm4, %v549_v17, %v550_v18  ;;  %v7633_v40 = vld [vmem:[#allocation2 + $0x90] sm:$0xff] }
  0x3a   :  { %v557_v29 = vrot.slane %v7594_v20, 1  ;;  %v559_v30 = vrot.slane %v7596_v11, 1  ;;  %6162 = vmatpush3.bf16.msra.mxu1 %v1281_v2  ;;  %v553_v31 = vsel %vm533_vm4, %v550_v18, %v552_v22  ;;  %v560_v32 = vrot.slane %v7602_v25, 1  ;;  %v7635_v41 = vld [vmem:[#allocation2 + $0x98] sm:$0xff]  ;;  %v7637_v42 = vld [vmem:[#allocation2 + $0xa0] sm:$0x3] }
  0x3b   :  { %9669 = vst [vmem:[#allocation4_spill] sm:$0xff] %v7608_v27  ;;  %v562_v33 = vrot.slane %v7604_v26, 1  ;;  %6362 = vmatmul.mubr.msk.bf16.vlgmr.msra.gmra.mrb[0].mxu0 %vm79_vm1, %v7608_v27  ;;  %6101 = vmatprep.mubr.msk.bf16.mxu1 %vm79_vm1, %v7608_v27  ;;  %v7625_v35 = vpack.c.bf16 %v553_v31, %v551_v28  ;;  %v556_v36 = vsel %vm533_vm4, %v554_v23, %v555_v24  ;;  %v7641_v43 = vld [vmem:[#allocation2 + $0xa8] sm:$0xff]  ;;  %v7643_v44 = vld [vmem:[#allocation2 + $0xb0] sm:$0xff]  ;;  %v7645_v45 = vld [vmem:[#allocation2 + $0xb8] sm:$0x3]  ;;  %v5726_v27 = vunpack.c.h.bf16 %v5787_v6 }
  0x3c   :  { %6426 = vmatpush3.bf16.msra.mxu0 %v3064_v4  ;;  %v558_v37 = vsel %vm533_vm4, %v555_v24, %v557_v29  ;;  %v561_v38 = vsel %vm533_vm4, %v559_v30, %v560_v32  ;;  %v564_v48 = vrot.slane %v7633_v40, 1  ;;  %v565_v49 = vrot.slane %v7635_v41, 1  ;;  %v5779_v57 = vld [vmem:[%s9557_s0 + $0x68] sm:$0xff]   ;;  %v7666_v58 = vld [vmem:[#allocation2 + $0xc0] sm:$0xff]  ;;  %v5780_v60 = vld [vmem:[%s9557_s0 + $0x70] sm:$0xff]  }
  0x3d   :  { %9670 = vst [vmem:[#allocation5_spill] sm:$0xff] %v7625_v35  ;;  %6365 = vmatprep.mubr.msk.bf16.mxu0 %vm79_vm1, %v7625_v35  ;;  %v563_v39 = vsel %vm533_vm4, %v560_v32, %v562_v33  ;;  %7210 = vmatprep.subr.msk.bf16.mxu0 %vm891_vm0, %v7619_v34  ;;  %v7647_v46 = vpack.c.bf16 %v558_v37, %v556_v36  ;;  %v567_v50 = vrot.slane %v7637_v42, 1  ;;  %v569_v51 = vrot.slane %v7641_v43, 1  ;;  %v7668_v59 = vld [vmem:[#allocation2 + $0xc8] sm:$0xff]  ;;  %v7677_v2 = vld [vmem:[#allocation2 + $0xd0] sm:$0x3] }
  0x3e   :  { %v7649_v47 = vpack.c.bf16 %v563_v39, %v561_v38  ;;  %v570_v52 = vrot.slane %v7643_v44, 1  ;;  %v572_v53 = vrot.slane %v7645_v45, 1  ;;  %v566_v61 = vsel %vm533_vm4, %v564_v48, %v565_v49  ;;  %v7679_v5 = vld [vmem:[#allocation2 + $0xd8] sm:$0xff]  ;;  %v7686_v10 = vld [vmem:[#allocation2 + $0xe0] sm:$0xff]  ;;  %v7688_v4 = vld [vmem:[#allocation2 + $0xe8] sm:$0x3] }
  0x3f   :  { %9671 = vst [vmem:[#allocation6_spill] sm:$0xff] %v7647_v46  ;;  %v568_v62 = vsel %vm533_vm4, %v565_v49, %v567_v50  ;;  %v5781_v7 = vld [vmem:[%s9557_s0 + $0x78] sm:$0xff]   ;;  %v1829_v15 = vld [vmem:[%s9556_s1 + $0x4] sm:$0x3]  ;;  %v574_v16 = vrot.slane %v7666_v58, 1  ;;  %v575_v17 = vrot.slane %v7668_v59, 1  ;;  %v5693_v22 = vunpack.c.l.bf16 %v5779_v57 }
  0x40   :  { %9672 = vst [vmem:[#allocation7_spill] sm:$0xff] %v7649_v47  ;;  %v571_v8 = vsel %vm533_vm4, %v569_v51, %v570_v52  ;;  %v573_v9 = vsel %vm533_vm4, %v570_v52, %v572_v53  ;;  %7205 = vmatprep.subr.msk.bf16.mxu1 %vm891_vm0, %v1829_v15  ;;  %v7696_v18 = vpack.c.bf16 %v568_v62, %v566_v61  ;;  %v577_v21 = vrot.slane %v7677_v2, 1  ;;  %v5782_v24 = vld [vmem:[%s9557_s0 + $0x80] sm:$0xff]   ;;  %v7716_v39 = vld [vmem:[#allocation2 + $0xf0] sm:$0xff]  ;;  %v5783_v49 = vld [vmem:[%s9557_s0 + $0x88] sm:$0xff]  }
  0x41   :  { %6102 = vmatmul.mubr.msk.bf16.gmra.mrb[4].mxu1 %vm79_vm1, %v7625_v35  ;;  %v5694_v23 = vunpack.c.h.bf16 %v5779_v57  ;;  %v7702_v28 = vpack.c.bf16 %v573_v9, %v571_v8  ;;  %v579_v29 = vrot.slane %v7679_v5, 1  ;;  %v580_v30 = vrot.slane %v7686_v10, 1  ;;  %258 = vst.msk [vmem:[#allocation2 + $0x151] sm:$0xff] %vm79_vm1, %v5693_v22  ;;  %v7728_v52 = vld [vmem:[#allocation2 + $0xf8] sm:$0xff]  ;;  %v5784_v53 = vld [vmem:[%s9557_s0 + $0x90] sm:$0xff]   ;;  %v7743_v8 = vld [vmem:[#allocation2 + $0x108] sm:$0xff] }
  0x42   :  { %6105 = vmatprep.mubr.msk.bf16.mxu1 %vm79_vm1, %v7647_v46  ;;  %9673 = vst [vmem:[#allocation8_spill] sm:$0xff] %v7696_v18  ;;  %v5697_v31 = vunpack.c.l.bf16 %v5780_v60  ;;  %v582_v32 = vrot.slane %v7688_v4, 1  ;;  %v5698_v33 = vunpack.c.h.bf16 %v5780_v60  ;;  %v5701_v36 = vunpack.c.l.bf16 %v5781_v7  ;;  %v7736_v61 = vld [vmem:[#allocation2 + $0x100] sm:$0x3]  ;;  %v5785_v62 = vld [vmem:[%s9557_s0 + $0x98] sm:$0xff]   ;;  %v7745_v9 = vld [vmem:[#allocation2 + $0x110] sm:$0xff] }
  0x43   :  { %6366 = vmatmul.mubr.msk.bf16.gmra.mrb[4].mxu0 %vm79_vm1, %v7647_v46  ;;  %9674 = vst [vmem:[#allocation9_spill] sm:$0xff] %v7702_v28  ;;  %259 = vst.msk [vmem:[#allocation2 + $0x159] sm:$0xff] %vm79_vm1, %v5694_v23  ;;  %v5702_v37 = vunpack.c.h.bf16 %v5781_v7  ;;  %v5705_v38 = vunpack.c.l.bf16 %v5782_v24  ;;  %v5706_v48 = vunpack.c.h.bf16 %v5782_v24  ;;  %v576_v50 = vsel %vm533_vm4, %v574_v16, %v575_v17  ;;  %v7747_v15 = vld [vmem:[#allocation2 + $0x118] sm:$0x3]  ;;  %v350_v46 = vld [vmem:[#allocation2 + $0x1b0] sm:$0xff] }
  0x44   :  { %6369 = vmatprep.mubr.msk.bf16.mxu0 %vm79_vm1, %v7649_v47  ;;  %260 = vst.msk [vmem:[#allocation2 + $0x169] sm:$0xff] %vm79_vm1, %v5697_v31  ;;  %261 = vst.msk [vmem:[#allocation2 + $0x171] sm:$0xff] %vm79_vm1, %v5698_v33  ;;  %v578_v51 = vsel %vm533_vm4, %v575_v17, %v577_v21  ;;  %v581_v57 = vsel %vm533_vm4, %v579_v29, %v580_v30  ;;  %v583_v60 = vsel %vm533_vm4, %v580_v30, %v582_v32  ;;  %v351_v35 = vld [vmem:[#allocation2 + $0x1b8] sm:$0xff] }
  0x45   :  { %262 = vst.msk [vmem:[#allocation2 + $0x181] sm:$0xff] %vm79_vm1, %v5701_v36  ;;  %263 = vst.msk [vmem:[#allocation2 + $0x189] sm:$0xff] %vm79_vm1, %v5702_v37  ;;  %v584_v7 = vrot.slane %v7716_v39, 1  ;;  %v5709_v16 = vunpack.c.l.bf16 %v5783_v49  ;;  %v5710_v17 = vunpack.c.h.bf16 %v5783_v49  ;;  %v7749_v21 = vpack.c.bf16 %v578_v51, %v576_v50  ;;  %v7774_v49 = vld [vmem:[#allocation2 + $0x120] sm:$0xff]  ;;  %v7776_v50 = vld [vmem:[#allocation2 + $0x128] sm:$0xff] }
  0x46   :  { %264 = vst.msk [vmem:[#allocation2 + $0x1c9] sm:$0xff] %vm79_vm1, %v5705_v38  ;;  %265 = vst.msk [vmem:[#allocation2 + $0x1d1] sm:$0xff] %vm79_vm1, %v5706_v48  ;;  %v585_v22 = vrot.slane %v7728_v52, 1  ;;  %v5713_v23 = vunpack.c.l.bf16 %v5784_v53  ;;  %v5714_v24 = vunpack.c.h.bf16 %v5784_v53  ;;  %v7752_v29 = vpack.c.bf16 %v583_v60, %v581_v57  ;;  %v7778_v51 = vld [vmem:[#allocation2 + $0x130] sm:$0x3]  ;;  %v7782_v60 = vld [vmem:[#allocation2 + $0x138] sm:$0xff] }
  0x47   :  { %9675 = vst [vmem:[#allocation10_spill] sm:$0xff] %v7749_v21  ;;  %v587_v30 = vrot.slane %v7736_v61, 1  ;;  %266 = vst.msk [vmem:[#allocation2 + $0x1e1] sm:$0xff] %vm79_vm1, %v5709_v16  ;;  %v5717_v31 = vunpack.c.l.bf16 %v5785_v62  ;;  %v5718_v32 = vunpack.c.h.bf16 %v5785_v62  ;;  %v589_v33 = vrot.slane %v7743_v8, 1  ;;  %v7784_v62 = vld [vmem:[#allocation2 + $0x140] sm:$0xff] }
  0x48   :  { %9676 = vst [vmem:[#allocation11_spill] sm:$0xff] %v7752_v29  ;;  %267 = vst.msk [vmem:[#allocation2 + $0x1e9] sm:$0xff] %vm79_vm1, %v5710_v17  ;;  %v590_v36 = vrot.slane %v7745_v9, 1  ;;  %v592_v37 = vrot.slane %v7747_v15, 1  ;;  %v586_v38 = vsel %vm533_vm4, %v584_v7, %v585_v22  ;;  %v7786_v16 = vld [vmem:[#allocation2 + $0x148] sm:$0x3] }
  0x49   :  { %6106 = vmatmul.mubr.msk.bf16.gmra.mrb[8].mxu1 %vm79_vm1, %v7649_v47  ;;  %268 = vst.msk [vmem:[#allocation2 + $0x1f9] sm:$0xff] %vm79_vm1, %v5713_v23  ;;  %269 = vst.msk [vmem:[#allocation2 + $0x201] sm:$0xff] %vm79_vm1, %v5714_v24  ;;  %v588_v48 = vsel %vm533_vm4, %v585_v22, %v587_v30  ;;  %v594_v7 = vrot.slane %v7774_v49, 1  ;;  %v595_v22 = vrot.slane %v7776_v50, 1  ;;  %v597_v23 = vrot.slane %v7778_v51, 1 }
  0x4a   :  { %6109 = vmatprep.mubr.msk.bf16.mxu1 %vm79_vm1, %v7696_v18  ;;  %270 = vst.msk [vmem:[#allocation2 + $0x211] sm:$0xff] %vm79_vm1, %v5717_v31  ;;  %271 = vst.msk [vmem:[#allocation2 + $0x219] sm:$0xff] %vm79_vm1, %v5718_v32  ;;  %v591_v53 = vsel %vm533_vm4, %v589_v33, %v590_v36  ;;  %v593_v57 = vsel %vm533_vm4, %v590_v36, %v592_v37  ;;  %v7788_v17 = vpack.c.bf16 %v588_v48, %v586_v38  ;;  %v5786_v33 = vld [vmem:[%s9557_s0 + $0xa0] sm:$0xff]  }
  0x4b   :  { %6370 = vmatmul.mubr.msk.bf16.gmra.mrb[8].mxu0 %vm79_vm1, %v7696_v18  ;;  %9677 = vst [vmem:[#allocation12_spill] sm:$0xff] %v7786_v16  ;;  %v7793_v24 = vpack.c.bf16 %v593_v57, %v591_v53  ;;  %v599_v30 = vrot.slane %v7782_v60, 1  ;;  %v600_v31 = vrot.slane %v7784_v62, 1  ;;  %v602_v32 = vrot.slane %v7786_v16, 1  ;;  %v7813_v53 = vld [vmem:[#allocation2 + $0x150] sm:$0xff]  ;;  %275 = vst.msk [vmem:[#allocation2 + $0x249] sm:$0xff] %vm79_vm1, %v5726_v27 }
  0x4c   :  { %6373 = vmatprep.mubr.msk.bf16.mxu0 %vm79_vm1, %v7702_v28  ;;  %9678 = vst [vmem:[#allocation13_spill] sm:$0xff] %v7788_v17  ;;  %v596_v36 = vsel %vm533_vm4, %v594_v7, %v595_v22  ;;  %v598_v37 = vsel %vm533_vm4, %v595_v22, %v597_v23  ;;  %v5721_v57 = vunpack.c.l.bf16 %v5786_v33  ;;  %v5722_v7 = vunpack.c.h.bf16 %v5786_v33  ;;  %v5788_v22 = vld [vmem:[%s9557_s0 + $0xb0] sm:$0xff]   ;;  %v7825_v23 = vld [vmem:[#allocation2 + $0x168] sm:$0xff] }
  0x4d   :  { %9679 = vst [vmem:[#allocation14_spill] sm:$0xff] %v7793_v24  ;;  %v601_v38 = vsel %vm533_vm4, %v599_v30, %v600_v31  ;;  %v603_v48 = vsel %vm533_vm4, %v600_v31, %v602_v32  ;;  %9682 = vst [vmem:[#allocation17_spill] sm:$0xff] %v7825_v23  ;;  %v7827_v30 = vld [vmem:[#allocation2 + $0x170] sm:$0xff]  ;;  %v7829_v31 = vld [vmem:[#allocation2 + $0x178] sm:$0x3]  ;;  %v7832_v32 = vpack.c.bf16 %v598_v37, %v596_v36  ;;  %v5725_v33 = vunpack.c.l.bf16 %v5787_v6 }
  0x4e   :  { %9683 = vst [vmem:[#allocation18_spill] sm:$0xff] %v7827_v30  ;;  %9684 = vst [vmem:[#allocation19_spill] sm:$0xff] %v7829_v31  ;;  %v5729_v16 = vunpack.c.l.bf16 %v5788_v22  ;;  %v5789_v36 = vld [vmem:[%s9557_s0 + $0xb8] sm:$0xff]   ;;  %v609_v37 = vrot.slane %v7825_v23, 1  ;;  %v5790_v6 = vld [vmem:[%s9557_s0 + $0xc0] sm:$0xff]  }
  0x4f   :  { %272 = vst.msk [vmem:[#allocation2 + $0x229] sm:$0xff] %vm79_vm1, %v5721_v57  ;;  %9685 = vst [vmem:[#allocation20_spill] sm:$0xff] %v7832_v32  ;;  %v5730_v57 = vunpack.c.h.bf16 %v5788_v22  ;;  %v5733_v22 = vunpack.c.l.bf16 %v5789_v36  ;;  %v7863_v23 = vld [vmem:[#allocation2 + $0x180] sm:$0xff]  ;;  %v7865_v27 = vld [vmem:[#allocation2 + $0x188] sm:$0xff] }
  0x50   :  { %273 = vst.msk [vmem:[#allocation2 + $0x231] sm:$0xff] %vm79_vm1, %v5722_v7  ;;  %274 = vst.msk [vmem:[#allocation2 + $0x241] sm:$0xff] %vm79_vm1, %v5725_v33  ;;  %v352_v7 = vld [vmem:[#allocation2 + $0x1c0] sm:$0x3] }
  0x51   :  { %6110 = vmatmul.mubr.msk.bf16.gmra.mrb[12].mxu1 %vm79_vm1, %v7702_v28  ;;  %v604_v28 = vrot.slane %v7813_v53, 1  ;;  %276 = vst.msk [vmem:[#allocation2 + $0x259] sm:$0xff] %vm79_vm1, %v5729_v16  ;;  %277 = vst.msk [vmem:[#allocation2 + $0x261] sm:$0xff] %vm79_vm1, %v5730_v57  ;;  %v7867_v16 = vld [vmem:[#allocation2 + $0x190] sm:$0x3]  ;;  %v617_v57 = vrot.slane %v352_v7, 1 }
  0x52   :  { %6113 = vmatprep.mubr.msk.bf16.mxu1 %vm79_vm1, %v7749_v21  ;;  %9687 = vst [vmem:[#allocation22_spill] sm:$0xff] %v7867_v16  ;;  %278 = vst.msk [vmem:[#allocation2 + $0x271] sm:$0xff] %vm79_vm1, %v5733_v22  ;;  %v7896_v22 = vld [vmem:[#allocation2 + $0x1d0] sm:$0xff] }
  0x53   :  { %6374 = vmatmul.mubr.msk.bf16.gmra.mrb[12].mxu0 %vm79_vm1, %v7749_v21  ;;  %v7834_v21 = vpack.c.bf16 %v603_v48, %v601_v38  ;;  %v610_v38 = vrot.slane %v7827_v30, 1  ;;  %v612_v48 = vrot.slane %v7829_v31, 1  ;;  %v615_v31 = vrot.slane %v351_v35, 1  ;;  %9691 = vst [vmem:[#allocation26_spill] sm:$0xff] %v7896_v22 }
  0x54   :  { %6377 = vmatprep.mubr.msk.bf16.mxu0 %vm79_vm1, %v7752_v29 }
  0x55   :  { %9686 = vst [vmem:[#allocation21_spill] sm:$0xff] %v7834_v21  ;;  %v611_v35 = vsel %vm533_vm4, %v609_v37, %v610_v38  ;;  %v2660_v37 = vrot.slane %v7867_v16, 1 }
  0x59   :  { %6114 = vmatmul.mubr.msk.bf16.gmra.mrb[16].mxu1 %vm79_vm1, %v7752_v29  ;;  %v7818_v29 = vld [vmem:[#allocation2 + $0x158] sm:$0xff] }
  0x5a   :  { %6117 = vmatprep.mubr.msk.bf16.mxu1 %vm79_vm1, %v7788_v17  ;;  %9680 = vst [vmem:[#allocation15_spill] sm:$0xff] %v7818_v29  ;;  %v605_v18 = vrot.slane %v7818_v29, 1  ;;  %v5738_v29 = vunpack.c.h.bf16 %v5790_v6 }
  0x5b   :  { %6378 = vmatmul.mubr.msk.bf16.gmra.mrb[16].mxu0 %vm79_vm1, %v7788_v17  ;;  %v7820_v17 = vld [vmem:[#allocation2 + $0x160] sm:$0x3] }
  0x5c   :  { %6381 = vmatprep.mubr.msk.bf16.mxu0 %vm79_vm1, %v7793_v24  ;;  %9681 = vst [vmem:[#allocation16_spill] sm:$0xff] %v7820_v17  ;;  %v607_v47 = vrot.slane %v7820_v17, 1  ;;  %v606_v33 = vsel %vm533_vm4, %v604_v28, %v605_v18  ;;  %v5734_v17 = vunpack.c.h.bf16 %v5789_v36  ;;  %v2657_v28 = vrot.slane %v7863_v23, 1  ;;  %281 = vst.msk [vmem:[#allocation2 + $0x291] sm:$0xff] %vm79_vm1, %v5738_v29  ;;  %v7894_v29 = vld [vmem:[#allocation2 + $0x1c8] sm:$0xff] }
  0x5d   :  { %v2658_v36 = vrot.slane %v7865_v27, 1  ;;  %9690 = vst [vmem:[#allocation25_spill] sm:$0xff] %v7894_v29 }
  0x5e   :  { %v608_v30 = vsel %vm533_vm4, %v605_v18, %v607_v47  ;;  %v5791_v47 = vld [vmem:[%s9557_s0 + $0xc8] sm:$0xff]   ;;  %279 = vst.msk [vmem:[#allocation2 + $0x279] sm:$0xff] %vm79_vm1, %v5734_v17 }
  0x5f   :  { %v7877_v18 = vpack.c.bf16 %v608_v30, %v606_v33  ;;  %v5741_v7 = vunpack.c.l.bf16 %v5791_v47  ;;  %v618_v30 = vsel %vm533_vm4, %v615_v31, %v617_v57  ;;  %v5792_v33 = vld [vmem:[%s9557_s0 + $0xd0] sm:$0xff]   ;;  %v7916_v57 = vld [vmem:[#allocation2 + $0x1e8] sm:$0xff] }
  0x60   :  { %v5745_v16 = vunpack.c.l.bf16 %v5792_v33 }
  0x61   :  { %6118 = vmatmul.mubr.msk.bf16.gmra.mrb[20].mxu1 %vm79_vm1, %v7793_v24  ;;  %v614_v24 = vrot.slane %v350_v46, 1  ;;  %v613_v46 = vsel %vm533_vm4, %v610_v38, %v612_v48  ;;  %9688 = vst [vmem:[#allocation23_spill] sm:$0xff] %v7877_v18  ;;  %v1578_v48 = vrot.slane %v7549_v54, 2  ;;  %v7898_v54 = vld [vmem:[#allocation2 + $0x1d8] sm:$0x3]  ;;  %282 = vst.msk [vmem:[#allocation2 + $0x2a1] sm:$0xff] %vm79_vm1, %v5741_v7 }
  0x62   :  { %6121 = vmatprep.mubr.msk.bf16.mxu1 %vm79_vm1, %v7832_v32  ;;  %v7883_v38 = vpack.c.bf16 %v613_v46, %v611_v35  ;;  %9692 = vst [vmem:[#allocation27_spill] sm:$0xff] %v7898_v54  ;;  %v1586_v35 = vrot.slane %v7570_v3, 2  ;;  %v7918_v7 = vld [vmem:[#allocation2 + $0x1f0] sm:$0x3]  ;;  %284 = vst.msk [vmem:[#allocation2 + $0x2b9] sm:$0xff] %vm79_vm1, %v5745_v16  ;;  %v1593_v16 = vrot.slane %v7587_v14, 2 }
  0x63   :  { %6382 = vmatmul.mubr.msk.bf16.gmra.mrb[20].mxu0 %vm79_vm1, %v7832_v32  ;;  %v5737_v32 = vunpack.c.l.bf16 %v5790_v6  ;;  %v1579_v6 = vrot.slane %v7551_v55, 2  ;;  %v616_v17 = vsel %vm533_vm4, %v614_v24, %v615_v31  ;;  %v1583_v55 = vrot.slane %v7558_v63, 2 }
  0x64   :  { %6385 = vmatprep.mubr.msk.bf16.mxu0 %vm79_vm1, %v7834_v21  ;;  %9689 = vst [vmem:[#allocation24_spill] sm:$0xff] %v7883_v38  ;;  %v1584_v24 = vrot.slane %v7560_v0, 2  ;;  %v2661_v31 = vsel %vm533_vm4, %v2658_v36, %v2660_v37  ;;  %v774_v46 = vpack.c.bf16 %v618_v30, %v616_v17  ;;  %v7914_v0 = vld [vmem:[#allocation2 + $0x1e0] sm:$0xff]  ;;  %v620_v37 = vrot.slane %v7896_v22, 1 }
  0x65   :  { %280 = vst.msk [vmem:[#allocation2 + $0x289] sm:$0xff] %vm79_vm1, %v5737_v32  ;;  %v1581_v32 = vrot.slane %v7553_v56, 2  ;;  %v2659_v56 = vsel %vm533_vm4, %v2657_v28, %v2658_v36  ;;  %v1580_v63 = vsel %vm1572_vm5, %v1578_v48, %v1579_v6  ;;  %v5742_v28 = vunpack.c.h.bf16 %v5791_v47 }
  0x66   :  { %v619_v36 = vrot.slane %v7894_v29, 1  ;;  %v1588_v17 = vrot.slane %v7562_v1, 2  ;;  %v1589_v48 = vrot.slane %v7583_v12, 2  ;;  %v1591_v30 = vrot.slane %v7585_v13, 2  ;;  %v5793_v1 = vld [vmem:[%s9557_s0 + $0xd8] sm:$0xff]  }
  0x67   :  { %v1582_v3 = vsel %vm1572_vm5, %v1579_v6, %v1581_v32  ;;  %283 = vst.msk [vmem:[#allocation2 + $0x2a9] sm:$0xff] %vm79_vm1, %v5742_v28  ;;  %v624_v47 = vrot.slane %v7914_v0, 1  ;;  %v625_v29 = vrot.slane %v7916_v57, 1  ;;  %v627_v22 = vrot.slane %v7918_v7, 1  ;;  %v7953_v28 = vld [vmem:[#allocation2 + $0x208] sm:$0x3] }
  0x68   :  { %v5746_v6 = vunpack.c.h.bf16 %v5792_v33  ;;  %v621_v12 = vsel %vm533_vm4, %v619_v36, %v620_v37  ;;  %v1585_v32 = vsel %vm1572_vm5, %v1583_v55, %v1584_v24  ;;  %v7949_v33 = vld [vmem:[#allocation2 + $0x1f8] sm:$0xff]  ;;  %v1592_v55 = vsel %vm1572_vm5, %v1589_v48, %v1591_v30  ;;  %v7964_v36 = vld [vmem:[#allocation2 + $0x210] sm:$0xff] }
  0x69   :  { %6122 = vmatmul.mubr.msk.bf16.gmra.mrb[24].mxu1 %vm79_vm1, %v7834_v21  ;;  %v7924_v21 = vpack.c.bf16 %v2661_v31, %v2659_v56  ;;  %v5794_v56 = vld [vmem:[%s9557_s0 + $0xe0] sm:$0xff]   ;;  %v1587_v31 = vsel %vm1572_vm5, %v1584_v24, %v1586_v35  ;;  %v628_v24 = vsel %vm533_vm4, %v625_v29, %v627_v22  ;;  %v1594_v35 = vrot.slane %v7592_v19, 2 }
  0x6a   :  { %6125 = vmatprep.mubr.msk.bf16.mxu1 %vm79_vm1, %v7877_v18  ;;  %285 = vst.msk [vmem:[#allocation2 + $0x2c1] sm:$0xff] %vm79_vm1, %v5746_v6  ;;  %v5750_v14 = vunpack.c.h.bf16 %v5793_v1  ;;  %v5753_v30 = vunpack.c.l.bf16 %v5794_v56  ;;  %v5754_v6 = vunpack.c.h.bf16 %v5794_v56  ;;  %v632_v19 = vrot.slane %v7953_v28, 1 }
  0x6b   :  { %6386 = vmatmul.mubr.msk.bf16.gmra.mrb[24].mxu0 %vm79_vm1, %v7877_v18  ;;  %v622_v18 = vrot.slane %v7898_v54, 1  ;;  %9693 = vst [vmem:[#allocation28_spill] sm:$0xff] %v7924_v21  ;;  %v7933_v54 = vpack.c.bf16 %v1582_v3, %v1580_v63  ;;  %v7951_v63 = vld [vmem:[#allocation2 + $0x200] sm:$0xff]  ;;  %v1596_v22 = vrot.slane %v7594_v20, 2  ;;  %v7990_v20 = vpack.c.bf16 %v1587_v31, %v1585_v32 }
  0x6c   :  { %6389 = vmatprep.mubr.msk.bf16.mxu0 %vm79_vm1, %v7883_v38  ;;  %v7968_v3 = vld [vmem:[#allocation2 + $0x220] sm:$0x3]  ;;  %287 = vst.msk [vmem:[#allocation2 + $0x2d9] sm:$0xff] %vm79_vm1, %v5750_v14  ;;  %288 = vst.msk [vmem:[#allocation2 + $0x2e9] sm:$0xff] %vm79_vm1, %v5753_v30  ;;  %v3429_v14 = vsel %vm891_vm0, %v7619_v34, 0  ;;  %v8015_v34 = vld [vmem:[#allocation2 + $0x228] sm:$0xff] }
  0x6d   :  { %9694 = vst [vmem:[#allocation29_spill] sm:$0xff] %v7933_v54  ;;  %v623_v13 = vsel %vm533_vm4, %v620_v37, %v622_v18  ;;  %v1590_v18 = vsel %vm1572_vm5, %v1588_v17, %v1589_v48  ;;  %v7966_v37 = vld [vmem:[#allocation2 + $0x218] sm:$0xff]  ;;  %v5749_v17 = vunpack.c.l.bf16 %v5793_v1  ;;  %v634_v1 = vrot.slane %v7964_v36, 1  ;;  %289 = vst.msk [vmem:[#allocation2 + $0x2f1] sm:$0xff] %vm79_vm1, %v5754_v6  ;;  %v8017_v6 = vld [vmem:[#allocation2 + $0x230] sm:$0xff] }
  0x6e   :  { %v7970_v48 = vpack.c.bf16 %v623_v13, %v621_v12  ;;  %v5795_v12 = vld [vmem:[%s9557_s0 + $0xe8] sm:$0xff]   ;;  %v635_v56 = vrot.slane %v7966_v37, 1  ;;  %9697 = vst [vmem:[#allocation32_spill] sm:$0xff] %v7990_v20 }
  0x6f   :  { %286 = vst.msk [vmem:[#allocation2 + $0x2d1] sm:$0xff] %vm79_vm1, %v5749_v17  ;;  %v7992_v17 = vpack.c.bf16 %v1592_v55, %v1590_v18  ;;  %v1601_v18 = vrot.slane %v7604_v26, 2  ;;  %v8019_v26 = vld [vmem:[#allocation2 + $0x238] sm:$0x3] }
  0x70   :  { %9695 = vst [vmem:[#allocation30_spill] sm:$0xff] %v7970_v48  ;;  %v636_v55 = vsel %vm533_vm4, %v634_v1, %v635_v56  ;;  %v1606_v1 = vrot.slane %v7637_v42, 2  ;;  %v639_v42 = vrot.slane %v8015_v34, 1 }
  0x71   :  { %6126 = vmatmul.mubr.msk.bf16.gmra.mrb[28].mxu1 %vm79_vm1, %v7883_v38  ;;  %9698 = vst [vmem:[#allocation33_spill] sm:$0xff] %v7992_v17  ;;  %v1598_v38 = vrot.slane %v7596_v11, 2  ;;  %v1595_v11 = vsel %vm1572_vm5, %v1593_v16, %v1594_v35  ;;  %v5758_v16 = vunpack.c.h.bf16 %v5795_v12 }
  0x72   :  { %6129 = vmatprep.mubr.msk.bf16.mxu1 %vm79_vm1, %v774_v46  ;;  %v626_v46 = vsel %vm533_vm4, %v624_v47, %v625_v29  ;;  %v629_v47 = vrot.slane %v7949_v33, 1  ;;  %v630_v29 = vrot.slane %v7951_v63, 1 }
  0x73   :  { %6390 = vmatmul.mubr.msk.bf16.gmra.mrb[28].mxu0 %vm79_vm1, %v7924_v21  ;;  %v7982_v13 = vpack.c.bf16 %v628_v24, %v626_v46  ;;  %v637_v21 = vrot.slane %v7968_v3, 1  ;;  %v1599_v46 = vrot.slane %v7602_v25, 2  ;;  %v5757_v24 = vunpack.c.l.bf16 %v5795_v12  ;;  %291 = vst.msk [vmem:[#allocation2 + $0x309] sm:$0xff] %vm79_vm1, %v5758_v16 }
  0x74   :  { %6427 = vmatprep.mubr.msk.bf16.mxu0 %vm79_vm1, %v7933_v54  ;;  %v5796_v54 = vld [vmem:[%s9557_s0 + $0xf0] sm:$0xff]   ;;  %v631_v32 = vsel %vm533_vm4, %v629_v47, %v630_v29  ;;  %v633_v31 = vsel %vm533_vm4, %v630_v29, %v632_v19  ;;  %v1597_v25 = vsel %vm1572_vm5, %v1594_v35, %v1596_v22  ;;  %v1603_v47 = vrot.slane %v7633_v40, 2 }
  0x75   :  { %9696 = vst [vmem:[#allocation31_spill] sm:$0xff] %v7982_v13  ;;  %v638_v30 = vsel %vm533_vm4, %v635_v56, %v637_v21  ;;  %290 = vst.msk [vmem:[#allocation2 + $0x301] sm:$0xff] %vm79_vm1, %v5757_v24  ;;  %v5761_v29 = vunpack.c.l.bf16 %v5796_v54  ;;  %v5762_v35 = vunpack.c.h.bf16 %v5796_v54  ;;  %v8022_v19 = vpack.c.bf16 %v633_v31, %v631_v32  ;;  %v8029_v56 = vld [vmem:[#allocation2 + $0x240] sm:$0xff]  ;;  %v8031_v24 = vld [vmem:[#allocation2 + $0x248] sm:$0xff] }
  0x76   :  { %v1600_v21 = vsel %vm1572_vm5, %v1598_v38, %v1599_v46  ;;  %v1604_v22 = vrot.slane %v7635_v41, 2  ;;  %v8033_v40 = vld [vmem:[#allocation2 + $0x250] sm:$0x3]  ;;  %v1602_v54 = vsel %vm1572_vm5, %v1599_v46, %v1601_v18  ;;  %v1608_v12 = vrot.slane %v7641_v43, 2 }
  0x77   :  { %9699 = vst [vmem:[#allocation34_spill] sm:$0xff] %v8022_v19  ;;  %v1611_v32 = vrot.slane %v7645_v45, 2  ;;  %292 = vst.msk [vmem:[#allocation2 + $0x319] sm:$0xff] %vm79_vm1, %v5761_v29  ;;  %v8042_v41 = vpack.c.bf16 %v638_v30, %v636_v55  ;;  %v640_v38 = vrot.slane %v8017_v6, 1  ;;  %v642_v46 = vrot.slane %v8019_v26, 1  ;;  %v8056_v30 = vld [vmem:[#allocation2 + $0x258] sm:$0xff] }
  0x78   :  { %293 = vst.msk [vmem:[#allocation2 + $0x321] sm:$0xff] %vm79_vm1, %v5762_v35  ;;  %v8047_v31 = vpack.c.bf16 %v1597_v25, %v1595_v11  ;;  %v644_v43 = vrot.slane %v8029_v56, 1  ;;  %v647_v45 = vrot.slane %v8033_v40, 1  ;;  %v8052_v18 = vpack.c.bf16 %v1602_v54, %v1600_v21  ;;  %v8061_v11 = vld [vmem:[#allocation2 + $0x260] sm:$0xff]  ;;  %v8063_v25 = vld [vmem:[#allocation2 + $0x268] sm:$0x3] }
  0x79   :  { %6130 = vmatmul.mubr.msk.bf16.gmra.mrb[32].mxu1 %vm79_vm1, %v7970_v48  ;;  %9700 = vst [vmem:[#allocation35_spill] sm:$0xff] %v8042_v41  ;;  %v1605_v16 = vsel %vm1572_vm5, %v1603_v47, %v1604_v22  ;;  %v1607_v55 = vsel %vm1572_vm5, %v1604_v22, %v1606_v1  ;;  %v1613_v29 = vrot.slane %v7666_v58, 2  ;;  %v1614_v54 = vrot.slane %v7668_v59, 2 }
  0x7a   :  { %6133 = vmatprep.mubr.msk.bf16.mxu1 %vm79_vm1, %v7982_v13  ;;  %9701 = vst [vmem:[#allocation36_spill] sm:$0xff] %v8047_v31  ;;  %9702 = vst [vmem:[#allocation37_spill] sm:$0xff] %v8052_v18  ;;  %v1616_v47 = vrot.slane %v7677_v2, 2  ;;  %v641_v58 = vsel %vm533_vm4, %v639_v42, %v640_v38  ;;  %v643_v22 = vsel %vm533_vm4, %v640_v38, %v642_v46  ;;  %v1618_v1 = vrot.slane %v7679_v5, 2  ;;  %v8089_v38 = vld [vmem:[#allocation2 + $0x270] sm:$0xff]  ;;  %v8091_v46 = vld [vmem:[#allocation2 + $0x278] sm:$0xff] }
  0x7b   :  { %6428 = vmatmul.mubr.msk.bf16.vlgmr.msra.gmra.mrb[0].mxu0 %vm79_vm1, %v7990_v20  ;;  %v1619_v48 = vrot.slane %v7686_v10, 2  ;;  %v649_v2 = vrot.slane %v8056_v30, 1  ;;  %v650_v5 = vrot.slane %v8061_v11, 1  ;;  %v652_v10 = vrot.slane %v8063_v25, 1 }
  0x7c   :  { %6492 = vmatpush3.bf16.msra.mxu0 %v3429_v14  ;;  %6431 = vmatprep.mubr.msk.bf16.mxu0 %vm79_vm1, %v7992_v17  ;;  %v1609_v14 = vrot.slane %v7643_v44, 2  ;;  %v645_v44 = vrot.slane %v8031_v24, 1  ;;  %v1624_v13 = vrot.slane %v7728_v52, 2 }
  0x7e   :  { %v1610_v35 = vsel %vm1572_vm5, %v1608_v12, %v1609_v14  ;;  %v1612_v21 = vsel %vm1572_vm5, %v1609_v14, %v1611_v32  ;;  %v646_v12 = vsel %vm533_vm4, %v644_v43, %v645_v44  ;;  %v648_v59 = vsel %vm533_vm4, %v645_v44, %v647_v45  ;;  %v8093_v43 = vld [vmem:[#allocation2 + $0x280] sm:$0x3] }
  0x7f   :  { %v1621_v14 = vrot.slane %v7688_v4, 2  ;;  %v8083_v32 = vpack.c.bf16 %v1607_v55, %v1605_v16  ;;  %v8087_v42 = vpack.c.bf16 %v1612_v21, %v1610_v35  ;;  %v8095_v44 = vpack.c.bf16 %v643_v22, %v641_v58  ;;  %v8099_v16 = vld [vmem:[#allocation2 + $0x288] sm:$0xff]  ;;  %v8101_v55 = vld [vmem:[#allocation2 + $0x290] sm:$0xff]  ;;  %v8106_v21 = vld [vmem:[#allocation2 + $0x298] sm:$0x3] }
  0x80   :  { %v1615_v4 = vsel %vm1572_vm5, %v1613_v29, %v1614_v54  ;;  %v1617_v45 = vsel %vm1572_vm5, %v1614_v54, %v1616_v47  ;;  %v8104_v35 = vpack.c.bf16 %v648_v59, %v646_v12  ;;  %9707 = vst [vmem:[#allocation42_spill] sm:$0xff] %v8106_v21  ;;  %v1626_v58 = vrot.slane %v7736_v61, 2 }
  0x81   :  { %6134 = vmatmul.mubr.msk.bf16.gmra.mrb[36].mxu1 %vm79_vm1, %v8022_v19  ;;  %9703 = vst [vmem:[#allocation38_spill] sm:$0xff] %v8083_v32  ;;  %9704 = vst [vmem:[#allocation39_spill] sm:$0xff] %v8087_v42  ;;  %v1620_v19 = vsel %vm1572_vm5, %v1618_v1, %v1619_v48  ;;  %v654_v29 = vrot.slane %v8089_v38, 1  ;;  %v655_v54 = vrot.slane %v8091_v46, 1  ;;  %v657_v47 = vrot.slane %v8093_v43, 1 }
  0x82   :  { %6137 = vmatprep.mubr.msk.bf16.mxu1 %vm79_vm1, %v8042_v41  ;;  %9705 = vst [vmem:[#allocation40_spill] sm:$0xff] %v8095_v44  ;;  %v1623_v41 = vrot.slane %v7716_v39, 2  ;;  %9706 = vst [vmem:[#allocation41_spill] sm:$0xff] %v8104_v35  ;;  %v1622_v22 = vsel %vm1572_vm5, %v1619_v48, %v1621_v14  ;;  %v651_v39 = vsel %vm533_vm4, %v649_v2, %v650_v5  ;;  %v659_v59 = vrot.slane %v8099_v16, 1 }
  0x83   :  { %6432 = vmatmul.mubr.msk.bf16.gmra.mrb[4].mxu0 %vm79_vm1, %v8047_v31  ;;  %v653_v12 = vsel %vm533_vm4, %v650_v5, %v652_v10  ;;  %v660_v1 = vrot.slane %v8101_v55, 1  ;;  %v662_v52 = vrot.slane %v8106_v21, 1  ;;  %v1628_v61 = vrot.slane %v7743_v8, 2 }
  0x84   :  { %6435 = vmatprep.mubr.msk.bf16.mxu0 %vm79_vm1, %v8052_v18  ;;  %v1629_v18 = vrot.slane %v7745_v9, 2  ;;  %v1631_v31 = vrot.slane %v7747_v15, 2  ;;  %v8127_v48 = vpack.c.bf16 %v1617_v45, %v1615_v4  ;;  %v8129_v2 = vpack.c.bf16 %v1622_v22, %v1620_v19  ;;  %v8142_v19 = vld [vmem:[#allocation2 + $0x2a0] sm:$0xff]  ;;  %v8144_v4 = vld [vmem:[#allocation2 + $0x2a8] sm:$0xff]  ;;  %v382_v45 = vld [vmem:[#allocation2 + $0x2b0] sm:$0x3] }
  0x85   :  { %v656_v14 = vsel %vm533_vm4, %v654_v29, %v655_v54  ;;  %v658_v5 = vsel %vm533_vm4, %v655_v54, %v657_v47  ;;  %v1625_v8 = vsel %vm1572_vm5, %v1623_v41, %v1624_v13  ;;  %v1627_v9 = vsel %vm1572_vm5, %v1624_v13, %v1626_v58 }
  0x86   :  { %9708 = vst [vmem:[#allocation43_spill] sm:$0xff] %v8127_v48  ;;  %9709 = vst [vmem:[#allocation44_spill] sm:$0xff] %v8129_v2  ;;  %v8137_v10 = vpack.c.bf16 %v653_v12, %v651_v39  ;;  %v661_v15 = vsel %vm533_vm4, %v659_v59, %v660_v1  ;;  %v1633_v29 = vrot.slane %v7774_v49, 2  ;;  %v1634_v54 = vrot.slane %v7776_v50, 2 }
  0x87   :  { %v663_v41 = vsel %vm533_vm4, %v660_v1, %v662_v52  ;;  %v1630_v13 = vsel %vm1572_vm5, %v1628_v61, %v1629_v18  ;;  %v1632_v58 = vsel %vm1572_vm5, %v1629_v18, %v1631_v31  ;;  %v1636_v47 = vrot.slane %v7778_v51, 2  ;;  %v8169_v61 = vld [vmem:[#allocation2 + $0x2b8] sm:$0xff] }
  0x88   :  { %9710 = vst [vmem:[#allocation45_spill] sm:$0xff] %v8137_v10  ;;  %v8152_v22 = vpack.c.bf16 %v658_v5, %v656_v14  ;;  %v8154_v39 = vpack.c.bf16 %v1627_v9, %v1625_v8  ;;  %v1683_v12 = vrot.slane %v8029_v56, 2  ;;  %v1684_v59 = vrot.slane %v8031_v24, 2  ;;  %v8171_v14 = vld [vmem:[#allocation2 + $0x2c0] sm:$0xff]  ;;  %v8173_v5 = vld [vmem:[#allocation2 + $0x2c8] sm:$0x3] }
  0x89   :  { %6138 = vmatmul.mubr.msk.bf16.gmra.mrb[40].mxu1 %vm79_vm1, %v8095_v44  ;;  %v664_v49 = vrot.slane %v8142_v19, 1  ;;  %v665_v50 = vrot.slane %v8144_v4, 1  ;;  %v1686_v1 = vrot.slane %v8033_v40, 2  ;;  %v8161_v52 = vpack.c.bf16 %v663_v41, %v661_v15  ;;  %9715 = vst [vmem:[#allocation50_spill] sm:$0xff] %v8173_v5 }
  0x8a   :  { %6141 = vmatprep.mubr.msk.bf16.mxu1 %vm79_vm1, %v8104_v35  ;;  %9711 = vst [vmem:[#allocation46_spill] sm:$0xff] %v8152_v22  ;;  %9712 = vst [vmem:[#allocation47_spill] sm:$0xff] %v8154_v39  ;;  %v667_v35 = vrot.slane %v382_v45, 1  ;;  %v8163_v31 = vpack.c.bf16 %v1632_v58, %v1630_v13  ;;  %v1635_v51 = vsel %vm1572_vm5, %v1633_v29, %v1634_v54  ;;  %v1693_v9 = vrot.slane %v8089_v38, 2 }
  0x8b   :  { %6436 = vmatmul.mubr.msk.bf16.gmra.mrb[8].mxu0 %vm79_vm1, %v8083_v32  ;;  %9713 = vst [vmem:[#allocation48_spill] sm:$0xff] %v8161_v52  ;;  %v1685_v18 = vsel %vm1572_vm5, %v1683_v12, %v1684_v59  ;;  %v1637_v8 = vsel %vm1572_vm5, %v1634_v54, %v1636_v47  ;;  %v1687_v40 = vsel %vm1572_vm5, %v1684_v59, %v1686_v1  ;;  %v1694_v15 = vrot.slane %v8091_v46, 2  ;;  %v8190_v12 = vld [vmem:[#allocation2 + $0x2d0] sm:$0xff]  ;;  %v8192_v59 = vld [vmem:[#allocation2 + $0x2d8] sm:$0xff]  ;;  %v388_v1 = vld [vmem:[#allocation2 + $0x2e0] sm:$0x3] }
  0x8c   :  { %6439 = vmatprep.mubr.msk.bf16.mxu0 %vm79_vm1, %v8087_v42  ;;  %9714 = vst [vmem:[#allocation49_spill] sm:$0xff] %v8163_v31  ;;  %v1638_v29 = vrot.slane %v7782_v60, 2  ;;  %v1639_v41 = vrot.slane %v7784_v62, 2  ;;  %v8183_v13 = vpack.c.bf16 %v1687_v40, %v1685_v18  ;;  %v1696_v58 = vrot.slane %v8093_v43, 2  ;;  %v9720_v32 = vld [vmem:[#allocation15_spill] sm:$0xff] }
  0x8d   :  { %v666_v54 = vsel %vm533_vm4, %v664_v49, %v665_v50  ;;  %v668_v47 = vsel %vm533_vm4, %v665_v50, %v667_v35  ;;  %v1695_v62 = vsel %vm1572_vm5, %v1693_v9, %v1694_v15  ;;  %v669_v43 = vrot.slane %v8169_v61, 1 }
  0x8e   :  { %9716 = vst [vmem:[#allocation51_spill] sm:$0xff] %v8183_v13  ;;  %v670_v18 = vrot.slane %v8171_v14, 1  ;;  %v672_v49 = vrot.slane %v8173_v5, 1  ;;  %v1697_v35 = vsel %vm1572_vm5, %v1694_v15, %v1696_v58  ;;  %v1703_v40 = vrot.slane %v8142_v19, 2  ;;  %v9730_v5 = vld [vmem:[#allocation18_spill] sm:$0xff] }
  0x8f   :  { %v8202_v50 = vpack.c.bf16 %v1697_v35, %v1695_v62  ;;  %v8206_v44 = vpack.c.bf16 %v668_v47, %v666_v54  ;;  %v674_v9 = vrot.slane %v8190_v12, 1  ;;  %v1643_v42 = vrot.slane %v7813_v53, 2  ;;  %v8223_v53 = vld [vmem:[#allocation2 + $0x2e8] sm:$0xff] }
  0x90   :  { %v1644_v17 = vrot.slane %v9720_v32, 2  ;;  %v671_v62 = vsel %vm533_vm4, %v669_v43, %v670_v18  ;;  %v673_v35 = vsel %vm533_vm4, %v670_v18, %v672_v49  ;;  %v1713_v54 = vrot.slane %v8190_v12, 2  ;;  %v9723_v32 = vld [vmem:[#allocation16_spill] sm:$0xff]  ;;  %v8231_v49 = vld [vmem:[#allocation2 + $0x2f0] sm:$0xff] }
  0x91   :  { %6142 = vmatmul.mubr.msk.bf16.gmra.mrb[44].mxu1 %vm79_vm1, %v8137_v10  ;;  %v1704_v10 = vrot.slane %v8144_v4, 2  ;;  %9719 = vst [vmem:[#allocation52_spill] sm:$0xff] %v8206_v44  ;;  %v8221_v47 = vpack.c.bf16 %v1637_v8, %v1635_v51  ;;  %v1646_v20 = vrot.slane %v9723_v32, 2  ;;  %v1640_v51 = vsel %vm1572_vm5, %v1638_v29, %v1639_v41 }
  0x92   :  { %6145 = vmatprep.mubr.msk.bf16.mxu1 %vm79_vm1, %v8152_v22  ;;  %v9717_v22 = vld [vmem:[#allocation12_spill] sm:$0xff]  ;;  %v679_v29 = vrot.slane %v8223_v53, 1  ;;  %v1649_v13 = vrot.slane %v9730_v5, 2  ;;  %v8292_v5 = vpack.c.bf16 %v8017_v6, %v8015_v34 }
  0x93   :  { %6440 = vmatmul.mubr.msk.bf16.gmra.mrb[12].mxu0 %vm79_vm1, %v8127_v48  ;;  %v1641_v60 = vrot.slane %v9717_v22, 2  ;;  %9718 = vst [vmem:[#allocation12_spill] sm:$0xff] %v8202_v50  ;;  %v1706_v22 = vrot.slane %v382_v45, 2  ;;  %v677_v48 = vrot.slane %v388_v1, 1  ;;  %v1705_v15 = vsel %vm1572_vm5, %v1703_v40, %v1704_v10  ;;  %9722 = vst [vmem:[#allocation53_spill] sm:$0xff] %v8221_v47 }
  0x94   :  { %6443 = vmatprep.mubr.msk.bf16.mxu0 %vm79_vm1, %v8129_v2  ;;  %v675_v2 = vrot.slane %v8192_v59, 1  ;;  %v1714_v40 = vrot.slane %v8192_v59, 2 }
  0x95   :  { %v1707_v58 = vsel %vm1572_vm5, %v1704_v10, %v1706_v22  ;;  %v1716_v10 = vrot.slane %v388_v1, 2  ;;  %v8233_v22 = vld [vmem:[#allocation2 + $0x2f8] sm:$0x3]  ;;  %v1642_v8 = vsel %vm1572_vm5, %v1639_v41, %v1641_v60  ;;  %v1645_v1 = vsel %vm1572_vm5, %v1643_v42, %v1644_v17 }
  0x96   :  { %v8216_v45 = vpack.c.bf16 %v1707_v58, %v1705_v15  ;;  %v676_v43 = vsel %vm533_vm4, %v674_v9, %v675_v2  ;;  %v678_v18 = vsel %vm533_vm4, %v675_v2, %v677_v48  ;;  %9724 = vst [vmem:[#allocation16_spill] sm:$0xff] %v8233_v22  ;;  %v8239_v15 = vpack.c.bf16 %v673_v35, %v671_v62  ;;  %v8242_v58 = vld [vmem:[#allocation2 + $0x300] sm:$0xff]  ;;  %v8244_v9 = vld [vmem:[#allocation2 + $0x308] sm:$0xff]  ;;  %v394_v48 = vld [vmem:[#allocation2 + $0x310] sm:$0x3] }
  0x97   :  { %v1715_v2 = vsel %vm1572_vm5, %v1713_v54, %v1714_v40  ;;  %v1717_v32 = vsel %vm1572_vm5, %v1714_v40, %v1716_v10  ;;  %v1723_v60 = vrot.slane %v8242_v58, 2  ;;  %v1724_v42 = vrot.slane %v8244_v9, 2  ;;  %v5797_v62 = vld [vmem:[%s9557_s0 + $0xf8] sm:$0xff]  }
  0x98   :  { %9721 = vst [vmem:[#allocation15_spill] sm:$0xff] %v8216_v45  ;;  %9725 = vst [vmem:[#allocation54_spill] sm:$0xff] %v8239_v15  ;;  %v8251_v41 = vpack.c.bf16 %v1717_v32, %v1715_v2  ;;  %v8258_v35 = vpack.c.bf16 %v678_v18, %v676_v43  ;;  %v680_v54 = vrot.slane %v8231_v49, 1  ;;  %v682_v40 = vrot.slane %v8233_v22, 1  ;;  %v9729_v22 = vld [vmem:[#allocation17_spill] sm:$0xff] }
  0x99   :  { %6146 = vmatmul.mubr.msk.bf16.gmra.mrb[48].mxu1 %vm79_vm1, %v8161_v52  ;;  %v1726_v10 = vrot.slane %v394_v48, 2  ;;  %v8265_v2 = vld [vmem:[%s9556_s1 + $0xc] ss:$0 sps:$4 sm:$0xcc]   ;;  %v684_v32 = vrot.slane %v8242_v58, 1  ;;  %v687_v52 = vrot.slane %v394_v48, 1  ;;  %v5765_v18 = vunpack.c.l.bf16 %v5797_v62 }
  0x9a   :  { %6149 = vmatprep.mubr.msk.bf16.mxu1 %vm79_vm1, %v8206_v44  ;;  %9726 = vst [vmem:[#allocation55_spill] sm:$0xff] %v8251_v41  ;;  %9727 = vst [vmem:[#allocation56_spill] sm:$0xff] %v8258_v35  ;;  %v685_v44 = vrot.slane %v8244_v9, 1  ;;  %v5766_v41 = vunpack.c.h.bf16 %v5797_v62  ;;  %v1647_v45 = vsel %vm1572_vm5, %v1644_v17, %v1646_v20  ;;  %v1648_v50 = vrot.slane %v9729_v22, 2 }
  0x9b   :  { %6444 = vmatmul.mubr.msk.bf16.gmra.mrb[16].mxu0 %vm79_vm1, %v8154_v39  ;;  %v8270_v39 = vpack.c.bf16 %v1642_v8, %v1640_v51  ;;  %v1727_v43 = vsel %vm1572_vm5, %v1724_v42, %v1726_v10  ;;  %v681_v48 = vsel %vm533_vm4, %v679_v29, %v680_v54  ;;  %v683_v51 = vsel %vm533_vm4, %v680_v54, %v682_v40  ;;  %v9731_v8 = vld [vmem:[#allocation19_spill] sm:$0xff]  ;;  %v8300_v29 = vld [vmem:[#allocation2 + $0x318] sm:$0xff] }
  0x9c   :  { %6447 = vmatprep.mubr.msk.bf16.mxu0 %vm79_vm1, %v8163_v31  ;;  %v1725_v31 = vsel %vm1572_vm5, %v1723_v60, %v1724_v42  ;;  %v1651_v60 = vrot.slane %v9731_v8, 2  ;;  %294 = vst.msk [vmem:[#allocation2 + $0x331] sm:$0xff] %vm79_vm1, %v5765_v18  ;;  %295 = vst.msk [vmem:[#allocation2 + $0x339] sm:$0xff] %vm79_vm1, %v5766_v41  ;;  %v9636_v20 = vrot.slane %v8265_v2, 2  ;;  %v686_v17 = vsel %vm533_vm4, %v684_v32, %v685_v44  ;;  %v8302_v41 = vld [vmem:[#allocation2 + $0x320] sm:$0xff] }
  0x9d   :  { %9728 = vst [vmem:[#allocation57_spill] sm:$0xff] %v8270_v39  ;;  %v8276_v21 = vpack.c.bf16 %v1727_v43, %v1725_v31  ;;  %v688_v31 = vsel %vm533_vm4, %v685_v44, %v687_v52  ;;  %v8296_v22 = vpack.c.bf16 %v8031_v24, %v8029_v56  ;;  %v8304_v42 = vld [vmem:[#allocation2 + $0x328] sm:$0x3]  ;;  %v8311_v44 = vpack.c.bf16 %v8061_v11, %v8056_v30 }
  0x9e   :  { %7211 = vmatprep.subr.msk.bf16.mxu0 %vm891_vm0, %v9636_v20  ;;  %v8315_v56 = vpack.c.bf16 %v8091_v46, %v8089_v38  ;;  %v8319_v24 = vpack.c.bf16 %v8101_v55, %v8099_v16  ;;  %v8325_v52 = vpack.c.bf16 %v8144_v4, %v8142_v19  ;;  %v8329_v62 = vpack.c.bf16 %v8171_v14, %v8169_v61 }
  0x9f   :  { %v8333_v54 = vpack.c.bf16 %v8192_v59, %v8190_v12  ;;  %v8337_v38 = vpack.c.bf16 %v8231_v49, %v8223_v53  ;;  %v8339_v46 = vpack.c.bf16 %v683_v51, %v681_v48  ;;  %v1650_v40 = vsel %vm1572_vm5, %v1648_v50, %v1649_v13  ;;  %v9740_v51 = vld [vmem:[#allocation22_spill] sm:$0xff] }
  0xa0   :  { %9732 = vst [vmem:[#allocation17_spill] sm:$0xff] %v8319_v24  ;;  %9733 = vst [vmem:[#allocation18_spill] sm:$0xff] %v8325_v52  ;;  %v1652_v10 = vsel %vm1572_vm5, %v1649_v13, %v1651_v60  ;;  %v8343_v19 = vpack.c.bf16 %v688_v31, %v686_v17  ;;  %v689_v4 = vrot.slane %v8300_v29, 1  ;;  %v690_v32 = vrot.slane %v8302_v41, 1  ;;  %v9741_v13 = vld [vmem:[#allocation25_spill] sm:$0xff]  ;;  %v9742_v60 = vld [vmem:[#allocation26_spill] sm:$0xff] }
  0xa1   :  { %6150 = vmatmul.mubr.msk.bf16.gmra.mrb[52].mxu1 %vm79_vm1, %v8239_v15  ;;  %9734 = vst [vmem:[#allocation19_spill] sm:$0xff] %v8329_v62  ;;  %9735 = vst [vmem:[#allocation58_spill] sm:$0xff] %v8333_v54  ;;  %v692_v43 = vrot.slane %v8304_v42, 1  ;;  %v8348_v12 = vpack.c.bf16 %v1647_v45, %v1645_v1  ;;  %v8350_v59 = vpack.c.bf16 %v1652_v10, %v1650_v40  ;;  %v3036_v18 = vrot.slane %v7863_v23, 2  ;;  %v9743_v31 = vld [vmem:[#allocation27_spill] sm:$0xff] }
  0xa2   :  { %6153 = vmatprep.mubr.msk.bf16.mxu1 %vm79_vm1, %v8258_v35  ;;  %9736 = vst [vmem:[#allocation59_spill] sm:$0xff] %v8337_v38  ;;  %9737 = vst [vmem:[#allocation60_spill] sm:$0xff] %v8339_v46  ;;  %v3037_v48 = vrot.slane %v7865_v27, 2  ;;  %v3039_v50 = vrot.slane %v9740_v51, 2  ;;  %v1658_v8 = vrot.slane %v9741_v13, 2  ;;  %v1659_v17 = vrot.slane %v9742_v60, 2 }
  0xa3   :  { %6448 = vmatmul.mubr.msk.bf16.gmra.mrb[20].mxu0 %vm79_vm1, %v8221_v47  ;;  %9738 = vst [vmem:[#allocation61_spill] sm:$0xff] %v8343_v19  ;;  %9739 = vst [vmem:[#allocation62_spill] sm:$0xff] %v8348_v12  ;;  %v1661_v20 = vrot.slane %v9743_v31, 2  ;;  %v691_v45 = vsel %vm533_vm4, %v689_v4, %v690_v32  ;;  %v693_v23 = vsel %vm533_vm4, %v690_v32, %v692_v43  ;;  %v8382_v51 = vld [vmem:[#allocation2 + $0x8] sm:$0xff]  ;;  %v1719_v15 = vrot.slane %v8231_v49, 2  ;;  %v7243_v49 = vld [vmem:[#allocation2 + $0x120] sm:$0xff] }
  0xa4   :  { %6451 = vmatprep.mubr.msk.bf16.mxu0 %vm79_vm1, %v8270_v39  ;;  %v8368_v27 = vpack.c.bf16 %v8244_v9, %v8242_v58  ;;  %v8372_v1 = vpack.c.bf16 %v8302_v41, %v8300_v29  ;;  %v3038_v40 = vsel %vm1572_vm5, %v3036_v18, %v3037_v48  ;;  %v3040_v10 = vsel %vm1572_vm5, %v3037_v48, %v3039_v50  ;;  %v8384_v58 = vld [vmem:[#allocation2] sm:$0xff] }
  0xa5   :  { %v8378_v4 = vpack.c.bf16 %v693_v23, %v691_v45  ;;  %v1660_v32 = vsel %vm1572_vm5, %v1658_v8, %v1659_v17  ;;  %v1662_v43 = vsel %vm1572_vm5, %v1659_v17, %v1661_v20  ;;  %v404_v9 = vpack.c.bf16 %v8382_v51, %v8384_v58  ;;  %v7220_v23 = vld [vmem:[#allocation2 + $0x18] sm:$0xff] }
  0xa6   :  { %9744 = vst [vmem:[#allocation22_spill] sm:$0xff] %v8368_v27  ;;  %9745 = vst [vmem:[#allocation25_spill] sm:$0xff] %v8372_v1  ;;  %v8388_v31 = vpack.c.bf16 %v3040_v10, %v3038_v40  ;;  %v1663_v18 = vrot.slane %v7914_v0, 2  ;;  %v1664_v48 = vrot.slane %v7916_v57, 2  ;;  %v1666_v50 = vrot.slane %v7918_v7, 2  ;;  %v7221_v40 = vld [vmem:[#allocation2 + $0x20] sm:$0xff] }
  0xa7   :  { %9746 = vst [vmem:[#allocation26_spill] sm:$0xff] %v8378_v4  ;;  %v1668_v20 = vrot.slane %v7949_v33, 2  ;;  %v1669_v8 = vrot.slane %v7951_v63, 2  ;;  %v1671_v17 = vrot.slane %v7953_v28, 2  ;;  %v8407_v10 = vpack.c.bf16 %v7221_v40, %v7220_v23 }
  0xa8   :  { %9747 = vst [vmem:[#allocation27_spill] sm:$0xff] %v8388_v31  ;;  %v1665_v45 = vsel %vm1572_vm5, %v1663_v18, %v1664_v48  ;;  %v1667_v7 = vsel %vm1572_vm5, %v1664_v48, %v1666_v50  ;;  %v1673_v50 = vrot.slane %v7964_v36, 2  ;;  %v1679_v23 = vrot.slane %v8017_v6, 2 }
  0xa9   :  { %6154 = vmatmul.mubr.msk.bf16.gmra.mrb[56].mxu1 %vm79_vm1, %v8339_v46  ;;  %9748 = vst [vmem:[#allocation63_spill] sm:$0xff] %v8407_v10  ;;  %v1672_v28 = vsel %vm1572_vm5, %v1669_v8, %v1671_v17  ;;  %v8417_v46 = vpack.c.bf16 %v1667_v7, %v1665_v45  ;;  %v1678_v17 = vrot.slane %v8015_v34, 2  ;;  %v1681_v40 = vrot.slane %v8019_v26, 2  ;;  %v7225_v26 = vld [vmem:[#allocation2 + $0x48] sm:$0xff]  ;;  %v7226_v45 = vld [vmem:[#allocation2 + $0x50] sm:$0xff] }
  0xaa   :  { %6157 = vmatprep.mubr.msk.bf16.mxu1 %vm79_vm1, %v8343_v19  ;;  %v8390_v19 = vpack.c.bf16 %v1662_v43, %v1660_v32  ;;  %v1670_v32 = vsel %vm1572_vm5, %v1668_v20, %v1669_v8  ;;  %v7222_v43 = vld [vmem:[#allocation2 + $0x30] sm:$0xff]  ;;  %v1674_v20 = vrot.slane %v7966_v37, 2  ;;  %v1676_v8 = vrot.slane %v7968_v3, 2 }
  0xab   :  { %6452 = vmatmul.mubr.msk.bf16.gmra.mrb[24].mxu0 %vm79_vm1, %v8348_v12  ;;  %v8419_v48 = vpack.c.bf16 %v1672_v28, %v1670_v32  ;;  %v8443_v7 = vpack.c.bf16 %v7226_v45, %v7225_v26  ;;  %v1680_v32 = vsel %vm1572_vm5, %v1678_v17, %v1679_v23  ;;  %v1682_v28 = vsel %vm1572_vm5, %v1679_v23, %v1681_v40  ;;  %v7229_v23 = vld [vmem:[#allocation2 + $0x78] sm:$0xff]  ;;  %v7230_v40 = vld [vmem:[#allocation2 + $0x80] sm:$0xff] }
  0xac   :  { %6455 = vmatprep.mubr.msk.bf16.mxu0 %vm79_vm1, %v8350_v59  ;;  %v1675_v34 = vsel %vm1572_vm5, %v1673_v50, %v1674_v20  ;;  %v1677_v6 = vsel %vm1572_vm5, %v1674_v20, %v1676_v8  ;;  %v8454_v50 = vpack.c.bf16 %v1682_v28, %v1680_v32  ;;  %v1688_v20 = vrot.slane %v8056_v30, 2  ;;  %v7232_v26 = vld [vmem:[#allocation2 + $0x98] sm:$0xff] }
  0xad   :  { %v8452_v35 = vpack.c.bf16 %v1677_v6, %v1675_v34  ;;  %v1689_v8 = vrot.slane %v8061_v11, 2  ;;  %v1691_v17 = vrot.slane %v8063_v25, 2  ;;  %v8467_v34 = vpack.c.bf16 %v7230_v40, %v7229_v23  ;;  %v7231_v11 = vld [vmem:[#allocation2 + $0x90] sm:$0xff] }
  0xae   :  { %v8471_v25 = vpack.c.bf16 %v7232_v26, %v7231_v11  ;;  %v1698_v32 = vrot.slane %v8099_v16, 2  ;;  %v1699_v28 = vrot.slane %v8101_v55, 2  ;;  %v7235_v55 = vld [vmem:[#allocation2 + $0xc0] sm:$0xff]  ;;  %v1708_v26 = vrot.slane %v8169_v61, 2 }
  0xaf   :  { %v1690_v6 = vsel %vm1572_vm5, %v1688_v20, %v1689_v8  ;;  %v1692_v30 = vsel %vm1572_vm5, %v1689_v8, %v1691_v17  ;;  %v9750_v20 = vld [vmem:[#allocation51_spill] sm:$0xff]  ;;  %v7233_v8 = vld [vmem:[#allocation2 + $0xa8] sm:$0xff]  ;;  %v7234_v17 = vld [vmem:[#allocation2 + $0xb0] sm:$0xff] }
  0xb0   :  { %v8473_v45 = vpack.c.bf16 %v1692_v30, %v1690_v6  ;;  %v8486_v23 = vpack.c.bf16 %v7234_v17, %v7233_v8  ;;  %v1700_v40 = vsel %vm1572_vm5, %v1698_v32, %v1699_v28  ;;  %v7236_v6 = vld [vmem:[#allocation2 + $0xc8] sm:$0xff] }
  0xb1   :  { %6158 = vmatmul.mubr.msk.bf16.gmra.mrb[60].mxu1 %vm79_vm1, %v8378_v4  ;;  %v8490_v30 = vpack.c.bf16 %v7236_v6, %v7235_v55  ;;  %v9753_v32 = vld [vmem:[#allocation12_spill] sm:$0xff]  ;;  %v1718_v6 = vrot.slane %v8223_v53, 2 }
  0xb2   :  { %6163 = vmatprep.mubr.msk.bf16.mxu1 %vm79_vm1, %v404_v9  ;;  %v7223_v9 = vld [vmem:[#allocation2 + $0x38] sm:$0xff] }
  0xb3   :  { %6456 = vmatmul.mubr.msk.bf16.gmra.mrb[28].mxu0 %vm79_vm1, %v8388_v31  ;;  %v8411_v4 = vpack.c.bf16 %v7223_v9, %v7222_v43  ;;  %v7224_v31 = vld [vmem:[%s9556_s1 + $0x4] sm:$0x3]  ;;  %v7228_v9 = vld [vmem:[#allocation2 + $0x68] sm:$0xff] }
  0xb4   :  { %6459 = vmatprep.mubr.msk.bf16.mxu0 %vm79_vm1, %v8390_v19  ;;  %v1927_v18 = vsel %vm891_vm0, %v7224_v31, 0  ;;  %v8432_v31 = vld [vmem:[%s9556_s1 + $0x4] ss:$0 sps:$4 sm:$0xcc]  }
  0xb5   :  { %v9646_v3 = vrot.slane %v8432_v31, 2  ;;  %v7227_v43 = vld [vmem:[#allocation2 + $0x60] sm:$0xff] }
  0xb9   :  { %6164 = vmatmul.mubr.msk.bf16.vlgmr.msra.gmra.mrb[0].mxu1 %vm79_vm1, %v8407_v10  ;;  %v9755_v10 = vld [vmem:[#allocation16_spill] sm:$0xff] }
  0xba   :  { %6228 = vmatpush3.bf16.msra.mxu1 %v1927_v18  ;;  %6167 = vmatprep.mubr.msk.bf16.mxu1 %vm79_vm1, %v8411_v4  ;;  %v8450_v18 = vpack.c.bf16 %v7228_v9, %v7227_v43  ;;  %v9749_v43 = vld [vmem:[#allocation42_spill] sm:$0xff] }
  0xbb   :  { %6460 = vmatmul.mubr.msk.bf16.gmra.mrb[32].mxu0 %vm79_vm1, %v8417_v46  ;;  %7206 = vmatprep.subr.msk.bf16.mxu1 %vm891_vm0, %v9646_v3  ;;  %v1701_v9 = vrot.slane %v9749_v43, 2  ;;  %v1709_v43 = vrot.slane %v8171_v14, 2  ;;  %v9752_v3 = vld [vmem:[#allocation50_spill] sm:$0xff]  ;;  %v7239_v14 = vld [vmem:[#allocation2 + $0xf0] sm:$0xff] }
  0xbc   :  { %6463 = vmatprep.mubr.msk.bf16.mxu0 %vm79_vm1, %v8419_v48  ;;  %v1711_v8 = vrot.slane %v9752_v3, 2 }
  0xbd   :  { %v1702_v16 = vsel %vm1572_vm5, %v1699_v28, %v1701_v9  ;;  %v7237_v28 = vld [vmem:[#allocation2 + $0xd8] sm:$0xff]  ;;  %v7238_v9 = vld [vmem:[#allocation2 + $0xe0] sm:$0xff] }
  0xbe   :  { %v8492_v11 = vpack.c.bf16 %v1702_v16, %v1700_v40  ;;  %v8505_v17 = vpack.c.bf16 %v7238_v9, %v7237_v28  ;;  %v1710_v40 = vsel %vm1572_vm5, %v1708_v26, %v1709_v43  ;;  %v1712_v61 = vsel %vm1572_vm5, %v1709_v43, %v1711_v8  ;;  %v7240_v16 = vld [vmem:[#allocation2 + $0xf8] sm:$0xff]  ;;  %v9756_v26 = vld [vmem:[#allocation15_spill] sm:$0xff]  ;;  %v7241_v43 = vld [vmem:[#allocation2 + $0x108] sm:$0xff] }
  0xbf   :  { %v8509_v3 = vpack.c.bf16 %v7240_v16, %v7239_v14  ;;  %v8511_v55 = vpack.c.bf16 %v1712_v61, %v1710_v40  ;;  %v1721_v28 = vrot.slane %v9755_v10, 2  ;;  %v7242_v8 = vld [vmem:[#allocation2 + $0x110] sm:$0xff]  ;;  %v1720_v40 = vsel %vm1572_vm5, %v1718_v6, %v1719_v15  ;;  %v7244_v61 = vld [vmem:[#allocation2 + $0x128] sm:$0xff]  ;;  %v9758_v6 = vld [vmem:[#allocation55_spill] sm:$0xff] }
  0xc0   :  { %9751 = vst [vmem:[#allocation42_spill] sm:$0xff] %v8492_v11  ;;  %v8524_v9 = vpack.c.bf16 %v7242_v8, %v7241_v43  ;;  %v8528_v10 = vpack.c.bf16 %v7244_v61, %v7243_v49  ;;  %v1728_v16 = vrot.slane %v8300_v29, 2  ;;  %v1731_v43 = vrot.slane %v8304_v42, 2  ;;  %v8549_v42 = vld [vmem:[#allocation2 + $0x338] sm:$0xff]  ;;  %v7247_v49 = vld [vmem:[#allocation2 + $0x150] sm:$0xff] }
  0xc1   :  { %6168 = vmatmul.mubr.msk.bf16.gmra.mrb[4].mxu1 %vm79_vm1, %v8443_v7  ;;  %9754 = vst [vmem:[#allocation51_spill] sm:$0xff] %v8511_v55  ;;  %v1722_v53 = vsel %vm1572_vm5, %v1719_v15, %v1721_v28  ;;  %v7245_v15 = vld [vmem:[#allocation2 + $0x138] sm:$0xff]  ;;  %v7246_v28 = vld [vmem:[#allocation2 + $0x140] sm:$0xff] }
  0xc2   :  { %6171 = vmatprep.mubr.msk.bf16.mxu1 %vm79_vm1, %v8450_v18  ;;  %v8530_v14 = vpack.c.bf16 %v1722_v53, %v1720_v40  ;;  %v8543_v8 = vpack.c.bf16 %v7246_v28, %v7245_v15  ;;  %v8551_v53 = vld [vmem:[#allocation2 + $0x340] sm:$0x3]  ;;  %v7248_v61 = vld [vmem:[#allocation2 + $0x158] sm:$0xff]  ;;  %v3042_v15 = vrot.slane %v8549_v42, 2  ;;  %v7249_v28 = vld [vmem:[#allocation2 + $0x168] sm:$0xff] }
  0xc3   :  { %6464 = vmatmul.mubr.msk.bf16.gmra.mrb[36].mxu0 %vm79_vm1, %v8452_v35  ;;  %9759 = vst [vmem:[#allocation12_spill] sm:$0xff] %v8551_v53 }
  0xc4   :  { %6467 = vmatprep.mubr.msk.bf16.mxu0 %vm79_vm1, %v8454_v50  ;;  %9757 = vst [vmem:[#allocation50_spill] sm:$0xff] %v8530_v14 }
  0xc9   :  { %6172 = vmatmul.mubr.msk.bf16.gmra.mrb[8].mxu1 %vm79_vm1, %v8467_v34 }
  0xca   :  { %6175 = vmatprep.mubr.msk.bf16.mxu1 %vm79_vm1, %v8471_v25 }
  0xcb   :  { %6468 = vmatmul.mubr.msk.bf16.gmra.mrb[40].mxu0 %vm79_vm1, %v9750_v20 }
  0xcc   :  { %6471 = vmatprep.mubr.msk.bf16.mxu0 %vm79_vm1, %v8473_v45 }
  0xd1   :  { %6176 = vmatmul.mubr.msk.bf16.gmra.mrb[12].mxu1 %vm79_vm1, %v8486_v23 }
  0xd2   :  { %6179 = vmatprep.mubr.msk.bf16.mxu1 %vm79_vm1, %v8490_v30 }
  0xd3   :  { %6472 = vmatmul.mubr.msk.bf16.gmra.mrb[44].mxu0 %vm79_vm1, %v9753_v32 }
  0xd4   :  { %6475 = vmatprep.mubr.msk.bf16.mxu0 %vm79_vm1, %v8492_v11 }
  0xd9   :  { %6180 = vmatmul.mubr.msk.bf16.gmra.mrb[16].mxu1 %vm79_vm1, %v8505_v17 }
  0xda   :  { %6183 = vmatprep.mubr.msk.bf16.mxu1 %vm79_vm1, %v8509_v3 }
  0xdb   :  { %6476 = vmatmul.mubr.msk.bf16.gmra.mrb[48].mxu0 %vm79_vm1, %v9756_v26 }
  0xdc   :  { %6479 = vmatprep.mubr.msk.bf16.mxu0 %vm79_vm1, %v8511_v55  ;;  %v1729_v55 = vrot.slane %v8302_v41, 2  ;;  %v8547_v41 = vld [vmem:[#allocation2 + $0x330] sm:$0xff] }
  0xde   :  { %v1730_v40 = vsel %vm1572_vm5, %v1728_v16, %v1729_v55  ;;  %v1732_v29 = vsel %vm1572_vm5, %v1729_v55, %v1731_v43  ;;  %v3044_v16 = vrot.slane %v8551_v53, 2 }
  0xdf   :  { %v8555_v26 = vpack.c.bf16 %v1732_v29, %v1730_v40  ;;  %v7250_v40 = vld [vmem:[#allocation2 + $0x170] sm:$0xff] }
  0xe0   :  { %v3045_v43 = vsel %vm1572_vm5, %v3042_v15, %v3044_v16  ;;  %v8570_v29 = vpack.c.bf16 %v7250_v40, %v7249_v28  ;;  %v9761_v16 = vrot.slane %v8265_v2, 2  ;;  %v7254_v2 = vld [vmem:[#allocation2 + $0x180] sm:$0xff] }
  0xe1   :  { %6184 = vmatmul.mubr.msk.bf16.gmra.mrb[20].mxu1 %vm79_vm1, %v8524_v9 }
  0xe2   :  { %6187 = vmatprep.mubr.msk.bf16.mxu1 %vm79_vm1, %v8528_v10 }
  0xe3   :  { %6480 = vmatmul.mubr.msk.bf16.gmra.mrb[52].mxu0 %vm79_vm1, %v9758_v6  ;;  %v8553_v6 = vpack.c.bf16 %v7248_v61, %v7247_v49  ;;  %v8572_v49 = vld [vmem:[#allocation2 + $0x1b0] sm:$0xff]  ;;  %v8574_v61 = vld [vmem:[#allocation2 + $0x1b8] sm:$0xff] }
  0xe4   :  { %6483 = vmatprep.mubr.msk.bf16.mxu0 %vm79_vm1, %v8530_v14  ;;  %v3041_v14 = vrot.slane %v8547_v41, 2  ;;  %v420_v53 = vpack.c.bf16 %v8574_v61, %v8572_v49 }
  0xe6   :  { %v3043_v55 = vsel %vm1572_vm5, %v3041_v14, %v3042_v15  ;;  %v8589_v14 = vpack.c.bf16 %v9742_v60, %v9741_v13  ;;  %v8593_v15 = vpack.c.bf16 %v7916_v57, %v7914_v0  ;;  %v8613_v0 = vpack.c.bf16 %v7951_v63, %v7949_v33  ;;  %v7255_v13 = vld [vmem:[#allocation2 + $0x188] sm:$0xff] }
  0xe7   :  { %v8578_v11 = vpack.c.bf16 %v3045_v43, %v3043_v55  ;;  %v8605_v55 = vld [vmem:[%s9556_s1 + $0x10] sm:$0x3]  ;;  %v8619_v57 = vpack.c.bf16 %v7966_v37, %v7964_v36  ;;  %v1573_v33 = vrot.slane %v8384_v58, 2  ;;  %v1574_v63 = vrot.slane %v8382_v51, 2  ;;  %v8671_v43 = vld [vmem:[#allocation2 + $0x198] sm:$0xff]  ;;  %v8673_v58 = vld [vmem:[#allocation2 + $0x1a0] sm:$0xff] }
  0xe8   :  { %v7253_v36 = vld [vmem:[#allocation2 + $0x10] sm:$0x3]  ;;  %v8663_v60 = vpack.c.bf16 %v7255_v13, %v7254_v2  ;;  %v3790_v40 = vrot.slane %v8671_v43, 1  ;;  %v3419_v13 = vpack.c.bf16 %v8673_v58, %v8671_v43 }
  0xe9   :  { %6188 = vmatmul.mubr.msk.bf16.gmra.mrb[24].mxu1 %vm79_vm1, %v8543_v8  ;;  %9760 = vst [vmem:[#allocation16_spill] sm:$0xff] %v8578_v11  ;;  %v1576_v37 = vrot.slane %v7253_v36, 2  ;;  %v1575_v51 = vsel %vm1572_vm5, %v1573_v33, %v1574_v63 }
  0xea   :  { %6191 = vmatprep.mubr.msk.bf16.mxu1 %vm79_vm1, %v8553_v6 }
  0xeb   :  { %6484 = vmatmul.mubr.msk.bf16.gmra.mrb[56].mxu0 %vm79_vm1, %v8276_v21  ;;  %v1577_v28 = vsel %vm1572_vm5, %v1574_v63, %v1576_v37  ;;  %v9762_v37 = vrot.slane %v8432_v31, 2  ;;  %v9765_v31 = vld [vmem:[#allocation33_spill] sm:$0xff] }
  0xec   :  { %6487 = vmatprep.mubr.msk.bf16.mxu0 %vm79_vm1, %v8555_v26  ;;  %v1797_v36 = vpack.c.bf16 %v1577_v28, %v1575_v51  ;;  %v9763_v28 = vld [vmem:[#allocation29_spill] sm:$0xff] }
  0xed   :  { %v2296_v51 = vsel %vm891_vm0, %v9762_v37, 0  ;;  %v9769_v37 = vld [vmem:[#allocation39_spill] sm:$0xff]  ;;  %v9773_v63 = vld [vmem:[#allocation49_spill] sm:$0xff] }
  0xf1   :  { %6192 = vmatmul.mubr.msk.bf16.gmra.mrb[28].mxu1 %vm79_vm1, %v8570_v29 }
  0xf2   :  { %6195 = vmatprep.mubr.msk.bf16.mxu1 %vm79_vm1, %v420_v53  ;;  %v3818_v53 = vsel %vm891_vm0, %v9761_v16, 0  ;;  %v3791_v16 = vrot.slane %v8673_v58, 1 }
  0xf3   :  { %6488 = vmatmul.mubr.msk.bf16.gmra.mrb[60].mxu0 %vm79_vm1, %v8578_v11 }
  0xf4   :  { %6493 = vmatprep.mubr.msk.bf16.mxu0 %vm79_vm1, %v8411_v4  ;;  %v8687_v11 = vsel %vm533_vm4, %v3790_v40, %v3791_v16  ;;  %v9764_v40 = vld [vmem:[#allocation32_spill] sm:$0xff] }
  0xf9   :  { %6196 = vmatmul.mubr.msk.bf16.gmra.mrb[32].mxu1 %vm79_vm1, %v8589_v14 }
  0xfa   :  { %6199 = vmatprep.mubr.msk.bf16.mxu1 %vm79_vm1, %v8593_v15 }
  0xfb   :  { %6494 = vmatmul.mubr.msk.bf16.vlgmr.msra.gmra.mrb[0].mxu0 %vm79_vm1, %v8443_v7 }
  0xfc   :  { %6558 = vmatpush3.bf16.msra.mxu0 %v3818_v53  ;;  %6497 = vmatprep.mubr.msk.bf16.mxu0 %vm79_vm1, %v8450_v18  ;;  %v8681_v53 = vld [vmem:[#allocation2 + $0x1a8] sm:$0x3] }
  0xfd   :  { %7212 = vmatprep.subr.msk.bf16.mxu0 %vm891_vm0, %v8605_v55  ;;  %v3793_v2 = vrot.slane %v8681_v53, 1 }
  0xff   :  { %v8690_v33 = vsel %vm533_vm4, %v3791_v16, %v3793_v2  ;;  %v7256_v16 = vld [vmem:[%s9556_s1 + $0x8] sm:$0x3]  ;;  %v9767_v2 = vld [vmem:[#allocation37_spill] sm:$0xff] }
 0x101   :  { %6200 = vmatmul.mubr.msk.bf16.gmra.mrb[36].mxu1 %vm79_vm1, %v8613_v0 }
 0x102   :  { %6203 = vmatprep.mubr.msk.bf16.mxu1 %vm79_vm1, %v8619_v57 }
 0x103   :  { %6498 = vmatmul.mubr.msk.bf16.gmra.mrb[4].mxu0 %vm79_vm1, %v8467_v34 }
 0x104   :  { %6501 = vmatprep.mubr.msk.bf16.mxu0 %vm79_vm1, %v8471_v25 }
 0x109   :  { %6204 = vmatmul.mubr.msk.bf16.gmra.mrb[40].mxu1 %vm79_vm1, %v8292_v5 }
 0x10a   :  { %6207 = vmatprep.mubr.msk.bf16.mxu1 %vm79_vm1, %v8296_v22 }
 0x10b   :  { %6502 = vmatmul.mubr.msk.bf16.gmra.mrb[8].mxu0 %vm79_vm1, %v8486_v23 }
 0x10c   :  { %6505 = vmatprep.mubr.msk.bf16.mxu0 %vm79_vm1, %v8490_v30 }
 0x111   :  { %6208 = vmatmul.mubr.msk.bf16.gmra.mrb[44].mxu1 %vm79_vm1, %v8311_v44 }
 0x112   :  { %6211 = vmatprep.mubr.msk.bf16.mxu1 %vm79_vm1, %v8315_v56 }
 0x113   :  { %6506 = vmatmul.mubr.msk.bf16.gmra.mrb[12].mxu0 %vm79_vm1, %v8505_v17 }
 0x114   :  { %6509 = vmatprep.mubr.msk.bf16.mxu0 %vm79_vm1, %v8509_v3 }
 0x119   :  { %6212 = vmatmul.mubr.msk.bf16.gmra.mrb[48].mxu1 %vm79_vm1, %v8319_v24 }
 0x11a   :  { %6215 = vmatprep.mubr.msk.bf16.mxu1 %vm79_vm1, %v8325_v52 }
 0x11b   :  { %6510 = vmatmul.mubr.msk.bf16.gmra.mrb[16].mxu0 %vm79_vm1, %v8524_v9 }
 0x11c   :  { %6513 = vmatprep.mubr.msk.bf16.mxu0 %vm79_vm1, %v8528_v10 }
 0x121   :  { %6216 = vmatmul.mubr.msk.bf16.gmra.mrb[52].mxu1 %vm79_vm1, %v8329_v62 }
 0x122   :  { %6219 = vmatprep.mubr.msk.bf16.mxu1 %vm79_vm1, %v8333_v54 }
 0x123   :  { %6514 = vmatmul.mubr.msk.bf16.gmra.mrb[20].mxu0 %vm79_vm1, %v8543_v8 }
 0x124   :  { %6517 = vmatprep.mubr.msk.bf16.mxu0 %vm79_vm1, %v8553_v6 }
 0x129   :  { %6220 = vmatmul.mubr.msk.bf16.gmra.mrb[56].mxu1 %vm79_vm1, %v8337_v38 }
 0x12a   :  { %6223 = vmatprep.mubr.msk.bf16.mxu1 %vm79_vm1, %v8368_v27 }
 0x12b   :  { %6518 = vmatmul.mubr.msk.bf16.gmra.mrb[24].mxu0 %vm79_vm1, %v8570_v29 }
 0x12c   :  { %6521 = vmatprep.mubr.msk.bf16.mxu0 %vm79_vm1, %v8663_v60 }
 0x131   :  { %6224 = vmatmul.mubr.msk.bf16.gmra.mrb[60].mxu1 %vm79_vm1, %v8372_v1 }
 0x132   :  { %6229 = vmatprep.mubr.msk.bf16.mxu1 %vm79_vm1, %v1797_v36  ;;  %v9766_v36 = vld [vmem:[#allocation36_spill] sm:$0xff] }
 0x133   :  { %6522 = vmatmul.mubr.msk.bf16.gmra.mrb[28].mxu0 %vm79_vm1, %v3419_v13  ;;  %v9768_v13 = vld [vmem:[#allocation38_spill] sm:$0xff] }
 0x134   :  { %6525 = vmatprep.mubr.msk.bf16.mxu0 %vm79_vm1, %v8593_v15 }
 0x139   :  { %6230 = vmatmul.mubr.msk.bf16.vlgmr.msra.gmra.mrb[0].mxu1 %vm79_vm1, %v9763_v28  ;;  %v9771_v28 = vld [vmem:[#allocation44_spill] sm:$0xff] }
 0x13a   :  { %6294 = vmatpush3.bf16.msra.mxu1 %v2296_v51  ;;  %6233 = vmatprep.mubr.msk.bf16.mxu1 %vm79_vm1, %v9764_v40  ;;  %v9770_v51 = vld [vmem:[#allocation43_spill] sm:$0xff] }
 0x13b   :  { %6526 = vmatmul.mubr.msk.bf16.gmra.mrb[32].mxu0 %vm79_vm1, %v8613_v0  ;;  %7208 = vmatprep.subr.msk.bf16.mxu1 %vm891_vm0, %v7256_v16  ;;  %v9772_v16 = vld [vmem:[#allocation47_spill] sm:$0xff] }
 0x13c   :  { %6529 = vmatprep.mubr.msk.bf16.mxu0 %vm79_vm1, %v8619_v57 }
 0x141   :  { %6234 = vmatmul.mubr.msk.bf16.gmra.mrb[4].mxu1 %vm79_vm1, %v9765_v31 }
 0x142   :  { %6237 = vmatprep.mubr.msk.bf16.mxu1 %vm79_vm1, %v9766_v36 }
 0x143   :  { %6530 = vmatmul.mubr.msk.bf16.gmra.mrb[36].mxu0 %vm79_vm1, %v8292_v5 }
 0x144   :  { %6533 = vmatprep.mubr.msk.bf16.mxu0 %vm79_vm1, %v8296_v22 }
 0x149   :  { %6238 = vmatmul.mubr.msk.bf16.gmra.mrb[8].mxu1 %vm79_vm1, %v9767_v2 }
 0x14a   :  { %6241 = vmatprep.mubr.msk.bf16.mxu1 %vm79_vm1, %v9768_v13 }
 0x14b   :  { %6534 = vmatmul.mubr.msk.bf16.gmra.mrb[40].mxu0 %vm79_vm1, %v8311_v44 }
 0x14c   :  { %6537 = vmatprep.mubr.msk.bf16.mxu0 %vm79_vm1, %v8315_v56 }
 0x151   :  { %6242 = vmatmul.mubr.msk.bf16.gmra.mrb[12].mxu1 %vm79_vm1, %v9769_v37 }
 0x152   :  { %6245 = vmatprep.mubr.msk.bf16.mxu1 %vm79_vm1, %v9770_v51 }
 0x153   :  { %6538 = vmatmul.mubr.msk.bf16.gmra.mrb[44].mxu0 %vm79_vm1, %v8319_v24 }
 0x154   :  { %6541 = vmatprep.mubr.msk.bf16.mxu0 %vm79_vm1, %v8325_v52  ;;  %v1653_v52 = vrot.slane %v8572_v49, 2  ;;  %v8769_v49 = vld [vmem:[#allocation2 + $0x350] sm:$0xff] }
 0x159   :  { %6246 = vmatmul.mubr.msk.bf16.gmra.mrb[16].mxu1 %vm79_vm1, %v9771_v28 }
 0x15a   :  { %6249 = vmatprep.mubr.msk.bf16.mxu1 %vm79_vm1, %v9772_v16  ;;  %v1654_v16 = vrot.slane %v8574_v61, 2 }
 0x15b   :  { %6542 = vmatmul.mubr.msk.bf16.gmra.mrb[48].mxu0 %vm79_vm1, %v8329_v62  ;;  %v7257_v62 = vld [vmem:[#allocation2 + $0x1c0] sm:$0x3] }
 0x15c   :  { %6545 = vmatprep.mubr.msk.bf16.mxu0 %vm79_vm1, %v8333_v54  ;;  %v1656_v28 = vrot.slane %v7257_v62, 2  ;;  %v8759_v54 = vpack.c.bf16 %v8549_v42, %v8547_v41  ;;  %v1655_v61 = vsel %vm1572_vm5, %v1653_v52, %v1654_v16 }
 0x15e   :  { %v1657_v62 = vsel %vm1572_vm5, %v1654_v16, %v1656_v28  ;;  %v9774_v16 = vld [vmem:[#allocation4_spill] sm:$0xff] }
 0x15f   :  { %v9793_v28 = vld [vmem:[#allocation28_spill] sm:$0xff] }
 0x161   :  { %6250 = vmatmul.mubr.msk.bf16.gmra.mrb[20].mxu1 %vm79_vm1, %v9773_v63 }
 0x162   :  { %6253 = vmatprep.mubr.msk.bf16.mxu1 %vm79_vm1, %v8221_v47  ;;  %v8777_v47 = vld [vmem:[#allocation2 + $0x358] sm:$0x3] }
 0x163   :  { %6546 = vmatmul.mubr.msk.bf16.gmra.mrb[52].mxu0 %vm79_vm1, %v8337_v38 }
 0x164   :  { %6549 = vmatprep.mubr.msk.bf16.mxu0 %vm79_vm1, %v8368_v27  ;;  %v8767_v27 = vld [vmem:[#allocation2 + $0x348] sm:$0xff] }
 0x165   :  { %v3795_v38 = vrot.slane %v8767_v27, 1  ;;  %v3420_v63 = vpack.c.bf16 %v8769_v49, %v8767_v27 }
 0x169   :  { %6254 = vmatmul.mubr.msk.bf16.gmra.mrb[24].mxu1 %vm79_vm1, %v8270_v39  ;;  %v3796_v39 = vrot.slane %v8769_v49, 1 }
 0x16a   :  { %6257 = vmatprep.mubr.msk.bf16.mxu1 %vm79_vm1, %v8348_v12  ;;  %v1813_v12 = vpack.c.bf16 %v1657_v62, %v1655_v61  ;;  %v9781_v61 = vld [vmem:[#allocation11_spill] sm:$0xff]  ;;  %v9782_v62 = vld [vmem:[#allocation13_spill] sm:$0xff] }
 0x16b   :  { %6550 = vmatmul.mubr.msk.bf16.gmra.mrb[56].mxu0 %vm79_vm1, %v8372_v1  ;;  %v3798_v1 = vrot.slane %v8777_v47, 1  ;;  %v8783_v24 = vsel %vm533_vm4, %v3795_v38, %v3796_v39  ;;  %v9775_v38 = vld [vmem:[#allocation5_spill] sm:$0xff] }
 0x16c   :  { %6553 = vmatprep.mubr.msk.bf16.mxu0 %vm79_vm1, %v8759_v54 }
 0x16d   :  { %v8786_v52 = vsel %vm533_vm4, %v3796_v39, %v3798_v1  ;;  %v4197_v39 = vsel %vm891_vm0, %v8605_v55, 0  ;;  %v9776_v1 = vld [vmem:[#allocation6_spill] sm:$0xff]  ;;  %v9779_v55 = vld [vmem:[#allocation9_spill] sm:$0xff] }
 0x171   :  { %6258 = vmatmul.mubr.msk.bf16.gmra.mrb[28].mxu1 %vm79_vm1, %v8350_v59 }
 0x172   :  { %6261 = vmatprep.mubr.msk.bf16.mxu1 %vm79_vm1, %v1813_v12  ;;  %v9778_v12 = vld [vmem:[#allocation8_spill] sm:$0xff] }
 0x173   :  { %6554 = vmatmul.mubr.msk.bf16.gmra.mrb[60].mxu0 %vm79_vm1, %v3420_v63  ;;  %v9780_v63 = vld [vmem:[#allocation10_spill] sm:$0xff] }
 0x174   :  { %6559 = vmatprep.mubr.msk.bf16.mxu0 %vm79_vm1, %v9774_v16  ;;  %v9783_v16 = vld [vmem:[#allocation42_spill] sm:$0xff] }
 0x179   :  { %6262 = vmatmul.mubr.msk.bf16.gmra.mrb[32].mxu1 %vm79_vm1, %v8390_v19  ;;  %v9777_v19 = vld [vmem:[#allocation7_spill] sm:$0xff] }
 0x17a   :  { %6265 = vmatprep.mubr.msk.bf16.mxu1 %vm79_vm1, %v8417_v46 }
 0x17b   :  { %6560 = vmatmul.mubr.msk.bf16.vlgmr.msra.gmra.mrb[0].mxu0 %vm79_vm1, %v9775_v38  ;;  %v9785_v38 = vld [vmem:[#allocation14_spill] sm:$0xff] }
 0x17c   :  { %6624 = vmatpush3.bf16.msra.mxu0 %v4197_v39  ;;  %6563 = vmatprep.mubr.msk.bf16.mxu0 %vm79_vm1, %v9776_v1  ;;  %v9784_v39 = vld [vmem:[#allocation15_spill] sm:$0xff]  ;;  %v9786_v1 = vld [vmem:[#allocation20_spill] sm:$0xff] }
 0x181   :  { %6266 = vmatmul.mubr.msk.bf16.gmra.mrb[36].mxu1 %vm79_vm1, %v8419_v48 }
 0x182   :  { %6269 = vmatprep.mubr.msk.bf16.mxu1 %vm79_vm1, %v8452_v35 }
 0x183   :  { %6564 = vmatmul.mubr.msk.bf16.gmra.mrb[4].mxu0 %vm79_vm1, %v9777_v19  ;;  %v9787_v19 = vld [vmem:[#allocation51_spill] sm:$0xff] }
 0x184   :  { %6567 = vmatprep.mubr.msk.bf16.mxu0 %vm79_vm1, %v9778_v12  ;;  %v9788_v12 = vld [vmem:[#allocation55_spill] sm:$0xff] }
 0x189   :  { %6270 = vmatmul.mubr.msk.bf16.gmra.mrb[40].mxu1 %vm79_vm1, %v8454_v50 }
 0x18a   :  { %6273 = vmatprep.mubr.msk.bf16.mxu1 %vm79_vm1, %v9750_v20 }
 0x18b   :  { %6568 = vmatmul.mubr.msk.bf16.gmra.mrb[8].mxu0 %vm79_vm1, %v9779_v55  ;;  %v9789_v55 = vld [vmem:[#allocation21_spill] sm:$0xff] }
 0x18c   :  { %6571 = vmatprep.mubr.msk.bf16.mxu0 %vm79_vm1, %v9780_v63  ;;  %v9790_v63 = vld [vmem:[#allocation23_spill] sm:$0xff] }
 0x191   :  { %6274 = vmatmul.mubr.msk.bf16.gmra.mrb[44].mxu1 %vm79_vm1, %v8473_v45 }
 0x192   :  { %6277 = vmatprep.mubr.msk.bf16.mxu1 %vm79_vm1, %v9753_v32 }
 0x193   :  { %6572 = vmatmul.mubr.msk.bf16.gmra.mrb[12].mxu0 %vm79_vm1, %v9781_v61  ;;  %v9791_v61 = vld [vmem:[#allocation50_spill] sm:$0xff] }
 0x194   :  { %6575 = vmatprep.mubr.msk.bf16.mxu0 %vm79_vm1, %v9782_v62  ;;  %v9792_v62 = vld [vmem:[#allocation24_spill] sm:$0xff] }
 0x199   :  { %6278 = vmatmul.mubr.msk.bf16.gmra.mrb[48].mxu1 %vm79_vm1, %v9783_v16 }
 0x19a   :  { %6281 = vmatprep.mubr.msk.bf16.mxu1 %vm79_vm1, %v9784_v39 }
 0x19b   :  { %6576 = vmatmul.mubr.msk.bf16.gmra.mrb[16].mxu0 %vm79_vm1, %v9785_v38  ;;  %v4173_v38 = vrot.slane %v8671_v43, 2  ;;  %v9794_v43 = vld [vmem:[#allocation63_spill] sm:$0xff] }
 0x19c   :  { %6579 = vmatprep.mubr.msk.bf16.mxu0 %vm79_vm1, %v9786_v1  ;;  %v4174_v1 = vrot.slane %v8673_v58, 2  ;;  %v9795_v58 = vpack.c.bf16 %v8690_v33, %v8687_v11  ;;  %v9800_v11 = vld [vmem:[#allocation40_spill] sm:$0xff]  ;;  %v9803_v33 = vld [vmem:[#allocation46_spill] sm:$0xff] }
 0x1a1   :  { %6282 = vmatmul.mubr.msk.bf16.gmra.mrb[52].mxu1 %vm79_vm1, %v9787_v19 }
 0x1a2   :  { %6285 = vmatprep.mubr.msk.bf16.mxu1 %vm79_vm1, %v9788_v12 }
 0x1a3   :  { %6580 = vmatmul.mubr.msk.bf16.gmra.mrb[20].mxu0 %vm79_vm1, %v9789_v55  ;;  %v4176_v55 = vrot.slane %v8681_v53, 2  ;;  %v9796_v53 = vld [vmem:[#allocation31_spill] sm:$0xff] }
 0x1a4   :  { %6583 = vmatprep.mubr.msk.bf16.mxu0 %vm79_vm1, %v9790_v63  ;;  %v8858_v63 = vsel %vm1572_vm5, %v4173_v38, %v4174_v1  ;;  %v9798_v38 = vld [vmem:[#allocation34_spill] sm:$0xff] }
 0x1a9   :  { %6286 = vmatmul.mubr.msk.bf16.gmra.mrb[56].mxu1 %vm79_vm1, %v9791_v61  ;;  %v8861_v61 = vsel %vm1572_vm5, %v4174_v1, %v4176_v55  ;;  %v9799_v1 = vld [vmem:[#allocation35_spill] sm:$0xff]  ;;  %v9808_v55 = vld [vmem:[#allocation12_spill] sm:$0xff] }
 0x1aa   :  { %6289 = vmatprep.mubr.msk.bf16.mxu1 %vm79_vm1, %v8276_v21 }
 0x1ab   :  { %6584 = vmatmul.mubr.msk.bf16.gmra.mrb[24].mxu0 %vm79_vm1, %v9792_v62  ;;  %v4187_v62 = vpack.c.bf16 %v8861_v61, %v8858_v63 }
 0x1ac   :  { %6587 = vmatprep.mubr.msk.bf16.mxu0 %vm79_vm1, %v9793_v28  ;;  %v9797_v28 = vld [vmem:[#allocation3_spill] sm:$0xff] }
 0x1b1   :  { %6290 = vmatmul.mubr.msk.bf16.gmra.mrb[60].mxu1 %vm79_vm1, %v8555_v26 }
 0x1b2   :  { %6295 = vmatprep.mubr.msk.bf16.mxu1 %vm79_vm1, %v9794_v43  ;;  %v2665_v43 = vrot.slane %v9808_v55, 1 }
 0x1b3   :  { %6588 = vmatmul.mubr.msk.bf16.gmra.mrb[28].mxu0 %vm79_vm1, %v9795_v58 }
 0x1b4   :  { %6591 = vmatprep.mubr.msk.bf16.mxu0 %vm79_vm1, %v9796_v53 }
 0x1b9   :  { %6296 = vmatmul.mubr.msk.bf16.vlgmr.msra.gmra.mrb[0].mxu1 %vm79_vm1, %v8411_v4  ;;  %v9801_v4 = vld [vmem:[#allocation41_spill] sm:$0xff] }
 0x1ba   :  { %6690 = vmatpush3.bf16.msra.mxu1 %v9797_v28  ;;  %6299 = vmatprep.mubr.msk.bf16.mxu1 %vm79_vm1, %v8443_v7  ;;  %v9802_v7 = vld [vmem:[#allocation45_spill] sm:$0xff] }
 0x1bb   :  { %6592 = vmatmul.mubr.msk.bf16.gmra.mrb[32].mxu0 %vm79_vm1, %v9798_v38 }
 0x1bc   :  { %6595 = vmatprep.mubr.msk.bf16.mxu0 %vm79_vm1, %v9799_v1 }
 0x1c1   :  { %6300 = vmatmul.mubr.msk.bf16.gmra.mrb[4].mxu1 %vm79_vm1, %v8450_v18  ;;  %v9804_v18 = vld [vmem:[#allocation48_spill] sm:$0xff] }
 0x1c2   :  { %6303 = vmatprep.mubr.msk.bf16.mxu1 %vm79_vm1, %v8467_v34  ;;  %v9805_v34 = vld [vmem:[#allocation52_spill] sm:$0xff] }
 0x1c3   :  { %6596 = vmatmul.mubr.msk.bf16.gmra.mrb[36].mxu0 %vm79_vm1, %v9800_v11 }
 0x1c4   :  { %6599 = vmatprep.mubr.msk.bf16.mxu0 %vm79_vm1, %v9801_v4 }
 0x1c9   :  { %6304 = vmatmul.mubr.msk.bf16.gmra.mrb[8].mxu1 %vm79_vm1, %v8471_v25  ;;  %v9806_v25 = vld [vmem:[#allocation54_spill] sm:$0xff] }
 0x1ca   :  { %6307 = vmatprep.mubr.msk.bf16.mxu1 %vm79_vm1, %v8486_v23  ;;  %v9807_v23 = vld [vmem:[#allocation56_spill] sm:$0xff] }
 0x1cb   :  { %6600 = vmatmul.mubr.msk.bf16.gmra.mrb[40].mxu0 %vm79_vm1, %v9802_v7 }
 0x1cc   :  { %6603 = vmatprep.mubr.msk.bf16.mxu0 %vm79_vm1, %v9803_v33 }
 0x1d1   :  { %6308 = vmatmul.mubr.msk.bf16.gmra.mrb[12].mxu1 %vm79_vm1, %v8490_v30  ;;  %v2662_v30 = vrot.slane %v8547_v41, 1  ;;  %v9811_v41 = vld [vmem:[#allocation26_spill] sm:$0xff] }
 0x1d2   :  { %6311 = vmatprep.mubr.msk.bf16.mxu1 %vm79_vm1, %v8505_v17  ;;  %v2663_v17 = vrot.slane %v8549_v42, 1  ;;  %v4179_v42 = vrot.slane %v8769_v49, 2 }
 0x1d3   :  { %6604 = vmatmul.mubr.msk.bf16.gmra.mrb[44].mxu0 %vm79_vm1, %v9804_v18 }
 0x1d4   :  { %6607 = vmatprep.mubr.msk.bf16.mxu0 %vm79_vm1, %v9805_v34  ;;  %v2664_v58 = vsel %vm533_vm4, %v2662_v30, %v2663_v17  ;;  %v2666_v28 = vsel %vm533_vm4, %v2663_v17, %v2665_v43  ;;  %v4181_v30 = vrot.slane %v8777_v47, 2  ;;  %v9813_v47 = vld [vmem:[#allocation17_spill] sm:$0xff] }
 0x1d9   :  { %6312 = vmatmul.mubr.msk.bf16.gmra.mrb[16].mxu1 %vm79_vm1, %v8509_v3  ;;  %v9809_v3 = vld [vmem:[#allocation60_spill] sm:$0xff] }
 0x1da   :  { %6315 = vmatprep.mubr.msk.bf16.mxu1 %vm79_vm1, %v8524_v9  ;;  %v9810_v9 = vld [vmem:[#allocation61_spill] sm:$0xff] }
 0x1db   :  { %6608 = vmatmul.mubr.msk.bf16.gmra.mrb[48].mxu0 %vm79_vm1, %v9806_v25 }
 0x1dc   :  { %6611 = vmatprep.mubr.msk.bf16.mxu0 %vm79_vm1, %v9807_v23 }
 0x1e1   :  { %6316 = vmatmul.mubr.msk.bf16.gmra.mrb[20].mxu1 %vm79_vm1, %v8528_v10  ;;  %v8929_v10 = vpack.c.bf16 %v2666_v28, %v2664_v58 }
 0x1e2   :  { %6319 = vmatprep.mubr.msk.bf16.mxu1 %vm79_vm1, %v8543_v8  ;;  %v4178_v8 = vrot.slane %v8767_v27, 2  ;;  %v9812_v27 = vpack.c.bf16 %v8786_v52, %v8783_v24  ;;  %v9815_v24 = vld [vmem:[#allocation47_spill] sm:$0xff] }
 0x1e3   :  { %6612 = vmatmul.mubr.msk.bf16.gmra.mrb[52].mxu0 %vm79_vm1, %v9809_v3 }
 0x1e4   :  { %6615 = vmatprep.mubr.msk.bf16.mxu0 %vm79_vm1, %v9810_v9  ;;  %v8943_v17 = vsel %vm1572_vm5, %v4178_v8, %v4179_v42 }
 0x1e9   :  { %6320 = vmatmul.mubr.msk.bf16.gmra.mrb[24].mxu1 %vm79_vm1, %v8553_v6  ;;  %v8946_v6 = vsel %vm1572_vm5, %v4179_v42, %v4181_v30 }
 0x1ea   :  { %6323 = vmatprep.mubr.msk.bf16.mxu1 %vm79_vm1, %v8570_v29  ;;  %v4188_v29 = vpack.c.bf16 %v8946_v6, %v8943_v17 }
 0x1eb   :  { %6616 = vmatmul.mubr.msk.bf16.gmra.mrb[56].mxu0 %vm79_vm1, %v9811_v41 }
 0x1ec   :  { %6619 = vmatprep.mubr.msk.bf16.mxu0 %vm79_vm1, %v8929_v10 }
 0x1f1   :  { %6324 = vmatmul.mubr.msk.bf16.gmra.mrb[28].mxu1 %vm79_vm1, %v8663_v60  ;;  %v9823_v60 = vld [vmem:[#allocation62_spill] sm:$0xff] }
 0x1f2   :  { %6327 = vmatprep.mubr.msk.bf16.mxu1 %vm79_vm1, %v8589_v14  ;;  %v9818_v14 = vld [vmem:[#allocation49_spill] sm:$0xff] }
 0x1f3   :  { %6620 = vmatmul.mubr.msk.bf16.gmra.mrb[60].mxu0 %vm79_vm1, %v9812_v27 }
 0x1f4   :  { %6625 = vmatprep.mubr.msk.bf16.mxu0 %vm79_vm1, %v9764_v40  ;;  %v9824_v40 = vld [vmem:[#allocation22_spill] sm:$0xff] }
 0x1f9   :  { %6328 = vmatmul.mubr.msk.bf16.gmra.mrb[32].mxu1 %vm79_vm1, %v8593_v15  ;;  %v9819_v15 = vld [vmem:[#allocation53_spill] sm:$0xff] }
 0x1fa   :  { %6331 = vmatprep.mubr.msk.bf16.mxu1 %vm79_vm1, %v8613_v0  ;;  %v9821_v0 = vld [vmem:[#allocation59_spill] sm:$0xff] }
 0x1fb   :  { %6626 = vmatmul.mubr.msk.bf16.vlgmr.msra.gmra.mrb[0].mxu0 %vm79_vm1, %v9765_v31  ;;  %v9825_v31 = vld [vmem:[#allocation25_spill] sm:$0xff] }
 0x1fc   :  { %6629 = vmatprep.mubr.msk.bf16.mxu0 %vm79_vm1, %v9766_v36  ;;  %v9826_v36 = vld [vmem:[#allocation27_spill] sm:$0xff] }
 0x201   :  { %6332 = vmatmul.mubr.msk.bf16.gmra.mrb[36].mxu1 %vm79_vm1, %v8619_v57  ;;  %v9822_v57 = vld [vmem:[#allocation57_spill] sm:$0xff] }
 0x202   :  { %6335 = vmatprep.mubr.msk.bf16.mxu1 %vm79_vm1, %v8292_v5  ;;  %v9814_v5 = vld [vmem:[#allocation44_spill] sm:$0xff] }
 0x203   :  { %6630 = vmatmul.mubr.msk.bf16.gmra.mrb[4].mxu0 %vm79_vm1, %v9767_v2  ;;  %v9827_v2 = vld [vmem:[#allocation30_spill] sm:$0xff] }
 0x204   :  { %6633 = vmatprep.mubr.msk.bf16.mxu0 %vm79_vm1, %v9768_v13 }
 0x209   :  { %6336 = vmatmul.mubr.msk.bf16.gmra.mrb[40].mxu1 %vm79_vm1, %v8296_v22  ;;  %v9816_v22 = vld [vmem:[#allocation18_spill] sm:$0xff] }
 0x20a   :  { %6339 = vmatprep.mubr.msk.bf16.mxu1 %vm79_vm1, %v8311_v44  ;;  %v9817_v44 = vld [vmem:[#allocation19_spill] sm:$0xff] }
 0x20b   :  { %6634 = vmatmul.mubr.msk.bf16.gmra.mrb[8].mxu0 %vm79_vm1, %v9769_v37 }
 0x20c   :  { %6637 = vmatprep.mubr.msk.bf16.mxu0 %vm79_vm1, %v9770_v51 }
 0x211   :  { %6340 = vmatmul.mubr.msk.bf16.gmra.mrb[44].mxu1 %vm79_vm1, %v8315_v56  ;;  %v9820_v56 = vld [vmem:[#allocation58_spill] sm:$0xff] }
 0x212   :  { %6343 = vmatprep.mubr.msk.bf16.mxu1 %vm79_vm1, %v9813_v47 }
 0x213   :  { %6638 = vmatmul.mubr.msk.bf16.gmra.mrb[12].mxu0 %vm79_vm1, %v9814_v5 }
 0x214   :  { %6641 = vmatprep.mubr.msk.bf16.mxu0 %vm79_vm1, %v9815_v24 }
 0x219   :  { %6344 = vmatmul.mubr.msk.bf16.gmra.mrb[48].mxu1 %vm79_vm1, %v9816_v22 }
 0x21a   :  { %6347 = vmatprep.mubr.msk.bf16.mxu1 %vm79_vm1, %v9817_v44 }
 0x21b   :  { %6642 = vmatmul.mubr.msk.bf16.gmra.mrb[16].mxu0 %vm79_vm1, %v9818_v14 }
 0x21c   :  { %6645 = vmatprep.mubr.msk.bf16.mxu0 %vm79_vm1, %v9819_v15 }
 0x221   :  { %6348 = vmatmul.mubr.msk.bf16.gmra.mrb[52].mxu1 %vm79_vm1, %v9820_v56 }
 0x222   :  { %6351 = vmatprep.mubr.msk.bf16.mxu1 %vm79_vm1, %v9821_v0 }
 0x223   :  { %6646 = vmatmul.mubr.msk.bf16.gmra.mrb[20].mxu0 %vm79_vm1, %v9822_v57 }
 0x224   :  { %6649 = vmatprep.mubr.msk.bf16.mxu0 %vm79_vm1, %v9823_v60 }
 0x229   :  { %6352 = vmatmul.mubr.msk.bf16.gmra.mrb[56].mxu1 %vm79_vm1, %v9824_v40 }
 0x22a   :  { %6355 = vmatprep.mubr.msk.bf16.mxu1 %vm79_vm1, %v9825_v31 }
 0x22b   :  { %6650 = vmatmul.mubr.msk.bf16.gmra.mrb[24].mxu0 %vm79_vm1, %v8350_v59 }
 0x22c   :  { %6653 = vmatprep.mubr.msk.bf16.mxu0 %vm79_vm1, %v9826_v36 }
 0x231   :  { %6356 = vmatmul.mubr.msk.bf16.gmra.mrb[60].mxu1 %vm79_vm1, %v8759_v54  ;;  %v9829_v54 = vld [vmem:[#allocation16_spill] sm:$0xff] }
 0x232   :  { %6393 = vmatprep.mubr.msk.bf16.mxu1 %vm79_vm1, %v9827_v2 }
 0x233   :  { %6654 = vmatmul.mubr.msk.bf16.gmra.mrb[28].mxu0 %vm79_vm1, %v4187_v62 }
 0x234   :  { %6657 = vmatprep.mubr.msk.bf16.mxu0 %vm79_vm1, %v8417_v46 }
 0x239   :  { %6394 = vmatmul.mubr.msk.bf16.vlgmr.msra.gmra.mrb[32].mxu1 %vm79_vm1, %v9796_v53 }
 0x23a   :  { %6397 = vmatprep.mubr.msk.bf16.mxu1 %vm79_vm1, %v9798_v38 }
 0x23b   :  { %6658 = vmatmul.mubr.msk.bf16.gmra.mrb[32].mxu0 %vm79_vm1, %v8419_v48 }
 0x23c   :  { %6661 = vmatprep.mubr.msk.bf16.mxu0 %vm79_vm1, %v8452_v35  ;;  %v9828_v35 = vld [vmem:[#allocation50_spill] sm:$0xff] }
 0x241   :  { %6398 = vmatmul.mubr.msk.bf16.gmra.mrb[36].mxu1 %vm79_vm1, %v9799_v1 }
 0x242   :  { %6401 = vmatprep.mubr.msk.bf16.mxu1 %vm79_vm1, %v9800_v11 }
 0x243   :  { %6662 = vmatmul.mubr.msk.bf16.gmra.mrb[36].mxu0 %vm79_vm1, %v8454_v50 }
 0x244   :  { %6665 = vmatprep.mubr.msk.bf16.mxu0 %vm79_vm1, %v9750_v20 }
 0x249   :  { %6402 = vmatmul.mubr.msk.bf16.gmra.mrb[40].mxu1 %vm79_vm1, %v9801_v4 }
 0x24a   :  { %6405 = vmatprep.mubr.msk.bf16.mxu1 %vm79_vm1, %v9802_v7 }
 0x24b   :  { %6666 = vmatmul.mubr.msk.bf16.gmra.mrb[40].mxu0 %vm79_vm1, %v8473_v45 }
 0x24c   :  { %6669 = vmatprep.mubr.msk.bf16.mxu0 %vm79_vm1, %v9753_v32 }
 0x251   :  { %6406 = vmatmul.mubr.msk.bf16.gmra.mrb[44].mxu1 %vm79_vm1, %v9803_v33 }
 0x252   :  { %6409 = vmatprep.mubr.msk.bf16.mxu1 %vm79_vm1, %v9804_v18 }
 0x253   :  { %6670 = vmatmul.mubr.msk.bf16.gmra.mrb[44].mxu0 %vm79_vm1, %v9783_v16 }
 0x254   :  { %6673 = vmatprep.mubr.msk.bf16.mxu0 %vm79_vm1, %v9784_v39 }
 0x259   :  { %6410 = vmatmul.mubr.msk.bf16.gmra.mrb[48].mxu1 %vm79_vm1, %v9805_v34 }
 0x25a   :  { %6413 = vmatprep.mubr.msk.bf16.mxu1 %vm79_vm1, %v9806_v25 }
 0x25b   :  { %6674 = vmatmul.mubr.msk.bf16.gmra.mrb[48].mxu0 %vm79_vm1, %v9787_v19 }
 0x25c   :  { %6677 = vmatprep.mubr.msk.bf16.mxu0 %vm79_vm1, %v9788_v12 }
 0x261   :  { %6414 = vmatmul.mubr.msk.bf16.gmra.mrb[52].mxu1 %vm79_vm1, %v9807_v23 }
 0x262   :  { %6417 = vmatprep.mubr.msk.bf16.mxu1 %vm79_vm1, %v9809_v3 }
 0x263   :  { %6678 = vmatmul.mubr.msk.bf16.gmra.mrb[52].mxu0 %vm79_vm1, %v9828_v35 }
 0x264   :  { %6681 = vmatprep.mubr.msk.bf16.mxu0 %vm79_vm1, %v8276_v21 }
 0x269   :  { %6418 = vmatmul.mubr.msk.bf16.gmra.mrb[56].mxu1 %vm79_vm1, %v9810_v9 }
 0x26a   :  { %6421 = vmatprep.mubr.msk.bf16.mxu1 %vm79_vm1, %v9811_v41 }
 0x26b   :  { %6682 = vmatmul.mubr.msk.bf16.gmra.mrb[56].mxu0 %vm79_vm1, %v8555_v26 }
 0x26c   :  { %6685 = vmatprep.mubr.msk.bf16.mxu0 %vm79_vm1, %v9829_v54 }
 0x271   :  { %6422 = vmatmul.mubr.msk.bf16.gmra.mrb[60].mxu1 %vm79_vm1, %v8929_v10 }
 0x273   :  { %6686 = vmatmul.mubr.msk.bf16.gmra.mrb[60].mxu0 %vm79_vm1, %v4188_v29 }
 0x28c   :  { %v6297_v21 = vpop.f32.mrb[0].mxu1 }
 0x28d   :  { %v2332_v46 = vpop.f32.mrb[1].mxu1 }
 0x28e   :  { %v6298_v59 = vpop.f32.mrb[2].mxu1 }
 0x28f   :  { %v2335_v48 = vpop.f32.mrb[3].mxu1 }
 0x294   :  { %v6301_v50 = vpop.f32.mrb[4].mxu1 }
 0x295   :  { %v2348_v45 = vpop.f32.mrb[5].mxu1 }
 0x296   :  { %v9088_v20 = vpop.f32.mrb[6].mxu1 }
 0x297   :  { %v9090_v32 = vpop.f32.mrb[7].mxu1 }
 0x29c   :  { %v9092_v26 = vpop.f32.mrb[8].mxu1 }
 0x29d   :  { %v9094_v13 = vpop.f32.mrb[9].mxu1 }
 0x29e   :  { %v9096_v37 = vpop.f32.mrb[10].mxu1 }
 0x29f   :  { %v9098_v51 = vpop.f32.mrb[11].mxu1 }
 0x2a4   :  { %v9100_v49 = vpop.f32.mrb[12].mxu1 }
 0x2a5   :  { %v9102_v52 = vpop.f32.mrb[13].mxu1 }
 0x2a6   :  { %v9104_v16 = vpop.f32.mrb[14].mxu1 }
 0x2a7   :  { %v9106_v39 = vpop.f32.mrb[15].mxu1 }
 0x2ac   :  { %v9108_v19 = vpop.f32.mrb[16].mxu1 }
 0x2ad   :  { %v9110_v12 = vpop.f32.mrb[17].mxu1 }
 0x2ae   :  { %v9112_v61 = vpop.f32.mrb[18].mxu1 }
 0x2af   :  { %v9114_v63 = vpop.f32.mrb[19].mxu1 }
 0x2b4   :  { %v9116_v62 = vpop.f32.mrb[20].mxu1 }
 0x2b5   :  { %v9118_v53 = vpop.f32.mrb[21].mxu1 }
 0x2b6   :  { %v9120_v38 = vpop.f32.mrb[22].mxu1 }
 0x2b7   :  { %v9122_v1 = vpop.f32.mrb[23].mxu1 }
 0x2bc   :  { %v9124_v11 = vpop.f32.mrb[24].mxu1 }
 0x2bd   :  { %v9126_v4 = vpop.f32.mrb[25].mxu1 }
 0x2be   :  { %v9128_v7 = vpop.f32.mrb[26].mxu1 }
 0x2bf   :  { %v9130_v33 = vpop.f32.mrb[27].mxu1 }
 0x2c4   :  { %v9132_v18 = vpop.f32.mrb[28].mxu1 }
 0x2c5   :  { %v9134_v34 = vpop.f32.mrb[29].mxu1 }
 0x2c6   :  { %v9136_v25 = vpop.f32.mrb[30].mxu1 }
 0x2c7   :  { %v9138_v23 = vpop.f32.mrb[31].mxu1 }
 0x2ce   :  { %v6627_v55 = vpop.f32.mrb[0].mxu0 }
 0x2cf   :  { %v6691_v43 = vadd.f32 %v6627_v55, %v6297_v21  ;;  %v4233_v3 = vpop.f32.mrb[1].mxu0 }
 0x2d0   :  { %v6692_v9 = vadd.f32 %v4233_v3, %v2332_v46  ;;  %v6628_v58 = vpop.f32.mrb[2].mxu0 }
 0x2d1   :  { %v5577_v28 = vpack.c.bf16 %v6691_v43, %v6691_v43  ;;  %v6693_v10 = vadd.f32 %v6628_v58, %v6298_v59  ;;  %v4236_v41 = vpop.f32.mrb[3].mxu0  ;;  %v5011_v17 = vmul.f32 %v6691_v43, %v6691_v43  ;;  %v4877_v44 = vsel %vm4873_vm7, %v6691_v43, 0.0 }
 0x2d2   :  { %v5575_v8 = vpack.c.bf16 %v6692_v9, %v6692_v9  ;;  %v5009_v42 = vmul.f32 %v6692_v9, %v6692_v9  ;;  %v6694_v30 = vadd.f32 %v4236_v41, %v2335_v48  ;;  %v4874_v29 = vsel %vm4873_vm7, %v6692_v9, 0.0 }
 0x2d3   :  { %4811 = vst.msk [vmem:[%s9558_s2 + $0x8] sm:$0xf] %vm4808_vm6, %v5577_v28  ;;  %v5578_v6 = vpack.c.bf16 %v6693_v10, %v6693_v10  ;;  %v5012_v24 = vmul.f32 %v6693_v10, %v6693_v10  ;;  %v5076_v31 = vsel %vm4873_vm7, %v5011_v17, 0.0  ;;  %v4879_v35 = vsel %vm4873_vm7, %v6693_v10, 0.0 }
 0x2d4   :  { %4809 = vst.msk [vmem:[%s9558_s2] sm:$0xf] %vm4808_vm6, %v5575_v8  ;;  %v5576_v27 = vpack.c.bf16 %v6694_v30, %v6694_v30  ;;  %v4875_v47 = vsel %vm4873_vm7, %v6694_v30, 0.0  ;;  %v5010_v5 = vmul.f32 %v6694_v30, %v6694_v30  ;;  %v5073_v14 = vsel %vm4873_vm7, %v5009_v42, 0.0 }
 0x2d5   :  { %4812 = vst.msk [vmem:[%s9558_s2 + $0xc] sm:$0xf] %vm4808_vm6, %v5578_v6  ;;  %v4876_v22 = vadd.f32 %v4875_v47, %v4874_v29  ;;  %v5078_v54 = vsel %vm4873_vm7, %v5012_v24, 0.0 }
 0x2d6   :  { %4810 = vst.msk [vmem:[%s9558_s2 + $0x4] sm:$0xf] %vm4808_vm6, %v5576_v27  ;;  %v5074_v15 = vsel %vm4873_vm7, %v5010_v5, 0.0  ;;  %v6631_v56 = vpop.f32.mrb[4].mxu0 }
 0x2d7   :  { %v4878_v0 = vadd.f32 %v4877_v44, %v4876_v22  ;;  %v5075_v57 = vadd.f32 %v5074_v15, %v5073_v14  ;;  %v6695_v60 = vadd.f32 %v6631_v56, %v6301_v50  ;;  %v4249_v40 = vpop.f32.mrb[5].mxu0 }
 0x2d8   :  { %v6696_v36 = vadd.f32 %v4249_v40, %v2348_v45  ;;  %v6632_v2 = vpop.f32.mrb[6].mxu0 }
 0x2d9   :  { %v5077_v21 = vadd.f32 %v5076_v31, %v5075_v57  ;;  %v5581_v46 = vpack.c.bf16 %v6695_v60, %v6695_v60  ;;  %v4252_v59 = vpop.f32.mrb[7].mxu0  ;;  %v4880_v55 = vadd.f32 %v4879_v35, %v4878_v0  ;;  %v6697_v45 = vadd.f32 %v6632_v2, %v9088_v20 }
 0x2da   :  { %v5579_v48 = vpack.c.bf16 %v6696_v36, %v6696_v36  ;;  %v4881_v43 = vsel %vm4873_vm7, %v6696_v36, 0.0  ;;  %v5013_v3 = vmul.f32 %v6696_v36, %v6696_v36  ;;  %v6698_v9 = vadd.f32 %v4252_v59, %v9090_v32 }
 0x2db   :  { %4815 = vst.msk [vmem:[%s9558_s2 + $0x18] sm:$0xf] %vm4808_vm6, %v5581_v46  ;;  %v5079_v50 = vadd.f32 %v5078_v54, %v5077_v21  ;;  %v4882_v58 = vadd.f32 %v4881_v43, %v4880_v55  ;;  %v5015_v10 = vmul.f32 %v6695_v60, %v6695_v60  ;;  %v5582_v8 = vpack.c.bf16 %v6697_v45, %v6697_v45 }
 0x2dc   :  { %4813 = vst.msk [vmem:[%s9558_s2 + $0x10] sm:$0xf] %vm4808_vm6, %v5579_v48  ;;  %v5080_v28 = vsel %vm4873_vm7, %v5013_v3, 0.0  ;;  %v5580_v42 = vpack.c.bf16 %v6698_v9, %v6698_v9  ;;  %v4883_v30 = vsel %vm4873_vm7, %v6698_v9, 0.0  ;;  %v5014_v17 = vmul.f32 %v6698_v9, %v6698_v9 }
 0x2dd   :  { %v5081_v41 = vadd.f32 %v5080_v28, %v5079_v50  ;;  %4816 = vst.msk [vmem:[%s9558_s2 + $0x1c] sm:$0xf] %vm4808_vm6, %v5582_v8  ;;  %v4884_v20 = vadd.f32 %v4883_v30, %v4882_v58  ;;  %v4885_v27 = vsel %vm4873_vm7, %v6695_v60, 0.0  ;;  %v5016_v47 = vmul.f32 %v6697_v45, %v6697_v45 }
 0x2de   :  { %v6635_v6 = vpop.f32.mrb[8].mxu0  ;;  %4814 = vst.msk [vmem:[%s9558_s2 + $0x14] sm:$0xf] %vm4808_vm6, %v5580_v42  ;;  %v5082_v5 = vsel %vm4873_vm7, %v5014_v17, 0.0  ;;  %v5084_v44 = vsel %vm4873_vm7, %v5015_v10, 0.0  ;;  %v4887_v0 = vsel %vm4873_vm7, %v6697_v45, 0.0 }
 0x2df   :  { %v6699_v32 = vadd.f32 %v6635_v6, %v9092_v26  ;;  %v4265_v29 = vpop.f32.mrb[9].mxu0  ;;  %v4886_v14 = vadd.f32 %v4885_v27, %v4884_v20  ;;  %v5083_v15 = vadd.f32 %v5082_v5, %v5081_v41  ;;  %v5086_v35 = vsel %vm4873_vm7, %v5016_v47, 0.0 }
 0x2e0   :  { %v6700_v24 = vadd.f32 %v4265_v29, %v9094_v13  ;;  %v6636_v22 = vpop.f32.mrb[10].mxu0 }
 0x2e1   :  { %v5585_v56 = vpack.c.bf16 %v6699_v32, %v6699_v32  ;;  %v4268_v26 = vpop.f32.mrb[11].mxu0  ;;  %v5085_v31 = vadd.f32 %v5084_v44, %v5083_v15  ;;  %v4888_v13 = vadd.f32 %v4887_v0, %v4886_v14  ;;  %v6701_v36 = vadd.f32 %v6636_v22, %v9096_v37 }
 0x2e2   :  { %v5583_v57 = vpack.c.bf16 %v6700_v24, %v6700_v24  ;;  %v4889_v60 = vsel %vm4873_vm7, %v6700_v24, 0.0  ;;  %v5017_v40 = vmul.f32 %v6700_v24, %v6700_v24  ;;  %v6702_v2 = vadd.f32 %v4268_v26, %v9098_v51 }
 0x2e3   :  { %4819 = vst.msk [vmem:[%s9558_s2 + $0x28] sm:$0xf] %vm4808_vm6, %v5585_v56  ;;  %v5019_v21 = vmul.f32 %v6699_v32, %v6699_v32  ;;  %v4890_v46 = vadd.f32 %v4889_v60, %v4888_v13  ;;  %v5087_v59 = vadd.f32 %v5086_v35, %v5085_v31  ;;  %v5586_v48 = vpack.c.bf16 %v6701_v36, %v6701_v36 }
 0x2e4   :  { %4817 = vst.msk [vmem:[%s9558_s2 + $0x20] sm:$0xf] %vm4808_vm6, %v5583_v57  ;;  %v5088_v54 = vsel %vm4873_vm7, %v5017_v40, 0.0  ;;  %v5584_v55 = vpack.c.bf16 %v6702_v2, %v6702_v2  ;;  %v4891_v43 = vsel %vm4873_vm7, %v6702_v2, 0.0  ;;  %v5018_v3 = vmul.f32 %v6702_v2, %v6702_v2 }
 0x2e5   :  { %v5089_v50 = vadd.f32 %v5088_v54, %v5087_v59  ;;  %4820 = vst.msk [vmem:[%s9558_s2 + $0x2c] sm:$0xf] %vm4808_vm6, %v5586_v48  ;;  %v4892_v51 = vadd.f32 %v4891_v43, %v4890_v46  ;;  %v4893_v58 = vsel %vm4873_vm7, %v6699_v32, 0.0  ;;  %v5020_v28 = vmul.f32 %v6701_v36, %v6701_v36 }
 0x2e6   :  { %v6639_v37 = vpop.f32.mrb[12].mxu0  ;;  %4818 = vst.msk [vmem:[%s9558_s2 + $0x24] sm:$0xf] %vm4808_vm6, %v5584_v55  ;;  %v5090_v10 = vsel %vm4873_vm7, %v5018_v3, 0.0  ;;  %v5092_v42 = vsel %vm4873_vm7, %v5019_v21, 0.0  ;;  %v4895_v20 = vsel %vm4873_vm7, %v6701_v36, 0.0 }
 0x2e7   :  { %v6703_v45 = vadd.f32 %v6639_v37, %v9100_v49  ;;  %v4281_v9 = vpop.f32.mrb[13].mxu0  ;;  %v4894_v30 = vadd.f32 %v4893_v58, %v4892_v51  ;;  %v5091_v17 = vadd.f32 %v5090_v10, %v5089_v50  ;;  %v5094_v22 = vsel %vm4873_vm7, %v5020_v28, 0.0 }
 0x2e8   :  { %v6704_v41 = vadd.f32 %v4281_v9, %v9102_v52  ;;  %v6640_v8 = vpop.f32.mrb[14].mxu0 }
 0x2e9   :  { %v5589_v6 = vpack.c.bf16 %v6703_v45, %v6703_v45  ;;  %v4284_v49 = vpop.f32.mrb[15].mxu0  ;;  %v5093_v47 = vadd.f32 %v5092_v42, %v5091_v17  ;;  %v4896_v52 = vadd.f32 %v4895_v20, %v4894_v30  ;;  %v6705_v5 = vadd.f32 %v6640_v8, %v9104_v16 }
 0x2ea   :  { %v5587_v32 = vpack.c.bf16 %v6704_v41, %v6704_v41  ;;  %v4897_v29 = vsel %vm4873_vm7, %v6704_v41, 0.0  ;;  %v5021_v27 = vmul.f32 %v6704_v41, %v6704_v41  ;;  %v6706_v24 = vadd.f32 %v4284_v49, %v9106_v39 }
 0x2eb   :  { %4823 = vst.msk [vmem:[%s9558_s2 + $0x38] sm:$0xf] %vm4808_vm6, %v5589_v6  ;;  %v5023_v14 = vmul.f32 %v6703_v45, %v6703_v45  ;;  %v4898_v15 = vadd.f32 %v4897_v29, %v4896_v52  ;;  %v5095_v56 = vadd.f32 %v5094_v22, %v5093_v47  ;;  %v5590_v26 = vpack.c.bf16 %v6705_v5, %v6705_v5 }
 0x2ec   :  { %4821 = vst.msk [vmem:[%s9558_s2 + $0x30] sm:$0xf] %vm4808_vm6, %v5587_v32  ;;  %v5096_v44 = vsel %vm4873_vm7, %v5021_v27, 0.0  ;;  %v5588_v0 = vpack.c.bf16 %v6706_v24, %v6706_v24  ;;  %v4899_v57 = vsel %vm4873_vm7, %v6706_v24, 0.0  ;;  %v5022_v60 = vmul.f32 %v6706_v24, %v6706_v24 }
 0x2ed   :  { %v5097_v40 = vadd.f32 %v5096_v44, %v5095_v56  ;;  %4824 = vst.msk [vmem:[%s9558_s2 + $0x3c] sm:$0xf] %vm4808_vm6, %v5590_v26  ;;  %v4900_v39 = vadd.f32 %v4899_v57, %v4898_v15  ;;  %v4901_v36 = vsel %vm4873_vm7, %v6703_v45, 0.0  ;;  %v5024_v2 = vmul.f32 %v6705_v5, %v6705_v5 }
 0x2ee   :  { %v6643_v16 = vpop.f32.mrb[16].mxu0  ;;  %4822 = vst.msk [vmem:[%s9558_s2 + $0x34] sm:$0xf] %vm4808_vm6, %v5588_v0  ;;  %v5098_v35 = vsel %vm4873_vm7, %v5022_v60, 0.0  ;;  %v5100_v46 = vsel %vm4873_vm7, %v5023_v14, 0.0  ;;  %v4903_v43 = vsel %vm4873_vm7, %v6705_v5, 0.0 }
 0x2ef   :  { %v6707_v31 = vadd.f32 %v6643_v16, %v9108_v19  ;;  %v4297_v13 = vpop.f32.mrb[17].mxu0  ;;  %v4902_v59 = vadd.f32 %v4901_v36, %v4900_v39  ;;  %v5099_v48 = vadd.f32 %v5098_v35, %v5097_v40  ;;  %v5102_v58 = vsel %vm4873_vm7, %v5024_v2, 0.0 }
 0x2f0   :  { %v6708_v54 = vadd.f32 %v4297_v13, %v9110_v12  ;;  %v6644_v21 = vpop.f32.mrb[18].mxu0 }
 0x2f1   :  { %v5593_v55 = vpack.c.bf16 %v6707_v31, %v6707_v31  ;;  %v4300_v19 = vpop.f32.mrb[19].mxu0  ;;  %v5101_v51 = vadd.f32 %v5100_v46, %v5099_v48  ;;  %v4904_v12 = vadd.f32 %v4903_v43, %v4902_v59  ;;  %v6709_v45 = vadd.f32 %v6644_v21, %v9112_v61 }
 0x2f2   :  { %v5591_v3 = vpack.c.bf16 %v6708_v54, %v6708_v54  ;;  %v4905_v37 = vsel %vm4873_vm7, %v6708_v54, 0.0  ;;  %v5025_v50 = vmul.f32 %v6708_v54, %v6708_v54  ;;  %v6710_v9 = vadd.f32 %v4300_v19, %v9114_v63 }
 0x2f3   :  { %4827 = vst.msk [vmem:[%s9558_s2 + $0x48] sm:$0xf] %vm4808_vm6, %v5593_v55  ;;  %v5027_v10 = vmul.f32 %v6707_v31, %v6707_v31  ;;  %v4906_v41 = vadd.f32 %v4905_v37, %v4904_v12  ;;  %v5103_v8 = vadd.f32 %v5102_v58, %v5101_v51  ;;  %v5594_v42 = vpack.c.bf16 %v6709_v45, %v6709_v45 }
 0x2f4   :  { %4825 = vst.msk [vmem:[%s9558_s2 + $0x40] sm:$0xf] %vm4808_vm6, %v5591_v3  ;;  %v5104_v28 = vsel %vm4873_vm7, %v5025_v50, 0.0  ;;  %v5592_v30 = vpack.c.bf16 %v6710_v9, %v6710_v9  ;;  %v4907_v17 = vsel %vm4873_vm7, %v6710_v9, 0.0  ;;  %v5026_v6 = vmul.f32 %v6710_v9, %v6710_v9 }
 0x2f5   :  { %v5105_v49 = vadd.f32 %v5104_v28, %v5103_v8  ;;  %4828 = vst.msk [vmem:[%s9558_s2 + $0x4c] sm:$0xf] %vm4808_vm6, %v5594_v42  ;;  %v4908_v63 = vadd.f32 %v4907_v17, %v4906_v41  ;;  %v4909_v29 = vsel %vm4873_vm7, %v6707_v31, 0.0  ;;  %v5028_v27 = vmul.f32 %v6709_v45, %v6709_v45 }
 0x2f6   :  { %v6647_v61 = vpop.f32.mrb[20].mxu0  ;;  %4826 = vst.msk [vmem:[%s9558_s2 + $0x44] sm:$0xf] %vm4808_vm6, %v5592_v30  ;;  %v5106_v47 = vsel %vm4873_vm7, %v5026_v6, 0.0  ;;  %v5108_v24 = vsel %vm4873_vm7, %v5027_v10, 0.0  ;;  %v4911_v15 = vsel %vm4873_vm7, %v6709_v45, 0.0 }
 0x2f7   :  { %v6711_v20 = vadd.f32 %v6647_v61, %v9116_v62  ;;  %v4313_v32 = vpop.f32.mrb[21].mxu0  ;;  %v4910_v22 = vadd.f32 %v4909_v29, %v4908_v63  ;;  %v5107_v44 = vadd.f32 %v5106_v47, %v5105_v49  ;;  %v5110_v40 = vsel %vm4873_vm7, %v5028_v27, 0.0 }
 0x2f8   :  { %v6712_v52 = vadd.f32 %v4313_v32, %v9118_v53  ;;  %v6648_v5 = vpop.f32.mrb[22].mxu0 }
 0x2f9   :  { %v5597_v14 = vpack.c.bf16 %v6711_v20, %v6711_v20  ;;  %v4316_v62 = vpop.f32.mrb[23].mxu0  ;;  %v5109_v57 = vadd.f32 %v5108_v24, %v5107_v44  ;;  %v4912_v53 = vadd.f32 %v4911_v15, %v4910_v22  ;;  %v6713_v60 = vadd.f32 %v6648_v5, %v9120_v38 }
 0x2fa   :  { %v5595_v56 = vpack.c.bf16 %v6712_v52, %v6712_v52  ;;  %v4913_v26 = vsel %vm4873_vm7, %v6712_v52, 0.0  ;;  %v5029_v0 = vmul.f32 %v6712_v52, %v6712_v52  ;;  %v6714_v16 = vadd.f32 %v4316_v62, %v9122_v1 }
 0x2fb   :  { %4831 = vst.msk [vmem:[%s9558_s2 + $0x58] sm:$0xf] %vm4808_vm6, %v5597_v14  ;;  %v5031_v31 = vmul.f32 %v6711_v20, %v6711_v20  ;;  %v4914_v13 = vadd.f32 %v4913_v26, %v4912_v53  ;;  %v5111_v36 = vadd.f32 %v5110_v40, %v5109_v57  ;;  %v5598_v2 = vpack.c.bf16 %v6713_v60, %v6713_v60 }
 0x2fc   :  { %4829 = vst.msk [vmem:[%s9558_s2 + $0x50] sm:$0xf] %vm4808_vm6, %v5595_v56  ;;  %v5112_v39 = vsel %vm4873_vm7, %v5029_v0, 0.0  ;;  %v5596_v35 = vpack.c.bf16 %v6714_v16, %v6714_v16  ;;  %v4915_v54 = vsel %vm4873_vm7, %v6714_v16, 0.0  ;;  %v5030_v21 = vmul.f32 %v6714_v16, %v6714_v16 }
 0x2fd   :  { %v5113_v46 = vadd.f32 %v5112_v39, %v5111_v36  ;;  %4832 = vst.msk [vmem:[%s9558_s2 + $0x5c] sm:$0xf] %vm4808_vm6, %v5598_v2  ;;  %v4916_v1 = vadd.f32 %v4915_v54, %v4914_v13  ;;  %v4917_v55 = vsel %vm4873_vm7, %v6711_v20, 0.0  ;;  %v5032_v19 = vmul.f32 %v6713_v60, %v6713_v60 }
 0x2fe   :  { %v6651_v38 = vpop.f32.mrb[24].mxu0  ;;  %4830 = vst.msk [vmem:[%s9558_s2 + $0x54] sm:$0xf] %vm4808_vm6, %v5596_v35  ;;  %v5114_v43 = vsel %vm4873_vm7, %v5030_v21, 0.0  ;;  %v5116_v50 = vsel %vm4873_vm7, %v5031_v31, 0.0  ;;  %v4919_v9 = vsel %vm4873_vm7, %v6713_v60, 0.0 }
 0x2ff   :  { %v6715_v59 = vadd.f32 %v6651_v38, %v9124_v11  ;;  %v4329_v48 = vpop.f32.mrb[25].mxu0  ;;  %v4918_v51 = vadd.f32 %v4917_v55, %v4916_v1  ;;  %v5115_v12 = vadd.f32 %v5114_v43, %v5113_v46  ;;  %v5118_v30 = vsel %vm4873_vm7, %v5032_v19, 0.0 }
 0x300   :  { %v6716_v3 = vadd.f32 %v4329_v48, %v9126_v4  ;;  %v6652_v37 = vpop.f32.mrb[26].mxu0 }
 0x301   :  { %v5601_v45 = vpack.c.bf16 %v6715_v59, %v6715_v59  ;;  %v4332_v11 = vpop.f32.mrb[27].mxu0  ;;  %v5117_v41 = vadd.f32 %v5116_v50, %v5115_v12  ;;  %v4920_v4 = vadd.f32 %v4919_v9, %v4918_v51  ;;  %v6717_v8 = vadd.f32 %v6652_v37, %v9128_v7 }
 0x302   :  { %v5599_v58 = vpack.c.bf16 %v6716_v3, %v6716_v3  ;;  %v4921_v28 = vsel %vm4873_vm7, %v6716_v3, 0.0  ;;  %v5033_v10 = vmul.f32 %v6716_v3, %v6716_v3  ;;  %v6718_v42 = vadd.f32 %v4332_v11, %v9130_v33 }
 0x303   :  { %4835 = vst.msk [vmem:[%s9558_s2 + $0x68] sm:$0xf] %vm4808_vm6, %v5601_v45  ;;  %v5035_v6 = vmul.f32 %v6715_v59, %v6715_v59  ;;  %v4922_v61 = vadd.f32 %v4921_v28, %v4920_v4  ;;  %v5119_v49 = vadd.f32 %v5118_v30, %v5117_v41  ;;  %v5602_v63 = vpack.c.bf16 %v6717_v8, %v6717_v8 }
 0x304   :  { %4833 = vst.msk [vmem:[%s9558_s2 + $0x60] sm:$0xf] %vm4808_vm6, %v5599_v58  ;;  %v5120_v17 = vsel %vm4873_vm7, %v5033_v10, 0.0  ;;  %v5600_v20 = vpack.c.bf16 %v6718_v42, %v6718_v42  ;;  %v4923_v32 = vsel %vm4873_vm7, %v6718_v42, 0.0  ;;  %v5034_v29 = vmul.f32 %v6718_v42, %v6718_v42 }
 0x305   :  { %v5121_v27 = vadd.f32 %v5120_v17, %v5119_v49  ;;  %4836 = vst.msk [vmem:[%s9558_s2 + $0x6c] sm:$0xf] %vm4808_vm6, %v5602_v63  ;;  %v4924_v33 = vadd.f32 %v4923_v32, %v4922_v61  ;;  %v4925_v5 = vsel %vm4873_vm7, %v6715_v59, 0.0  ;;  %v5036_v24 = vmul.f32 %v6717_v8, %v6717_v8 }
 0x306   :  { %v6655_v7 = vpop.f32.mrb[28].mxu0  ;;  %4834 = vst.msk [vmem:[%s9558_s2 + $0x64] sm:$0xf] %vm4808_vm6, %v5600_v20  ;;  %v5122_v22 = vsel %vm4873_vm7, %v5034_v29, 0.0  ;;  %v5124_v62 = vsel %vm4873_vm7, %v5035_v6, 0.0  ;;  %v4927_v0 = vsel %vm4873_vm7, %v6717_v8, 0.0 }
 0x307   :  { %v6719_v47 = vadd.f32 %v6655_v7, %v9132_v18  ;;  %v4345_v52 = vpop.f32.mrb[29].mxu0  ;;  %v4926_v15 = vadd.f32 %v4925_v5, %v4924_v33  ;;  %v5123_v56 = vadd.f32 %v5122_v22, %v5121_v27  ;;  %v5126_v31 = vsel %vm4873_vm7, %v5036_v24, 0.0 }
 0x308   :  { %v6720_v44 = vadd.f32 %v4345_v52, %v9134_v34  ;;  %v6656_v14 = vpop.f32.mrb[30].mxu0 }
 0x309   :  { %v5605_v26 = vpack.c.bf16 %v6719_v47, %v6719_v47  ;;  %v4348_v18 = vpop.f32.mrb[31].mxu0  ;;  %v5125_v16 = vadd.f32 %v5124_v62, %v5123_v56  ;;  %v4928_v34 = vadd.f32 %v4927_v0, %v4926_v15  ;;  %v6721_v40 = vadd.f32 %v6656_v14, %v9136_v25 }
 0x30a   :  { %v5603_v57 = vpack.c.bf16 %v6720_v44, %v6720_v44  ;;  %v4929_v53 = vsel %vm4873_vm7, %v6720_v44, 0.0  ;;  %v5037_v60 = vmul.f32 %v6720_v44, %v6720_v44  ;;  %v6722_v39 = vadd.f32 %v4348_v18, %v9138_v23 }
 0x30b   :  { %4839 = vst.msk [vmem:[%s9558_s2 + $0x78] sm:$0xf] %vm4808_vm6, %v5605_v26  ;;  %v5039_v2 = vmul.f32 %v6719_v47, %v6719_v47  ;;  %v4930_v35 = vadd.f32 %v4929_v53, %v4928_v34  ;;  %v5127_v54 = vadd.f32 %v5126_v31, %v5125_v16  ;;  %v5606_v21 = vpack.c.bf16 %v6721_v40, %v6721_v40 }
 0x30c   :  { %4837 = vst.msk [vmem:[%s9558_s2 + $0x70] sm:$0xf] %vm4808_vm6, %v5603_v57  ;;  %v5128_v13 = vsel %vm4873_vm7, %v5037_v60, 0.0  ;;  %v6395_v36 = vpop.f32.mrb[32].mxu1  ;;  %v5604_v46 = vpack.c.bf16 %v6722_v39, %v6722_v39  ;;  %v4931_v25 = vsel %vm4873_vm7, %v6722_v39, 0.0  ;;  %v5038_v1 = vmul.f32 %v6722_v39, %v6722_v39 }
 0x30d   :  { %v2845_v38 = vpop.f32.mrb[33].mxu1  ;;  %v5129_v48 = vadd.f32 %v5128_v13, %v5127_v54  ;;  %4840 = vst.msk [vmem:[%s9558_s2 + $0x7c] sm:$0xf] %vm4808_vm6, %v5606_v21  ;;  %v4932_v55 = vadd.f32 %v4931_v25, %v4930_v35  ;;  %v4933_v37 = vsel %vm4873_vm7, %v6719_v47, 0.0  ;;  %v5040_v50 = vmul.f32 %v6721_v40, %v6721_v40 }
 0x30e   :  { %v6659_v23 = vpop.f32.mrb[32].mxu0  ;;  %v6396_v59 = vpop.f32.mrb[34].mxu1  ;;  %4838 = vst.msk [vmem:[%s9558_s2 + $0x74] sm:$0xf] %vm4808_vm6, %v5604_v46  ;;  %v5130_v51 = vsel %vm4873_vm7, %v5038_v1, 0.0  ;;  %v5132_v11 = vsel %vm4873_vm7, %v5039_v2, 0.0 }
 0x30f   :  { %v6723_v19 = vadd.f32 %v6659_v23, %v6395_v36  ;;  %v4361_v43 = vpop.f32.mrb[33].mxu0  ;;  %v2848_v3 = vpop.f32.mrb[35].mxu1  ;;  %v4934_v9 = vadd.f32 %v4933_v37, %v4932_v55  ;;  %v5131_v58 = vadd.f32 %v5130_v51, %v5129_v48  ;;  %v4935_v41 = vsel %vm4873_vm7, %v6721_v40, 0.0 }
 0x310   :  { %v6724_v12 = vadd.f32 %v4361_v43, %v2845_v38  ;;  %v6660_v45 = vpop.f32.mrb[34].mxu0  ;;  %v5134_v49 = vsel %vm4873_vm7, %v5040_v50, 0.0 }
 0x311   :  { %v5609_v28 = vpack.c.bf16 %v6723_v19, %v6723_v19  ;;  %v4364_v10 = vpop.f32.mrb[35].mxu0  ;;  %v5133_v30 = vadd.f32 %v5132_v11, %v5131_v58  ;;  %v4936_v17 = vadd.f32 %v4935_v41, %v4934_v9  ;;  %v6725_v6 = vadd.f32 %v6660_v45, %v6396_v59 }
 0x312   :  { %v5607_v4 = vpack.c.bf16 %v6724_v12, %v6724_v12  ;;  %v4937_v8 = vsel %vm4873_vm7, %v6724_v12, 0.0  ;;  %v5041_v42 = vmul.f32 %v6724_v12, %v6724_v12  ;;  %v6726_v61 = vadd.f32 %v4364_v10, %v2848_v3 }
 0x313   :  { %4843 = vst.msk [vmem:[%s9558_s2 + $0x88] sm:$0xf] %vm4808_vm6, %v5609_v28  ;;  %v5043_v32 = vmul.f32 %v6723_v19, %v6723_v19  ;;  %v4938_v29 = vadd.f32 %v4937_v8, %v4936_v17  ;;  %v5135_v7 = vadd.f32 %v5134_v49, %v5133_v30  ;;  %v5610_v27 = vpack.c.bf16 %v6725_v6, %v6725_v6 }
 0x314   :  { %4841 = vst.msk [vmem:[%s9558_s2 + $0x80] sm:$0xf] %vm4808_vm6, %v5607_v4  ;;  %v5136_v63 = vsel %vm4873_vm7, %v5041_v42, 0.0  ;;  %v6399_v20 = vpop.f32.mrb[36].mxu1  ;;  %v5608_v47 = vpack.c.bf16 %v6726_v61, %v6726_v61  ;;  %v4939_v52 = vsel %vm4873_vm7, %v6726_v61, 0.0  ;;  %v5042_v5 = vmul.f32 %v6726_v61, %v6726_v61 }
 0x315   :  { %v2861_v33 = vpop.f32.mrb[37].mxu1  ;;  %v5137_v44 = vadd.f32 %v5136_v63, %v5135_v7  ;;  %4844 = vst.msk [vmem:[%s9558_s2 + $0x8c] sm:$0xf] %vm4808_vm6, %v5610_v27  ;;  %v4940_v14 = vadd.f32 %v4939_v52, %v4938_v29  ;;  %v4941_v26 = vsel %vm4873_vm7, %v6723_v19, 0.0  ;;  %v5044_v18 = vmul.f32 %v6725_v6, %v6725_v6 }
 0x316   :  { %v6663_v24 = vpop.f32.mrb[36].mxu0  ;;  %v6400_v22 = vpop.f32.mrb[38].mxu1  ;;  %4842 = vst.msk [vmem:[%s9558_s2 + $0x84] sm:$0xf] %vm4808_vm6, %v5608_v47  ;;  %v5138_v0 = vsel %vm4873_vm7, %v5042_v5, 0.0  ;;  %v5140_v60 = vsel %vm4873_vm7, %v5043_v32, 0.0 }
 0x317   :  { %v6727_v62 = vadd.f32 %v6663_v24, %v6399_v20  ;;  %v4377_v15 = vpop.f32.mrb[37].mxu0  ;;  %v2864_v56 = vpop.f32.mrb[39].mxu1  ;;  %v4942_v16 = vadd.f32 %v4941_v26, %v4940_v14  ;;  %v5139_v34 = vadd.f32 %v5138_v0, %v5137_v44  ;;  %v4943_v31 = vsel %vm4873_vm7, %v6725_v6, 0.0 }
 0x318   :  { %v6728_v57 = vadd.f32 %v4377_v15, %v2861_v33  ;;  %v6664_v53 = vpop.f32.mrb[38].mxu0  ;;  %v5142_v46 = vsel %vm4873_vm7, %v5044_v18, 0.0 }
 0x319   :  { %v5613_v40 = vpack.c.bf16 %v6727_v62, %v6727_v62  ;;  %v4380_v39 = vpop.f32.mrb[39].mxu0  ;;  %v5141_v35 = vadd.f32 %v5140_v60, %v5139_v34  ;;  %v4944_v54 = vadd.f32 %v4943_v31, %v4942_v16  ;;  %v6729_v21 = vadd.f32 %v6664_v53, %v6400_v22 }
 0x31a   :  { %v5611_v13 = vpack.c.bf16 %v6728_v57, %v6728_v57  ;;  %v4945_v36 = vsel %vm4873_vm7, %v6728_v57, 0.0  ;;  %v5045_v2 = vmul.f32 %v6728_v57, %v6728_v57  ;;  %v6730_v38 = vadd.f32 %v4380_v39, %v2864_v56 }
 0x31b   :  { %4847 = vst.msk [vmem:[%s9558_s2 + $0x98] sm:$0xf] %vm4808_vm6, %v5613_v40  ;;  %v5047_v23 = vmul.f32 %v6727_v62, %v6727_v62  ;;  %v4946_v59 = vadd.f32 %v4945_v36, %v4944_v54  ;;  %v5143_v48 = vadd.f32 %v5142_v46, %v5141_v35  ;;  %v5614_v55 = vpack.c.bf16 %v6729_v21, %v6729_v21 }
 0x31c   :  { %4845 = vst.msk [vmem:[%s9558_s2 + $0x90] sm:$0xf] %vm4808_vm6, %v5611_v13  ;;  %v5144_v25 = vsel %vm4873_vm7, %v5045_v2, 0.0  ;;  %v6403_v1 = vpop.f32.mrb[40].mxu1  ;;  %v5612_v43 = vpack.c.bf16 %v6730_v38, %v6730_v38  ;;  %v4947_v3 = vsel %vm4873_vm7, %v6730_v38, 0.0  ;;  %v5046_v37 = vmul.f32 %v6730_v38, %v6730_v38 }
 0x31d   :  { %v2877_v19 = vpop.f32.mrb[41].mxu1  ;;  %v5145_v12 = vadd.f32 %v5144_v25, %v5143_v48  ;;  %4848 = vst.msk [vmem:[%s9558_s2 + $0x9c] sm:$0xf] %vm4808_vm6, %v5614_v55  ;;  %v4948_v45 = vadd.f32 %v4947_v3, %v4946_v59  ;;  %v4949_v28 = vsel %vm4873_vm7, %v6727_v62, 0.0  ;;  %v5048_v10 = vmul.f32 %v6729_v21, %v6729_v21 }
 0x31e   :  { %v6667_v50 = vpop.f32.mrb[40].mxu0  ;;  %v6404_v51 = vpop.f32.mrb[42].mxu1  ;;  %4846 = vst.msk [vmem:[%s9558_s2 + $0x94] sm:$0xf] %vm4808_vm6, %v5612_v43  ;;  %v5146_v41 = vsel %vm4873_vm7, %v5046_v37, 0.0  ;;  %v5148_v42 = vsel %vm4873_vm7, %v5047_v23, 0.0 }
 0x31f   :  { %v6731_v11 = vadd.f32 %v6667_v50, %v6403_v1  ;;  %v4393_v9 = vpop.f32.mrb[41].mxu0  ;;  %v2880_v58 = vpop.f32.mrb[43].mxu1  ;;  %v4950_v30 = vadd.f32 %v4949_v28, %v4948_v45  ;;  %v5147_v17 = vadd.f32 %v5146_v41, %v5145_v12  ;;  %v4951_v49 = vsel %vm4873_vm7, %v6729_v21, 0.0 }
 0x320   :  { %v6732_v4 = vadd.f32 %v4393_v9, %v2877_v19  ;;  %v6668_v8 = vpop.f32.mrb[42].mxu0  ;;  %v5150_v47 = vsel %vm4873_vm7, %v5048_v10, 0.0 }
 0x321   :  { %v5617_v6 = vpack.c.bf16 %v6731_v11, %v6731_v11  ;;  %v4396_v61 = vpop.f32.mrb[43].mxu0  ;;  %v5149_v29 = vadd.f32 %v5148_v42, %v5147_v17  ;;  %v4952_v7 = vadd.f32 %v4951_v49, %v4950_v30  ;;  %v6733_v27 = vadd.f32 %v6668_v8, %v6404_v51 }
 0x322   :  { %v5615_v63 = vpack.c.bf16 %v6732_v4, %v6732_v4  ;;  %v4953_v20 = vsel %vm4873_vm7, %v6732_v4, 0.0  ;;  %v5049_v32 = vmul.f32 %v6732_v4, %v6732_v4  ;;  %v6734_v33 = vadd.f32 %v4396_v61, %v2880_v58 }
 0x323   :  { %4851 = vst.msk [vmem:[%s9558_s2 + $0xa8] sm:$0xf] %vm4808_vm6, %v5617_v6  ;;  %v5051_v24 = vmul.f32 %v6731_v11, %v6731_v11  ;;  %v4954_v22 = vadd.f32 %v4953_v20, %v4952_v7  ;;  %v5151_v44 = vadd.f32 %v5150_v47, %v5149_v29  ;;  %v5618_v14 = vpack.c.bf16 %v6733_v27, %v6733_v27 }
 0x324   :  { %4849 = vst.msk [vmem:[%s9558_s2 + $0xa0] sm:$0xf] %vm4808_vm6, %v5615_v63  ;;  %v5152_v52 = vsel %vm4873_vm7, %v5049_v32, 0.0  ;;  %v6407_v5 = vpop.f32.mrb[44].mxu1  ;;  %v5616_v15 = vpack.c.bf16 %v6734_v33, %v6734_v33  ;;  %v4955_v56 = vsel %vm4873_vm7, %v6734_v33, 0.0  ;;  %v5050_v26 = vmul.f32 %v6734_v33, %v6734_v33 }
 0x325   :  { %v2893_v62 = vpop.f32.mrb[45].mxu1  ;;  %v5153_v57 = vadd.f32 %v5152_v52, %v5151_v44  ;;  %4852 = vst.msk [vmem:[%s9558_s2 + $0xac] sm:$0xf] %vm4808_vm6, %v5618_v14  ;;  %v4956_v53 = vadd.f32 %v4955_v56, %v4954_v22  ;;  %v4957_v40 = vsel %vm4873_vm7, %v6731_v11, 0.0  ;;  %v5052_v39 = vmul.f32 %v6733_v27, %v6733_v27 }
 0x326   :  { %v6671_v18 = vpop.f32.mrb[44].mxu0  ;;  %v6408_v0 = vpop.f32.mrb[46].mxu1  ;;  %4850 = vst.msk [vmem:[%s9558_s2 + $0xa4] sm:$0xf] %vm4808_vm6, %v5616_v15  ;;  %v5154_v31 = vsel %vm4873_vm7, %v5050_v26, 0.0  ;;  %v5156_v2 = vsel %vm4873_vm7, %v5051_v24, 0.0 }
 0x327   :  { %v6735_v60 = vadd.f32 %v6671_v18, %v6407_v5  ;;  %v4409_v16 = vpop.f32.mrb[45].mxu0  ;;  %v2896_v34 = vpop.f32.mrb[47].mxu1  ;;  %v4958_v35 = vadd.f32 %v4957_v40, %v4956_v53  ;;  %v5155_v54 = vadd.f32 %v5154_v31, %v5153_v57  ;;  %v4959_v46 = vsel %vm4873_vm7, %v6733_v27, 0.0 }
 0x328   :  { %v6736_v13 = vadd.f32 %v4409_v16, %v2893_v62  ;;  %v6672_v36 = vpop.f32.mrb[46].mxu0  ;;  %v5158_v43 = vsel %vm4873_vm7, %v5052_v39, 0.0 }
 0x329   :  { %v5621_v21 = vpack.c.bf16 %v6735_v60, %v6735_v60  ;;  %v4412_v38 = vpop.f32.mrb[47].mxu0  ;;  %v5157_v59 = vadd.f32 %v5156_v2, %v5155_v54  ;;  %v4960_v48 = vadd.f32 %v4959_v46, %v4958_v35  ;;  %v6737_v55 = vadd.f32 %v6672_v36, %v6408_v0 }
 0x32a   :  { %v5619_v25 = vpack.c.bf16 %v6736_v13, %v6736_v13  ;;  %v4961_v1 = vsel %vm4873_vm7, %v6736_v13, 0.0  ;;  %v5053_v23 = vmul.f32 %v6736_v13, %v6736_v13  ;;  %v6738_v19 = vadd.f32 %v4412_v38, %v2896_v34 }
 0x32b   :  { %4855 = vst.msk [vmem:[%s9558_s2 + $0xb8] sm:$0xf] %vm4808_vm6, %v5621_v21  ;;  %v5055_v50 = vmul.f32 %v6735_v60, %v6735_v60  ;;  %v4962_v51 = vadd.f32 %v4961_v1, %v4960_v48  ;;  %v5159_v12 = vadd.f32 %v5158_v43, %v5157_v59  ;;  %v5622_v45 = vpack.c.bf16 %v6737_v55, %v6737_v55 }
 0x32c   :  { %4853 = vst.msk [vmem:[%s9558_s2 + $0xb0] sm:$0xf] %vm4808_vm6, %v5619_v25  ;;  %v5160_v3 = vsel %vm4873_vm7, %v5053_v23, 0.0  ;;  %v6411_v37 = vpop.f32.mrb[48].mxu1  ;;  %v5620_v9 = vpack.c.bf16 %v6738_v19, %v6738_v19  ;;  %v4963_v58 = vsel %vm4873_vm7, %v6738_v19, 0.0  ;;  %v5054_v28 = vmul.f32 %v6738_v19, %v6738_v19 }
 0x32d   :  { %v2909_v11 = vpop.f32.mrb[49].mxu1  ;;  %v5161_v4 = vadd.f32 %v5160_v3, %v5159_v12  ;;  %4856 = vst.msk [vmem:[%s9558_s2 + $0xbc] sm:$0xf] %vm4808_vm6, %v5622_v45  ;;  %v4964_v8 = vadd.f32 %v4963_v58, %v4962_v51  ;;  %v4965_v6 = vsel %vm4873_vm7, %v6735_v60, 0.0  ;;  %v5056_v61 = vmul.f32 %v6737_v55, %v6737_v55 }
 0x32e   :  { %v6675_v10 = vpop.f32.mrb[48].mxu0  ;;  %v6412_v41 = vpop.f32.mrb[50].mxu1  ;;  %4854 = vst.msk [vmem:[%s9558_s2 + $0xb4] sm:$0xf] %vm4808_vm6, %v5620_v9  ;;  %v5162_v49 = vsel %vm4873_vm7, %v5054_v28, 0.0  ;;  %v5164_v32 = vsel %vm4873_vm7, %v5055_v50, 0.0 }
 0x32f   :  { %v6739_v42 = vadd.f32 %v6675_v10, %v6411_v37  ;;  %v4425_v30 = vpop.f32.mrb[49].mxu0  ;;  %v2912_v17 = vpop.f32.mrb[51].mxu1  ;;  %v4966_v29 = vadd.f32 %v4965_v6, %v4964_v8  ;;  %v5163_v7 = vadd.f32 %v5162_v49, %v5161_v4  ;;  %v4967_v47 = vsel %vm4873_vm7, %v6737_v55, 0.0 }
 0x330   :  { %v6740_v63 = vadd.f32 %v4425_v30, %v2909_v11  ;;  %v6676_v20 = vpop.f32.mrb[50].mxu0  ;;  %v5166_v15 = vsel %vm4873_vm7, %v5056_v61, 0.0 }
 0x331   :  { %v5625_v27 = vpack.c.bf16 %v6739_v42, %v6739_v42  ;;  %v4428_v33 = vpop.f32.mrb[51].mxu0  ;;  %v5165_v22 = vadd.f32 %v5164_v32, %v5163_v7  ;;  %v4968_v44 = vadd.f32 %v4967_v47, %v4966_v29  ;;  %v6741_v14 = vadd.f32 %v6676_v20, %v6412_v41 }
 0x332   :  { %v5623_v52 = vpack.c.bf16 %v6740_v63, %v6740_v63  ;;  %v4969_v5 = vsel %vm4873_vm7, %v6740_v63, 0.0  ;;  %v5057_v24 = vmul.f32 %v6740_v63, %v6740_v63  ;;  %v6742_v62 = vadd.f32 %v4428_v33, %v2912_v17 }
 0x333   :  { %4859 = vst.msk [vmem:[%s9558_s2 + $0xc8] sm:$0xf] %vm4808_vm6, %v5625_v27  ;;  %v5059_v18 = vmul.f32 %v6739_v42, %v6739_v42  ;;  %v4970_v0 = vadd.f32 %v4969_v5, %v4968_v44  ;;  %v5167_v57 = vadd.f32 %v5166_v15, %v5165_v22  ;;  %v5626_v53 = vpack.c.bf16 %v6741_v14, %v6741_v14 }
 0x334   :  { %4857 = vst.msk [vmem:[%s9558_s2 + $0xc0] sm:$0xf] %vm4808_vm6, %v5623_v52  ;;  %v5168_v56 = vsel %vm4873_vm7, %v5057_v24, 0.0  ;;  %v6415_v26 = vpop.f32.mrb[52].mxu1  ;;  %v5624_v16 = vpack.c.bf16 %v6742_v62, %v6742_v62  ;;  %v4971_v34 = vsel %vm4873_vm7, %v6742_v62, 0.0  ;;  %v5058_v40 = vmul.f32 %v6742_v62, %v6742_v62 }
 0x335   :  { %v2925_v60 = vpop.f32.mrb[53].mxu1  ;;  %v5169_v13 = vadd.f32 %v5168_v56, %v5167_v57  ;;  %4860 = vst.msk [vmem:[%s9558_s2 + $0xcc] sm:$0xf] %vm4808_vm6, %v5626_v53  ;;  %v4972_v36 = vadd.f32 %v4971_v34, %v4970_v0  ;;  %v4973_v21 = vsel %vm4873_vm7, %v6739_v42, 0.0  ;;  %v5060_v38 = vmul.f32 %v6741_v14, %v6741_v14 }
 0x336   :  { %v6679_v39 = vpop.f32.mrb[52].mxu0  ;;  %v6416_v31 = vpop.f32.mrb[54].mxu1  ;;  %4858 = vst.msk [vmem:[%s9558_s2 + $0xc4] sm:$0xf] %vm4808_vm6, %v5624_v16  ;;  %v5170_v46 = vsel %vm4873_vm7, %v5058_v40, 0.0  ;;  %v5172_v23 = vsel %vm4873_vm7, %v5059_v18, 0.0 }
 0x337   :  { %v6743_v2 = vadd.f32 %v6679_v39, %v6415_v26  ;;  %v4441_v35 = vpop.f32.mrb[53].mxu0  ;;  %v2928_v54 = vpop.f32.mrb[55].mxu1  ;;  %v4974_v59 = vadd.f32 %v4973_v21, %v4972_v36  ;;  %v5171_v48 = vadd.f32 %v5170_v46, %v5169_v13  ;;  %v4975_v43 = vsel %vm4873_vm7, %v6741_v14, 0.0 }
 0x338   :  { %v6744_v25 = vadd.f32 %v4441_v35, %v2925_v60  ;;  %v6680_v1 = vpop.f32.mrb[54].mxu0  ;;  %v5174_v9 = vsel %vm4873_vm7, %v5060_v38, 0.0 }
 0x339   :  { %v5629_v55 = vpack.c.bf16 %v6743_v2, %v6743_v2  ;;  %v4444_v19 = vpop.f32.mrb[55].mxu0  ;;  %v5173_v51 = vadd.f32 %v5172_v23, %v5171_v48  ;;  %v4976_v12 = vadd.f32 %v4975_v43, %v4974_v59  ;;  %v6745_v45 = vadd.f32 %v6680_v1, %v6416_v31 }
 0x33a   :  { %v5627_v3 = vpack.c.bf16 %v6744_v25, %v6744_v25  ;;  %v4977_v37 = vsel %vm4873_vm7, %v6744_v25, 0.0  ;;  %v5061_v50 = vmul.f32 %v6744_v25, %v6744_v25  ;;  %v6746_v11 = vadd.f32 %v4444_v19, %v2928_v54 }
 0x33b   :  { %4863 = vst.msk [vmem:[%s9558_s2 + $0xd8] sm:$0xf] %vm4808_vm6, %v5629_v55  ;;  %v5063_v10 = vmul.f32 %v6743_v2, %v6743_v2  ;;  %v4978_v41 = vadd.f32 %v4977_v37, %v4976_v12  ;;  %v5175_v4 = vadd.f32 %v5174_v9, %v5173_v51  ;;  %v5630_v8 = vpack.c.bf16 %v6745_v45, %v6745_v45 }
 0x33c   :  { %4861 = vst.msk [vmem:[%s9558_s2 + $0xd0] sm:$0xf] %vm4808_vm6, %v5627_v3  ;;  %v5176_v58 = vsel %vm4873_vm7, %v5061_v50, 0.0  ;;  %v6419_v28 = vpop.f32.mrb[56].mxu1  ;;  %v5628_v30 = vpack.c.bf16 %v6746_v11, %v6746_v11  ;;  %v4979_v17 = vsel %vm4873_vm7, %v6746_v11, 0.0  ;;  %v5062_v6 = vmul.f32 %v6746_v11, %v6746_v11 }
 0x33d   :  { %v2941_v42 = vpop.f32.mrb[57].mxu1  ;;  %v5177_v63 = vadd.f32 %v5176_v58, %v5175_v4  ;;  %4864 = vst.msk [vmem:[%s9558_s2 + $0xdc] sm:$0xf] %vm4808_vm6, %v5630_v8  ;;  %v4980_v20 = vadd.f32 %v4979_v17, %v4978_v41  ;;  %v4981_v27 = vsel %vm4873_vm7, %v6743_v2, 0.0  ;;  %v5064_v33 = vmul.f32 %v6745_v45, %v6745_v45 }
 0x33e   :  { %v6683_v61 = vpop.f32.mrb[56].mxu0  ;;  %v6420_v49 = vpop.f32.mrb[58].mxu1  ;;  %4862 = vst.msk [vmem:[%s9558_s2 + $0xd4] sm:$0xf] %vm4808_vm6, %v5628_v30  ;;  %v5178_v47 = vsel %vm4873_vm7, %v5062_v6, 0.0  ;;  %v5180_v24 = vsel %vm4873_vm7, %v5063_v10, 0.0 }
 0x33f   :  { %v6747_v32 = vadd.f32 %v6683_v61, %v6419_v28  ;;  %v4457_v29 = vpop.f32.mrb[57].mxu0  ;;  %v2944_v7 = vpop.f32.mrb[59].mxu1  ;;  %v4982_v22 = vadd.f32 %v4981_v27, %v4980_v20  ;;  %v5179_v44 = vadd.f32 %v5178_v47, %v5177_v63  ;;  %v4983_v15 = vsel %vm4873_vm7, %v6745_v45, 0.0 }
 0x340   :  { %v6748_v52 = vadd.f32 %v4457_v29, %v2941_v42  ;;  %v6684_v5 = vpop.f32.mrb[58].mxu0  ;;  %v5182_v16 = vsel %vm4873_vm7, %v5064_v33, 0.0 }
 0x341   :  { %v5633_v14 = vpack.c.bf16 %v6747_v32, %v6747_v32  ;;  %v4460_v62 = vpop.f32.mrb[59].mxu0  ;;  %v5181_v0 = vadd.f32 %v5180_v24, %v5179_v44  ;;  %v4984_v57 = vadd.f32 %v4983_v15, %v4982_v22  ;;  %v6749_v53 = vadd.f32 %v6684_v5, %v6420_v49 }
 0x342   :  { %v5631_v56 = vpack.c.bf16 %v6748_v52, %v6748_v52  ;;  %v4985_v26 = vsel %vm4873_vm7, %v6748_v52, 0.0  ;;  %v5065_v18 = vmul.f32 %v6748_v52, %v6748_v52  ;;  %v6750_v60 = vadd.f32 %v4460_v62, %v2944_v7 }
 0x343   :  { %4867 = vst.msk [vmem:[%s9558_s2 + $0xe8] sm:$0xf] %vm4808_vm6, %v5633_v14  ;;  %v5067_v39 = vmul.f32 %v6747_v32, %v6747_v32  ;;  %v4986_v31 = vadd.f32 %v4985_v26, %v4984_v57  ;;  %v5183_v13 = vadd.f32 %v5182_v16, %v5181_v0  ;;  %v5634_v36 = vpack.c.bf16 %v6749_v53, %v6749_v53 }
 0x344   :  { %4865 = vst.msk [vmem:[%s9558_s2 + $0xe0] sm:$0xf] %vm4808_vm6, %v5631_v56  ;;  %v5184_v34 = vsel %vm4873_vm7, %v5065_v18, 0.0  ;;  %v6423_v40 = vpop.f32.mrb[60].mxu1  ;;  %v5632_v35 = vpack.c.bf16 %v6750_v60, %v6750_v60  ;;  %v4987_v54 = vsel %vm4873_vm7, %v6750_v60, 0.0  ;;  %v5066_v21 = vmul.f32 %v6750_v60, %v6750_v60 }
 0x345   :  { %v2957_v2 = vpop.f32.mrb[61].mxu1  ;;  %v5185_v25 = vadd.f32 %v5184_v34, %v5183_v13  ;;  %4868 = vst.msk [vmem:[%s9558_s2 + $0xec] sm:$0xf] %vm4808_vm6, %v5634_v36  ;;  %v4988_v1 = vadd.f32 %v4987_v54, %v4986_v31  ;;  %v4989_v55 = vsel %vm4873_vm7, %v6747_v32, 0.0  ;;  %v5068_v19 = vmul.f32 %v6749_v53, %v6749_v53 }
 0x346   :  { %v6687_v38 = vpop.f32.mrb[60].mxu0  ;;  %v6424_v46 = vpop.f32.mrb[62].mxu1  ;;  %4866 = vst.msk [vmem:[%s9558_s2 + $0xe4] sm:$0xf] %vm4808_vm6, %v5632_v35  ;;  %v5186_v43 = vsel %vm4873_vm7, %v5066_v21, 0.0  ;;  %v5188_v50 = vsel %vm4873_vm7, %v5067_v39, 0.0 }
 0x347   :  { %v6751_v23 = vadd.f32 %v6687_v38, %v6423_v40  ;;  %v4473_v59 = vpop.f32.mrb[61].mxu0  ;;  %v2960_v48 = vpop.f32.mrb[63].mxu1  ;;  %v4990_v51 = vadd.f32 %v4989_v55, %v4988_v1  ;;  %v5187_v12 = vadd.f32 %v5186_v43, %v5185_v25  ;;  %v4991_v9 = vsel %vm4873_vm7, %v6749_v53, 0.0 }
 0x348   :  { %v6752_v3 = vadd.f32 %v4473_v59, %v2957_v2  ;;  %v6688_v37 = vpop.f32.mrb[62].mxu0  ;;  %v5190_v30 = vsel %vm4873_vm7, %v5068_v19, 0.0 }
 0x349   :  { %v5637_v45 = vpack.c.bf16 %v6751_v23, %v6751_v23  ;;  %v4476_v11 = vpop.f32.mrb[63].mxu0  ;;  %v5189_v41 = vadd.f32 %v5188_v50, %v5187_v12  ;;  %v4992_v4 = vadd.f32 %v4991_v9, %v4990_v51  ;;  %v6753_v8 = vadd.f32 %v6688_v37, %v6424_v46 }
 0x34a   :  { %v5635_v58 = vpack.c.bf16 %v6752_v3, %v6752_v3  ;;  %v4993_v28 = vsel %vm4873_vm7, %v6752_v3, 0.0  ;;  %v5069_v10 = vmul.f32 %v6752_v3, %v6752_v3  ;;  %v6754_v42 = vadd.f32 %v4476_v11, %v2960_v48 }
 0x34b   :  { %4871 = vst.msk [vmem:[%s9558_s2 + $0xf8] sm:$0xf] %vm4808_vm6, %v5637_v45  ;;  %v4994_v6 = vadd.f32 %v4993_v28, %v4992_v4  ;;  %v5191_v61 = vadd.f32 %v5190_v30, %v5189_v41  ;;  %v5638_v49 = vpack.c.bf16 %v6753_v8, %v6753_v8  ;;  %v5071_v63 = vmul.f32 %v6751_v23, %v6751_v23 }
 0x34c   :  { %4869 = vst.msk [vmem:[%s9558_s2 + $0xf0] sm:$0xf] %vm4808_vm6, %v5635_v58  ;;  %v5192_v17 = vsel %vm4873_vm7, %v5069_v10, 0.0  ;;  %v5636_v20 = vpack.c.bf16 %v6754_v42, %v6754_v42  ;;  %v4995_v32 = vsel %vm4873_vm7, %v6754_v42, 0.0  ;;  %v5070_v29 = vmul.f32 %v6754_v42, %v6754_v42 }
 0x34d   :  { %v5193_v7 = vadd.f32 %v5192_v17, %v5191_v61  ;;  %4872 = vst.msk [vmem:[%s9558_s2 + $0xfc] sm:$0xf] %vm4808_vm6, %v5638_v49  ;;  %v4996_v27 = vadd.f32 %v4995_v32, %v4994_v6  ;;  %v4997_v33 = vsel %vm4873_vm7, %v6751_v23, 0.0  ;;  %v5072_v47 = vmul.f32 %v6753_v8, %v6753_v8 }
 0x34e   :  { %4870 = vst.msk [vmem:[%s9558_s2 + $0xf4] sm:$0xf] %vm4808_vm6, %v5636_v20  ;;  %v5194_v52 = vsel %vm4873_vm7, %v5070_v29, 0.0  ;;  %v5196_v22 = vsel %vm4873_vm7, %v5071_v63, 0.0  ;;  %v4999_v44 = vsel %vm4873_vm7, %v6753_v8, 0.0 }
 0x34f   :  { %v4998_v5 = vadd.f32 %v4997_v33, %v4996_v27  ;;  %v5195_v24 = vadd.f32 %v5194_v52, %v5193_v7  ;;  %v5198_v15 = vsel %vm4873_vm7, %v5072_v47, 0.0 }
 0x351   :  { %v5000_v14 = vadd.f32 %v4999_v44, %v4998_v5  ;;  %v5197_v62 = vadd.f32 %v5196_v22, %v5195_v24 }
 0x353   :  { %v5001_v56 = vrot.slane %v5000_v14, 4  ;;  %v5199_v26 = vadd.f32 %v5198_v15, %v5197_v62 }
 0x355   :  { %v5002_v18 = vadd.f32 %v5001_v56, %v5000_v14  ;;  %v5200_v0 = vrot.slane %v5199_v26, 4 }
 0x357   :  { %v5003_v57 = vrot.slane %v5002_v18, 2  ;;  %v5201_v53 = vadd.f32 %v5200_v0, %v5199_v26 }
 0x359   :  { %v5004_v60 = vadd.f32 %v5003_v57, %v5002_v18  ;;  %v5202_v16 = vrot.slane %v5201_v53, 2 }
 0x35b   :  { %v5005_v34 = vrot.slane %v5004_v60, 1  ;;  %v5203_v40 = vadd.f32 %v5202_v16, %v5201_v53 }
 0x35d   :  { %v5006_v39 = vadd.f32 %v5005_v34, %v5004_v60  ;;  %v5204_v31 = vrot.slane %v5203_v40, 1 }
 0x35f   :  { %5008 = vst.msk [vmem:[%s9559_s3] sm:$0x1] %vm5007_vm8, %v5006_v39  ;;  %v5205_v13 = vadd.f32 %v5204_v31, %v5203_v40 }
 0x361   :  { %5206 = vst.msk [vmem:[%s9560_s4] sm:$0x1] %vm5007_vm8, %v5205_v13 }

// kernel: conv_block_forward.4
= control target key start
LH: loop header
LB: loop body
LE: loop exit
PB: predicated region body
PF: predicated region fallthrough
CT: control target
= control target key end

     0   :  { %vm1099_vm0 = vcmask 1043456   ;;  %vm355_vm1 = vcmask 64512   ;;  %vm358_vm2 = vcmask 58368   ;;  %v7453_v2 = vmov 0.0   ;;  %s9951_s3 = inlined_call_operand.vmem [shape: bf16[72,8], index: 3, kind: input, shape index: {}]   ;;  %s9952_s0 = inlined_call_operand.vmem [shape: bf16[2,16,16,8], index: 0, kind: input, shape index: {}]   ;;  %s9953_s1 = inlined_call_operand.vmem [shape: f32[1,8], index: 1, kind: input, shape index: {}]   ;;  %s9954_s2 = inlined_call_operand.vmem [shape: f32[1,8], index: 2, kind: input, shape index: {}]   ;;  %s9955_s4 = inlined_call_operand.vmem [shape: bf16[2,16,16,8], index: 4, kind: output, shape index: {0}]   ;;  %s9956_s5 = inlined_call_operand.vmem [shape: f32[1,1,8], index: 5, kind: output, shape index: {1}]   ;;  %s9957_s6 = inlined_call_operand.vmem [shape: f32[1,1,8], index: 6, kind: output, shape index: {2}]  }
   0x1   :  { %v1002_v0 = vld [vmem:[%s9951_s3 + $0x4] sm:$0xf]  ;;  %v2877_v1 = vld [vmem:[%s9951_s3 + $0x10] sm:$0xf]  ;;  %356 = vst.msk [vmem:[#allocation2] sm:$0xff] %vm355_vm1, %v7453_v2  ;;  %357 = vst.msk [vmem:[#allocation2 + $0x8] sm:$0xff] %vm355_vm1, %v7453_v2 }
   0x2   :  { %359 = vst.msk [vmem:[#allocation2 + $0x10] sm:$0x3] %vm358_vm2, %v7453_v2  ;;  %vm370_vm3 = vcmask 57344   ;;  %362 = vst.msk [vmem:[#allocation2 + $0x1c0] sm:$0x3] %vm358_vm2, %v7453_v2  ;;  %7395 = vmatprep.subr.msk.bf16.mxu1 %vm1099_vm0, %v1002_v0  ;;  %7399 = vmatprep.subr.msk.bf16.mxu0 %vm1099_vm0, %v2877_v1  ;;  %v7522_v3 = vsel %vm1099_vm0, %v1002_v0, 0 }
   0x3   :  { %360 = vst.msk [vmem:[#allocation2 + $0x1b0] sm:$0xff] %vm355_vm1, %v7453_v2  ;;  %361 = vst.msk [vmem:[#allocation2 + $0x1b8] sm:$0xff] %vm355_vm1, %v7453_v2  ;;  %v7525_v4 = vsel %vm1099_vm0, %v2877_v1, 0  ;;  %v5832_v5 = vld [vmem:[%s9952_s0] sm:$0xff]   ;;  %v5959_v7 = vld [vmem:[%s9952_s0 + $0x8] sm:$0xff]   ;;  %6288 = vmatpush3.bf16.msra.mxu1 %v7522_v3  ;;  %vm745_vm4 = vcmask 1046528  }
   0x4   :  { %364 = vst.msk [vmem:[#allocation2 + $0x198] sm:$0xff] %vm355_vm1, %v7453_v2  ;;  %365 = vst.msk [vmem:[#allocation2 + $0x1a0] sm:$0xff] %vm355_vm1, %v7453_v2  ;;  %v7665_v6 = vld [vmem:[%s9953_s1] ss:$0 sm:$0xff]  ;;  %6552 = vmatpush3.bf16.msra.mxu0 %v7525_v4  ;;  %v5833_v8 = vunpack.c.l.bf16 %v5832_v5  ;;  %v5834_v9 = vunpack.c.h.bf16 %v5832_v5  ;;  %v3256_v11 = vld [vmem:[%s9951_s3 + $0x14] sm:$0xf]  ;;  %v5837_v12 = vunpack.c.l.bf16 %v5959_v7  ;;  %v5838_v13 = vunpack.c.h.bf16 %v5959_v7 }
   0x5   :  { %366 = vst.msk [vmem:[#allocation2 + $0x1a8] sm:$0x3] %vm358_vm2, %v7453_v2  ;;  %369 = vst.msk [vmem:[#allocation2 + $0x358] sm:$0x3] %vm358_vm2, %v7453_v2  ;;  %v648_v10 = vld [vmem:[%s9951_s3] sm:$0xf]  ;;  %7401 = vmatprep.subr.msk.bf16.mxu0 %vm1099_vm0, %v3256_v11 }
   0x6   :  { %367 = vst.msk [vmem:[#allocation2 + $0x348] sm:$0xff] %vm355_vm1, %v7453_v2  ;;  %368 = vst.msk [vmem:[#allocation2 + $0x350] sm:$0xff] %vm355_vm1, %v7453_v2  ;;  %v7693_v14 = vld [vmem:[%s9954_s2] ss:$0 sm:$0xff]  ;;  %7396 = vmatprep.subr.msk.bf16.mxu1 %vm1099_vm0, %v648_v10  ;;  %v5960_v15 = vld [vmem:[%s9952_s0 + $0x10] sm:$0xff]   ;;  %v156_v17 = vmul.f32 %v5833_v8, %v7665_v6  ;;  %v157_v18 = vmul.f32 %v5834_v9, %v7665_v6  ;;  %v158_v19 = vmul.f32 %v5837_v12, %v7665_v6  ;;  %vm1780_vm5 = vcmask 1045504  }
   0x7   :  { %10058 = vst [vmem:[#allocation3_spill] sm:$0xff] %v7525_v4  ;;  %371 = vst.msk [vmem:[#allocation2] sm:$0x1] %vm370_vm3, %v7453_v2  ;;  %v5961_v16 = vld [vmem:[%s9952_s0 + $0x18] sm:$0xff]   ;;  %v159_v20 = vmul.f32 %v5838_v13, %v7665_v6  ;;  %v5841_v21 = vunpack.c.l.bf16 %v5960_v15  ;;  %v5842_v22 = vunpack.c.h.bf16 %v5960_v15  ;;  %v5962_v29 = vld [vmem:[%s9952_s0 + $0x20] sm:$0xff]   ;;  %v7718_v38 = vsel %vm1099_vm0, %v648_v10, 0 }
   0x8   :  { %407 = vst.msk [vmem:[#allocation2 + $0x11] sm:$0x1] %vm370_vm3, %v7453_v2  ;;  %372 = vst.msk [vmem:[#allocation2 + $0x18] sm:$0x1] %vm370_vm3, %v7453_v2  ;;  %v5845_v23 = vunpack.c.l.bf16 %v5961_v16  ;;  %v5846_v24 = vunpack.c.h.bf16 %v5961_v16  ;;  %v227_v25 = vadd.f32 %v7693_v14, %v156_v17  ;;  %v228_v26 = vadd.f32 %v7693_v14, %v157_v18  ;;  %v509_v30 = vld [vmem:[#allocation2 + $0x8] sm:$0xff]  ;;  %v5964_v53 = vld [vmem:[%s9952_s0 + $0x30] sm:$0xff]  }
   0x9   :  { %373 = vst.msk [vmem:[#allocation2 + $0x30] sm:$0x1] %vm370_vm3, %v7453_v2  ;;  %374 = vst.msk [vmem:[#allocation2 + $0x48] sm:$0x1] %vm370_vm3, %v7453_v2  ;;  %v229_v27 = vadd.f32 %v7693_v14, %v158_v19  ;;  %v230_v28 = vadd.f32 %v7693_v14, %v159_v20  ;;  %v160_v31 = vmul.f32 %v5841_v21, %v7665_v6  ;;  %v747_v36 = vrot.slane %v509_v30, 1  ;;  %v5963_v48 = vld [vmem:[%s9952_s0 + $0x28] sm:$0xff]  }
   0xa   :  { %375 = vst.msk [vmem:[#allocation2 + $0x60] sm:$0x1] %vm370_vm3, %v7453_v2  ;;  %376 = vst.msk [vmem:[#allocation2 + $0x78] sm:$0x1] %vm370_vm3, %v7453_v2  ;;  %v161_v32 = vmul.f32 %v5842_v22, %v7665_v6  ;;  %v162_v33 = vmul.f32 %v5845_v23, %v7665_v6  ;;  %v291_v37 = vmax.f32 %v227_v25, 0.0  ;;  %v163_v39 = vmul.f32 %v5846_v24, %v7665_v6  ;;  %v5965_v58 = vld [vmem:[%s9952_s0 + $0x38] sm:$0xff]  }
   0xb   :  { %377 = vst.msk [vmem:[#allocation2 + $0x90] sm:$0x1] %vm370_vm3, %v7453_v2  ;;  %378 = vst.msk [vmem:[#allocation2 + $0xa8] sm:$0x1] %vm370_vm3, %v7453_v2  ;;  %v7722_v42 = vsel %vm1099_vm0, %v3256_v11, 0  ;;  %v5849_v43 = vunpack.c.l.bf16 %v5962_v29  ;;  %v292_v44 = vmax.f32 %v228_v26, 0.0  ;;  %v231_v47 = vadd.f32 %v7693_v14, %v160_v31 }
   0xc   :  { %379 = vst.msk [vmem:[#allocation2 + $0xc0] sm:$0x1] %vm370_vm3, %v7453_v2  ;;  %380 = vst.msk [vmem:[#allocation2 + $0xd8] sm:$0x1] %vm370_vm3, %v7453_v2  ;;  %v293_v45 = vmax.f32 %v229_v27, 0.0  ;;  %v294_v46 = vmax.f32 %v230_v28, 0.0  ;;  %v232_v51 = vadd.f32 %v7693_v14, %v161_v32  ;;  %v233_v52 = vadd.f32 %v7693_v14, %v162_v33 }
   0xd   :  { %381 = vst.msk [vmem:[#allocation2 + $0xf0] sm:$0x1] %vm370_vm3, %v7453_v2  ;;  %382 = vst.msk [vmem:[#allocation2 + $0x108] sm:$0x1] %vm370_vm3, %v7453_v2  ;;  %v295_v55 = vmax.f32 %v231_v47, 0.0  ;;  %v234_v56 = vadd.f32 %v7693_v14, %v163_v39  ;;  %v5850_v57 = vunpack.c.h.bf16 %v5962_v29  ;;  %v164_v61 = vmul.f32 %v5849_v43, %v7665_v6  ;;  %v7763_v19 = vld [vmem:[%s9952_s0 + $0x40] sm:$0xff]  }
   0xe   :  { %383 = vst.msk [vmem:[#allocation2 + $0x120] sm:$0x1] %vm370_vm3, %v7453_v2  ;;  %384 = vst.msk [vmem:[#allocation2 + $0x138] sm:$0x1] %vm370_vm3, %v7453_v2  ;;  %v508_v34 = vld [vmem:[#allocation2] sm:$0xff]  ;;  %v296_v59 = vmax.f32 %v232_v51, 0.0  ;;  %v5853_v62 = vunpack.c.l.bf16 %v5963_v48  ;;  %v5854_v1 = vunpack.c.h.bf16 %v5963_v48  ;;  %v5858_v7 = vunpack.c.h.bf16 %v5964_v53 }
   0xf   :  { %385 = vst.msk [vmem:[#allocation2 + $0x150] sm:$0x1] %vm370_vm3, %v7453_v2  ;;  %386 = vst.msk [vmem:[#allocation2 + $0x168] sm:$0x1] %vm370_vm3, %v7453_v2  ;;  %v510_v35 = vld [vmem:[#allocation2 + $0x10] sm:$0x3]  ;;  %v165_v0 = vmul.f32 %v5850_v57, %v7665_v6  ;;  %v235_v3 = vadd.f32 %v7693_v14, %v164_v61  ;;  %v5861_v8 = vunpack.c.l.bf16 %v5965_v58  ;;  %v5862_v12 = vunpack.c.h.bf16 %v5965_v58 }
  0x10   :  { %387 = vst.msk [vmem:[#allocation2 + $0x180] sm:$0x1] %vm370_vm3, %v7453_v2  ;;  %390 = vst.msk [vmem:[#allocation2 + $0x1c8] sm:$0x1] %vm370_vm3, %v7453_v2  ;;  %v746_v40 = vrot.slane %v508_v34, 1  ;;  %v749_v41 = vrot.slane %v510_v35, 1  ;;  %v166_v5 = vmul.f32 %v5853_v62, %v7665_v6  ;;  %v167_v10 = vmul.f32 %v5854_v1, %v7665_v6 }
  0x11   :  { %391 = vst.msk [vmem:[#allocation2 + $0x1e0] sm:$0x1] %vm370_vm3, %v7453_v2  ;;  %392 = vst.msk [vmem:[#allocation2 + $0x1f8] sm:$0x1] %vm370_vm3, %v7453_v2  ;;  %v297_v60 = vmax.f32 %v233_v52, 0.0  ;;  %v298_v63 = vmax.f32 %v234_v56, 0.0  ;;  %v236_v9 = vadd.f32 %v7693_v14, %v165_v0  ;;  %v169_v17 = vmul.f32 %v5858_v7, %v7665_v6 }
  0x12   :  { %393 = vst.msk [vmem:[#allocation2 + $0x210] sm:$0x1] %vm370_vm3, %v7453_v2  ;;  %394 = vst.msk [vmem:[#allocation2 + $0x228] sm:$0x1] %vm370_vm3, %v7453_v2  ;;  %v748_v49 = vsel %vm745_vm4, %v746_v40, %v747_v36  ;;  %v750_v50 = vsel %vm745_vm4, %v747_v36, %v749_v41  ;;  %v299_v15 = vmax.f32 %v235_v3, 0.0  ;;  %v237_v16 = vadd.f32 %v7693_v14, %v166_v5 }
  0x13   :  { %395 = vst.msk [vmem:[#allocation2 + $0x240] sm:$0x1] %vm370_vm3, %v7453_v2  ;;  %396 = vst.msk [vmem:[#allocation2 + $0x258] sm:$0x1] %vm370_vm3, %v7453_v2  ;;  %v970_v54 = vpack.c.bf16 %v750_v50, %v748_v49  ;;  %v170_v18 = vmul.f32 %v5861_v8, %v7665_v6  ;;  %v300_v21 = vmax.f32 %v236_v9, 0.0  ;;  %v7767_v22 = vadd.f32 %v7693_v14, %v167_v10  ;;  %v5967_v9 = vld [vmem:[%s9952_s0 + $0x48] sm:$0xff]  }
  0x14   :  { %397 = vst.msk [vmem:[#allocation2 + $0x270] sm:$0x1] %vm370_vm3, %v7453_v2  ;;  %398 = vst.msk [vmem:[#allocation2 + $0x288] sm:$0x1] %vm370_vm3, %v7453_v2  ;;  %v301_v27 = vmax.f32 %v237_v16, 0.0  ;;  %v7780_v28 = vadd.f32 %v7693_v14, %v169_v17  ;;  %v171_v29 = vmul.f32 %v5862_v12, %v7665_v6  ;;  %v5865_v36 = vunpack.c.l.bf16 %v7763_v19 }
  0x15   :  { %399 = vst.msk [vmem:[#allocation2 + $0x2a0] sm:$0x1] %vm370_vm3, %v7453_v2  ;;  %400 = vst.msk [vmem:[#allocation2 + $0x2b8] sm:$0x1] %vm370_vm3, %v7453_v2  ;;  %6289 = vmatprep.mubr.msk.bf16.mxu1 %vm355_vm1, %v970_v54  ;;  %v7784_v30 = vadd.f32 %v7693_v14, %v170_v18  ;;  %v7833_v1 = vld [vmem:[%s9951_s3 + $0x18] sm:$0xf] }
  0x16   :  { %401 = vst.msk [vmem:[#allocation2 + $0x2d0] sm:$0x1] %vm370_vm3, %v7453_v2  ;;  %402 = vst.msk [vmem:[#allocation2 + $0x2e8] sm:$0x1] %vm370_vm3, %v7453_v2  ;;  %v304_v7 = vmax.f32 %v7780_v28, 0.0  ;;  %v242_v8 = vadd.f32 %v7693_v14, %v171_v29  ;;  %v5866_v28 = vunpack.c.h.bf16 %v7763_v19  ;;  %v172_v29 = vmul.f32 %v5865_v36, %v7665_v6 }
  0x17   :  { %403 = vst.msk [vmem:[#allocation2 + $0x300] sm:$0x1] %vm370_vm3, %v7453_v2  ;;  %404 = vst.msk [vmem:[#allocation2 + $0x318] sm:$0x1] %vm370_vm3, %v7453_v2  ;;  %v305_v16 = vmax.f32 %v7784_v30, 0.0  ;;  %v5869_v30 = vunpack.c.l.bf16 %v5967_v9  ;;  %vm5004_vm6 = vcmask 60416  }
  0x18   :  { %405 = vst.msk [vmem:[#allocation2 + $0x330] sm:$0x1] %vm370_vm3, %v7453_v2  ;;  %408 = vst.msk [vmem:[#allocation2 + $0x29] sm:$0x1] %vm370_vm3, %v7453_v2  ;;  %v173_v19 = vmul.f32 %v5866_v28, %v7665_v6  ;;  %v243_v36 = vadd.f32 %v7693_v14, %v172_v29 }
  0x19   :  { %409 = vst.msk [vmem:[#allocation2 + $0x41] sm:$0x1] %vm370_vm3, %v7453_v2  ;;  %410 = vst.msk [vmem:[#allocation2 + $0x59] sm:$0x1] %vm370_vm3, %v7453_v2 }
  0x1a   :  { %411 = vst.msk [vmem:[#allocation2 + $0x71] sm:$0x1] %vm370_vm3, %v7453_v2  ;;  %412 = vst.msk [vmem:[#allocation2 + $0x89] sm:$0x1] %vm370_vm3, %v7453_v2 }
  0x1b   :  { %413 = vst.msk [vmem:[#allocation2 + $0xa1] sm:$0x1] %vm370_vm3, %v7453_v2  ;;  %414 = vst.msk [vmem:[#allocation2 + $0xb9] sm:$0x1] %vm370_vm3, %v7453_v2 }
  0x1c   :  { %415 = vst.msk [vmem:[#allocation2 + $0xd1] sm:$0x1] %vm370_vm3, %v7453_v2  ;;  %416 = vst.msk [vmem:[#allocation2 + $0xe9] sm:$0x1] %vm370_vm3, %v7453_v2 }
  0x1d   :  { %417 = vst.msk [vmem:[#allocation2 + $0x101] sm:$0x1] %vm370_vm3, %v7453_v2  ;;  %418 = vst.msk [vmem:[#allocation2 + $0x119] sm:$0x1] %vm370_vm3, %v7453_v2 }
  0x1e   :  { %419 = vst.msk [vmem:[#allocation2 + $0x131] sm:$0x1] %vm370_vm3, %v7453_v2  ;;  %420 = vst.msk [vmem:[#allocation2 + $0x149] sm:$0x1] %vm370_vm3, %v7453_v2 }
  0x1f   :  { %421 = vst.msk [vmem:[#allocation2 + $0x161] sm:$0x1] %vm370_vm3, %v7453_v2  ;;  %422 = vst.msk [vmem:[#allocation2 + $0x179] sm:$0x1] %vm370_vm3, %v7453_v2 }
  0x20   :  { %423 = vst.msk [vmem:[#allocation2 + $0x191] sm:$0x1] %vm370_vm3, %v7453_v2  ;;  %426 = vst.msk [vmem:[#allocation2 + $0x1d9] sm:$0x1] %vm370_vm3, %v7453_v2 }
  0x21   :  { %427 = vst.msk [vmem:[#allocation2 + $0x1f1] sm:$0x1] %vm370_vm3, %v7453_v2  ;;  %428 = vst.msk [vmem:[#allocation2 + $0x209] sm:$0x1] %vm370_vm3, %v7453_v2 }
  0x22   :  { %429 = vst.msk [vmem:[#allocation2 + $0x221] sm:$0x1] %vm370_vm3, %v7453_v2  ;;  %430 = vst.msk [vmem:[#allocation2 + $0x239] sm:$0x1] %vm370_vm3, %v7453_v2 }
  0x23   :  { %431 = vst.msk [vmem:[#allocation2 + $0x251] sm:$0x1] %vm370_vm3, %v7453_v2  ;;  %432 = vst.msk [vmem:[#allocation2 + $0x269] sm:$0x1] %vm370_vm3, %v7453_v2 }
  0x24   :  { %433 = vst.msk [vmem:[#allocation2 + $0x281] sm:$0x1] %vm370_vm3, %v7453_v2  ;;  %434 = vst.msk [vmem:[#allocation2 + $0x299] sm:$0x1] %vm370_vm3, %v7453_v2 }
  0x25   :  { %435 = vst.msk [vmem:[#allocation2 + $0x2b1] sm:$0x1] %vm370_vm3, %v7453_v2  ;;  %436 = vst.msk [vmem:[#allocation2 + $0x2c9] sm:$0x1] %vm370_vm3, %v7453_v2 }
  0x26   :  { %437 = vst.msk [vmem:[#allocation2 + $0x2e1] sm:$0x1] %vm370_vm3, %v7453_v2  ;;  %438 = vst.msk [vmem:[#allocation2 + $0x2f9] sm:$0x1] %vm370_vm3, %v7453_v2 }
  0x27   :  { %439 = vst.msk [vmem:[#allocation2 + $0x311] sm:$0x1] %vm370_vm3, %v7453_v2  ;;  %440 = vst.msk [vmem:[#allocation2 + $0x329] sm:$0x1] %vm370_vm3, %v7453_v2 }
  0x28   :  { %441 = vst.msk [vmem:[#allocation2 + $0x341] sm:$0x1] %vm370_vm3, %v7453_v2  ;;  %388 = vst.msk [vmem:[#allocation2 + $0x198] sm:$0x1] %vm370_vm3, %v7453_v2 }
  0x29   :  { %389 = vst.msk [vmem:[#allocation2 + $0x1b0] sm:$0x1] %vm370_vm3, %v7453_v2  ;;  %406 = vst.msk [vmem:[#allocation2 + $0x348] sm:$0x1] %vm370_vm3, %v7453_v2 }
  0x2a   :  { %424 = vst.msk [vmem:[#allocation2 + $0x1a9] sm:$0x1] %vm370_vm3, %v7453_v2  ;;  %425 = vst.msk [vmem:[#allocation2 + $0x1c1] sm:$0x1] %vm370_vm3, %v7453_v2 }
  0x2b   :  { %442 = vst.msk [vmem:[#allocation2 + $0x359] sm:$0x1] %vm370_vm3, %v7453_v2  ;;  %v5857_v2 = vunpack.c.l.bf16 %v5964_v53 }
  0x2c   :  { %444 = vst.msk [vmem:[#allocation2 + $0x19] sm:$0xff] %vm355_vm1, %v291_v37  ;;  %445 = vst.msk [vmem:[#allocation2 + $0x21] sm:$0xff] %vm355_vm1, %v292_v44 }
  0x2d   :  { %446 = vst.msk [vmem:[#allocation2 + $0x31] sm:$0xff] %vm355_vm1, %v293_v45  ;;  %447 = vst.msk [vmem:[#allocation2 + $0x39] sm:$0xff] %vm355_vm1, %v294_v46  ;;  %v168_v11 = vmul.f32 %v5857_v2, %v7665_v6 }
  0x2e   :  { %448 = vst.msk [vmem:[#allocation2 + $0x49] sm:$0xff] %vm355_vm1, %v295_v55  ;;  %449 = vst.msk [vmem:[#allocation2 + $0x51] sm:$0xff] %vm355_vm1, %v296_v59 }
  0x2f   :  { %450 = vst.msk [vmem:[#allocation2 + $0x61] sm:$0xff] %vm355_vm1, %v297_v60  ;;  %451 = vst.msk [vmem:[#allocation2 + $0x69] sm:$0xff] %vm355_vm1, %v298_v63  ;;  %v7770_v23 = vadd.f32 %v7693_v14, %v168_v11  ;;  %v302_v63 = vmax.f32 %v7767_v22, 0.0  ;;  %v306_v22 = vmax.f32 %v242_v8, 0.0 }
  0x30   :  { %452 = vst.msk [vmem:[#allocation2 + $0x79] sm:$0xff] %vm355_vm1, %v299_v15  ;;  %453 = vst.msk [vmem:[#allocation2 + $0x81] sm:$0xff] %vm355_vm1, %v300_v21 }
  0x31   :  { %454 = vst.msk [vmem:[#allocation2 + $0x91] sm:$0xff] %vm355_vm1, %v301_v27  ;;  %v303_v0 = vmax.f32 %v7770_v23, 0.0  ;;  %455 = vst.msk [vmem:[#allocation2 + $0x99] sm:$0xff] %vm355_vm1, %v302_v63  ;;  %v2037_v23 = vld [vmem:[%s9951_s3 + $0x8] sm:$0xf] }
  0x32   :  { %457 = vst.msk [vmem:[#allocation2 + $0xb1] sm:$0xff] %vm355_vm1, %v304_v7  ;;  %458 = vst.msk [vmem:[#allocation2 + $0xc1] sm:$0xff] %vm355_vm1, %v305_v16 }
  0x33   :  { %v7755_v13 = vld [vmem:[#allocation2 + $0x18] sm:$0xff]  ;;  %v7772_v24 = vld [vmem:[#allocation2 + $0x20] sm:$0xff]  ;;  %v7774_v25 = vld [vmem:[#allocation2 + $0x28] sm:$0x3]  ;;  %456 = vst.msk [vmem:[#allocation2 + $0xa9] sm:$0xff] %vm355_vm1, %v303_v0 }
  0x34   :  { %v751_v20 = vrot.slane %v7755_v13, 1  ;;  %v7776_v26 = vld [vmem:[#allocation2 + $0x30] sm:$0xff]  ;;  %v752_v31 = vrot.slane %v7772_v24, 1  ;;  %v754_v32 = vrot.slane %v7774_v25, 1  ;;  %v7788_v33 = vld [vmem:[#allocation2 + $0x38] sm:$0xff]  ;;  %459 = vst.msk [vmem:[#allocation2 + $0xc9] sm:$0xff] %vm355_vm1, %v306_v22 }
  0x35   :  { %v7790_v34 = vld [vmem:[#allocation2 + $0x40] sm:$0x3]  ;;  %v756_v35 = vrot.slane %v7776_v26, 1  ;;  %v757_v37 = vrot.slane %v7788_v33, 1  ;;  %v7799_v43 = vld [vmem:[#allocation2 + $0x48] sm:$0xff]  ;;  %v7805_v47 = vld [vmem:[#allocation2 + $0x50] sm:$0xff] }
  0x36   :  { %v759_v39 = vrot.slane %v7790_v34, 1  ;;  %v753_v44 = vsel %vm745_vm4, %v751_v20, %v752_v31  ;;  %v755_v45 = vsel %vm745_vm4, %v752_v31, %v754_v32  ;;  %v7807_v48 = vld [vmem:[#allocation2 + $0x58] sm:$0x3]  ;;  %v761_v49 = vrot.slane %v7799_v43, 1  ;;  %v7810_v50 = vld [vmem:[#allocation2 + $0x60] sm:$0xff]  ;;  %v7815_v55 = vld [vmem:[#allocation2 + $0x68] sm:$0xff] }
  0x37   :  { %v971_v51 = vpack.c.bf16 %v755_v45, %v753_v44  ;;  %v758_v52 = vsel %vm745_vm4, %v756_v35, %v757_v37  ;;  %v762_v54 = vrot.slane %v7805_v47, 1  ;;  %v7817_v56 = vld [vmem:[#allocation2 + $0x70] sm:$0x3]  ;;  %v764_v58 = vrot.slane %v7807_v48, 1  ;;  %v7840_v5 = vld [vmem:[#allocation2 + $0x78] sm:$0xff]  ;;  %v7853_v11 = vld [vmem:[#allocation2 + $0x80] sm:$0xff] }
  0x38   :  { %v760_v53 = vsel %vm745_vm4, %v757_v37, %v759_v39  ;;  %v766_v59 = vrot.slane %v7810_v50, 1  ;;  %v767_v60 = vrot.slane %v7815_v55, 1  ;;  %v769_v62 = vrot.slane %v7817_v56, 1  ;;  %v7855_v12 = vld [vmem:[#allocation2 + $0x88] sm:$0x3]  ;;  %v7868_v21 = vld [vmem:[#allocation2 + $0x90] sm:$0xff] }
  0x39   :  { %v7819_v57 = vpack.c.bf16 %v760_v53, %v758_v52  ;;  %6290 = vmatmul.mubr.msk.bf16.vlgmr.msra.gmra.mrb[0].mxu1 %vm355_vm1, %v971_v51  ;;  %6553 = vmatprep.mubr.msk.bf16.mxu0 %vm355_vm1, %v971_v51  ;;  %v763_v61 = vsel %vm745_vm4, %v761_v49, %v762_v54  ;;  %v765_v2 = vsel %vm745_vm4, %v762_v54, %v764_v58  ;;  %v771_v15 = vrot.slane %v7840_v5, 1  ;;  %v7885_v31 = vld [vmem:[%s9952_s0 + $0x58] sm:$0xff]   ;;  %v7899_v49 = vld [vmem:[%s9952_s0 + $0x60] sm:$0xff]  }
  0x3a   :  { %6354 = vmatpush3.bf16.msra.mxu1 %v7718_v38  ;;  %v768_v3 = vsel %vm745_vm4, %v766_v59, %v767_v60  ;;  %v7850_v38 = vpack.c.bf16 %v765_v2, %v763_v61  ;;  %v770_v10 = vsel %vm745_vm4, %v767_v60, %v769_v62  ;;  %v772_v18 = vrot.slane %v7853_v11, 1  ;;  %v7913_v62 = vld [vmem:[#allocation2 + $0x98] sm:$0xff]  ;;  %v7915_v63 = vld [vmem:[#allocation2 + $0xa0] sm:$0x3]  ;;  %v7917_v0 = vld [vmem:[#allocation2 + $0xa8] sm:$0xff] }
  0x3b   :  { %10059 = vst [vmem:[#allocation4_spill] sm:$0xff] %v7819_v57  ;;  %6554 = vmatmul.mubr.msk.bf16.vlgmr.msra.gmra.mrb[0].mxu0 %vm355_vm1, %v7819_v57  ;;  %6293 = vmatprep.mubr.msk.bf16.mxu1 %vm355_vm1, %v7819_v57  ;;  %v7864_v17 = vpack.c.bf16 %v770_v10, %v768_v3  ;;  %v774_v20 = vrot.slane %v7855_v12, 1  ;;  %v776_v27 = vrot.slane %v7868_v21, 1  ;;  %v5870_v37 = vunpack.c.h.bf16 %v5967_v9  ;;  %v7929_v16 = vld [vmem:[#allocation2 + $0xb8] sm:$0x3] }
  0x3c   :  { %6618 = vmatpush3.bf16.msra.mxu0 %v7722_v42  ;;  %10060 = vst [vmem:[#allocation5_spill] sm:$0xff] %v7850_v38  ;;  %v5968_v42 = vld [vmem:[%s9952_s0 + $0x50] sm:$0xff]   ;;  %6557 = vmatprep.mubr.msk.bf16.mxu0 %vm355_vm1, %v7850_v38  ;;  %v773_v32 = vsel %vm745_vm4, %v771_v15, %v772_v18  ;;  %v174_v45 = vmul.f32 %v5869_v30, %v7665_v6  ;;  %v5877_v54 = vunpack.c.l.bf16 %v7885_v31  ;;  %v307_v59 = vmax.f32 %v243_v36, 0.0 }
  0x3d   :  { %10061 = vst [vmem:[#allocation6_spill] sm:$0xff] %v7864_v17  ;;  %7402 = vmatprep.subr.msk.bf16.mxu0 %vm1099_vm0, %v7833_v1  ;;  %7397 = vmatprep.subr.msk.bf16.mxu1 %vm1099_vm0, %v2037_v23  ;;  %v775_v35 = vsel %vm745_vm4, %v772_v18, %v774_v20  ;;  %v5873_v39 = vunpack.c.l.bf16 %v5968_v42  ;;  %v175_v51 = vmul.f32 %v5870_v37, %v7665_v6  ;;  %v5874_v52 = vunpack.c.h.bf16 %v5968_v42  ;;  %v7927_v15 = vld [vmem:[#allocation2 + $0xb0] sm:$0xff]  ;;  %v7936_v23 = vld [vmem:[#allocation2 + $0xc0] sm:$0xff] }
  0x3e   :  { %v7891_v44 = vpack.c.bf16 %v775_v35, %v773_v32  ;;  %v244_v58 = vadd.f32 %v7693_v14, %v173_v19  ;;  %v245_v60 = vadd.f32 %v7693_v14, %v174_v45  ;;  %v5878_v61 = vunpack.c.h.bf16 %v7885_v31  ;;  %460 = vst.msk [vmem:[#allocation2 + $0xd9] sm:$0xff] %vm355_vm1, %v307_v59  ;;  %v7940_v32 = vld [vmem:[#allocation2 + $0xc8] sm:$0xff]  ;;  %v7942_v35 = vld [vmem:[#allocation2 + $0xd0] sm:$0x3] }
  0x3f   :  { %v176_v53 = vmul.f32 %v5873_v39, %v7665_v6  ;;  %v246_v2 = vadd.f32 %v7693_v14, %v175_v51  ;;  %v177_v3 = vmul.f32 %v5874_v52, %v7665_v6  ;;  %v5881_v8 = vunpack.c.l.bf16 %v7899_v49 }
  0x40   :  { %10062 = vst [vmem:[#allocation7_spill] sm:$0xff] %v7891_v44  ;;  %v777_v9 = vrot.slane %v7913_v62, 1  ;;  %v779_v10 = vrot.slane %v7915_v63, 1  ;;  %v781_v42 = vrot.slane %v7917_v0, 1  ;;  %v178_v18 = vmul.f32 %v5877_v54, %v7665_v6 }
  0x41   :  { %6294 = vmatmul.mubr.msk.bf16.gmra.mrb[4].mxu1 %vm355_vm1, %v7850_v38  ;;  %v247_v7 = vadd.f32 %v7693_v14, %v176_v53  ;;  %v782_v20 = vrot.slane %v7927_v15, 1  ;;  %v784_v22 = vrot.slane %v7929_v16, 1  ;;  %v308_v28 = vmax.f32 %v244_v58, 0.0 }
  0x42   :  { %6297 = vmatprep.mubr.msk.bf16.mxu1 %vm355_vm1, %v7864_v17  ;;  %v309_v29 = vmax.f32 %v245_v60, 0.0  ;;  %v778_v30 = vsel %vm745_vm4, %v776_v27, %v777_v9  ;;  %v780_v31 = vsel %vm745_vm4, %v777_v9, %v779_v10  ;;  %v786_v37 = vrot.slane %v7936_v23, 1  ;;  %v5971_v27 = vld [vmem:[%s9952_s0 + $0x68] sm:$0xff]  }
  0x43   :  { %6558 = vmatmul.mubr.msk.bf16.gmra.mrb[4].mxu0 %vm355_vm1, %v7864_v17  ;;  %v310_v39 = vmax.f32 %v246_v2, 0.0  ;;  %v7945_v19 = vpack.c.bf16 %v780_v31, %v778_v30  ;;  %v783_v36 = vsel %vm745_vm4, %v781_v42, %v782_v20  ;;  %v785_v45 = vsel %vm745_vm4, %v782_v20, %v784_v22  ;;  %461 = vst.msk [vmem:[#allocation2 + $0xe1] sm:$0xff] %vm355_vm1, %v308_v28  ;;  %v7985_v28 = vld [vmem:[%s9952_s0 + $0x78] sm:$0xff]  }
  0x44   :  { %6561 = vmatprep.mubr.msk.bf16.mxu0 %vm355_vm1, %v7891_v44  ;;  %v787_v51 = vrot.slane %v7940_v32, 1  ;;  %462 = vst.msk [vmem:[#allocation2 + $0xf1] sm:$0xff] %vm355_vm1, %v309_v29  ;;  %v7955_v52 = vpack.c.bf16 %v785_v45, %v783_v36  ;;  %v789_v53 = vrot.slane %v7942_v35, 1  ;;  %v248_v54 = vadd.f32 %v7693_v14, %v177_v3 }
  0x45   :  { %10063 = vst [vmem:[#allocation8_spill] sm:$0xff] %v7945_v19  ;;  %463 = vst.msk [vmem:[#allocation2 + $0xf9] sm:$0xff] %vm355_vm1, %v310_v39  ;;  %v311_v58 = vmax.f32 %v247_v7, 0.0  ;;  %v179_v60 = vmul.f32 %v5878_v61, %v7665_v6  ;;  %v249_v2 = vadd.f32 %v7693_v14, %v178_v18  ;;  %v5882_v9 = vunpack.c.h.bf16 %v7899_v49  ;;  %v5972_v7 = vld [vmem:[%s9952_s0 + $0x70] sm:$0xff]   ;;  %v7978_v61 = vld [vmem:[#allocation2 + $0xd8] sm:$0xff] }
  0x46   :  { %10064 = vst [vmem:[#allocation9_spill] sm:$0xff] %v7955_v52  ;;  %v788_v59 = vsel %vm745_vm4, %v786_v37, %v787_v51  ;;  %v790_v10 = vsel %vm745_vm4, %v787_v51, %v789_v53  ;;  %v312_v42 = vmax.f32 %v248_v54, 0.0  ;;  %v180_v20 = vmul.f32 %v5881_v8, %v7665_v6 }
  0x47   :  { %464 = vst.msk [vmem:[#allocation2 + $0x109] sm:$0xff] %vm355_vm1, %v311_v58  ;;  %v5885_v3 = vunpack.c.l.bf16 %v5971_v27  ;;  %v7976_v49 = vpack.c.bf16 %v790_v10, %v788_v59  ;;  %v250_v18 = vadd.f32 %v7693_v14, %v179_v60  ;;  %v313_v22 = vmax.f32 %v249_v2, 0.0 }
  0x48   :  { %v181_v8 = vmul.f32 %v5882_v9, %v7665_v6  ;;  %v791_v29 = vrot.slane %v7978_v61, 1  ;;  %465 = vst.msk [vmem:[#allocation2 + $0x111] sm:$0xff] %vm355_vm1, %v312_v42  ;;  %v251_v30 = vadd.f32 %v7693_v14, %v180_v20  ;;  %v5886_v31 = vunpack.c.h.bf16 %v5971_v27 }
  0x49   :  { %6298 = vmatmul.mubr.msk.bf16.gmra.mrb[8].mxu1 %vm355_vm1, %v7891_v44  ;;  %10065 = vst [vmem:[#allocation10_spill] sm:$0xff] %v7976_v49  ;;  %v182_v37 = vmul.f32 %v5885_v3, %v7665_v6  ;;  %v314_v39 = vmax.f32 %v250_v18, 0.0  ;;  %466 = vst.msk [vmem:[#allocation2 + $0x121] sm:$0xff] %vm355_vm1, %v313_v22  ;;  %v5889_v45 = vunpack.c.l.bf16 %v5972_v7  ;;  %v5890_v51 = vunpack.c.h.bf16 %v5972_v7 }
  0x4a   :  { %6301 = vmatprep.mubr.msk.bf16.mxu1 %vm355_vm1, %v7945_v19  ;;  %v252_v36 = vadd.f32 %v7693_v14, %v181_v8  ;;  %v7995_v53 = vld [vmem:[#allocation2 + $0xe0] sm:$0xff]  ;;  %v7997_v54 = vld [vmem:[#allocation2 + $0xe8] sm:$0x3]  ;;  %v315_v59 = vmax.f32 %v251_v30, 0.0  ;;  %v183_v60 = vmul.f32 %v5886_v31, %v7665_v6  ;;  %v5893_v2 = vunpack.c.l.bf16 %v7985_v28 }
  0x4b   :  { %6562 = vmatmul.mubr.msk.bf16.gmra.mrb[8].mxu0 %vm355_vm1, %v7945_v19  ;;  %v7999_v58 = vld [vmem:[#allocation2 + $0xf0] sm:$0xff]  ;;  %v253_v27 = vadd.f32 %v7693_v14, %v182_v37  ;;  %v792_v9 = vrot.slane %v7995_v53, 1  ;;  %v794_v10 = vrot.slane %v7997_v54, 1  ;;  %467 = vst.msk [vmem:[#allocation2 + $0x129] sm:$0xff] %vm355_vm1, %v314_v39  ;;  %v184_v7 = vmul.f32 %v5889_v45, %v7665_v6 }
  0x4c   :  { %6565 = vmatprep.mubr.msk.bf16.mxu0 %vm355_vm1, %v7955_v52  ;;  %v8006_v42 = vld [vmem:[#allocation2 + $0xf8] sm:$0xff]  ;;  %v8008_v20 = vld [vmem:[#allocation2 + $0x100] sm:$0x3]  ;;  %v796_v3 = vrot.slane %v7999_v58, 1  ;;  %v316_v8 = vmax.f32 %v252_v36, 0.0  ;;  %468 = vst.msk [vmem:[#allocation2 + $0x139] sm:$0xff] %vm355_vm1, %v315_v59  ;;  %v254_v30 = vadd.f32 %v7693_v14, %v183_v60  ;;  %v185_v39 = vmul.f32 %v5890_v51, %v7665_v6 }
  0x4d   :  { %v797_v18 = vrot.slane %v8006_v42, 1  ;;  %v799_v22 = vrot.slane %v8008_v20, 1  ;;  %v793_v31 = vsel %vm745_vm4, %v791_v29, %v792_v9  ;;  %v795_v37 = vsel %vm745_vm4, %v792_v9, %v794_v10  ;;  %v562_v29 = vld [vmem:[#allocation2 + $0x1b0] sm:$0xff] }
  0x4e   :  { %v8019_v46 = vld [vmem:[#allocation2 + $0x108] sm:$0xff]  ;;  %v317_v40 = vmax.f32 %v253_v27, 0.0  ;;  %v8024_v45 = vpack.c.bf16 %v795_v37, %v793_v31  ;;  %469 = vst.msk [vmem:[#allocation2 + $0x141] sm:$0xff] %vm355_vm1, %v316_v8  ;;  %v318_v10 = vmax.f32 %v254_v30, 0.0  ;;  %v5894_v37 = vunpack.c.h.bf16 %v7985_v28 }
  0x4f   :  { %v798_v36 = vsel %vm745_vm4, %v796_v3, %v797_v18  ;;  %v800_v59 = vsel %vm745_vm4, %v797_v18, %v799_v22  ;;  %v801_v60 = vrot.slane %v8019_v46, 1  ;;  %v8036_v27 = vld [vmem:[#allocation2 + $0x110] sm:$0xff]  ;;  %v8038_v9 = vld [vmem:[#allocation2 + $0x118] sm:$0x3]  ;;  %v255_v3 = vadd.f32 %v7693_v14, %v184_v7 }
  0x50   :  { %10066 = vst [vmem:[#allocation11_spill] sm:$0xff] %v8024_v45  ;;  %v8034_v51 = vpack.c.bf16 %v800_v59, %v798_v36  ;;  %470 = vst.msk [vmem:[#allocation2 + $0x151] sm:$0xff] %vm355_vm1, %v317_v40  ;;  %v256_v18 = vadd.f32 %v7693_v14, %v185_v39  ;;  %v802_v22 = vrot.slane %v8036_v27, 1  ;;  %v804_v8 = vrot.slane %v8038_v9, 1  ;;  %v8047_v31 = vld [vmem:[#allocation2 + $0x120] sm:$0xff]  ;;  %v563_v36 = vld [vmem:[#allocation2 + $0x1b8] sm:$0xff] }
  0x51   :  { %6302 = vmatmul.mubr.msk.bf16.gmra.mrb[12].mxu1 %vm355_vm1, %v7955_v52  ;;  %v186_v30 = vmul.f32 %v5893_v2, %v7665_v6  ;;  %v806_v40 = vrot.slane %v8047_v31, 1  ;;  %471 = vst.msk [vmem:[#allocation2 + $0x159] sm:$0xff] %vm355_vm1, %v318_v10  ;;  %v319_v7 = vmax.f32 %v255_v3, 0.0  ;;  %v564_v59 = vld [vmem:[#allocation2 + $0x1c0] sm:$0x3]  ;;  %v826_v41 = vrot.slane %v562_v29, 1 }
  0x52   :  { %6305 = vmatprep.mubr.msk.bf16.mxu1 %vm355_vm1, %v7976_v49  ;;  %10067 = vst [vmem:[#allocation12_spill] sm:$0xff] %v8034_v51  ;;  %v320_v39 = vmax.f32 %v256_v18, 0.0  ;;  %v803_v4 = vsel %vm745_vm4, %v801_v60, %v802_v22  ;;  %v8055_v52 = vld [vmem:[#allocation2 + $0x128] sm:$0xff]  ;;  %v8057_v19 = vld [vmem:[#allocation2 + $0x130] sm:$0x3]  ;;  %v187_v28 = vmul.f32 %v5894_v37, %v7665_v6  ;;  %v5974_v10 = vld [vmem:[%s9952_s0 + $0x80] sm:$0xff]  }
  0x53   :  { %6566 = vmatmul.mubr.msk.bf16.gmra.mrb[12].mxu0 %vm355_vm1, %v7976_v49  ;;  %v805_v49 = vsel %vm745_vm4, %v802_v22, %v804_v8  ;;  %v257_v2 = vadd.f32 %v7693_v14, %v186_v30  ;;  %v807_v29 = vrot.slane %v8055_v52, 1  ;;  %v809_v60 = vrot.slane %v8057_v19, 1  ;;  %v8068_v18 = vld [vmem:[#allocation2 + $0x138] sm:$0xff]  ;;  %472 = vst.msk [vmem:[#allocation2 + $0x169] sm:$0xff] %vm355_vm1, %v319_v7 }
  0x54   :  { %6569 = vmatprep.mubr.msk.bf16.mxu0 %vm355_vm1, %v8024_v45  ;;  %v8064_v3 = vpack.c.bf16 %v805_v49, %v803_v4  ;;  %473 = vst.msk [vmem:[#allocation2 + $0x171] sm:$0xff] %vm355_vm1, %v320_v39  ;;  %v827_v22 = vrot.slane %v563_v36, 1  ;;  %v811_v8 = vrot.slane %v8068_v18, 1  ;;  %v258_v37 = vadd.f32 %v7693_v14, %v187_v28 }
  0x55   :  { %v321_v30 = vmax.f32 %v257_v2, 0.0  ;;  %v829_v44 = vrot.slane %v564_v59, 1  ;;  %v808_v4 = vsel %vm745_vm4, %v806_v40, %v807_v29  ;;  %v810_v49 = vsel %vm745_vm4, %v807_v29, %v809_v60  ;;  %v8076_v17 = vld [vmem:[#allocation2 + $0x140] sm:$0xff]  ;;  %v8078_v38 = vld [vmem:[#allocation2 + $0x148] sm:$0x3] }
  0x56   :  { %10068 = vst [vmem:[#allocation13_spill] sm:$0xff] %v8064_v3  ;;  %10069 = vst [vmem:[#allocation14_spill] sm:$0xff] %v8076_v17  ;;  %v8081_v57 = vsel %vm745_vm4, %v826_v41, %v827_v22  ;;  %v5897_v7 = vunpack.c.l.bf16 %v5974_v10  ;;  %v8085_v36 = vpack.c.bf16 %v810_v49, %v808_v4  ;;  %v812_v39 = vrot.slane %v8076_v17, 1 }
  0x57   :  { %10070 = vst [vmem:[#allocation15_spill] sm:$0xff] %v8078_v38  ;;  %v814_v59 = vrot.slane %v8078_v38, 1  ;;  %v8089_v40 = vld [vmem:[#allocation2 + $0x150] sm:$0xff]  ;;  %v322_v28 = vmax.f32 %v258_v37, 0.0  ;;  %474 = vst.msk [vmem:[#allocation2 + $0x181] sm:$0xff] %vm355_vm1, %v321_v30  ;;  %v8098_v2 = vsel %vm745_vm4, %v827_v22, %v829_v44  ;;  %v5898_v29 = vunpack.c.h.bf16 %v5974_v10 }
  0x58   :  { %10071 = vst [vmem:[#allocation16_spill] sm:$0xff] %v8085_v36  ;;  %10072 = vst [vmem:[#allocation17_spill] sm:$0xff] %v8089_v40  ;;  %v816_v41 = vrot.slane %v8089_v40, 1  ;;  %v188_v60 = vmul.f32 %v5897_v7, %v7665_v6  ;;  %v813_v37 = vsel %vm745_vm4, %v811_v8, %v812_v39  ;;  %v8105_v4 = vld [vmem:[#allocation2 + $0x158] sm:$0xff]  ;;  %v8107_v49 = vld [vmem:[#allocation2 + $0x160] sm:$0x3] }
  0x59   :  { %6306 = vmatmul.mubr.msk.bf16.gmra.mrb[16].mxu1 %vm355_vm1, %v8024_v45  ;;  %v815_v30 = vsel %vm745_vm4, %v812_v39, %v814_v59  ;;  %10073 = vst [vmem:[#allocation18_spill] sm:$0xff] %v8105_v4  ;;  %10074 = vst [vmem:[#allocation19_spill] sm:$0xff] %v8107_v49  ;;  %v1786_v10 = vrot.slane %v7755_v13, 2  ;;  %v817_v7 = vrot.slane %v8105_v4, 1  ;;  %v189_v8 = vmul.f32 %v5898_v29, %v7665_v6 }
  0x5a   :  { %6309 = vmatprep.mubr.msk.bf16.mxu1 %vm355_vm1, %v8034_v51  ;;  %475 = vst.msk [vmem:[#allocation2 + $0x189] sm:$0xff] %vm355_vm1, %v322_v28  ;;  %v8113_v22 = vpack.c.bf16 %v815_v30, %v813_v37  ;;  %v8118_v39 = vld [vmem:[#allocation2 + $0x168] sm:$0xff]  ;;  %v259_v28 = vadd.f32 %v7693_v14, %v188_v60  ;;  %v1787_v44 = vrot.slane %v7772_v24, 2  ;;  %v1789_v13 = vrot.slane %v7774_v25, 2 }
  0x5b   :  { %6570 = vmatmul.mubr.msk.bf16.gmra.mrb[16].mxu0 %vm355_vm1, %v8034_v51  ;;  %v819_v51 = vrot.slane %v8107_v49, 1  ;;  %v8120_v59 = vld [vmem:[#allocation2 + $0x170] sm:$0xff]  ;;  %v8122_v45 = vld [vmem:[#allocation2 + $0x178] sm:$0x3]  ;;  %v10076_v37 = vrot.slane %v7788_v33, 2  ;;  %v10077_v30 = vrot.slane %v7776_v26, 2  ;;  %v818_v29 = vsel %vm745_vm4, %v816_v41, %v817_v7 }
  0x5c   :  { %6573 = vmatprep.mubr.msk.bf16.mxu0 %vm355_vm1, %v8064_v3  ;;  %10075 = vst [vmem:[#allocation20_spill] sm:$0xff] %v8113_v22  ;;  %v821_v40 = vrot.slane %v8118_v39, 1  ;;  %v822_v38 = vrot.slane %v8120_v59, 1  ;;  %v824_v24 = vrot.slane %v8122_v45, 1  ;;  %v260_v25 = vadd.f32 %v7693_v14, %v189_v8  ;;  %v5975_v26 = vld [vmem:[%s9952_s0 + $0x88] sm:$0xff]   ;;  %v5976_v8 = vld [vmem:[%s9952_s0 + $0x90] sm:$0xff]  }
  0x5d   :  { %v1793_v49 = vsel %vm1780_vm5, %v10077_v30, %v10076_v37  ;;  %v820_v4 = vsel %vm745_vm4, %v817_v7, %v819_v51  ;;  %v323_v60 = vmax.f32 %v259_v28, 0.0  ;;  %v1788_v51 = vsel %vm1780_vm5, %v1786_v10, %v1787_v44 }
  0x5e   :  { %v8136_v17 = vpack.c.bf16 %v820_v4, %v818_v29  ;;  %v823_v37 = vsel %vm745_vm4, %v821_v40, %v822_v38  ;;  %v8144_v41 = vld [vmem:[#allocation2 + $0x180] sm:$0xff]  ;;  %v1790_v7 = vsel %vm1780_vm5, %v1787_v44, %v1789_v13  ;;  %v10079_v4 = vrot.slane %v7790_v34, 2 }
  0x5f   :  { %v10080_v30 = vrot.slane %v7788_v33, 2  ;;  %v825_v40 = vsel %vm745_vm4, %v822_v38, %v824_v24  ;;  %v2861_v28 = vrot.slane %v8144_v41, 1  ;;  %v324_v10 = vmax.f32 %v260_v25, 0.0  ;;  %476 = vst.msk [vmem:[#allocation2 + $0x1c9] sm:$0xff] %vm355_vm1, %v323_v60 }
  0x60   :  { %10078 = vst [vmem:[#allocation21_spill] sm:$0xff] %v8136_v17  ;;  %v8161_v44 = vpack.c.bf16 %v1790_v7, %v1788_v51  ;;  %v8167_v33 = vpack.c.bf16 %v825_v40, %v823_v37  ;;  %v8177_v24 = vsel %vm1099_vm0, %v7833_v1, 0  ;;  %v5901_v25 = vunpack.c.l.bf16 %v5975_v26 }
  0x61   :  { %v1795_v29 = vsel %vm1780_vm5, %v10080_v30, %v10079_v4  ;;  %6310 = vmatmul.mubr.msk.bf16.gmra.mrb[20].mxu1 %vm355_vm1, %v8064_v3  ;;  %v8169_v34 = vld [vmem:[#allocation2 + $0x188] sm:$0xff]  ;;  %v8171_v13 = vld [vmem:[#allocation2 + $0x190] sm:$0x3]  ;;  %477 = vst.msk [vmem:[#allocation2 + $0x1d1] sm:$0xff] %vm355_vm1, %v324_v10  ;;  %v5902_v37 = vunpack.c.h.bf16 %v5975_v26  ;;  %v5905_v7 = vunpack.c.l.bf16 %v5976_v8  ;;  %v1796_v30 = vrot.slane %v7799_v43, 2 }
  0x62   :  { %10081 = vst [vmem:[#allocation22_spill] sm:$0xff] %v8161_v44  ;;  %6313 = vmatprep.mubr.msk.bf16.mxu1 %vm355_vm1, %v8085_v36  ;;  %10082 = vst [vmem:[#allocation23_spill] sm:$0xff] %v8167_v33  ;;  %v8173_v38 = vpack.c.bf16 %v1795_v29, %v1793_v49  ;;  %v2862_v60 = vrot.slane %v8169_v34, 1  ;;  %v2864_v51 = vrot.slane %v8171_v13, 1  ;;  %v190_v4 = vmul.f32 %v5901_v25, %v7665_v6 }
  0x63   :  { %6574 = vmatmul.mubr.msk.bf16.gmra.mrb[20].mxu0 %vm355_vm1, %v8085_v36  ;;  %10083 = vst [vmem:[#allocation24_spill] sm:$0xff] %v8171_v13  ;;  %v5906_v49 = vunpack.c.h.bf16 %v5976_v8  ;;  %v1797_v1 = vrot.slane %v7805_v47, 2  ;;  %v191_v36 = vmul.f32 %v5902_v37, %v7665_v6  ;;  %v192_v3 = vmul.f32 %v5905_v7, %v7665_v6 }
  0x64   :  { %10084 = vst [vmem:[#allocation25_spill] sm:$0xff] %v8173_v38  ;;  %6577 = vmatprep.mubr.msk.bf16.mxu0 %vm355_vm1, %v8113_v22  ;;  %v2863_v29 = vsel %vm745_vm4, %v2861_v28, %v2862_v60  ;;  %v2865_v40 = vsel %vm745_vm4, %v2862_v60, %v2864_v51  ;;  %v261_v26 = vadd.f32 %v7693_v14, %v190_v4  ;;  %v1799_v28 = vrot.slane %v7807_v48, 2 }
  0x65   :  { %v8191_v13 = vpack.c.bf16 %v2865_v40, %v2863_v29  ;;  %v193_v10 = vmul.f32 %v5906_v49, %v7665_v6  ;;  %v1798_v8 = vsel %vm1780_vm5, %v1796_v30, %v1797_v1  ;;  %v262_v43 = vadd.f32 %v7693_v14, %v191_v36  ;;  %v5977_v49 = vld [vmem:[%s9952_s0 + $0x98] sm:$0xff]   ;;  %v5978_v30 = vld [vmem:[%s9952_s0 + $0xa0] sm:$0xff]  }
  0x66   :  { %v263_v47 = vadd.f32 %v7693_v14, %v192_v3  ;;  %v1801_v25 = vrot.slane %v7810_v50, 2  ;;  %v8200_v60 = vld [vmem:[#allocation2 + $0x1c8] sm:$0xff]  ;;  %v325_v51 = vmax.f32 %v261_v26, 0.0  ;;  %v1802_v7 = vrot.slane %v7815_v55, 2 }
  0x67   :  { %10085 = vst [vmem:[#allocation26_spill] sm:$0xff] %v8191_v13  ;;  %v264_v37 = vadd.f32 %v7693_v14, %v193_v10  ;;  %v1804_v4 = vrot.slane %v7817_v56, 2  ;;  %v831_v48 = vrot.slane %v8200_v60, 1  ;;  %v326_v3 = vmax.f32 %v262_v43, 0.0 }
  0x68   :  { %v327_v50 = vmax.f32 %v263_v47, 0.0  ;;  %v1800_v36 = vsel %vm1780_vm5, %v1797_v1, %v1799_v28  ;;  %v8219_v55 = vld [vmem:[#allocation2 + $0x1d0] sm:$0xff]  ;;  %v8221_v56 = vld [vmem:[#allocation2 + $0x1d8] sm:$0x3]  ;;  %478 = vst.msk [vmem:[#allocation2 + $0x1e1] sm:$0xff] %vm355_vm1, %v325_v51  ;;  %v1803_v1 = vsel %vm1780_vm5, %v1801_v25, %v1802_v7  ;;  %v5909_v28 = vunpack.c.l.bf16 %v5977_v49 }
  0x69   :  { %6314 = vmatmul.mubr.msk.bf16.gmra.mrb[24].mxu1 %vm355_vm1, %v8113_v22  ;;  %v328_v29 = vmax.f32 %v264_v37, 0.0  ;;  %v8224_v40 = vpack.c.bf16 %v1800_v36, %v1798_v8  ;;  %v1805_v26 = vsel %vm1780_vm5, %v1802_v7, %v1804_v4  ;;  %v832_v10 = vrot.slane %v8219_v55, 1  ;;  %479 = vst.msk [vmem:[#allocation2 + $0x1e9] sm:$0xff] %vm355_vm1, %v326_v3 }
  0x6a   :  { %6317 = vmatprep.mubr.msk.bf16.mxu1 %vm355_vm1, %v8136_v17  ;;  %v834_v43 = vrot.slane %v8221_v56, 1  ;;  %480 = vst.msk [vmem:[#allocation2 + $0x1f9] sm:$0xff] %vm355_vm1, %v327_v50  ;;  %v8234_v47 = vpack.c.bf16 %v1805_v26, %v1803_v1  ;;  %v5910_v8 = vunpack.c.h.bf16 %v5977_v49  ;;  %v5913_v25 = vunpack.c.l.bf16 %v5978_v30 }
  0x6b   :  { %6578 = vmatmul.mubr.msk.bf16.gmra.mrb[24].mxu0 %vm355_vm1, %v8136_v17  ;;  %10086 = vst [vmem:[#allocation27_spill] sm:$0xff] %v8224_v40  ;;  %481 = vst.msk [vmem:[#allocation2 + $0x201] sm:$0xff] %vm355_vm1, %v328_v29  ;;  %v5914_v51 = vunpack.c.h.bf16 %v5978_v30  ;;  %v1806_v37 = vrot.slane %v7840_v5, 2  ;;  %v833_v7 = vsel %vm745_vm4, %v831_v48, %v832_v10  ;;  %v194_v36 = vmul.f32 %v5909_v28, %v7665_v6  ;;  %v5979_v5 = vld [vmem:[%s9952_s0 + $0xa8] sm:$0xff]  }
  0x6c   :  { %6581 = vmatprep.mubr.msk.bf16.mxu0 %vm355_vm1, %v8167_v33  ;;  %10087 = vst [vmem:[#allocation28_spill] sm:$0xff] %v8234_v47  ;;  %v835_v4 = vsel %vm745_vm4, %v832_v10, %v834_v43  ;;  %v1807_v3 = vrot.slane %v7853_v11, 2  ;;  %v195_v50 = vmul.f32 %v5910_v8, %v7665_v6  ;;  %v196_v1 = vmul.f32 %v5913_v25, %v7665_v6 }
  0x6d   :  { %v8242_v17 = vpack.c.bf16 %v835_v4, %v833_v7  ;;  %v197_v49 = vmul.f32 %v5914_v51, %v7665_v6  ;;  %v265_v48 = vadd.f32 %v7693_v14, %v194_v36  ;;  %v1809_v29 = vrot.slane %v7855_v12, 2 }
  0x6e   :  { %v1808_v30 = vsel %vm1780_vm5, %v1806_v37, %v1807_v3  ;;  %v1811_v11 = vrot.slane %v7868_v21, 2  ;;  %v266_v26 = vadd.f32 %v7693_v14, %v195_v50  ;;  %v267_v10 = vadd.f32 %v7693_v14, %v196_v1 }
  0x6f   :  { %10088 = vst [vmem:[#allocation29_spill] sm:$0xff] %v8242_v17  ;;  %v268_v43 = vadd.f32 %v7693_v14, %v197_v49  ;;  %v1812_v6 = vrot.slane %v7913_v62, 2  ;;  %v8260_v28 = vld [vmem:[#allocation2 + $0x1e0] sm:$0xff]  ;;  %v329_v8 = vmax.f32 %v265_v48, 0.0  ;;  %v1810_v25 = vsel %vm1780_vm5, %v1807_v3, %v1809_v29 }
  0x70   :  { %v1814_v12 = vrot.slane %v7915_v63, 2  ;;  %v5917_v51 = vunpack.c.l.bf16 %v5979_v5  ;;  %v10089_v21 = vpack.c.bf16 %v8098_v2, %v8081_v57  ;;  %v8270_v62 = vld [vmem:[#allocation2 + $0x1e8] sm:$0xff]  ;;  %v8272_v37 = vld [vmem:[#allocation2 + $0x1f0] sm:$0x3]  ;;  %v836_v7 = vrot.slane %v8260_v28, 1 }
  0x71   :  { %6318 = vmatmul.mubr.msk.bf16.gmra.mrb[28].mxu1 %vm355_vm1, %v8167_v33  ;;  %v8275_v4 = vld [vmem:[#allocation2 + $0x1f8] sm:$0xff]  ;;  %v330_v36 = vmax.f32 %v266_v26, 0.0  ;;  %v8277_v3 = vpack.c.bf16 %v1810_v25, %v1808_v30  ;;  %v1813_v63 = vsel %vm1780_vm5, %v1811_v11, %v1812_v6  ;;  %v837_v57 = vrot.slane %v8270_v62, 1  ;;  %482 = vst.msk [vmem:[#allocation2 + $0x211] sm:$0xff] %vm355_vm1, %v329_v8  ;;  %v5980_v25 = vld [vmem:[%s9952_s0 + $0xb0] sm:$0xff]  }
  0x72   :  { %6321 = vmatprep.mubr.msk.bf16.mxu1 %vm355_vm1, %v10089_v21  ;;  %v839_v2 = vrot.slane %v8272_v37, 1  ;;  %v8284_v50 = vld [vmem:[#allocation2 + $0x200] sm:$0xff]  ;;  %v8286_v1 = vld [vmem:[#allocation2 + $0x208] sm:$0x3]  ;;  %v841_v49 = vrot.slane %v8275_v4, 1  ;;  %v1815_v48 = vsel %vm1780_vm5, %v1812_v6, %v1814_v12  ;;  %v331_v11 = vmax.f32 %v267_v10, 0.0 }
  0x73   :  { %6582 = vmatmul.mubr.msk.bf16.gmra.mrb[28].mxu0 %vm355_vm1, %v8191_v13  ;;  %10090 = vst [vmem:[#allocation30_spill] sm:$0xff] %v8277_v3  ;;  %v842_v30 = vrot.slane %v8284_v50, 1  ;;  %v844_v29 = vrot.slane %v8286_v1, 1  ;;  %483 = vst.msk [vmem:[#allocation2 + $0x219] sm:$0xff] %vm355_vm1, %v330_v36  ;;  %v332_v26 = vmax.f32 %v268_v43, 0.0  ;;  %v838_v21 = vsel %vm745_vm4, %v836_v7, %v837_v57 }
  0x74   :  { %6619 = vmatprep.mubr.msk.bf16.mxu0 %vm355_vm1, %v8161_v44  ;;  %v840_v13 = vsel %vm745_vm4, %v837_v57, %v839_v2  ;;  %v8299_v33 = vpack.c.bf16 %v1815_v48, %v1813_v63  ;;  %v5918_v8 = vunpack.c.h.bf16 %v5979_v5  ;;  %484 = vst.msk [vmem:[#allocation2 + $0x229] sm:$0xff] %vm355_vm1, %v331_v11  ;;  %v8310_v10 = vld [vmem:[%s9953_s1] ss:$0 sm:$0xff]  ;;  %v5921_v5 = vunpack.c.l.bf16 %v5980_v25  ;;  %v5981_v11 = vld [vmem:[%s9952_s0 + $0xb8] sm:$0xff]  }
  0x75   :  { %v8301_v6 = vpack.c.bf16 %v840_v13, %v838_v21  ;;  %v843_v12 = vsel %vm745_vm4, %v841_v49, %v842_v30  ;;  %v845_v22 = vsel %vm745_vm4, %v842_v30, %v844_v29  ;;  %485 = vst.msk [vmem:[#allocation2 + $0x231] sm:$0xff] %vm355_vm1, %v332_v26  ;;  %v198_v43 = vmul.f32 %v8310_v10, %v5917_v51 }
  0x76   :  { %10091 = vst [vmem:[#allocation31_spill] sm:$0xff] %v8299_v33  ;;  %v8313_v7 = vpack.c.bf16 %v845_v22, %v843_v12  ;;  %v199_v13 = vmul.f32 %v8310_v10, %v5918_v8  ;;  %v5922_v36 = vunpack.c.h.bf16 %v5980_v25  ;;  %v1816_v57 = vrot.slane %v7917_v0, 2 }
  0x77   :  { %10092 = vst [vmem:[#allocation32_spill] sm:$0xff] %v8301_v6  ;;  %v269_v63 = vadd.f32 %v7693_v14, %v198_v43  ;;  %v1817_v2 = vrot.slane %v7927_v15, 2  ;;  %v1819_v49 = vrot.slane %v7929_v16, 2  ;;  %v200_v22 = vmul.f32 %v8310_v10, %v5921_v5 }
  0x78   :  { %10093 = vst [vmem:[#allocation33_spill] sm:$0xff] %v8313_v7  ;;  %v270_v48 = vadd.f32 %v7693_v14, %v199_v13  ;;  %v201_v51 = vmul.f32 %v8310_v10, %v5922_v36  ;;  %v1821_v30 = vrot.slane %v7936_v23, 2  ;;  %v8330_v0 = vld [vmem:[#allocation2 + $0x210] sm:$0xff]  ;;  %v1822_v14 = vrot.slane %v7940_v32, 2  ;;  %v8349_v32 = vld [vmem:[%s9954_s2] ss:$0 sm:$0xff] }
  0x79   :  { %6322 = vmatmul.mubr.msk.bf16.gmra.mrb[32].mxu1 %vm355_vm1, %v8242_v17  ;;  %v333_v15 = vmax.f32 %v269_v63, 0.0  ;;  %v1818_v16 = vsel %vm1780_vm5, %v1816_v57, %v1817_v2  ;;  %v1820_v29 = vsel %vm1780_vm5, %v1817_v2, %v1819_v49  ;;  %v846_v25 = vrot.slane %v8330_v0, 1  ;;  %v5982_v36 = vld [vmem:[%s9952_s0 + $0xc0] sm:$0xff]   ;;  %v8365_v63 = vld [vmem:[%s9951_s3 + $0x1c] sm:$0xf] }
  0x7a   :  { %6325 = vmatprep.mubr.msk.bf16.mxu1 %vm355_vm1, %v8301_v6  ;;  %v8341_v23 = vld [vmem:[#allocation2 + $0x218] sm:$0xff]  ;;  %v8343_v26 = vld [vmem:[#allocation2 + $0x220] sm:$0x3]  ;;  %v334_v21 = vmax.f32 %v270_v48, 0.0  ;;  %v271_v8 = vadd.f32 %v8349_v32, %v200_v22  ;;  %v272_v12 = vadd.f32 %v8349_v32, %v201_v51  ;;  %v8356_v13 = vpack.c.bf16 %v1820_v29, %v1818_v16  ;;  %10095 = vst [vmem:[#allocation35_spill] sm:$0xff] %v8365_v63 }
  0x7b   :  { %6620 = vmatmul.mubr.msk.bf16.vlgmr.msra.gmra.mrb[0].mxu0 %vm355_vm1, %v8173_v38  ;;  %v849_v43 = vrot.slane %v8343_v26, 1  ;;  %486 = vst.msk [vmem:[#allocation2 + $0x241] sm:$0xff] %vm355_vm1, %v333_v15  ;;  %v1823_v5 = vsel %vm1780_vm5, %v1821_v30, %v1822_v14  ;;  %v8367_v57 = vld [vmem:[#allocation2 + $0x228] sm:$0xff]  ;;  %v5925_v51 = vunpack.c.l.bf16 %v5981_v11  ;;  %v5926_v30 = vunpack.c.h.bf16 %v5981_v11 }
  0x7c   :  { %6684 = vmatpush3.bf16.msra.mxu0 %v8177_v24  ;;  %6623 = vmatprep.mubr.msk.bf16.mxu0 %vm355_vm1, %v8224_v40  ;;  %v847_v24 = vrot.slane %v8341_v23, 1  ;;  %10094 = vst [vmem:[#allocation34_spill] sm:$0xff] %v8356_v13  ;;  %v8369_v2 = vld [vmem:[#allocation2 + $0x230] sm:$0xff]  ;;  %v8371_v49 = vld [vmem:[#allocation2 + $0x238] sm:$0x3]  ;;  %487 = vst.msk [vmem:[#allocation2 + $0x249] sm:$0xff] %vm355_vm1, %v334_v21 }
  0x7d   :  { %v335_v48 = vmax.f32 %v271_v8, 0.0  ;;  %v336_v22 = vmax.f32 %v272_v12, 0.0  ;;  %7403 = vmatprep.subr.msk.bf16.mxu0 %vm1099_vm0, %v8365_v63  ;;  %v851_v29 = vrot.slane %v8367_v57, 1  ;;  %v852_v17 = vrot.slane %v8369_v2, 1 }
  0x7e   :  { %v848_v15 = vsel %vm745_vm4, %v846_v25, %v847_v24  ;;  %v850_v16 = vsel %vm745_vm4, %v847_v24, %v849_v43  ;;  %v854_v40 = vrot.slane %v8371_v49, 1  ;;  %v1824_v11 = vrot.slane %v7942_v35, 2 }
  0x7f   :  { %v8380_v6 = vpack.c.bf16 %v850_v16, %v848_v15  ;;  %488 = vst.msk [vmem:[#allocation2 + $0x259] sm:$0xff] %vm355_vm1, %v335_v48  ;;  %489 = vst.msk [vmem:[#allocation2 + $0x261] sm:$0xff] %vm355_vm1, %v336_v22  ;;  %v202_v21 = vmul.f32 %v8310_v10, %v5925_v51  ;;  %v853_v25 = vsel %vm745_vm4, %v851_v29, %v852_v17  ;;  %v5929_v12 = vunpack.c.l.bf16 %v5982_v36 }
  0x80   :  { %v203_v8 = vmul.f32 %v8310_v10, %v5926_v30  ;;  %v5930_v24 = vunpack.c.h.bf16 %v5982_v36  ;;  %v855_v43 = vsel %vm745_vm4, %v852_v17, %v854_v40  ;;  %v1825_v15 = vsel %vm1780_vm5, %v1822_v14, %v1824_v11 }
  0x81   :  { %10096 = vst [vmem:[#allocation36_spill] sm:$0xff] %v8380_v6  ;;  %6326 = vmatmul.mubr.msk.bf16.gmra.mrb[36].mxu1 %vm355_vm1, %v8313_v7  ;;  %v273_v48 = vadd.f32 %v8349_v32, %v202_v21  ;;  %v1826_v22 = vrot.slane %v7978_v61, 2  ;;  %v8399_v35 = vpack.c.bf16 %v855_v43, %v853_v25  ;;  %v8401_v36 = vpack.c.bf16 %v1825_v15, %v1823_v5  ;;  %v5983_v5 = vld [vmem:[%s9952_s0 + $0xc8] sm:$0xff]  }
  0x82   :  { %6329 = vmatprep.mubr.msk.bf16.mxu1 %vm355_vm1, %v8380_v6  ;;  %v274_v51 = vadd.f32 %v8349_v32, %v203_v8  ;;  %v1827_v17 = vrot.slane %v7995_v53, 2  ;;  %v8407_v40 = vld [vmem:[#allocation2 + $0x240] sm:$0xff]  ;;  %v204_v14 = vmul.f32 %v8310_v10, %v5929_v12  ;;  %v205_v30 = vmul.f32 %v8310_v10, %v5930_v24 }
  0x83   :  { %6624 = vmatmul.mubr.msk.bf16.gmra.mrb[4].mxu0 %vm355_vm1, %v8234_v47  ;;  %10097 = vst [vmem:[#allocation37_spill] sm:$0xff] %v8399_v35  ;;  %10098 = vst [vmem:[#allocation38_spill] sm:$0xff] %v8401_v36  ;;  %v337_v61 = vmax.f32 %v273_v48, 0.0  ;;  %v1829_v16 = vrot.slane %v7997_v54, 2  ;;  %v8415_v29 = vld [vmem:[#allocation2 + $0x248] sm:$0xff]  ;;  %v856_v53 = vrot.slane %v8407_v40, 1  ;;  %v5933_v7 = vunpack.c.l.bf16 %v5983_v5 }
  0x84   :  { %6627 = vmatprep.mubr.msk.bf16.mxu0 %vm355_vm1, %v8277_v3  ;;  %v8417_v11 = vld [vmem:[#allocation2 + $0x250] sm:$0x3]  ;;  %v338_v21 = vmax.f32 %v274_v51, 0.0  ;;  %v1828_v25 = vsel %vm1780_vm5, %v1826_v22, %v1827_v17  ;;  %v1831_v8 = vrot.slane %v7999_v58, 2  ;;  %v857_v12 = vrot.slane %v8415_v29, 1 }
  0x85   :  { %v859_v24 = vrot.slane %v8417_v11, 1  ;;  %490 = vst.msk [vmem:[#allocation2 + $0x271] sm:$0xff] %vm355_vm1, %v337_v61  ;;  %v275_v54 = vadd.f32 %v8349_v32, %v204_v14  ;;  %v276_v43 = vadd.f32 %v8349_v32, %v205_v30  ;;  %v1830_v58 = vsel %vm1780_vm5, %v1827_v17, %v1829_v16 }
  0x86   :  { %v8427_v15 = vld [vmem:[#allocation2 + $0x258] sm:$0xff]  ;;  %v8429_v48 = vld [vmem:[#allocation2 + $0x260] sm:$0xff]  ;;  %v8431_v6 = vld [vmem:[#allocation2 + $0x268] sm:$0x3]  ;;  %491 = vst.msk [vmem:[#allocation2 + $0x279] sm:$0xff] %vm355_vm1, %v338_v21  ;;  %v1832_v22 = vrot.slane %v8006_v42, 2  ;;  %v858_v61 = vsel %vm745_vm4, %v856_v53, %v857_v12  ;;  %v8450_v17 = vpack.c.bf16 %v1830_v58, %v1828_v25  ;;  %v5934_v25 = vunpack.c.h.bf16 %v5983_v5 }
  0x87   :  { %v1834_v51 = vrot.slane %v8008_v20, 2  ;;  %v860_v14 = vsel %vm745_vm4, %v857_v12, %v859_v24  ;;  %v861_v30 = vrot.slane %v8427_v15, 1  ;;  %v862_v3 = vrot.slane %v8429_v48, 1  ;;  %v5984_v42 = vld [vmem:[%s9952_s0 + $0xd0] sm:$0xff]  }
  0x88   :  { %v8441_v47 = vpack.c.bf16 %v860_v14, %v858_v61  ;;  %v864_v38 = vrot.slane %v8431_v6, 1  ;;  %v339_v21 = vmax.f32 %v275_v54, 0.0  ;;  %v340_v44 = vmax.f32 %v276_v43, 0.0  ;;  %10100 = vst [vmem:[#allocation40_spill] sm:$0xff] %v8450_v17 }
  0x89   :  { %6330 = vmatmul.mubr.msk.bf16.gmra.mrb[40].mxu1 %vm355_vm1, %v8399_v35  ;;  %v863_v20 = vsel %vm745_vm4, %v861_v30, %v862_v3  ;;  %v1833_v16 = vsel %vm1780_vm5, %v1831_v8, %v1832_v22  ;;  %v1835_v53 = vsel %vm1780_vm5, %v1832_v22, %v1834_v51  ;;  %v206_v54 = vmul.f32 %v8310_v10, %v5933_v7 }
  0x8a   :  { %10099 = vst [vmem:[#allocation39_spill] sm:$0xff] %v8441_v47  ;;  %6333 = vmatprep.mubr.msk.bf16.mxu1 %vm355_vm1, %v8441_v47  ;;  %v865_v12 = vsel %vm745_vm4, %v862_v3, %v864_v38  ;;  %492 = vst.msk [vmem:[#allocation2 + $0x289] sm:$0xff] %vm355_vm1, %v339_v21  ;;  %v8461_v24 = vpack.c.bf16 %v1835_v53, %v1833_v16  ;;  %v5937_v43 = vunpack.c.l.bf16 %v5984_v42  ;;  %v5938_v58 = vunpack.c.h.bf16 %v5984_v42 }
  0x8b   :  { %6628 = vmatmul.mubr.msk.bf16.gmra.mrb[8].mxu0 %vm355_vm1, %v8299_v33  ;;  %493 = vst.msk [vmem:[#allocation2 + $0x291] sm:$0xff] %vm355_vm1, %v340_v44  ;;  %v8464_v8 = vpack.c.bf16 %v865_v12, %v863_v20  ;;  %v1836_v22 = vrot.slane %v8019_v46, 2  ;;  %v207_v38 = vmul.f32 %v8310_v10, %v5934_v25  ;;  %v277_v44 = vadd.f32 %v8349_v32, %v206_v54 }
  0x8c   :  { %10101 = vst [vmem:[#allocation41_spill] sm:$0xff] %v8461_v24  ;;  %6631 = vmatprep.mubr.msk.bf16.mxu0 %vm355_vm1, %v8356_v13  ;;  %v8469_v51 = vld [vmem:[#allocation2 + $0x270] sm:$0xff]  ;;  %v1837_v3 = vrot.slane %v8036_v27, 2  ;;  %v1839_v5 = vrot.slane %v8038_v9, 2  ;;  %v208_v30 = vmul.f32 %v8310_v10, %v5937_v43  ;;  %v209_v46 = vmul.f32 %v8310_v10, %v5938_v58  ;;  %v5985_v9 = vld [vmem:[%s9952_s0 + $0xd8] sm:$0xff]  }
  0x8d   :  { %10102 = vst [vmem:[#allocation42_spill] sm:$0xff] %v8464_v8  ;;  %v8475_v7 = vld [vmem:[#allocation2 + $0x278] sm:$0xff]  ;;  %v8477_v61 = vld [vmem:[#allocation2 + $0x280] sm:$0x3]  ;;  %v866_v14 = vrot.slane %v8469_v51, 1  ;;  %v1841_v21 = vrot.slane %v8047_v31, 2  ;;  %v278_v27 = vadd.f32 %v8349_v32, %v207_v38 }
  0x8e   :  { %v867_v42 = vrot.slane %v8475_v7, 1  ;;  %v869_v20 = vrot.slane %v8477_v61, 1  ;;  %v341_v16 = vmax.f32 %v277_v44, 0.0  ;;  %v279_v53 = vadd.f32 %v8349_v32, %v208_v30  ;;  %v5986_v44 = vld [vmem:[%s9952_s0 + $0xe0] sm:$0xff]  }
  0x8f   :  { %v280_v12 = vadd.f32 %v8349_v32, %v209_v46  ;;  %v1838_v25 = vsel %vm1780_vm5, %v1836_v22, %v1837_v3  ;;  %v1840_v54 = vsel %vm1780_vm5, %v1837_v3, %v1839_v5  ;;  %v342_v58 = vmax.f32 %v278_v27, 0.0 }
  0x90   :  { %v868_v31 = vsel %vm745_vm4, %v866_v14, %v867_v42  ;;  %v870_v43 = vsel %vm745_vm4, %v867_v42, %v869_v20  ;;  %494 = vst.msk [vmem:[#allocation2 + $0x2a1] sm:$0xff] %vm355_vm1, %v341_v16  ;;  %v8496_v38 = vpack.c.bf16 %v1840_v54, %v1838_v25  ;;  %v343_v14 = vmax.f32 %v279_v53, 0.0 }
  0x91   :  { %6334 = vmatmul.mubr.msk.bf16.gmra.mrb[44].mxu1 %vm355_vm1, %v8464_v8  ;;  %v8503_v30 = vpack.c.bf16 %v870_v43, %v868_v31  ;;  %v8505_v22 = vld [vmem:[#allocation2 + $0x288] sm:$0xff]  ;;  %v344_v46 = vmax.f32 %v280_v12, 0.0  ;;  %v5941_v42 = vunpack.c.l.bf16 %v5985_v9  ;;  %495 = vst.msk [vmem:[#allocation2 + $0x2a9] sm:$0xff] %vm355_vm1, %v342_v58  ;;  %v1842_v25 = vrot.slane %v8055_v52, 2 }
  0x92   :  { %10103 = vst [vmem:[#allocation43_spill] sm:$0xff] %v8496_v38  ;;  %v8507_v3 = vld [vmem:[#allocation2 + $0x290] sm:$0xff]  ;;  %v8509_v5 = vld [vmem:[#allocation2 + $0x298] sm:$0x3]  ;;  %v871_v20 = vrot.slane %v8505_v22, 1  ;;  %496 = vst.msk [vmem:[#allocation2 + $0x2b9] sm:$0xff] %vm355_vm1, %v343_v14  ;;  %v5942_v12 = vunpack.c.h.bf16 %v5985_v9  ;;  %v5945_v31 = vunpack.c.l.bf16 %v5986_v44 }
  0x93   :  { %10104 = vst [vmem:[#allocation44_spill] sm:$0xff] %v8503_v30  ;;  %6632 = vmatmul.mubr.msk.bf16.gmra.mrb[12].mxu0 %vm355_vm1, %v8401_v36  ;;  %v872_v27 = vrot.slane %v8507_v3, 1  ;;  %v874_v16 = vrot.slane %v8509_v5, 1  ;;  %6337 = vmatprep.mubr.msk.bf16.mxu1 %vm355_vm1, %v8503_v30  ;;  %497 = vst.msk [vmem:[#allocation2 + $0x2c1] sm:$0xff] %vm355_vm1, %v344_v46  ;;  %v1844_v53 = vrot.slane %v8057_v19, 2  ;;  %v210_v54 = vmul.f32 %v8310_v10, %v5941_v42 }
  0x94   :  { %6635 = vmatprep.mubr.msk.bf16.mxu0 %vm355_vm1, %v8450_v17  ;;  %v1843_v58 = vsel %vm1780_vm5, %v1841_v21, %v1842_v25  ;;  %v5946_v30 = vunpack.c.h.bf16 %v5986_v44  ;;  %v211_v14 = vmul.f32 %v8310_v10, %v5942_v12  ;;  %v212_v9 = vmul.f32 %v8310_v10, %v5945_v31  ;;  %v5988_v17 = vld [vmem:[%s9952_s0 + $0xf0] sm:$0xff]  }
  0x95   :  { %v873_v43 = vsel %vm745_vm4, %v871_v20, %v872_v27  ;;  %v875_v52 = vsel %vm745_vm4, %v872_v27, %v874_v16  ;;  %v1845_v47 = vsel %vm1780_vm5, %v1842_v25, %v1844_v53  ;;  %v281_v46 = vadd.f32 %v8349_v32, %v210_v54  ;;  %v10107_v16 = vld [vmem:[#allocation14_spill] sm:$0xff]  ;;  %v10108_v25 = vld [vmem:[#allocation15_spill] sm:$0xff] }
  0x96   :  { %v8529_v8 = vpack.c.bf16 %v875_v52, %v873_v43  ;;  %v8534_v19 = vpack.c.bf16 %v1845_v47, %v1843_v58  ;;  %v213_v42 = vmul.f32 %v8310_v10, %v5946_v30  ;;  %v1846_v20 = vrot.slane %v8068_v18, 2  ;;  %v5987_v47 = vld [vmem:[%s9952_s0 + $0xe8] sm:$0xff]   ;;  %v10109_v18 = vld [vmem:[#allocation17_spill] sm:$0xff] }
  0x97   :  { %v8539_v27 = vld [vmem:[#allocation2 + $0x2a0] sm:$0xff]  ;;  %v282_v21 = vadd.f32 %v8349_v32, %v211_v14  ;;  %v345_v44 = vmax.f32 %v281_v46, 0.0  ;;  %v1847_v43 = vrot.slane %v10107_v16, 2  ;;  %v1849_v53 = vrot.slane %v10108_v25, 2  ;;  %v10110_v25 = vld [vmem:[#allocation18_spill] sm:$0xff] }
  0x98   :  { %10105 = vst [vmem:[#allocation45_spill] sm:$0xff] %v8529_v8  ;;  %10106 = vst [vmem:[#allocation46_spill] sm:$0xff] %v8534_v19  ;;  %v876_v12 = vrot.slane %v8539_v27, 1  ;;  %v283_v54 = vadd.f32 %v8349_v32, %v212_v9  ;;  %v284_v30 = vadd.f32 %v8349_v32, %v213_v42  ;;  %v1851_v31 = vrot.slane %v10109_v18, 2  ;;  %v8553_v52 = vld [vmem:[#allocation2 + $0x2a8] sm:$0xff] }
  0x99   :  { %6338 = vmatmul.mubr.msk.bf16.gmra.mrb[48].mxu1 %vm355_vm1, %v8529_v8  ;;  %v8555_v58 = vld [vmem:[#allocation2 + $0x2b0] sm:$0x3]  ;;  %v346_v14 = vmax.f32 %v282_v21, 0.0  ;;  %498 = vst.msk [vmem:[#allocation2 + $0x2d1] sm:$0xff] %vm355_vm1, %v345_v44  ;;  %v1848_v46 = vsel %vm1780_vm5, %v1846_v20, %v1847_v43  ;;  %v1850_v16 = vsel %vm1780_vm5, %v1847_v43, %v1849_v53  ;;  %v1852_v9 = vrot.slane %v10110_v25, 2  ;;  %v8565_v8 = vld [vmem:[#allocation2 + $0x2b8] sm:$0xff] }
  0x9a   :  { %v877_v42 = vrot.slane %v8553_v52, 1  ;;  %v879_v18 = vrot.slane %v8555_v58, 1  ;;  %v8567_v35 = vld [vmem:[#allocation2 + $0x2c0] sm:$0xff]  ;;  %v8569_v21 = vld [vmem:[#allocation2 + $0x2c8] sm:$0x3]  ;;  %v8571_v44 = vpack.c.bf16 %v1850_v16, %v1848_v46  ;;  %v5949_v20 = vunpack.c.l.bf16 %v5987_v47 }
  0x9b   :  { %6636 = vmatmul.mubr.msk.bf16.gmra.mrb[16].mxu0 %vm355_vm1, %v8461_v24  ;;  %10111 = vst [vmem:[#allocation14_spill] sm:$0xff] %v8569_v21  ;;  %v881_v43 = vrot.slane %v8565_v8, 1  ;;  %v882_v53 = vrot.slane %v8567_v35, 1  ;;  %v884_v25 = vrot.slane %v8569_v21, 1  ;;  %499 = vst.msk [vmem:[#allocation2 + $0x2d9] sm:$0xff] %vm355_vm1, %v346_v14  ;;  %v347_v24 = vmax.f32 %v283_v54, 0.0 }
  0x9c   :  { %10112 = vst [vmem:[#allocation15_spill] sm:$0xff] %v8571_v44  ;;  %6639 = vmatprep.mubr.msk.bf16.mxu0 %vm355_vm1, %v8496_v38  ;;  %v878_v46 = vsel %vm745_vm4, %v876_v12, %v877_v42  ;;  %v880_v16 = vsel %vm745_vm4, %v877_v42, %v879_v18  ;;  %v348_v36 = vmax.f32 %v284_v30, 0.0  ;;  %v1853_v13 = vsel %vm1780_vm5, %v1851_v31, %v1852_v9  ;;  %v10114_v54 = vld [vmem:[#allocation19_spill] sm:$0xff] }
  0x9d   :  { %v8585_v33 = vpack.c.bf16 %v880_v16, %v878_v46  ;;  %v883_v63 = vsel %vm745_vm4, %v881_v43, %v882_v53  ;;  %v885_v38 = vsel %vm745_vm4, %v882_v53, %v884_v25  ;;  %500 = vst.msk [vmem:[#allocation2 + $0x2e9] sm:$0xff] %vm355_vm1, %v347_v24  ;;  %v1854_v14 = vrot.slane %v10114_v54, 2 }
  0x9e   :  { %v8591_v21 = vpack.c.bf16 %v885_v38, %v883_v63  ;;  %501 = vst.msk [vmem:[#allocation2 + $0x2f1] sm:$0xff] %vm355_vm1, %v348_v36  ;;  %v5950_v12 = vunpack.c.h.bf16 %v5987_v47  ;;  %v214_v42 = vmul.f32 %v8310_v10, %v5949_v20  ;;  %v5953_v30 = vunpack.c.l.bf16 %v5988_v17 }
  0x9f   :  { %10113 = vst [vmem:[#allocation17_spill] sm:$0xff] %v8585_v33  ;;  %6341 = vmatprep.mubr.msk.bf16.mxu1 %vm355_vm1, %v8585_v33  ;;  %v1855_v31 = vsel %vm1780_vm5, %v1852_v9, %v1854_v14  ;;  %v5954_v18 = vunpack.c.h.bf16 %v5988_v17  ;;  %v1856_v43 = vrot.slane %v8118_v39, 2  ;;  %v1857_v24 = vrot.slane %v8120_v59, 2 }
  0xa0   :  { %10115 = vst [vmem:[#allocation18_spill] sm:$0xff] %v8591_v21  ;;  %v8600_v53 = vld [vmem:[#allocation2 + $0x2d0] sm:$0xff]  ;;  %v215_v63 = vmul.f32 %v8310_v10, %v5950_v12  ;;  %v285_v36 = vadd.f32 %v8349_v32, %v214_v42  ;;  %v216_v38 = vmul.f32 %v8310_v10, %v5953_v30  ;;  %v1859_v17 = vrot.slane %v8122_v45, 2 }
  0xa1   :  { %6342 = vmatmul.mubr.msk.bf16.gmra.mrb[52].mxu1 %vm355_vm1, %v8591_v21  ;;  %v886_v47 = vrot.slane %v8600_v53, 1  ;;  %v217_v9 = vmul.f32 %v8310_v10, %v5954_v18  ;;  %v8616_v20 = vpack.c.bf16 %v1855_v31, %v1853_v13  ;;  %v1858_v12 = vsel %vm1780_vm5, %v1856_v43, %v1857_v24 }
  0xa2   :  { %v8612_v39 = vld [vmem:[#allocation2 + $0x2d8] sm:$0xff]  ;;  %v8614_v59 = vld [vmem:[#allocation2 + $0x2e0] sm:$0x3]  ;;  %v286_v25 = vadd.f32 %v8349_v32, %v215_v63  ;;  %v349_v46 = vmax.f32 %v285_v36, 0.0  ;;  %v287_v16 = vadd.f32 %v8349_v32, %v216_v38  ;;  %v1860_v31 = vsel %vm1780_vm5, %v1857_v24, %v1859_v17 }
  0xa3   :  { %6640 = vmatmul.mubr.msk.bf16.gmra.mrb[20].mxu0 %vm355_vm1, %v8534_v19  ;;  %10116 = vst [vmem:[#allocation19_spill] sm:$0xff] %v8616_v20  ;;  %v887_v54 = vrot.slane %v8612_v39, 1  ;;  %v889_v14 = vrot.slane %v8614_v59, 1  ;;  %v288_v45 = vadd.f32 %v8349_v32, %v217_v9  ;;  %v3240_v18 = vrot.slane %v8144_v41, 2 }
  0xa4   :  { %6643 = vmatprep.mubr.msk.bf16.mxu0 %vm355_vm1, %v8571_v44  ;;  %v8626_v42 = vld [vmem:[#allocation2 + $0x2e8] sm:$0xff]  ;;  %v350_v13 = vmax.f32 %v286_v25, 0.0  ;;  %502 = vst.msk [vmem:[#allocation2 + $0x301] sm:$0xff] %vm355_vm1, %v349_v46  ;;  %v351_v30 = vmax.f32 %v287_v16, 0.0  ;;  %v3241_v41 = vrot.slane %v8169_v34, 2  ;;  %v8646_v24 = vpack.c.bf16 %v1860_v31, %v1858_v12 }
  0xa5   :  { %v888_v63 = vsel %vm745_vm4, %v886_v47, %v887_v54  ;;  %v890_v36 = vsel %vm745_vm4, %v887_v54, %v889_v14  ;;  %v8633_v38 = vld [vmem:[#allocation2 + $0x2f0] sm:$0xff]  ;;  %v8635_v21 = vld [vmem:[#allocation2 + $0x2f8] sm:$0x3]  ;;  %v891_v43 = vrot.slane %v8626_v42, 1  ;;  %v352_v9 = vmax.f32 %v288_v45, 0.0  ;;  %v10119_v47 = vld [vmem:[#allocation24_spill] sm:$0xff] }
  0xa6   :  { %v8638_v33 = vpack.c.bf16 %v890_v36, %v888_v63  ;;  %v892_v25 = vrot.slane %v8633_v38, 1  ;;  %v894_v46 = vrot.slane %v8635_v21, 1  ;;  %503 = vst.msk [vmem:[#allocation2 + $0x309] sm:$0xff] %vm355_vm1, %v350_v13  ;;  %504 = vst.msk [vmem:[#allocation2 + $0x319] sm:$0xff] %vm355_vm1, %v351_v30  ;;  %v3243_v17 = vrot.slane %v10119_v47, 2 }
  0xa7   :  { %505 = vst.msk [vmem:[#allocation2 + $0x321] sm:$0xff] %vm355_vm1, %v352_v9  ;;  %10118 = vst [vmem:[#allocation48_spill] sm:$0xff] %v8646_v24  ;;  %v1866_v16 = vrot.slane %v8200_v60, 2  ;;  %v1867_v45 = vrot.slane %v8219_v55, 2  ;;  %v1869_v13 = vrot.slane %v8221_v56, 2  ;;  %v3242_v12 = vsel %vm1780_vm5, %v3240_v18, %v3241_v41 }
  0xa8   :  { %10117 = vst [vmem:[#allocation47_spill] sm:$0xff] %v8638_v33  ;;  %6345 = vmatprep.mubr.msk.bf16.mxu1 %vm355_vm1, %v8638_v33  ;;  %v893_v54 = vsel %vm745_vm4, %v891_v43, %v892_v25  ;;  %v895_v14 = vsel %vm745_vm4, %v892_v25, %v894_v46  ;;  %v3244_v60 = vsel %vm1780_vm5, %v3241_v41, %v3243_v17  ;;  %v1871_v9 = vrot.slane %v8260_v28, 2 }
  0xa9   :  { %v8656_v34 = vpack.c.bf16 %v895_v14, %v893_v54  ;;  %v1868_v55 = vsel %vm1780_vm5, %v1866_v16, %v1867_v45  ;;  %v1870_v56 = vsel %vm1780_vm5, %v1867_v45, %v1869_v13  ;;  %v8677_v43 = vpack.c.bf16 %v3244_v60, %v3242_v12 }
  0xaa   :  { %v1872_v25 = vrot.slane %v8270_v62, 2  ;;  %v8688_v54 = vpack.c.bf16 %v1870_v56, %v1868_v55  ;;  %v1874_v28 = vrot.slane %v8272_v37, 2  ;;  %v1876_v62 = vrot.slane %v8275_v4, 2 }
  0xab   :  { %10120 = vst [vmem:[#allocation24_spill] sm:$0xff] %v8656_v34  ;;  %6644 = vmatmul.mubr.msk.bf16.gmra.mrb[24].mxu0 %vm355_vm1, %v8616_v20  ;;  %6346 = vmatmul.mubr.msk.bf16.gmra.mrb[56].mxu1 %vm355_vm1, %v8656_v34  ;;  %v8664_v30 = vld [vmem:[#allocation2 + $0x300] sm:$0xff]  ;;  %10121 = vst [vmem:[#allocation49_spill] sm:$0xff] %v8677_v43  ;;  %v1877_v60 = vrot.slane %v8284_v50, 2  ;;  %v1879_v34 = vrot.slane %v8286_v1, 2 }
  0xac   :  { %6647 = vmatprep.mubr.msk.bf16.mxu0 %vm355_vm1, %v8646_v24  ;;  %v896_v31 = vrot.slane %v8664_v30, 1  ;;  %v8702_v24 = vld [vmem:[#allocation2 + $0x8] sm:$0xff]  ;;  %v8704_v20 = vld [vmem:[#allocation2] sm:$0xff]  ;;  %v1873_v1 = vsel %vm1780_vm5, %v1871_v9, %v1872_v25  ;;  %v1884_v9 = vrot.slane %v8343_v26, 2 }
  0xad   :  { %v8671_v63 = vld [vmem:[#allocation2 + $0x308] sm:$0xff]  ;;  %v8673_v36 = vld [vmem:[#allocation2 + $0x310] sm:$0x3]  ;;  %v8675_v18 = vld [vmem:[#allocation2 + $0x318] sm:$0xff]  ;;  %v616_v37 = vpack.c.bf16 %v8702_v24, %v8704_v20 }
  0xae   :  { %v897_v46 = vrot.slane %v8671_v63, 1  ;;  %v899_v41 = vrot.slane %v8673_v36, 1  ;;  %v8683_v47 = vld [vmem:[#allocation2 + $0x320] sm:$0xff]  ;;  %v8685_v17 = vld [vmem:[#allocation2 + $0x328] sm:$0x3]  ;;  %v901_v16 = vrot.slane %v8675_v18, 1 }
  0xaf   :  { %v902_v14 = vrot.slane %v8683_v47, 1  ;;  %v904_v45 = vrot.slane %v8685_v17, 1 }
  0xb0   :  { %v898_v13 = vsel %vm745_vm4, %v896_v31, %v897_v46  ;;  %v900_v12 = vsel %vm745_vm4, %v897_v46, %v899_v41  ;;  %v1875_v31 = vsel %vm1780_vm5, %v1872_v25, %v1874_v28  ;;  %v1878_v46 = vsel %vm1780_vm5, %v1876_v62, %v1877_v60  ;;  %v7410_v25 = vld [vmem:[#allocation2 + $0x18] sm:$0xff]  ;;  %v7411_v28 = vld [vmem:[#allocation2 + $0x20] sm:$0xff] }
  0xb1   :  { %v8698_v33 = vpack.c.bf16 %v900_v12, %v898_v13  ;;  %v903_v55 = vsel %vm745_vm4, %v901_v16, %v902_v14  ;;  %v905_v56 = vsel %vm745_vm4, %v902_v14, %v904_v45  ;;  %v1880_v41 = vsel %vm1780_vm5, %v1877_v60, %v1879_v34 }
  0xb2   :  { %v8708_v4 = vpack.c.bf16 %v905_v56, %v903_v55  ;;  %v8723_v16 = vpack.c.bf16 %v1875_v31, %v1873_v1  ;;  %v8725_v14 = vpack.c.bf16 %v1880_v41, %v1878_v46  ;;  %v1881_v45 = vrot.slane %v8330_v0, 2  ;;  %v7412_v55 = vld [vmem:[#allocation2 + $0x30] sm:$0xff]  ;;  %v7413_v56 = vld [vmem:[#allocation2 + $0x38] sm:$0xff]  ;;  %v7414_v1 = vld [vmem:[%s9951_s3 + $0x8] sm:$0xf] }
  0xb3   :  { %10122 = vst [vmem:[#allocation50_spill] sm:$0xff] %v8698_v33  ;;  %6648 = vmatmul.mubr.msk.bf16.gmra.mrb[28].mxu0 %vm355_vm1, %v8677_v43  ;;  %6349 = vmatprep.mubr.msk.bf16.mxu1 %vm355_vm1, %v8698_v33  ;;  %v1882_v13 = vrot.slane %v8341_v23, 2  ;;  %v8730_v12 = vpack.c.bf16 %v7411_v28, %v7410_v25  ;;  %v1886_v62 = vrot.slane %v8367_v57, 2  ;;  %v1887_v34 = vrot.slane %v8369_v2, 2  ;;  %v8754_v25 = vld [vmem:[%s9951_s3 + $0xc] sm:$0xf] }
  0xb4   :  { %10123 = vst [vmem:[#allocation51_spill] sm:$0xff] %v8708_v4  ;;  %6651 = vmatprep.mubr.msk.bf16.mxu0 %vm355_vm1, %v8688_v54  ;;  %6350 = vmatmul.mubr.msk.bf16.gmra.mrb[60].mxu1 %vm355_vm1, %v8708_v4  ;;  %10124 = vst [vmem:[#allocation52_spill] sm:$0xff] %v8725_v14  ;;  %v1889_v60 = vrot.slane %v8371_v49, 2  ;;  %v2135_v26 = vsel %vm1099_vm0, %v7414_v1, 0  ;;  %v1897_v1 = vrot.slane %v8429_v48, 2  ;;  %v1904_v43 = vrot.slane %v8477_v61, 2 }
  0xb5   :  { %6355 = vmatprep.mubr.msk.bf16.mxu1 %vm355_vm1, %v616_v37  ;;  %10125 = vst [vmem:[#allocation53_spill] sm:$0xff] %v8730_v12  ;;  %v8735_v37 = vpack.c.bf16 %v7413_v56, %v7412_v55  ;;  %v1883_v31 = vsel %vm1780_vm5, %v1881_v45, %v1882_v13  ;;  %v1885_v49 = vsel %vm1780_vm5, %v1882_v13, %v1884_v9  ;;  %v1891_v13 = vrot.slane %v8407_v40, 2 }
  0xb6   :  { %v1888_v46 = vsel %vm1780_vm5, %v1886_v62, %v1887_v34  ;;  %v1890_v41 = vsel %vm1780_vm5, %v1887_v34, %v1889_v60  ;;  %v8758_v28 = vpack.c.bf16 %v1885_v49, %v1883_v31  ;;  %v1892_v9 = vrot.slane %v8415_v29, 2  ;;  %v7415_v34 = vld [vmem:[#allocation2 + $0x48] sm:$0xff]  ;;  %v7416_v60 = vld [vmem:[#allocation2 + $0x50] sm:$0xff]  ;;  %v7417_v31 = vld [vmem:[#allocation2 + $0x60] sm:$0xff] }
  0xb7   :  { %v8762_v45 = vpack.c.bf16 %v1890_v41, %v1888_v46  ;;  %v1894_v62 = vrot.slane %v8417_v11, 2  ;;  %v8767_v55 = vpack.c.bf16 %v7416_v60, %v7415_v34  ;;  %v1896_v56 = vrot.slane %v8427_v15, 2  ;;  %v7418_v49 = vld [vmem:[#allocation2 + $0x68] sm:$0xff]  ;;  %v5989_v11 = vld [vmem:[%s9952_s0 + $0xf8] sm:$0xff]  }
  0xb8   :  { %10126 = vst [vmem:[#allocation54_spill] sm:$0xff] %v8758_v28  ;;  %v8772_v46 = vpack.c.bf16 %v7418_v49, %v7417_v31  ;;  %v1893_v41 = vsel %vm1780_vm5, %v1891_v13, %v1892_v9  ;;  %v1901_v31 = vrot.slane %v8469_v51, 2  ;;  %v1902_v49 = vrot.slane %v8475_v7, 2 }
  0xb9   :  { %10127 = vst [vmem:[#allocation55_spill] sm:$0xff] %v8762_v45  ;;  %v1895_v34 = vsel %vm1780_vm5, %v1892_v9, %v1894_v62  ;;  %v5957_v4 = vunpack.c.l.bf16 %v5989_v11  ;;  %v5958_v13 = vunpack.c.h.bf16 %v5989_v11  ;;  %v7419_v9 = vld [vmem:[#allocation2 + $0x78] sm:$0xff]  ;;  %v7420_v62 = vld [vmem:[#allocation2 + $0x80] sm:$0xff]  ;;  %v1906_v61 = vrot.slane %v8505_v22, 2 }
  0xba   :  { %v8792_v33 = vpack.c.bf16 %v1895_v34, %v1893_v41  ;;  %v1907_v11 = vrot.slane %v8507_v3, 2  ;;  %v1909_v41 = vrot.slane %v8509_v5, 2  ;;  %v1903_v34 = vsel %vm1780_vm5, %v1901_v31, %v1902_v49 }
  0xbb   :  { %6652 = vmatmul.mubr.msk.bf16.gmra.mrb[32].mxu0 %vm355_vm1, %v8723_v16  ;;  %v8821_v5 = vpack.c.bf16 %v8553_v52, %v8539_v27  ;;  %v8847_v31 = vpack.c.bf16 %v8683_v47, %v8675_v18 }
  0xbc   :  { %6655 = vmatprep.mubr.msk.bf16.mxu0 %vm355_vm1, %v8725_v14  ;;  %6356 = vmatmul.mubr.msk.bf16.vlgmr.msra.gmra.mrb[0].mxu1 %vm355_vm1, %v8730_v12  ;;  %v8794_v12 = vpack.c.bf16 %v7420_v62, %v7419_v9  ;;  %v1905_v9 = vsel %vm1780_vm5, %v1902_v49, %v1904_v43  ;;  %v8825_v43 = vpack.c.bf16 %v8567_v35, %v8565_v8  ;;  %v1911_v62 = vrot.slane %v8539_v27, 2 }
  0xbd   :  { %6420 = vmatpush3.bf16.msra.mxu1 %v2135_v26  ;;  %6359 = vmatprep.mubr.msk.bf16.mxu1 %vm355_vm1, %v8735_v37  ;;  %v1899_v26 = vrot.slane %v8431_v6, 2  ;;  %v1898_v6 = vsel %vm1780_vm5, %v1896_v56, %v1897_v1  ;;  %10130 = vst [vmem:[#allocation58_spill] sm:$0xff] %v8821_v5  ;;  %10135 = vst [vmem:[#allocation63_spill] sm:$0xff] %v8847_v31  ;;  %v8853_v49 = vpack.c.bf16 %v1905_v9, %v1903_v34  ;;  %v7425_v34 = vld [vmem:[#allocation2 + $0xc0] sm:$0xff]  ;;  %v7426_v9 = vld [vmem:[#allocation2 + $0xc8] sm:$0xff] }
  0xbe   :  { %7398 = vmatprep.subr.msk.bf16.mxu1 %vm1099_vm0, %v8754_v25  ;;  %10131 = vst [vmem:[#allocation59_spill] sm:$0xff] %v8825_v43 }
  0xbf   :  { %v1900_v60 = vsel %vm1780_vm5, %v1897_v1, %v1899_v26  ;;  %v218_v1 = vmul.f32 %v8310_v10, %v5957_v4  ;;  %v219_v26 = vmul.f32 %v8310_v10, %v5958_v13  ;;  %v8813_v10 = vpack.c.bf16 %v8475_v7, %v8469_v51 }
  0xc0   :  { %v8796_v56 = vpack.c.bf16 %v1900_v60, %v1898_v6  ;;  %v8831_v51 = vpack.c.bf16 %v8612_v39, %v8600_v53  ;;  %v8835_v7 = vpack.c.bf16 %v8633_v38, %v8626_v42  ;;  %v8843_v60 = vpack.c.bf16 %v8671_v63, %v8664_v30 }
  0xc1   :  { %v289_v6 = vadd.f32 %v8349_v32, %v218_v1  ;;  %v290_v4 = vadd.f32 %v8349_v32, %v219_v26  ;;  %10128 = vst [vmem:[#allocation56_spill] sm:$0xff] %v8813_v10  ;;  %v1912_v1 = vrot.slane %v8553_v52, 2  ;;  %v1914_v26 = vrot.slane %v8555_v58, 2 }
  0xc2   :  { %10132 = vst [vmem:[#allocation60_spill] sm:$0xff] %v8831_v51  ;;  %10133 = vst [vmem:[#allocation61_spill] sm:$0xff] %v8835_v7 }
  0xc3   :  { %6656 = vmatmul.mubr.msk.bf16.gmra.mrb[36].mxu0 %vm355_vm1, %v8758_v28  ;;  %v7422_v28 = vld [vmem:[#allocation2 + $0x98] sm:$0xff]  ;;  %v353_v32 = vmax.f32 %v289_v6, 0.0  ;;  %10134 = vst [vmem:[#allocation62_spill] sm:$0xff] %v8843_v60  ;;  %v1916_v6 = vrot.slane %v8565_v8, 2  ;;  %v1913_v27 = vsel %vm1780_vm5, %v1911_v62, %v1912_v1  ;;  %v1915_v52 = vsel %vm1780_vm5, %v1912_v1, %v1914_v26 }
  0xc4   :  { %6659 = vmatprep.mubr.msk.bf16.mxu0 %vm355_vm1, %v8762_v45  ;;  %6360 = vmatmul.mubr.msk.bf16.gmra.mrb[4].mxu1 %vm355_vm1, %v8767_v55  ;;  %v7421_v45 = vld [vmem:[#allocation2 + $0x90] sm:$0xff]  ;;  %v8879_v58 = vpack.c.bf16 %v1915_v52, %v1913_v27  ;;  %v1922_v62 = vrot.slane %v8612_v39, 2  ;;  %v1924_v1 = vrot.slane %v8614_v59, 2  ;;  %v7427_v26 = vld [vmem:[#allocation2 + $0xd8] sm:$0xff]  ;;  %v1931_v52 = vrot.slane %v8664_v30, 2 }
  0xc5   :  { %6363 = vmatprep.mubr.msk.bf16.mxu1 %vm355_vm1, %v8772_v46  ;;  %v8800_v14 = vpack.c.bf16 %v7422_v28, %v7421_v45  ;;  %v8817_v28 = vpack.c.bf16 %v8507_v3, %v8505_v22  ;;  %v354_v45 = vmax.f32 %v290_v4, 0.0  ;;  %v1908_v22 = vsel %vm1780_vm5, %v1906_v61, %v1907_v11  ;;  %506 = vst.msk [vmem:[#allocation2 + $0x331] sm:$0xff] %vm355_vm1, %v353_v32  ;;  %v7423_v61 = vld [vmem:[#allocation2 + $0xa8] sm:$0xff]  ;;  %v10136_v32 = vld [vmem:[#allocation14_spill] sm:$0xff] }
  0xc6   :  { %v1910_v3 = vsel %vm1780_vm5, %v1907_v11, %v1909_v41  ;;  %v7424_v11 = vld [vmem:[#allocation2 + $0xb0] sm:$0xff]  ;;  %v1917_v4 = vrot.slane %v8567_v35, 2  ;;  %v1925_v39 = vsel %vm1780_vm5, %v1922_v62, %v1924_v1 }
  0xc7   :  { %10129 = vst [vmem:[#allocation57_spill] sm:$0xff] %v8817_v28  ;;  %507 = vst.msk [vmem:[#allocation2 + $0x339] sm:$0xff] %vm355_vm1, %v354_v45  ;;  %v8855_v13 = vpack.c.bf16 %v1910_v3, %v1908_v22  ;;  %v8860_v41 = vpack.c.bf16 %v7424_v11, %v7423_v61  ;;  %v1919_v45 = vrot.slane %v10136_v32, 2  ;;  %v8865_v22 = vpack.c.bf16 %v7426_v9, %v7425_v34  ;;  %v7428_v11 = vld [vmem:[#allocation2 + $0xe0] sm:$0xff]  ;;  %v7429_v34 = vld [vmem:[#allocation2 + $0xf0] sm:$0xff] }
  0xc8   :  { %v1918_v35 = vsel %vm1780_vm5, %v1916_v6, %v1917_v4  ;;  %v1921_v61 = vrot.slane %v8600_v53, 2  ;;  %v8886_v32 = vpack.c.bf16 %v7428_v11, %v7427_v26  ;;  %v1926_v6 = vrot.slane %v8626_v42, 2  ;;  %v7430_v9 = vld [vmem:[#allocation2 + $0xf8] sm:$0xff] }
  0xc9   :  { %v1920_v8 = vsel %vm1780_vm5, %v1917_v4, %v1919_v45  ;;  %v1927_v4 = vrot.slane %v8633_v38, 2  ;;  %v1929_v45 = vrot.slane %v8635_v21, 2  ;;  %v8891_v27 = vpack.c.bf16 %v7430_v9, %v7429_v34 }
  0xca   :  { %v8881_v3 = vpack.c.bf16 %v1920_v8, %v1918_v35  ;;  %v1923_v53 = vsel %vm1780_vm5, %v1921_v61, %v1922_v62  ;;  %v1932_v35 = vrot.slane %v8671_v63, 2  ;;  %v1934_v8 = vrot.slane %v8673_v36, 2  ;;  %v7431_v61 = vld [vmem:[#allocation2 + $0x108] sm:$0xff]  ;;  %v7432_v62 = vld [vmem:[#allocation2 + $0x110] sm:$0xff] }
  0xcb   :  { %6660 = vmatmul.mubr.msk.bf16.gmra.mrb[40].mxu0 %vm355_vm1, %v8792_v33  ;;  %v1928_v59 = vsel %vm1780_vm5, %v1926_v6, %v1927_v4  ;;  %v1930_v21 = vsel %vm1780_vm5, %v1927_v4, %v1929_v45  ;;  %v8905_v42 = vpack.c.bf16 %v1925_v39, %v1923_v53  ;;  %v8912_v1 = vpack.c.bf16 %v7432_v62, %v7431_v61  ;;  %v7433_v4 = vld [vmem:[#allocation2 + $0x120] sm:$0xff]  ;;  %v7434_v45 = vld [vmem:[#allocation2 + $0x128] sm:$0xff]  ;;  %v7437_v62 = vld [vmem:[#allocation2 + $0x150] sm:$0xff] }
  0xcc   :  { %6663 = vmatprep.mubr.msk.bf16.mxu0 %vm355_vm1, %v8796_v56  ;;  %6364 = vmatmul.mubr.msk.bf16.gmra.mrb[8].mxu1 %vm355_vm1, %v8794_v12  ;;  %v8907_v38 = vpack.c.bf16 %v1930_v21, %v1928_v59  ;;  %v1936_v26 = vrot.slane %v8675_v18, 2  ;;  %v1937_v11 = vrot.slane %v8683_v47, 2  ;;  %v1939_v6 = vrot.slane %v8685_v17, 2  ;;  %v8929_v47 = vld [vmem:[#allocation2 + $0x330] sm:$0xff] }
  0xcd   :  { %6367 = vmatprep.mubr.msk.bf16.mxu1 %vm355_vm1, %v8800_v14  ;;  %v8917_v34 = vpack.c.bf16 %v7434_v45, %v7433_v4  ;;  %v1933_v30 = vsel %vm1780_vm5, %v1931_v52, %v1932_v35  ;;  %v1935_v63 = vsel %vm1780_vm5, %v1932_v35, %v1934_v8  ;;  %v3245_v59 = vrot.slane %v8929_v47, 2  ;;  %v7435_v35 = vld [vmem:[#allocation2 + $0x138] sm:$0xff]  ;;  %v7436_v8 = vld [vmem:[#allocation2 + $0x140] sm:$0xff] }
  0xce   :  { %v1938_v36 = vsel %vm1780_vm5, %v1936_v26, %v1937_v11  ;;  %v1940_v18 = vsel %vm1780_vm5, %v1937_v11, %v1939_v6  ;;  %v8931_v17 = vld [vmem:[#allocation2 + $0x338] sm:$0xff]  ;;  %v8933_v9 = vld [vmem:[#allocation2 + $0x340] sm:$0x3]  ;;  %v8937_v53 = vpack.c.bf16 %v1935_v63, %v1933_v30  ;;  %v8944_v61 = vpack.c.bf16 %v7436_v8, %v7435_v35  ;;  %v7439_v30 = vld [vmem:[#allocation2 + $0x168] sm:$0xff] }
  0xcf   :  { %v8939_v39 = vpack.c.bf16 %v1940_v18, %v1938_v36  ;;  %v3246_v21 = vrot.slane %v8931_v17, 2  ;;  %v3248_v52 = vrot.slane %v8933_v9, 2  ;;  %v7438_v26 = vld [vmem:[#allocation2 + $0x158] sm:$0xff]  ;;  %v7440_v63 = vld [vmem:[#allocation2 + $0x170] sm:$0xff] }
  0xd0   :  { %v8946_v11 = vpack.c.bf16 %v7438_v26, %v7437_v62  ;;  %v8960_v36 = vpack.c.bf16 %v7440_v63, %v7439_v30  ;;  %v8962_v18 = vld [vmem:[#allocation2 + $0x1b0] sm:$0xff]  ;;  %v8964_v35 = vld [vmem:[#allocation2 + $0x1b8] sm:$0xff]  ;;  %v10139_v62 = vld [vmem:[#allocation35_spill] sm:$0xff] }
  0xd1   :  { %v3247_v6 = vsel %vm1780_vm5, %v3245_v59, %v3246_v21  ;;  %v3249_v4 = vsel %vm1780_vm5, %v3246_v21, %v3248_v52  ;;  %v632_v59 = vpack.c.bf16 %v8964_v35, %v8962_v18  ;;  %v7443_v21 = vld [vmem:[#allocation2 + $0x1c8] sm:$0xff]  ;;  %v7444_v52 = vld [vmem:[#allocation2 + $0x1d0] sm:$0xff]  ;;  %v4014_v26 = vsel %vm1099_vm0, %v10139_v62, 0  ;;  %v8990_v63 = vld [vmem:[%s9951_s3 + $0x20] sm:$0xf] }
  0xd2   :  { %v8958_v45 = vpack.c.bf16 %v3249_v4, %v3247_v6  ;;  %v8975_v8 = vpack.c.bf16 %v7444_v52, %v7443_v21  ;;  %v7445_v6 = vld [vmem:[#allocation2 + $0x1e0] sm:$0xff]  ;;  %v7446_v4 = vld [vmem:[#allocation2 + $0x1e8] sm:$0xff]  ;;  %v9001_v52 = vpack.c.bf16 %v8341_v23, %v8330_v0  ;;  %v9017_v0 = vpack.c.bf16 %v8415_v29, %v8407_v40 }
  0xd3   :  { %6664 = vmatmul.mubr.msk.bf16.gmra.mrb[44].mxu0 %vm355_vm1, %v8853_v49  ;;  %v8979_v30 = vpack.c.bf16 %v7446_v4, %v7445_v6  ;;  %v9029_v23 = vpack.c.bf16 %v8429_v48, %v8427_v15  ;;  %v1781_v29 = vrot.slane %v8704_v20, 2  ;;  %v1782_v15 = vrot.slane %v8702_v24, 2  ;;  %v7450_v48 = vld [vmem:[#allocation2 + $0x10] sm:$0x3]  ;;  %v9063_v6 = vld [vmem:[#allocation2 + $0x1a0] sm:$0xff] }
  0xd4   :  { %6667 = vmatprep.mubr.msk.bf16.mxu0 %vm355_vm1, %v8855_v13  ;;  %6368 = vmatmul.mubr.msk.bf16.gmra.mrb[12].mxu1 %vm355_vm1, %v8860_v41  ;;  %10137 = vst [vmem:[#allocation14_spill] sm:$0xff] %v8958_v45  ;;  %10138 = vst [vmem:[#allocation64_spill] sm:$0xff] %v8975_v8  ;;  %v1784_v62 = vrot.slane %v7450_v48, 2  ;;  %v3991_v4 = vrot.slane %v9063_v6, 1 }
  0xd5   :  { %6371 = vmatprep.mubr.msk.bf16.mxu1 %vm355_vm1, %v8865_v22 }
  0xdb   :  { %6668 = vmatmul.mubr.msk.bf16.gmra.mrb[48].mxu0 %vm355_vm1, %v8879_v58 }
  0xdc   :  { %6671 = vmatprep.mubr.msk.bf16.mxu0 %vm355_vm1, %v8881_v3  ;;  %6372 = vmatmul.mubr.msk.bf16.gmra.mrb[16].mxu1 %vm355_vm1, %v8886_v32 }
  0xdd   :  { %6375 = vmatprep.mubr.msk.bf16.mxu1 %vm355_vm1, %v8891_v27 }
  0xe3   :  { %6672 = vmatmul.mubr.msk.bf16.gmra.mrb[52].mxu0 %vm355_vm1, %v8905_v42 }
  0xe4   :  { %6675 = vmatprep.mubr.msk.bf16.mxu0 %vm355_vm1, %v8907_v38  ;;  %6376 = vmatmul.mubr.msk.bf16.gmra.mrb[20].mxu1 %vm355_vm1, %v8912_v1 }
  0xe5   :  { %6379 = vmatprep.mubr.msk.bf16.mxu1 %vm355_vm1, %v8917_v34 }
  0xeb   :  { %6676 = vmatmul.mubr.msk.bf16.gmra.mrb[56].mxu0 %vm355_vm1, %v8937_v53 }
  0xec   :  { %6679 = vmatprep.mubr.msk.bf16.mxu0 %vm355_vm1, %v8939_v39  ;;  %6380 = vmatmul.mubr.msk.bf16.gmra.mrb[24].mxu1 %vm355_vm1, %v8944_v61 }
  0xed   :  { %6383 = vmatprep.mubr.msk.bf16.mxu1 %vm355_vm1, %v8946_v11 }
  0xf3   :  { %6680 = vmatmul.mubr.msk.bf16.gmra.mrb[60].mxu0 %vm355_vm1, %v8958_v45 }
  0xf4   :  { %6685 = vmatprep.mubr.msk.bf16.mxu0 %vm355_vm1, %v8735_v37  ;;  %6384 = vmatmul.mubr.msk.bf16.gmra.mrb[28].mxu1 %vm355_vm1, %v8960_v36 }
  0xf5   :  { %6387 = vmatprep.mubr.msk.bf16.mxu1 %vm355_vm1, %v632_v59  ;;  %v7447_v59 = vld [vmem:[#allocation2 + $0x1f8] sm:$0xff] }
  0xf6   :  { %v8997_v21 = vpack.c.bf16 %v8284_v50, %v7447_v59  ;;  %v9013_v50 = vpack.c.bf16 %v8369_v2, %v8367_v57  ;;  %v7448_v57 = vld [vmem:[#allocation2 + $0x180] sm:$0xff]  ;;  %v7449_v2 = vld [vmem:[#allocation2 + $0x188] sm:$0xff]  ;;  %v1783_v59 = vsel %vm1780_vm5, %v1781_v29, %v1782_v15  ;;  %v9150_v29 = vpack.c.bf16 %v8931_v17, %v8929_v47 }
  0xf7   :  { %v9055_v40 = vpack.c.bf16 %v7449_v2, %v7448_v57  ;;  %v1785_v57 = vsel %vm1780_vm5, %v1782_v15, %v1784_v62  ;;  %v9077_v2 = vld [vmem:[#allocation2 + $0x1a8] sm:$0x3]  ;;  %v2500_v15 = vsel %vm1099_vm0, %v8754_v25, 0  ;;  %v10141_v62 = vld [vmem:[#allocation22_spill] sm:$0xff]  ;;  %v10143_v25 = vld [vmem:[#allocation27_spill] sm:$0xff] }
  0xf8   :  { %v3993_v48 = vrot.slane %v9077_v2, 1  ;;  %v2005_v45 = vpack.c.bf16 %v1785_v57, %v1783_v59  ;;  %v10146_v59 = vld [vmem:[#allocation31_spill] sm:$0xff]  ;;  %v10147_v57 = vld [vmem:[#allocation34_spill] sm:$0xff]  ;;  %10152 = vst [vmem:[#allocation22_spill] sm:$0xff] %v9150_v29 }
  0xf9   :  { %10140 = vst [vmem:[#allocation35_spill] sm:$0xff] %v9055_v40 }
  0xfb   :  { %6686 = vmatmul.mubr.msk.bf16.vlgmr.msra.gmra.mrb[0].mxu0 %vm355_vm1, %v8767_v55 }
  0xfc   :  { %6750 = vmatpush3.bf16.msra.mxu0 %v4014_v26  ;;  %6689 = vmatprep.mubr.msk.bf16.mxu0 %vm355_vm1, %v8772_v46  ;;  %v9061_v26 = vld [vmem:[#allocation2 + $0x198] sm:$0xff] }
  0xfd   :  { %6388 = vmatmul.mubr.msk.bf16.gmra.mrb[32].mxu1 %vm355_vm1, %v8975_v8  ;;  %7404 = vmatprep.subr.msk.bf16.mxu0 %vm1099_vm0, %v8990_v63  ;;  %v3619_v20 = vpack.c.bf16 %v9063_v6, %v9061_v26  ;;  %v3990_v24 = vrot.slane %v9061_v26, 1 }
  0xfe   :  { %6391 = vmatprep.mubr.msk.bf16.mxu1 %vm355_vm1, %v8979_v30 }
  0xff   :  { %v9082_v8 = vsel %vm745_vm4, %v3990_v24, %v3991_v4  ;;  %v10144_v24 = vld [vmem:[#allocation28_spill] sm:$0xff] }
 0x103   :  { %6690 = vmatmul.mubr.msk.bf16.gmra.mrb[4].mxu0 %vm355_vm1, %v8794_v12 }
 0x104   :  { %6693 = vmatprep.mubr.msk.bf16.mxu0 %vm355_vm1, %v8800_v14 }
 0x105   :  { %6392 = vmatmul.mubr.msk.bf16.gmra.mrb[36].mxu1 %vm355_vm1, %v8997_v21 }
 0x106   :  { %6395 = vmatprep.mubr.msk.bf16.mxu1 %vm355_vm1, %v9001_v52 }
 0x10b   :  { %6694 = vmatmul.mubr.msk.bf16.gmra.mrb[8].mxu0 %vm355_vm1, %v8860_v41 }
 0x10c   :  { %6697 = vmatprep.mubr.msk.bf16.mxu0 %vm355_vm1, %v8865_v22 }
 0x10d   :  { %6396 = vmatmul.mubr.msk.bf16.gmra.mrb[40].mxu1 %vm355_vm1, %v9013_v50 }
 0x10e   :  { %6399 = vmatprep.mubr.msk.bf16.mxu1 %vm355_vm1, %v9017_v0 }
 0x113   :  { %6698 = vmatmul.mubr.msk.bf16.gmra.mrb[12].mxu0 %vm355_vm1, %v8886_v32 }
 0x114   :  { %6701 = vmatprep.mubr.msk.bf16.mxu0 %vm355_vm1, %v8891_v27 }
 0x115   :  { %6400 = vmatmul.mubr.msk.bf16.gmra.mrb[44].mxu1 %vm355_vm1, %v9029_v23 }
 0x116   :  { %6403 = vmatprep.mubr.msk.bf16.mxu1 %vm355_vm1, %v8813_v10 }
 0x11b   :  { %6702 = vmatmul.mubr.msk.bf16.gmra.mrb[16].mxu0 %vm355_vm1, %v8912_v1 }
 0x11c   :  { %6705 = vmatprep.mubr.msk.bf16.mxu0 %vm355_vm1, %v8917_v34 }
 0x11d   :  { %6404 = vmatmul.mubr.msk.bf16.gmra.mrb[48].mxu1 %vm355_vm1, %v8817_v28 }
 0x11e   :  { %6407 = vmatprep.mubr.msk.bf16.mxu1 %vm355_vm1, %v8821_v5 }
 0x123   :  { %6706 = vmatmul.mubr.msk.bf16.gmra.mrb[20].mxu0 %vm355_vm1, %v8944_v61 }
 0x124   :  { %6709 = vmatprep.mubr.msk.bf16.mxu0 %vm355_vm1, %v8946_v11 }
 0x125   :  { %6408 = vmatmul.mubr.msk.bf16.gmra.mrb[52].mxu1 %vm355_vm1, %v8825_v43 }
 0x126   :  { %6411 = vmatprep.mubr.msk.bf16.mxu1 %vm355_vm1, %v8831_v51 }
 0x12b   :  { %6710 = vmatmul.mubr.msk.bf16.gmra.mrb[24].mxu0 %vm355_vm1, %v8960_v36 }
 0x12c   :  { %6713 = vmatprep.mubr.msk.bf16.mxu0 %vm355_vm1, %v9055_v40  ;;  %v9085_v40 = vsel %vm745_vm4, %v3991_v4, %v3993_v48  ;;  %v10145_v4 = vld [vmem:[#allocation30_spill] sm:$0xff] }
 0x12d   :  { %6412 = vmatmul.mubr.msk.bf16.gmra.mrb[56].mxu1 %vm355_vm1, %v8835_v7  ;;  %v10148_v48 = vld [vmem:[#allocation38_spill] sm:$0xff] }
 0x12e   :  { %6415 = vmatprep.mubr.msk.bf16.mxu1 %vm355_vm1, %v8843_v60 }
 0x133   :  { %6714 = vmatmul.mubr.msk.bf16.gmra.mrb[28].mxu0 %vm355_vm1, %v3619_v20  ;;  %v10142_v20 = vld [vmem:[#allocation25_spill] sm:$0xff] }
 0x134   :  { %6717 = vmatprep.mubr.msk.bf16.mxu0 %vm355_vm1, %v8979_v30 }
 0x135   :  { %6416 = vmatmul.mubr.msk.bf16.gmra.mrb[60].mxu1 %vm355_vm1, %v8847_v31 }
 0x136   :  { %6421 = vmatprep.mubr.msk.bf16.mxu1 %vm355_vm1, %v2005_v45  ;;  %v7451_v45 = vld [vmem:[%s9951_s3 + $0x10] sm:$0xf] }
 0x13b   :  { %6718 = vmatmul.mubr.msk.bf16.gmra.mrb[32].mxu0 %vm355_vm1, %v8997_v21 }
 0x13c   :  { %6721 = vmatprep.mubr.msk.bf16.mxu0 %vm355_vm1, %v9001_v52 }
 0x13d   :  { %6422 = vmatmul.mubr.msk.bf16.vlgmr.msra.gmra.mrb[0].mxu1 %vm355_vm1, %v10141_v62  ;;  %v10150_v62 = vld [vmem:[#allocation41_spill] sm:$0xff] }
 0x13e   :  { %6486 = vmatpush3.bf16.msra.mxu1 %v2500_v15  ;;  %6425 = vmatprep.mubr.msk.bf16.mxu1 %vm355_vm1, %v10142_v20  ;;  %v10149_v15 = vld [vmem:[#allocation40_spill] sm:$0xff] }
 0x13f   :  { %7400 = vmatprep.subr.msk.bf16.mxu1 %vm1099_vm0, %v7451_v45  ;;  %v10151_v45 = vld [vmem:[#allocation43_spill] sm:$0xff] }
 0x143   :  { %6722 = vmatmul.mubr.msk.bf16.gmra.mrb[36].mxu0 %vm355_vm1, %v9013_v50 }
 0x144   :  { %6725 = vmatprep.mubr.msk.bf16.mxu0 %vm355_vm1, %v9017_v0 }
 0x145   :  { %6426 = vmatmul.mubr.msk.bf16.gmra.mrb[4].mxu1 %vm355_vm1, %v10143_v25 }
 0x146   :  { %6429 = vmatprep.mubr.msk.bf16.mxu1 %vm355_vm1, %v10144_v24 }
 0x14b   :  { %6726 = vmatmul.mubr.msk.bf16.gmra.mrb[40].mxu0 %vm355_vm1, %v9029_v23 }
 0x14c   :  { %6729 = vmatprep.mubr.msk.bf16.mxu0 %vm355_vm1, %v8813_v10  ;;  %v9172_v10 = vld [vmem:[#allocation2 + $0x358] sm:$0x3] }
 0x14d   :  { %6430 = vmatmul.mubr.msk.bf16.gmra.mrb[8].mxu1 %vm355_vm1, %v10145_v4 }
 0x14e   :  { %6433 = vmatprep.mubr.msk.bf16.mxu1 %vm355_vm1, %v10146_v59 }
 0x153   :  { %6730 = vmatmul.mubr.msk.bf16.gmra.mrb[44].mxu0 %vm355_vm1, %v8817_v28 }
 0x154   :  { %6733 = vmatprep.mubr.msk.bf16.mxu0 %vm355_vm1, %v8821_v5  ;;  %v7452_v5 = vld [vmem:[#allocation2 + $0x1c0] sm:$0x3] }
 0x155   :  { %6434 = vmatmul.mubr.msk.bf16.gmra.mrb[12].mxu1 %vm355_vm1, %v10147_v57 }
 0x156   :  { %6437 = vmatprep.mubr.msk.bf16.mxu1 %vm355_vm1, %v10148_v48 }
 0x15b   :  { %6734 = vmatmul.mubr.msk.bf16.gmra.mrb[48].mxu0 %vm355_vm1, %v8825_v43  ;;  %v9156_v43 = vld [vmem:[#allocation2 + $0x350] sm:$0xff] }
 0x15c   :  { %6737 = vmatprep.mubr.msk.bf16.mxu0 %vm355_vm1, %v8831_v51  ;;  %v9154_v51 = vld [vmem:[#allocation2 + $0x348] sm:$0xff] }
 0x15d   :  { %6438 = vmatmul.mubr.msk.bf16.gmra.mrb[16].mxu1 %vm355_vm1, %v10149_v15  ;;  %v3995_v28 = vrot.slane %v9154_v51, 1  ;;  %v10154_v15 = vld [vmem:[#allocation4_spill] sm:$0xff] }
 0x15e   :  { %6441 = vmatprep.mubr.msk.bf16.mxu1 %vm355_vm1, %v10150_v62 }
 0x163   :  { %6738 = vmatmul.mubr.msk.bf16.gmra.mrb[52].mxu0 %vm355_vm1, %v8835_v7  ;;  %v1861_v7 = vrot.slane %v8962_v18, 2  ;;  %v3996_v18 = vrot.slane %v9156_v43, 1 }
 0x164   :  { %6741 = vmatprep.mubr.msk.bf16.mxu0 %vm355_vm1, %v8843_v60  ;;  %v1862_v60 = vrot.slane %v8964_v35, 2 }
 0x165   :  { %6442 = vmatmul.mubr.msk.bf16.gmra.mrb[20].mxu1 %vm355_vm1, %v10151_v45  ;;  %v1864_v45 = vrot.slane %v7452_v5, 2 }
 0x166   :  { %6445 = vmatprep.mubr.msk.bf16.mxu1 %vm355_vm1, %v8534_v19  ;;  %v10153_v19 = vld [vmem:[#allocation19_spill] sm:$0xff]  ;;  %v1863_v35 = vsel %vm1780_vm5, %v1861_v7, %v1862_v60 }
 0x167   :  { %v1865_v5 = vsel %vm1780_vm5, %v1862_v60, %v1864_v45  ;;  %v10155_v60 = vld [vmem:[#allocation48_spill] sm:$0xff]  ;;  %v10156_v45 = vld [vmem:[#allocation5_spill] sm:$0xff] }
 0x168   :  { %v2021_v62 = vpack.c.bf16 %v1865_v5, %v1863_v35  ;;  %v10163_v35 = vld [vmem:[#allocation10_spill] sm:$0xff]  ;;  %v10165_v5 = vld [vmem:[#allocation11_spill] sm:$0xff] }
 0x16b   :  { %6742 = vmatmul.mubr.msk.bf16.gmra.mrb[56].mxu0 %vm355_vm1, %v8847_v31  ;;  %v3620_v31 = vpack.c.bf16 %v9156_v43, %v9154_v51 }
 0x16c   :  { %6745 = vmatprep.mubr.msk.bf16.mxu0 %vm355_vm1, %v9150_v29  ;;  %v3998_v29 = vrot.slane %v9172_v10, 1 }
 0x16d   :  { %6446 = vmatmul.mubr.msk.bf16.gmra.mrb[24].mxu1 %vm355_vm1, %v8571_v44 }
 0x16e   :  { %6449 = vmatprep.mubr.msk.bf16.mxu1 %vm355_vm1, %v10153_v19  ;;  %v9177_v19 = vsel %vm745_vm4, %v3995_v28, %v3996_v18  ;;  %v9180_v44 = vsel %vm745_vm4, %v3996_v18, %v3998_v29  ;;  %v10157_v28 = vld [vmem:[#allocation6_spill] sm:$0xff]  ;;  %v10158_v29 = vld [vmem:[#allocation7_spill] sm:$0xff]  ;;  %v10162_v18 = vld [vmem:[#allocation9_spill] sm:$0xff] }
 0x16f   :  { %v4005_v7 = vpack.c.bf16 %v9180_v44, %v9177_v19  ;;  %v10192_v19 = vld [vmem:[#allocation40_spill] sm:$0xff]  ;;  %v10193_v44 = vld [vmem:[#allocation41_spill] sm:$0xff] }
 0x173   :  { %6746 = vmatmul.mubr.msk.bf16.gmra.mrb[60].mxu0 %vm355_vm1, %v3620_v31  ;;  %v4393_v31 = vsel %vm1099_vm0, %v8990_v63, 0  ;;  %v10160_v63 = vld [vmem:[#allocation52_spill] sm:$0xff] }
 0x174   :  { %6751 = vmatprep.mubr.msk.bf16.mxu0 %vm355_vm1, %v10154_v15  ;;  %v10159_v15 = vld [vmem:[#allocation8_spill] sm:$0xff] }
 0x175   :  { %6450 = vmatmul.mubr.msk.bf16.gmra.mrb[28].mxu1 %vm355_vm1, %v10155_v60 }
 0x176   :  { %6453 = vmatprep.mubr.msk.bf16.mxu1 %vm355_vm1, %v2021_v62  ;;  %v10161_v62 = vld [vmem:[#allocation54_spill] sm:$0xff] }
 0x17b   :  { %6752 = vmatmul.mubr.msk.bf16.vlgmr.msra.gmra.mrb[0].mxu0 %vm355_vm1, %v10156_v45  ;;  %v10167_v45 = vld [vmem:[#allocation13_spill] sm:$0xff] }
 0x17c   :  { %6816 = vmatpush3.bf16.msra.mxu0 %v4393_v31  ;;  %6755 = vmatprep.mubr.msk.bf16.mxu0 %vm355_vm1, %v10157_v28  ;;  %v10166_v31 = vld [vmem:[#allocation12_spill] sm:$0xff] }
 0x17d   :  { %6454 = vmatmul.mubr.msk.bf16.gmra.mrb[32].mxu1 %vm355_vm1, %v8688_v54  ;;  %v10164_v54 = vld [vmem:[#allocation55_spill] sm:$0xff]  ;;  %v10168_v28 = vld [vmem:[#allocation16_spill] sm:$0xff] }
 0x17e   :  { %6457 = vmatprep.mubr.msk.bf16.mxu1 %vm355_vm1, %v8723_v16 }
 0x183   :  { %6756 = vmatmul.mubr.msk.bf16.gmra.mrb[4].mxu0 %vm355_vm1, %v10158_v29  ;;  %v10169_v29 = vld [vmem:[#allocation20_spill] sm:$0xff] }
 0x184   :  { %6759 = vmatprep.mubr.msk.bf16.mxu0 %vm355_vm1, %v10159_v15  ;;  %v10170_v15 = vld [vmem:[#allocation21_spill] sm:$0xff] }
 0x185   :  { %6458 = vmatmul.mubr.msk.bf16.gmra.mrb[36].mxu1 %vm355_vm1, %v10160_v63 }
 0x186   :  { %6461 = vmatprep.mubr.msk.bf16.mxu1 %vm355_vm1, %v10161_v62 }
 0x18b   :  { %6760 = vmatmul.mubr.msk.bf16.gmra.mrb[8].mxu0 %vm355_vm1, %v10162_v18  ;;  %v10171_v18 = vld [vmem:[#allocation23_spill] sm:$0xff] }
 0x18c   :  { %6763 = vmatprep.mubr.msk.bf16.mxu0 %vm355_vm1, %v10163_v35  ;;  %v10172_v35 = vld [vmem:[#allocation26_spill] sm:$0xff] }
 0x18d   :  { %6462 = vmatmul.mubr.msk.bf16.gmra.mrb[40].mxu1 %vm355_vm1, %v10164_v54 }
 0x18e   :  { %6465 = vmatprep.mubr.msk.bf16.mxu1 %vm355_vm1, %v8792_v33 }
 0x193   :  { %6764 = vmatmul.mubr.msk.bf16.gmra.mrb[12].mxu0 %vm355_vm1, %v10165_v5  ;;  %v4369_v5 = vrot.slane %v9061_v26, 2 }
 0x194   :  { %6767 = vmatprep.mubr.msk.bf16.mxu0 %vm355_vm1, %v10166_v31  ;;  %v4370_v31 = vrot.slane %v9063_v6, 2  ;;  %v10175_v6 = vld [vmem:[#allocation53_spill] sm:$0xff] }
 0x195   :  { %6466 = vmatmul.mubr.msk.bf16.gmra.mrb[44].mxu1 %vm355_vm1, %v8796_v56 }
 0x196   :  { %6469 = vmatprep.mubr.msk.bf16.mxu1 %vm355_vm1, %v8853_v49 }
 0x19b   :  { %6768 = vmatmul.mubr.msk.bf16.gmra.mrb[16].mxu0 %vm355_vm1, %v10167_v45  ;;  %v4372_v45 = vrot.slane %v9077_v2, 2  ;;  %v10178_v2 = vld [vmem:[#allocation3_spill] sm:$0xff] }
 0x19c   :  { %6771 = vmatprep.mubr.msk.bf16.mxu0 %vm355_vm1, %v10168_v28  ;;  %v10173_v28 = vpack.c.bf16 %v9085_v40, %v9082_v8  ;;  %v10176_v8 = vld [vmem:[#allocation33_spill] sm:$0xff]  ;;  %v10177_v40 = vld [vmem:[#allocation36_spill] sm:$0xff] }
 0x19d   :  { %6470 = vmatmul.mubr.msk.bf16.gmra.mrb[48].mxu1 %vm355_vm1, %v8855_v13 }
 0x19e   :  { %6473 = vmatprep.mubr.msk.bf16.mxu1 %vm355_vm1, %v8879_v58 }
 0x1a3   :  { %6772 = vmatmul.mubr.msk.bf16.gmra.mrb[20].mxu0 %vm355_vm1, %v10169_v29  ;;  %v9255_v29 = vsel %vm1780_vm5, %v4369_v5, %v4370_v31  ;;  %v10180_v5 = vld [vmem:[#allocation39_spill] sm:$0xff] }
 0x1a4   :  { %6775 = vmatprep.mubr.msk.bf16.mxu0 %vm355_vm1, %v10170_v15  ;;  %v9258_v15 = vsel %vm1780_vm5, %v4370_v31, %v4372_v45  ;;  %v10181_v31 = vld [vmem:[#allocation42_spill] sm:$0xff]  ;;  %v10184_v45 = vld [vmem:[#allocation17_spill] sm:$0xff] }
 0x1a5   :  { %6474 = vmatmul.mubr.msk.bf16.gmra.mrb[52].mxu1 %vm355_vm1, %v8881_v3  ;;  %v4383_v26 = vpack.c.bf16 %v9258_v15, %v9255_v29 }
 0x1a6   :  { %6477 = vmatprep.mubr.msk.bf16.mxu1 %vm355_vm1, %v8905_v42 }
 0x1ab   :  { %6776 = vmatmul.mubr.msk.bf16.gmra.mrb[24].mxu0 %vm355_vm1, %v10171_v18  ;;  %v10174_v18 = vld [vmem:[#allocation32_spill] sm:$0xff] }
 0x1ac   :  { %6779 = vmatprep.mubr.msk.bf16.mxu0 %vm355_vm1, %v10172_v35  ;;  %v10179_v35 = vld [vmem:[#allocation37_spill] sm:$0xff] }
 0x1ad   :  { %6478 = vmatmul.mubr.msk.bf16.gmra.mrb[56].mxu1 %vm355_vm1, %v8907_v38 }
 0x1ae   :  { %6481 = vmatprep.mubr.msk.bf16.mxu1 %vm355_vm1, %v8937_v53 }
 0x1b3   :  { %6780 = vmatmul.mubr.msk.bf16.gmra.mrb[28].mxu0 %vm355_vm1, %v10173_v28  ;;  %v10187_v28 = vld [vmem:[#allocation24_spill] sm:$0xff] }
 0x1b4   :  { %6783 = vmatprep.mubr.msk.bf16.mxu0 %vm355_vm1, %v10174_v18 }
 0x1b5   :  { %6482 = vmatmul.mubr.msk.bf16.gmra.mrb[60].mxu1 %vm355_vm1, %v8939_v39 }
 0x1b6   :  { %6487 = vmatprep.mubr.msk.bf16.mxu1 %vm355_vm1, %v10175_v6 }
 0x1bb   :  { %6784 = vmatmul.mubr.msk.bf16.gmra.mrb[32].mxu0 %vm355_vm1, %v10176_v8 }
 0x1bc   :  { %6787 = vmatprep.mubr.msk.bf16.mxu0 %vm355_vm1, %v10177_v40 }
 0x1bd   :  { %6488 = vmatmul.mubr.msk.bf16.vlgmr.msra.gmra.mrb[0].mxu1 %vm355_vm1, %v8735_v37  ;;  %v10182_v37 = vld [vmem:[#allocation44_spill] sm:$0xff] }
 0x1be   :  { %6882 = vmatpush3.bf16.msra.mxu1 %v10178_v2  ;;  %6491 = vmatprep.mubr.msk.bf16.mxu1 %vm355_vm1, %v8767_v55  ;;  %v10183_v55 = vld [vmem:[#allocation45_spill] sm:$0xff] }
 0x1c3   :  { %6788 = vmatmul.mubr.msk.bf16.gmra.mrb[36].mxu0 %vm355_vm1, %v10179_v35 }
 0x1c4   :  { %6791 = vmatprep.mubr.msk.bf16.mxu0 %vm355_vm1, %v10180_v5 }
 0x1c5   :  { %6492 = vmatmul.mubr.msk.bf16.gmra.mrb[4].mxu1 %vm355_vm1, %v8772_v46  ;;  %v10186_v46 = vld [vmem:[#allocation47_spill] sm:$0xff] }
 0x1c6   :  { %6495 = vmatprep.mubr.msk.bf16.mxu1 %vm355_vm1, %v8794_v12  ;;  %v10185_v12 = vld [vmem:[#allocation18_spill] sm:$0xff] }
 0x1cb   :  { %6792 = vmatmul.mubr.msk.bf16.gmra.mrb[40].mxu0 %vm355_vm1, %v10181_v31 }
 0x1cc   :  { %6795 = vmatprep.mubr.msk.bf16.mxu0 %vm355_vm1, %v10182_v37 }
 0x1cd   :  { %6496 = vmatmul.mubr.msk.bf16.gmra.mrb[8].mxu1 %vm355_vm1, %v8800_v14  ;;  %v2866_v14 = vrot.slane %v8929_v47, 1  ;;  %v10189_v47 = vld [vmem:[#allocation51_spill] sm:$0xff] }
 0x1ce   :  { %6499 = vmatprep.mubr.msk.bf16.mxu1 %vm355_vm1, %v8860_v41  ;;  %v2867_v41 = vrot.slane %v8931_v17, 1  ;;  %v4375_v17 = vrot.slane %v9156_v43, 2  ;;  %v10190_v43 = vld [vmem:[#allocation35_spill] sm:$0xff] }
 0x1d3   :  { %6796 = vmatmul.mubr.msk.bf16.gmra.mrb[44].mxu0 %vm355_vm1, %v10183_v55 }
 0x1d4   :  { %6799 = vmatprep.mubr.msk.bf16.mxu0 %vm355_vm1, %v10184_v45 }
 0x1d5   :  { %6500 = vmatmul.mubr.msk.bf16.gmra.mrb[12].mxu1 %vm355_vm1, %v8865_v22  ;;  %v2869_v22 = vrot.slane %v8933_v9, 1  ;;  %v4377_v9 = vrot.slane %v9172_v10, 2  ;;  %v10191_v10 = vld [vmem:[#allocation64_spill] sm:$0xff] }
 0x1d6   :  { %6503 = vmatprep.mubr.msk.bf16.mxu1 %vm355_vm1, %v8886_v32  ;;  %v10188_v32 = vld [vmem:[#allocation50_spill] sm:$0xff] }
 0x1d7   :  { %v2870_v6 = vsel %vm745_vm4, %v2867_v41, %v2869_v22  ;;  %v9343_v2 = vsel %vm1780_vm5, %v4375_v17, %v4377_v9 }
 0x1db   :  { %6800 = vmatmul.mubr.msk.bf16.gmra.mrb[48].mxu0 %vm355_vm1, %v10185_v12 }
 0x1dc   :  { %6803 = vmatprep.mubr.msk.bf16.mxu0 %vm355_vm1, %v10186_v46 }
 0x1dd   :  { %6504 = vmatmul.mubr.msk.bf16.gmra.mrb[16].mxu1 %vm355_vm1, %v8891_v27  ;;  %v2868_v27 = vsel %vm745_vm4, %v2866_v14, %v2867_v41 }
 0x1de   :  { %6507 = vmatprep.mubr.msk.bf16.mxu1 %vm355_vm1, %v8912_v1  ;;  %v9322_v1 = vpack.c.bf16 %v2870_v6, %v2868_v27 }
 0x1e3   :  { %6804 = vmatmul.mubr.msk.bf16.gmra.mrb[52].mxu0 %vm355_vm1, %v10187_v28 }
 0x1e4   :  { %6807 = vmatprep.mubr.msk.bf16.mxu0 %vm355_vm1, %v10188_v32 }
 0x1e5   :  { %6508 = vmatmul.mubr.msk.bf16.gmra.mrb[20].mxu1 %vm355_vm1, %v8917_v34  ;;  %v4374_v34 = vrot.slane %v9154_v51, 2 }
 0x1e6   :  { %6511 = vmatprep.mubr.msk.bf16.mxu1 %vm355_vm1, %v8944_v61 }
 0x1e7   :  { %v9340_v61 = vsel %vm1780_vm5, %v4374_v34, %v4375_v17 }
 0x1e8   :  { %v4384_v51 = vpack.c.bf16 %v9343_v2, %v9340_v61 }
 0x1eb   :  { %6808 = vmatmul.mubr.msk.bf16.gmra.mrb[56].mxu0 %vm355_vm1, %v10189_v47 }
 0x1ec   :  { %6811 = vmatprep.mubr.msk.bf16.mxu0 %vm355_vm1, %v9322_v1 }
 0x1ed   :  { %6512 = vmatmul.mubr.msk.bf16.gmra.mrb[24].mxu1 %vm355_vm1, %v8946_v11  ;;  %v10194_v11 = vld [vmem:[#allocation56_spill] sm:$0xff] }
 0x1ee   :  { %6515 = vmatprep.mubr.msk.bf16.mxu1 %vm355_vm1, %v8960_v36  ;;  %v10195_v36 = vld [vmem:[#allocation57_spill] sm:$0xff] }
 0x1f3   :  { %6812 = vmatmul.mubr.msk.bf16.gmra.mrb[60].mxu0 %vm355_vm1, %v4005_v7 }
 0x1f4   :  { %6817 = vmatprep.mubr.msk.bf16.mxu0 %vm355_vm1, %v10142_v20  ;;  %v10202_v20 = vld [vmem:[#allocation60_spill] sm:$0xff] }
 0x1f5   :  { %6516 = vmatmul.mubr.msk.bf16.gmra.mrb[28].mxu1 %vm355_vm1, %v10190_v43 }
 0x1f6   :  { %6519 = vmatprep.mubr.msk.bf16.mxu1 %vm355_vm1, %v10191_v10 }
 0x1fb   :  { %6818 = vmatmul.mubr.msk.bf16.vlgmr.msra.gmra.mrb[0].mxu0 %vm355_vm1, %v10143_v25  ;;  %v10203_v25 = vld [vmem:[#allocation61_spill] sm:$0xff] }
 0x1fc   :  { %6821 = vmatprep.mubr.msk.bf16.mxu0 %vm355_vm1, %v10144_v24  ;;  %v10204_v24 = vld [vmem:[#allocation49_spill] sm:$0xff] }
 0x1fd   :  { %6520 = vmatmul.mubr.msk.bf16.gmra.mrb[32].mxu1 %vm355_vm1, %v8979_v30  ;;  %v10196_v30 = vld [vmem:[#allocation43_spill] sm:$0xff] }
 0x1fe   :  { %6523 = vmatprep.mubr.msk.bf16.mxu1 %vm355_vm1, %v8997_v21  ;;  %v10197_v21 = vld [vmem:[#allocation46_spill] sm:$0xff] }
 0x203   :  { %6822 = vmatmul.mubr.msk.bf16.gmra.mrb[4].mxu0 %vm355_vm1, %v10145_v4  ;;  %v10205_v4 = vld [vmem:[#allocation62_spill] sm:$0xff] }
 0x204   :  { %6825 = vmatprep.mubr.msk.bf16.mxu0 %vm355_vm1, %v10146_v59  ;;  %v10206_v59 = vld [vmem:[#allocation63_spill] sm:$0xff] }
 0x205   :  { %6524 = vmatmul.mubr.msk.bf16.gmra.mrb[36].mxu1 %vm355_vm1, %v9001_v52  ;;  %v10198_v52 = vld [vmem:[#allocation58_spill] sm:$0xff] }
 0x206   :  { %6527 = vmatprep.mubr.msk.bf16.mxu1 %vm355_vm1, %v9013_v50  ;;  %v10199_v50 = vld [vmem:[#allocation59_spill] sm:$0xff] }
 0x20b   :  { %6826 = vmatmul.mubr.msk.bf16.gmra.mrb[8].mxu0 %vm355_vm1, %v10147_v57  ;;  %v10207_v57 = vld [vmem:[#allocation22_spill] sm:$0xff] }
 0x20c   :  { %6829 = vmatprep.mubr.msk.bf16.mxu0 %vm355_vm1, %v10148_v48  ;;  %v10208_v48 = vld [vmem:[#allocation29_spill] sm:$0xff] }
 0x20d   :  { %6528 = vmatmul.mubr.msk.bf16.gmra.mrb[40].mxu1 %vm355_vm1, %v9017_v0  ;;  %v10200_v0 = vld [vmem:[#allocation15_spill] sm:$0xff] }
 0x20e   :  { %6531 = vmatprep.mubr.msk.bf16.mxu1 %vm355_vm1, %v9029_v23  ;;  %v10201_v23 = vld [vmem:[#allocation19_spill] sm:$0xff] }
 0x213   :  { %6830 = vmatmul.mubr.msk.bf16.gmra.mrb[12].mxu0 %vm355_vm1, %v10192_v19 }
 0x214   :  { %6833 = vmatprep.mubr.msk.bf16.mxu0 %vm355_vm1, %v10193_v44 }
 0x215   :  { %6532 = vmatmul.mubr.msk.bf16.gmra.mrb[44].mxu1 %vm355_vm1, %v10194_v11 }
 0x216   :  { %6535 = vmatprep.mubr.msk.bf16.mxu1 %vm355_vm1, %v10195_v36 }
 0x21b   :  { %6834 = vmatmul.mubr.msk.bf16.gmra.mrb[16].mxu0 %vm355_vm1, %v10196_v30 }
 0x21c   :  { %6837 = vmatprep.mubr.msk.bf16.mxu0 %vm355_vm1, %v10197_v21 }
 0x21d   :  { %6536 = vmatmul.mubr.msk.bf16.gmra.mrb[48].mxu1 %vm355_vm1, %v10198_v52 }
 0x21e   :  { %6539 = vmatprep.mubr.msk.bf16.mxu1 %vm355_vm1, %v10199_v50 }
 0x223   :  { %6838 = vmatmul.mubr.msk.bf16.gmra.mrb[20].mxu0 %vm355_vm1, %v10200_v0 }
 0x224   :  { %6841 = vmatprep.mubr.msk.bf16.mxu0 %vm355_vm1, %v10201_v23 }
 0x225   :  { %6540 = vmatmul.mubr.msk.bf16.gmra.mrb[52].mxu1 %vm355_vm1, %v10202_v20 }
 0x226   :  { %6543 = vmatprep.mubr.msk.bf16.mxu1 %vm355_vm1, %v10203_v25 }
 0x22b   :  { %6842 = vmatmul.mubr.msk.bf16.gmra.mrb[24].mxu0 %vm355_vm1, %v10155_v60 }
 0x22c   :  { %6845 = vmatprep.mubr.msk.bf16.mxu0 %vm355_vm1, %v10204_v24 }
 0x22d   :  { %6544 = vmatmul.mubr.msk.bf16.gmra.mrb[56].mxu1 %vm355_vm1, %v10205_v4 }
 0x22e   :  { %6547 = vmatprep.mubr.msk.bf16.mxu1 %vm355_vm1, %v10206_v59 }
 0x233   :  { %6846 = vmatmul.mubr.msk.bf16.gmra.mrb[28].mxu0 %vm355_vm1, %v4383_v26 }
 0x234   :  { %6849 = vmatprep.mubr.msk.bf16.mxu0 %vm355_vm1, %v8723_v16 }
 0x235   :  { %6548 = vmatmul.mubr.msk.bf16.gmra.mrb[60].mxu1 %vm355_vm1, %v10207_v57 }
 0x236   :  { %6585 = vmatprep.mubr.msk.bf16.mxu1 %vm355_vm1, %v10208_v48 }
 0x23b   :  { %6850 = vmatmul.mubr.msk.bf16.gmra.mrb[32].mxu0 %vm355_vm1, %v10160_v63 }
 0x23c   :  { %6853 = vmatprep.mubr.msk.bf16.mxu0 %vm355_vm1, %v10161_v62 }
 0x23d   :  { %6586 = vmatmul.mubr.msk.bf16.vlgmr.msra.gmra.mrb[32].mxu1 %vm355_vm1, %v10174_v18 }
 0x23e   :  { %6589 = vmatprep.mubr.msk.bf16.mxu1 %vm355_vm1, %v10176_v8 }
 0x243   :  { %6854 = vmatmul.mubr.msk.bf16.gmra.mrb[36].mxu0 %vm355_vm1, %v10164_v54 }
 0x244   :  { %6857 = vmatprep.mubr.msk.bf16.mxu0 %vm355_vm1, %v8792_v33  ;;  %v10209_v33 = vld [vmem:[#allocation14_spill] sm:$0xff] }
 0x245   :  { %6590 = vmatmul.mubr.msk.bf16.gmra.mrb[36].mxu1 %vm355_vm1, %v10177_v40 }
 0x246   :  { %6593 = vmatprep.mubr.msk.bf16.mxu1 %vm355_vm1, %v10179_v35 }
 0x24b   :  { %6858 = vmatmul.mubr.msk.bf16.gmra.mrb[40].mxu0 %vm355_vm1, %v8796_v56 }
 0x24c   :  { %6861 = vmatprep.mubr.msk.bf16.mxu0 %vm355_vm1, %v8853_v49 }
 0x24d   :  { %6594 = vmatmul.mubr.msk.bf16.gmra.mrb[40].mxu1 %vm355_vm1, %v10180_v5 }
 0x24e   :  { %6597 = vmatprep.mubr.msk.bf16.mxu1 %vm355_vm1, %v10181_v31 }
 0x253   :  { %6862 = vmatmul.mubr.msk.bf16.gmra.mrb[44].mxu0 %vm355_vm1, %v8855_v13 }
 0x254   :  { %6865 = vmatprep.mubr.msk.bf16.mxu0 %vm355_vm1, %v8879_v58 }
 0x255   :  { %6598 = vmatmul.mubr.msk.bf16.gmra.mrb[44].mxu1 %vm355_vm1, %v10182_v37 }
 0x256   :  { %6601 = vmatprep.mubr.msk.bf16.mxu1 %vm355_vm1, %v10183_v55 }
 0x25b   :  { %6866 = vmatmul.mubr.msk.bf16.gmra.mrb[48].mxu0 %vm355_vm1, %v8881_v3 }
 0x25c   :  { %6869 = vmatprep.mubr.msk.bf16.mxu0 %vm355_vm1, %v8905_v42 }
 0x25d   :  { %6602 = vmatmul.mubr.msk.bf16.gmra.mrb[48].mxu1 %vm355_vm1, %v10184_v45 }
 0x25e   :  { %6605 = vmatprep.mubr.msk.bf16.mxu1 %vm355_vm1, %v10185_v12 }
 0x263   :  { %6870 = vmatmul.mubr.msk.bf16.gmra.mrb[52].mxu0 %vm355_vm1, %v8907_v38 }
 0x264   :  { %6873 = vmatprep.mubr.msk.bf16.mxu0 %vm355_vm1, %v8937_v53 }
 0x265   :  { %6606 = vmatmul.mubr.msk.bf16.gmra.mrb[52].mxu1 %vm355_vm1, %v10186_v46 }
 0x266   :  { %6609 = vmatprep.mubr.msk.bf16.mxu1 %vm355_vm1, %v10187_v28 }
 0x26b   :  { %6874 = vmatmul.mubr.msk.bf16.gmra.mrb[56].mxu0 %vm355_vm1, %v8939_v39 }
 0x26c   :  { %6877 = vmatprep.mubr.msk.bf16.mxu0 %vm355_vm1, %v10209_v33 }
 0x26d   :  { %6610 = vmatmul.mubr.msk.bf16.gmra.mrb[56].mxu1 %vm355_vm1, %v10188_v32 }
 0x26e   :  { %6613 = vmatprep.mubr.msk.bf16.mxu1 %vm355_vm1, %v10189_v47 }
 0x273   :  { %6878 = vmatmul.mubr.msk.bf16.gmra.mrb[60].mxu0 %vm355_vm1, %v4384_v51 }
 0x275   :  { %6614 = vmatmul.mubr.msk.bf16.gmra.mrb[60].mxu1 %vm355_vm1, %v9322_v1 }
 0x290   :  { %v6489_v16 = vpop.f32.mrb[0].mxu1 }
 0x291   :  { %v2536_v56 = vpop.f32.mrb[1].mxu1 }
 0x292   :  { %v6490_v49 = vpop.f32.mrb[2].mxu1 }
 0x293   :  { %v2539_v13 = vpop.f32.mrb[3].mxu1 }
 0x298   :  { %v6493_v58 = vpop.f32.mrb[4].mxu1 }
 0x299   :  { %v2552_v3 = vpop.f32.mrb[5].mxu1 }
 0x29a   :  { %v9481_v42 = vpop.f32.mrb[6].mxu1 }
 0x29b   :  { %v9483_v38 = vpop.f32.mrb[7].mxu1 }
 0x2a0   :  { %v9485_v53 = vpop.f32.mrb[8].mxu1 }
 0x2a1   :  { %v9487_v39 = vpop.f32.mrb[9].mxu1 }
 0x2a2   :  { %v9489_v7 = vpop.f32.mrb[10].mxu1 }
 0x2a3   :  { %v9491_v60 = vpop.f32.mrb[11].mxu1 }
 0x2a8   :  { %v9493_v63 = vpop.f32.mrb[12].mxu1 }
 0x2a9   :  { %v9495_v62 = vpop.f32.mrb[13].mxu1 }
 0x2aa   :  { %v9497_v54 = vpop.f32.mrb[14].mxu1 }
 0x2ab   :  { %v9499_v29 = vpop.f32.mrb[15].mxu1 }
 0x2b0   :  { %v9501_v15 = vpop.f32.mrb[16].mxu1 }
 0x2b1   :  { %v9503_v18 = vpop.f32.mrb[17].mxu1 }
 0x2b2   :  { %v9505_v26 = vpop.f32.mrb[18].mxu1 }
 0x2b3   :  { %v9507_v8 = vpop.f32.mrb[19].mxu1 }
 0x2b8   :  { %v9509_v40 = vpop.f32.mrb[20].mxu1 }
 0x2b9   :  { %v9511_v35 = vpop.f32.mrb[21].mxu1 }
 0x2ba   :  { %v9513_v5 = vpop.f32.mrb[22].mxu1 }
 0x2bb   :  { %v9515_v31 = vpop.f32.mrb[23].mxu1 }
 0x2c0   :  { %v9517_v37 = vpop.f32.mrb[24].mxu1 }
 0x2c1   :  { %v9519_v55 = vpop.f32.mrb[25].mxu1 }
 0x2c2   :  { %v9521_v45 = vpop.f32.mrb[26].mxu1 }
 0x2c3   :  { %v9523_v12 = vpop.f32.mrb[27].mxu1 }
 0x2c8   :  { %v9525_v46 = vpop.f32.mrb[28].mxu1 }
 0x2c9   :  { %v9527_v14 = vpop.f32.mrb[29].mxu1 }
 0x2ca   :  { %v9529_v41 = vpop.f32.mrb[30].mxu1 }
 0x2cb   :  { %v9531_v22 = vpop.f32.mrb[31].mxu1 }
 0x2ce   :  { %v6819_v28 = vpop.f32.mrb[0].mxu0 }
 0x2cf   :  { %v6883_v32 = vadd.f32 %v6819_v28, %v6489_v16  ;;  %v4429_v27 = vpop.f32.mrb[1].mxu0 }
 0x2d0   :  { %v6884_v6 = vadd.f32 %v4429_v27, %v2536_v56  ;;  %v6820_v1 = vpop.f32.mrb[2].mxu0 }
 0x2d1   :  { %v5769_v47 = vpack.c.bf16 %v6883_v32, %v6883_v32  ;;  %v6885_v34 = vadd.f32 %v6820_v1, %v6490_v49  ;;  %v4432_v17 = vpop.f32.mrb[3].mxu0  ;;  %v5205_v51 = vmul.f32 %v6883_v32, %v6883_v32  ;;  %v5072_v21 = vsel %vm355_vm1, %v6883_v32, 0.0 }
 0x2d2   :  { %v5767_v9 = vpack.c.bf16 %v6884_v6, %v6884_v6  ;;  %v5203_v61 = vmul.f32 %v6884_v6, %v6884_v6  ;;  %v6886_v2 = vadd.f32 %v4432_v17, %v2539_v13  ;;  %v5069_v10 = vsel %vm355_vm1, %v6884_v6, 0.0 }
 0x2d3   :  { %5007 = vst.msk [vmem:[%s9955_s4 + $0x8] sm:$0xf] %vm5004_vm6, %v5769_v47  ;;  %v5770_v43 = vpack.c.bf16 %v6885_v34, %v6885_v34  ;;  %v5206_v36 = vmul.f32 %v6885_v34, %v6885_v34  ;;  %v5270_v4 = vsel %vm355_vm1, %v5205_v51, 0.0  ;;  %v5074_v48 = vsel %vm355_vm1, %v6885_v34, 0.0 }
 0x2d4   :  { %5005 = vst.msk [vmem:[%s9955_s4] sm:$0xf] %vm5004_vm6, %v5767_v9  ;;  %v5768_v19 = vpack.c.bf16 %v6886_v2, %v6886_v2  ;;  %v5070_v44 = vsel %vm355_vm1, %v6886_v2, 0.0  ;;  %v5204_v11 = vmul.f32 %v6886_v2, %v6886_v2  ;;  %v5267_v52 = vsel %vm355_vm1, %v5203_v61, 0.0 }
 0x2d5   :  { %5008 = vst.msk [vmem:[%s9955_s4 + $0xc] sm:$0xf] %vm5004_vm6, %v5770_v43  ;;  %v5071_v30 = vadd.f32 %v5070_v44, %v5069_v10  ;;  %v5272_v33 = vsel %vm355_vm1, %v5206_v36, 0.0 }
 0x2d6   :  { %5006 = vst.msk [vmem:[%s9955_s4 + $0x4] sm:$0xf] %vm5004_vm6, %v5768_v19  ;;  %v5268_v50 = vsel %vm355_vm1, %v5204_v11, 0.0  ;;  %v6823_v0 = vpop.f32.mrb[4].mxu0 }
 0x2d7   :  { %v5073_v23 = vadd.f32 %v5072_v21, %v5071_v30  ;;  %v5269_v20 = vadd.f32 %v5268_v50, %v5267_v52  ;;  %v6887_v25 = vadd.f32 %v6823_v0, %v6493_v58  ;;  %v4445_v24 = vpop.f32.mrb[5].mxu0 }
 0x2d8   :  { %v6888_v59 = vadd.f32 %v4445_v24, %v2552_v3  ;;  %v6824_v57 = vpop.f32.mrb[6].mxu0 }
 0x2d9   :  { %v5271_v16 = vadd.f32 %v5270_v4, %v5269_v20  ;;  %v5773_v56 = vpack.c.bf16 %v6887_v25, %v6887_v25  ;;  %v4448_v49 = vpop.f32.mrb[7].mxu0  ;;  %v5075_v28 = vadd.f32 %v5074_v48, %v5073_v23  ;;  %v6889_v3 = vadd.f32 %v6824_v57, %v9481_v42 }
 0x2da   :  { %v5771_v13 = vpack.c.bf16 %v6888_v59, %v6888_v59  ;;  %v5076_v32 = vsel %vm355_vm1, %v6888_v59, 0.0  ;;  %v5207_v27 = vmul.f32 %v6888_v59, %v6888_v59  ;;  %v6890_v6 = vadd.f32 %v4448_v49, %v9483_v38 }
 0x2db   :  { %5011 = vst.msk [vmem:[%s9955_s4 + $0x18] sm:$0xf] %vm5004_vm6, %v5773_v56  ;;  %v5273_v58 = vadd.f32 %v5272_v33, %v5271_v16  ;;  %v5077_v1 = vadd.f32 %v5076_v32, %v5075_v28  ;;  %v5209_v34 = vmul.f32 %v6887_v25, %v6887_v25  ;;  %v5774_v9 = vpack.c.bf16 %v6889_v3, %v6889_v3 }
 0x2dc   :  { %5009 = vst.msk [vmem:[%s9955_s4 + $0x10] sm:$0xf] %vm5004_vm6, %v5771_v13  ;;  %v5274_v47 = vsel %vm355_vm1, %v5207_v27, 0.0  ;;  %v5772_v61 = vpack.c.bf16 %v6890_v6, %v6890_v6  ;;  %v5078_v2 = vsel %vm355_vm1, %v6890_v6, 0.0  ;;  %v5208_v51 = vmul.f32 %v6890_v6, %v6890_v6 }
 0x2dd   :  { %v5275_v17 = vadd.f32 %v5274_v47, %v5273_v58  ;;  %5012 = vst.msk [vmem:[%s9955_s4 + $0x1c] sm:$0xf] %vm5004_vm6, %v5774_v9  ;;  %v5079_v42 = vadd.f32 %v5078_v2, %v5077_v1  ;;  %v5080_v19 = vsel %vm355_vm1, %v6887_v25, 0.0  ;;  %v5210_v44 = vmul.f32 %v6889_v3, %v6889_v3 }
 0x2de   :  { %v6827_v43 = vpop.f32.mrb[8].mxu0  ;;  %5010 = vst.msk [vmem:[%s9955_s4 + $0x14] sm:$0xf] %vm5004_vm6, %v5772_v61  ;;  %v5276_v11 = vsel %vm355_vm1, %v5208_v51, 0.0  ;;  %v5278_v21 = vsel %vm355_vm1, %v5209_v34, 0.0  ;;  %v5082_v23 = vsel %vm355_vm1, %v6889_v3, 0.0 }
 0x2df   :  { %v6891_v38 = vadd.f32 %v6827_v43, %v9485_v53  ;;  %v4461_v10 = vpop.f32.mrb[9].mxu0  ;;  %v5081_v52 = vadd.f32 %v5080_v19, %v5079_v42  ;;  %v5277_v50 = vadd.f32 %v5276_v11, %v5275_v17  ;;  %v5280_v48 = vsel %vm355_vm1, %v5210_v44, 0.0 }
 0x2e0   :  { %v6892_v36 = vadd.f32 %v4461_v10, %v9487_v39  ;;  %v6828_v30 = vpop.f32.mrb[10].mxu0 }
 0x2e1   :  { %v5777_v0 = vpack.c.bf16 %v6891_v38, %v6891_v38  ;;  %v4464_v53 = vpop.f32.mrb[11].mxu0  ;;  %v5279_v4 = vadd.f32 %v5278_v21, %v5277_v50  ;;  %v5083_v39 = vadd.f32 %v5082_v23, %v5081_v52  ;;  %v6893_v59 = vadd.f32 %v6828_v30, %v9489_v7 }
 0x2e2   :  { %v5775_v20 = vpack.c.bf16 %v6892_v36, %v6892_v36  ;;  %v5084_v25 = vsel %vm355_vm1, %v6892_v36, 0.0  ;;  %v5211_v24 = vmul.f32 %v6892_v36, %v6892_v36  ;;  %v6894_v57 = vadd.f32 %v4464_v53, %v9491_v60 }
 0x2e3   :  { %5015 = vst.msk [vmem:[%s9955_s4 + $0x28] sm:$0xf] %vm5004_vm6, %v5777_v0  ;;  %v5213_v16 = vmul.f32 %v6891_v38, %v6891_v38  ;;  %v5085_v56 = vadd.f32 %v5084_v25, %v5083_v39  ;;  %v5281_v49 = vadd.f32 %v5280_v48, %v5279_v4  ;;  %v5778_v13 = vpack.c.bf16 %v6893_v59, %v6893_v59 }
 0x2e4   :  { %5013 = vst.msk [vmem:[%s9955_s4 + $0x20] sm:$0xf] %vm5004_vm6, %v5775_v20  ;;  %v5282_v33 = vsel %vm355_vm1, %v5211_v24, 0.0  ;;  %v5776_v28 = vpack.c.bf16 %v6894_v57, %v6894_v57  ;;  %v5086_v32 = vsel %vm355_vm1, %v6894_v57, 0.0  ;;  %v5212_v27 = vmul.f32 %v6894_v57, %v6894_v57 }
 0x2e5   :  { %v5283_v58 = vadd.f32 %v5282_v33, %v5281_v49  ;;  %5016 = vst.msk [vmem:[%s9955_s4 + $0x2c] sm:$0xf] %vm5004_vm6, %v5778_v13  ;;  %v5087_v60 = vadd.f32 %v5086_v32, %v5085_v56  ;;  %v5088_v1 = vsel %vm355_vm1, %v6891_v38, 0.0  ;;  %v5214_v47 = vmul.f32 %v6893_v59, %v6893_v59 }
 0x2e6   :  { %v6831_v7 = vpop.f32.mrb[12].mxu0  ;;  %5014 = vst.msk [vmem:[%s9955_s4 + $0x24] sm:$0xf] %vm5004_vm6, %v5776_v28  ;;  %v5284_v34 = vsel %vm355_vm1, %v5212_v27, 0.0  ;;  %v5286_v61 = vsel %vm355_vm1, %v5213_v16, 0.0  ;;  %v5090_v42 = vsel %vm355_vm1, %v6893_v59, 0.0 }
 0x2e7   :  { %v6895_v3 = vadd.f32 %v6831_v7, %v9493_v63  ;;  %v4477_v6 = vpop.f32.mrb[13].mxu0  ;;  %v5089_v2 = vadd.f32 %v5088_v1, %v5087_v60  ;;  %v5285_v51 = vadd.f32 %v5284_v34, %v5283_v58  ;;  %v5288_v30 = vsel %vm355_vm1, %v5214_v47, 0.0 }
 0x2e8   :  { %v6896_v17 = vadd.f32 %v4477_v6, %v9495_v62  ;;  %v6832_v9 = vpop.f32.mrb[14].mxu0 }
 0x2e9   :  { %v5781_v43 = vpack.c.bf16 %v6895_v3, %v6895_v3  ;;  %v4480_v63 = vpop.f32.mrb[15].mxu0  ;;  %v5287_v44 = vadd.f32 %v5286_v61, %v5285_v51  ;;  %v5091_v62 = vadd.f32 %v5090_v42, %v5089_v2  ;;  %v6897_v11 = vadd.f32 %v6832_v9, %v9497_v54 }
 0x2ea   :  { %v5779_v38 = vpack.c.bf16 %v6896_v17, %v6896_v17  ;;  %v5092_v10 = vsel %vm355_vm1, %v6896_v17, 0.0  ;;  %v5215_v19 = vmul.f32 %v6896_v17, %v6896_v17  ;;  %v6898_v36 = vadd.f32 %v4480_v63, %v9499_v29 }
 0x2eb   :  { %5019 = vst.msk [vmem:[%s9955_s4 + $0x38] sm:$0xf] %vm5004_vm6, %v5781_v43  ;;  %v5217_v52 = vmul.f32 %v6895_v3, %v6895_v3  ;;  %v5093_v50 = vadd.f32 %v5092_v10, %v5091_v62  ;;  %v5289_v0 = vadd.f32 %v5288_v30, %v5287_v44  ;;  %v5782_v53 = vpack.c.bf16 %v6897_v11, %v6897_v11 }
 0x2ec   :  { %5017 = vst.msk [vmem:[%s9955_s4 + $0x30] sm:$0xf] %vm5004_vm6, %v5779_v38  ;;  %v5290_v21 = vsel %vm355_vm1, %v5215_v19, 0.0  ;;  %v5780_v23 = vpack.c.bf16 %v6898_v36, %v6898_v36  ;;  %v5094_v20 = vsel %vm355_vm1, %v6898_v36, 0.0  ;;  %v5216_v25 = vmul.f32 %v6898_v36, %v6898_v36 }
 0x2ed   :  { %v5291_v24 = vadd.f32 %v5290_v21, %v5289_v0  ;;  %5020 = vst.msk [vmem:[%s9955_s4 + $0x3c] sm:$0xf] %vm5004_vm6, %v5782_v53  ;;  %v5095_v29 = vadd.f32 %v5094_v20, %v5093_v50  ;;  %v5096_v59 = vsel %vm355_vm1, %v6895_v3, 0.0  ;;  %v5218_v57 = vmul.f32 %v6897_v11, %v6897_v11 }
 0x2ee   :  { %v6835_v54 = vpop.f32.mrb[16].mxu0  ;;  %5018 = vst.msk [vmem:[%s9955_s4 + $0x34] sm:$0xf] %vm5004_vm6, %v5780_v23  ;;  %v5292_v48 = vsel %vm355_vm1, %v5216_v25, 0.0  ;;  %v5294_v56 = vsel %vm355_vm1, %v5217_v52, 0.0  ;;  %v5098_v32 = vsel %vm355_vm1, %v6897_v11, 0.0 }
 0x2ef   :  { %v6899_v4 = vadd.f32 %v6835_v54, %v9501_v15  ;;  %v4493_v39 = vpop.f32.mrb[17].mxu0  ;;  %v5097_v49 = vadd.f32 %v5096_v59, %v5095_v29  ;;  %v5293_v13 = vadd.f32 %v5292_v48, %v5291_v24  ;;  %v5296_v1 = vsel %vm355_vm1, %v5218_v57, 0.0 }
 0x2f0   :  { %v6900_v33 = vadd.f32 %v4493_v39, %v9503_v18  ;;  %v6836_v16 = vpop.f32.mrb[18].mxu0 }
 0x2f1   :  { %v5785_v28 = vpack.c.bf16 %v6899_v4, %v6899_v4  ;;  %v4496_v15 = vpop.f32.mrb[19].mxu0  ;;  %v5295_v60 = vadd.f32 %v5294_v56, %v5293_v13  ;;  %v5099_v18 = vadd.f32 %v5098_v32, %v5097_v49  ;;  %v6901_v3 = vadd.f32 %v6836_v16, %v9505_v26 }
 0x2f2   :  { %v5783_v27 = vpack.c.bf16 %v6900_v33, %v6900_v33  ;;  %v5100_v7 = vsel %vm355_vm1, %v6900_v33, 0.0  ;;  %v5219_v58 = vmul.f32 %v6900_v33, %v6900_v33  ;;  %v6902_v6 = vadd.f32 %v4496_v15, %v9507_v8 }
 0x2f3   :  { %5023 = vst.msk [vmem:[%s9955_s4 + $0x48] sm:$0xf] %vm5004_vm6, %v5785_v28  ;;  %v5221_v34 = vmul.f32 %v6899_v4, %v6899_v4  ;;  %v5101_v17 = vadd.f32 %v5100_v7, %v5099_v18  ;;  %v5297_v9 = vadd.f32 %v5296_v1, %v5295_v60  ;;  %v5786_v61 = vpack.c.bf16 %v6901_v3, %v6901_v3 }
 0x2f4   :  { %5021 = vst.msk [vmem:[%s9955_s4 + $0x40] sm:$0xf] %vm5004_vm6, %v5783_v27  ;;  %v5298_v47 = vsel %vm355_vm1, %v5219_v58, 0.0  ;;  %v5784_v2 = vpack.c.bf16 %v6902_v6, %v6902_v6  ;;  %v5102_v51 = vsel %vm355_vm1, %v6902_v6, 0.0  ;;  %v5220_v43 = vmul.f32 %v6902_v6, %v6902_v6 }
 0x2f5   :  { %v5299_v63 = vadd.f32 %v5298_v47, %v5297_v9  ;;  %5024 = vst.msk [vmem:[%s9955_s4 + $0x4c] sm:$0xf] %vm5004_vm6, %v5786_v61  ;;  %v5103_v8 = vadd.f32 %v5102_v51, %v5101_v17  ;;  %v5104_v10 = vsel %vm355_vm1, %v6899_v4, 0.0  ;;  %v5222_v19 = vmul.f32 %v6901_v3, %v6901_v3 }
 0x2f6   :  { %v6839_v26 = vpop.f32.mrb[20].mxu0  ;;  %5022 = vst.msk [vmem:[%s9955_s4 + $0x44] sm:$0xf] %vm5004_vm6, %v5784_v2  ;;  %v5300_v44 = vsel %vm355_vm1, %v5220_v43, 0.0  ;;  %v5302_v36 = vsel %vm355_vm1, %v5221_v34, 0.0  ;;  %v5106_v50 = vsel %vm355_vm1, %v6901_v3, 0.0 }
 0x2f7   :  { %v6903_v42 = vadd.f32 %v6839_v26, %v9509_v40  ;;  %v4509_v38 = vpop.f32.mrb[21].mxu0  ;;  %v5105_v30 = vadd.f32 %v5104_v10, %v5103_v8  ;;  %v5301_v21 = vadd.f32 %v5300_v44, %v5299_v63  ;;  %v5304_v24 = vsel %vm355_vm1, %v5222_v19, 0.0 }
 0x2f8   :  { %v6904_v62 = vadd.f32 %v4509_v38, %v9511_v35  ;;  %v6840_v11 = vpop.f32.mrb[22].mxu0 }
 0x2f9   :  { %v5789_v52 = vpack.c.bf16 %v6903_v42, %v6903_v42  ;;  %v4512_v40 = vpop.f32.mrb[23].mxu0  ;;  %v5303_v20 = vadd.f32 %v5302_v36, %v5301_v21  ;;  %v5107_v35 = vadd.f32 %v5106_v50, %v5105_v30  ;;  %v6905_v25 = vadd.f32 %v6840_v11, %v9513_v5 }
 0x2fa   :  { %v5787_v0 = vpack.c.bf16 %v6904_v62, %v6904_v62  ;;  %v5108_v53 = vsel %vm355_vm1, %v6904_v62, 0.0  ;;  %v5223_v23 = vmul.f32 %v6904_v62, %v6904_v62  ;;  %v6906_v54 = vadd.f32 %v4512_v40, %v9515_v31 }
 0x2fb   :  { %5027 = vst.msk [vmem:[%s9955_s4 + $0x58] sm:$0xf] %vm5004_vm6, %v5789_v52  ;;  %v5225_v4 = vmul.f32 %v6903_v42, %v6903_v42  ;;  %v5109_v39 = vadd.f32 %v5108_v53, %v5107_v35  ;;  %v5305_v59 = vadd.f32 %v5304_v24, %v5303_v20  ;;  %v5790_v57 = vpack.c.bf16 %v6905_v25, %v6905_v25 }
 0x2fc   :  { %5025 = vst.msk [vmem:[%s9955_s4 + $0x50] sm:$0xf] %vm5004_vm6, %v5787_v0  ;;  %v5306_v29 = vsel %vm355_vm1, %v5223_v23, 0.0  ;;  %v5788_v48 = vpack.c.bf16 %v6906_v54, %v6906_v54  ;;  %v5110_v33 = vsel %vm355_vm1, %v6906_v54, 0.0  ;;  %v5224_v16 = vmul.f32 %v6906_v54, %v6906_v54 }
 0x2fd   :  { %v5307_v56 = vadd.f32 %v5306_v29, %v5305_v59  ;;  %5028 = vst.msk [vmem:[%s9955_s4 + $0x5c] sm:$0xf] %vm5004_vm6, %v5790_v57  ;;  %v5111_v31 = vadd.f32 %v5110_v33, %v5109_v39  ;;  %v5112_v28 = vsel %vm355_vm1, %v6903_v42, 0.0  ;;  %v5226_v15 = vmul.f32 %v6905_v25, %v6905_v25 }
 0x2fe   :  { %v6843_v5 = vpop.f32.mrb[24].mxu0  ;;  %5026 = vst.msk [vmem:[%s9955_s4 + $0x54] sm:$0xf] %vm5004_vm6, %v5788_v48  ;;  %v5308_v32 = vsel %vm355_vm1, %v5224_v16, 0.0  ;;  %v5310_v58 = vsel %vm355_vm1, %v5225_v4, 0.0  ;;  %v5114_v6 = vsel %vm355_vm1, %v6905_v25, 0.0 }
 0x2ff   :  { %v6907_v49 = vadd.f32 %v6843_v5, %v9517_v37  ;;  %v4525_v13 = vpop.f32.mrb[25].mxu0  ;;  %v5113_v60 = vadd.f32 %v5112_v28, %v5111_v31  ;;  %v5309_v18 = vadd.f32 %v5308_v32, %v5307_v56  ;;  %v5312_v2 = vsel %vm355_vm1, %v5226_v15, 0.0 }
 0x300   :  { %v6908_v27 = vadd.f32 %v4525_v13, %v9519_v55  ;;  %v6844_v7 = vpop.f32.mrb[26].mxu0 }
 0x301   :  { %v5793_v3 = vpack.c.bf16 %v6907_v49, %v6907_v49  ;;  %v4528_v37 = vpop.f32.mrb[27].mxu0  ;;  %v5311_v17 = vadd.f32 %v5310_v58, %v5309_v18  ;;  %v5115_v55 = vadd.f32 %v5114_v6, %v5113_v60  ;;  %v6909_v9 = vadd.f32 %v6844_v7, %v9521_v45 }
 0x302   :  { %v5791_v1 = vpack.c.bf16 %v6908_v27, %v6908_v27  ;;  %v5116_v47 = vsel %vm355_vm1, %v6908_v27, 0.0  ;;  %v5227_v34 = vmul.f32 %v6908_v27, %v6908_v27  ;;  %v6910_v61 = vadd.f32 %v4528_v37, %v9523_v12 }
 0x303   :  { %5031 = vst.msk [vmem:[%s9955_s4 + $0x68] sm:$0xf] %vm5004_vm6, %v5793_v3  ;;  %v5229_v43 = vmul.f32 %v6907_v49, %v6907_v49  ;;  %v5117_v26 = vadd.f32 %v5116_v47, %v5115_v55  ;;  %v5313_v63 = vadd.f32 %v5312_v2, %v5311_v17  ;;  %v5794_v8 = vpack.c.bf16 %v6909_v9, %v6909_v9 }
 0x304   :  { %5029 = vst.msk [vmem:[%s9955_s4 + $0x60] sm:$0xf] %vm5004_vm6, %v5791_v1  ;;  %v5314_v51 = vsel %vm355_vm1, %v5227_v34, 0.0  ;;  %v5792_v42 = vpack.c.bf16 %v6910_v61, %v6910_v61  ;;  %v5118_v38 = vsel %vm355_vm1, %v6910_v61, 0.0  ;;  %v5228_v10 = vmul.f32 %v6910_v61, %v6910_v61 }
 0x305   :  { %v5315_v19 = vadd.f32 %v5314_v51, %v5313_v63  ;;  %5032 = vst.msk [vmem:[%s9955_s4 + $0x6c] sm:$0xf] %vm5004_vm6, %v5794_v8  ;;  %v5119_v12 = vadd.f32 %v5118_v38, %v5117_v26  ;;  %v5120_v11 = vsel %vm355_vm1, %v6907_v49, 0.0  ;;  %v5230_v36 = vmul.f32 %v6909_v9, %v6909_v9 }
 0x306   :  { %v6847_v45 = vpop.f32.mrb[28].mxu0  ;;  %5030 = vst.msk [vmem:[%s9955_s4 + $0x64] sm:$0xf] %vm5004_vm6, %v5792_v42  ;;  %v5316_v30 = vsel %vm355_vm1, %v5228_v10, 0.0  ;;  %v5318_v40 = vsel %vm355_vm1, %v5229_v43, 0.0  ;;  %v5122_v23 = vsel %vm355_vm1, %v6909_v9, 0.0 }
 0x307   :  { %v6911_v44 = vadd.f32 %v6847_v45, %v9525_v46  ;;  %v4541_v62 = vpop.f32.mrb[29].mxu0  ;;  %v5121_v50 = vadd.f32 %v5120_v11, %v5119_v12  ;;  %v5317_v0 = vadd.f32 %v5316_v30, %v5315_v19  ;;  %v5320_v4 = vsel %vm355_vm1, %v5230_v36, 0.0 }
 0x308   :  { %v6912_v21 = vadd.f32 %v4541_v62, %v9527_v14  ;;  %v6848_v52 = vpop.f32.mrb[30].mxu0 }
 0x309   :  { %v5797_v53 = vpack.c.bf16 %v6911_v44, %v6911_v44  ;;  %v4544_v46 = vpop.f32.mrb[31].mxu0  ;;  %v5319_v54 = vadd.f32 %v5318_v40, %v5317_v0  ;;  %v5123_v14 = vadd.f32 %v5122_v23, %v5121_v50  ;;  %v6913_v24 = vadd.f32 %v6848_v52, %v9529_v41 }
 0x30a   :  { %v5795_v20 = vpack.c.bf16 %v6912_v21, %v6912_v21  ;;  %v5124_v35 = vsel %vm355_vm1, %v6912_v21, 0.0  ;;  %v5231_v25 = vmul.f32 %v6912_v21, %v6912_v21  ;;  %v6914_v29 = vadd.f32 %v4544_v46, %v9531_v22 }
 0x30b   :  { %5035 = vst.msk [vmem:[%s9955_s4 + $0x78] sm:$0xf] %vm5004_vm6, %v5797_v53  ;;  %v5125_v59 = vadd.f32 %v5124_v35, %v5123_v14  ;;  %v5321_v57 = vadd.f32 %v5320_v4, %v5319_v54  ;;  %v5798_v48 = vpack.c.bf16 %v6913_v24, %v6913_v24  ;;  %v5233_v33 = vmul.f32 %v6911_v44, %v6911_v44 }
 0x30c   :  { %5033 = vst.msk [vmem:[%s9955_s4 + $0x70] sm:$0xf] %vm5004_vm6, %v5795_v20  ;;  %v5322_v39 = vsel %vm355_vm1, %v5231_v25, 0.0  ;;  %v5796_v16 = vpack.c.bf16 %v6914_v29, %v6914_v29  ;;  %v5126_v5 = vsel %vm355_vm1, %v6914_v29, 0.0  ;;  %v5232_v56 = vmul.f32 %v6914_v29, %v6914_v29 }
 0x30d   :  { %v5323_v31 = vadd.f32 %v5322_v39, %v5321_v57  ;;  %5036 = vst.msk [vmem:[%s9955_s4 + $0x7c] sm:$0xf] %vm5004_vm6, %v5798_v48  ;;  %v5234_v22 = vmul.f32 %v6913_v24, %v6913_v24  ;;  %v5127_v49 = vadd.f32 %v5126_v5, %v5125_v59  ;;  %v5128_v28 = vsel %vm355_vm1, %v6911_v44, 0.0 }
 0x30e   :  { %v6851_v41 = vpop.f32.mrb[32].mxu0  ;;  %5034 = vst.msk [vmem:[%s9955_s4 + $0x74] sm:$0xf] %vm5004_vm6, %v5796_v16  ;;  %v5324_v15 = vsel %vm355_vm1, %v5232_v56, 0.0  ;;  %v5326_v37 = vsel %vm355_vm1, %v5233_v33, 0.0  ;;  %v5130_v47 = vsel %vm355_vm1, %v6913_v24, 0.0 }
 0x30f   :  { %v4557_v13 = vpop.f32.mrb[33].mxu0  ;;  %v5129_v7 = vadd.f32 %v5128_v28, %v5127_v49  ;;  %v5325_v58 = vadd.f32 %v5324_v15, %v5323_v31  ;;  %v5328_v34 = vsel %vm355_vm1, %v5234_v22, 0.0 }
 0x310   :  { %v6587_v32 = vpop.f32.mrb[32].mxu1  ;;  %v6852_v27 = vpop.f32.mrb[34].mxu0 }
 0x311   :  { %v3049_v60 = vpop.f32.mrb[33].mxu1  ;;  %v6915_v18 = vadd.f32 %v6851_v41, %v6587_v32  ;;  %v4560_v3 = vpop.f32.mrb[35].mxu0  ;;  %v5327_v17 = vadd.f32 %v5326_v37, %v5325_v58  ;;  %v5131_v2 = vadd.f32 %v5130_v47, %v5129_v7 }
 0x312   :  { %v6588_v6 = vpop.f32.mrb[34].mxu1  ;;  %v6916_v1 = vadd.f32 %v4557_v13, %v3049_v60 }
 0x313   :  { %v5801_v55 = vpack.c.bf16 %v6915_v18, %v6915_v18  ;;  %v3052_v9 = vpop.f32.mrb[35].mxu1  ;;  %v5329_v26 = vadd.f32 %v5328_v34, %v5327_v17  ;;  %v6917_v63 = vadd.f32 %v6852_v27, %v6588_v6  ;;  %v5237_v45 = vmul.f32 %v6915_v18, %v6915_v18 }
 0x314   :  { %v5799_v61 = vpack.c.bf16 %v6916_v1, %v6916_v1  ;;  %v5132_v51 = vsel %vm355_vm1, %v6916_v1, 0.0  ;;  %v5235_v43 = vmul.f32 %v6916_v1, %v6916_v1  ;;  %v6918_v8 = vadd.f32 %v4560_v3, %v3052_v9 }
 0x315   :  { %5039 = vst.msk [vmem:[%s9955_s4 + $0x88] sm:$0xf] %vm5004_vm6, %v5801_v55  ;;  %v5133_v42 = vadd.f32 %v5132_v51, %v5131_v2  ;;  %v5802_v12 = vpack.c.bf16 %v6917_v63, %v6917_v63  ;;  %v5136_v53 = vsel %vm355_vm1, %v6915_v18, 0.0  ;;  %v5238_v46 = vmul.f32 %v6917_v63, %v6917_v63 }
 0x316   :  { %5037 = vst.msk [vmem:[%s9955_s4 + $0x80] sm:$0xf] %vm5004_vm6, %v5799_v61  ;;  %v5330_v38 = vsel %vm355_vm1, %v5235_v43, 0.0  ;;  %v6855_v10 = vpop.f32.mrb[36].mxu0  ;;  %v5800_v62 = vpack.c.bf16 %v6918_v8, %v6918_v8  ;;  %v5134_v11 = vsel %vm355_vm1, %v6918_v8, 0.0  ;;  %v5236_v36 = vmul.f32 %v6918_v8, %v6918_v8 }
 0x317   :  { %v5331_v19 = vadd.f32 %v5330_v38, %v5329_v26  ;;  %v4573_v44 = vpop.f32.mrb[37].mxu0  ;;  %5040 = vst.msk [vmem:[%s9955_s4 + $0x8c] sm:$0xf] %vm5004_vm6, %v5802_v12  ;;  %v5135_v52 = vadd.f32 %v5134_v11, %v5133_v42  ;;  %v5334_v25 = vsel %vm355_vm1, %v5237_v45, 0.0  ;;  %v5138_v4 = vsel %vm355_vm1, %v6917_v63, 0.0 }
 0x318   :  { %v6591_v30 = vpop.f32.mrb[36].mxu1  ;;  %v6856_v21 = vpop.f32.mrb[38].mxu0  ;;  %5038 = vst.msk [vmem:[%s9955_s4 + $0x84] sm:$0xf] %vm5004_vm6, %v5800_v62  ;;  %v5332_v23 = vsel %vm355_vm1, %v5236_v36, 0.0  ;;  %v5336_v56 = vsel %vm355_vm1, %v5238_v46, 0.0 }
 0x319   :  { %v3065_v40 = vpop.f32.mrb[37].mxu1  ;;  %v6919_v50 = vadd.f32 %v6855_v10, %v6591_v30  ;;  %v4576_v0 = vpop.f32.mrb[39].mxu0  ;;  %v5137_v54 = vadd.f32 %v5136_v53, %v5135_v52  ;;  %v5333_v14 = vadd.f32 %v5332_v23, %v5331_v19 }
 0x31a   :  { %v6592_v20 = vpop.f32.mrb[38].mxu1  ;;  %v6920_v35 = vadd.f32 %v4573_v44, %v3065_v40 }
 0x31b   :  { %v5805_v24 = vpack.c.bf16 %v6919_v50, %v6919_v50  ;;  %v3068_v29 = vpop.f32.mrb[39].mxu1  ;;  %v5335_v48 = vadd.f32 %v5334_v25, %v5333_v14  ;;  %v5139_v33 = vadd.f32 %v5138_v4, %v5137_v54  ;;  %v6921_v16 = vadd.f32 %v6856_v21, %v6592_v20 }
 0x31c   :  { %v5803_v39 = vpack.c.bf16 %v6920_v35, %v6920_v35  ;;  %v5140_v59 = vsel %vm355_vm1, %v6920_v35, 0.0  ;;  %v5239_v57 = vmul.f32 %v6920_v35, %v6920_v35  ;;  %v6922_v5 = vadd.f32 %v4576_v0, %v3068_v29 }
 0x31d   :  { %5043 = vst.msk [vmem:[%s9955_s4 + $0x98] sm:$0xf] %vm5004_vm6, %v5805_v24  ;;  %v5241_v22 = vmul.f32 %v6919_v50, %v6919_v50  ;;  %v5141_v49 = vadd.f32 %v5140_v59, %v5139_v33  ;;  %v5337_v13 = vadd.f32 %v5336_v56, %v5335_v48  ;;  %v5806_v28 = vpack.c.bf16 %v6921_v16, %v6921_v16 }
 0x31e   :  { %5041 = vst.msk [vmem:[%s9955_s4 + $0x90] sm:$0xf] %vm5004_vm6, %v5803_v39  ;;  %v5338_v41 = vsel %vm355_vm1, %v5239_v57, 0.0  ;;  %v6859_v31 = vpop.f32.mrb[40].mxu0  ;;  %v5804_v32 = vpack.c.bf16 %v6922_v5, %v6922_v5  ;;  %v5142_v27 = vsel %vm355_vm1, %v6922_v5, 0.0  ;;  %v5240_v7 = vmul.f32 %v6922_v5, %v6922_v5 }
 0x31f   :  { %v4589_v15 = vpop.f32.mrb[41].mxu0  ;;  %v5339_v18 = vadd.f32 %v5338_v41, %v5337_v13  ;;  %5044 = vst.msk [vmem:[%s9955_s4 + $0x9c] sm:$0xf] %vm5004_vm6, %v5806_v28  ;;  %v5143_v3 = vadd.f32 %v5142_v27, %v5141_v49  ;;  %v5144_v47 = vsel %vm355_vm1, %v6919_v50, 0.0  ;;  %v5242_v34 = vmul.f32 %v6921_v16, %v6921_v16 }
 0x320   :  { %v6595_v58 = vpop.f32.mrb[40].mxu1  ;;  %v6860_v60 = vpop.f32.mrb[42].mxu0  ;;  %5042 = vst.msk [vmem:[%s9955_s4 + $0x94] sm:$0xf] %vm5004_vm6, %v5804_v32  ;;  %v5340_v17 = vsel %vm355_vm1, %v5240_v7, 0.0  ;;  %v5342_v61 = vsel %vm355_vm1, %v5241_v22, 0.0 }
 0x321   :  { %v3081_v37 = vpop.f32.mrb[41].mxu1  ;;  %v6923_v6 = vadd.f32 %v6859_v31, %v6595_v58  ;;  %v4592_v1 = vpop.f32.mrb[43].mxu0  ;;  %v5145_v2 = vadd.f32 %v5144_v47, %v5143_v3  ;;  %v5341_v51 = vadd.f32 %v5340_v17, %v5339_v18  ;;  %v5146_v63 = vsel %vm355_vm1, %v6921_v16, 0.0 }
 0x322   :  { %v6596_v55 = vpop.f32.mrb[42].mxu1  ;;  %v6924_v9 = vadd.f32 %v4589_v15, %v3081_v37  ;;  %v5344_v44 = vsel %vm355_vm1, %v5242_v34, 0.0 }
 0x323   :  { %v5809_v43 = vpack.c.bf16 %v6923_v6, %v6923_v6  ;;  %v3084_v26 = vpop.f32.mrb[43].mxu1  ;;  %v5343_v10 = vadd.f32 %v5342_v61, %v5341_v51  ;;  %v5147_v45 = vadd.f32 %v5146_v63, %v5145_v2  ;;  %v6925_v19 = vadd.f32 %v6860_v60, %v6596_v55 }
 0x324   :  { %v5807_v8 = vpack.c.bf16 %v6924_v9, %v6924_v9  ;;  %v5148_v42 = vsel %vm355_vm1, %v6924_v9, 0.0  ;;  %v5243_v38 = vmul.f32 %v6924_v9, %v6924_v9  ;;  %v6926_v12 = vadd.f32 %v4592_v1, %v3084_v26 }
 0x325   :  { %5047 = vst.msk [vmem:[%s9955_s4 + $0xa8] sm:$0xf] %vm5004_vm6, %v5809_v43  ;;  %v5245_v36 = vmul.f32 %v6923_v6, %v6923_v6  ;;  %v5149_v30 = vadd.f32 %v5148_v42, %v5147_v45  ;;  %v5345_v21 = vadd.f32 %v5344_v44, %v5343_v10  ;;  %v5810_v52 = vpack.c.bf16 %v6925_v19, %v6925_v19 }
 0x326   :  { %5045 = vst.msk [vmem:[%s9955_s4 + $0xa0] sm:$0xf] %vm5004_vm6, %v5807_v8  ;;  %v5346_v62 = vsel %vm355_vm1, %v5243_v38, 0.0  ;;  %v6863_v11 = vpop.f32.mrb[44].mxu0  ;;  %v5808_v50 = vpack.c.bf16 %v6926_v12, %v6926_v12  ;;  %v5150_v0 = vsel %vm355_vm1, %v6926_v12, 0.0  ;;  %v5244_v53 = vmul.f32 %v6926_v12, %v6926_v12 }
 0x327   :  { %v4605_v40 = vpop.f32.mrb[45].mxu0  ;;  %v5347_v20 = vadd.f32 %v5346_v62, %v5345_v21  ;;  %5048 = vst.msk [vmem:[%s9955_s4 + $0xac] sm:$0xf] %vm5004_vm6, %v5810_v52  ;;  %v5151_v35 = vadd.f32 %v5150_v0, %v5149_v30  ;;  %v5152_v24 = vsel %vm355_vm1, %v6923_v6, 0.0  ;;  %v5246_v29 = vmul.f32 %v6925_v19, %v6925_v19 }
 0x328   :  { %v6599_v46 = vpop.f32.mrb[44].mxu1  ;;  %v6864_v23 = vpop.f32.mrb[46].mxu0  ;;  %5046 = vst.msk [vmem:[%s9955_s4 + $0xa4] sm:$0xf] %vm5004_vm6, %v5808_v50  ;;  %v5348_v4 = vsel %vm355_vm1, %v5244_v53, 0.0  ;;  %v5350_v57 = vsel %vm355_vm1, %v5245_v36, 0.0 }
 0x329   :  { %v3097_v25 = vpop.f32.mrb[45].mxu1  ;;  %v6927_v54 = vadd.f32 %v6863_v11, %v6599_v46  ;;  %v4608_v14 = vpop.f32.mrb[47].mxu0  ;;  %v5153_v48 = vadd.f32 %v5152_v24, %v5151_v35  ;;  %v5349_v33 = vadd.f32 %v5348_v4, %v5347_v20  ;;  %v5154_v56 = vsel %vm355_vm1, %v6925_v19, 0.0 }
 0x32a   :  { %v6600_v39 = vpop.f32.mrb[46].mxu1  ;;  %v6928_v59 = vadd.f32 %v4605_v40, %v3097_v25  ;;  %v5352_v32 = vsel %vm355_vm1, %v5246_v29, 0.0 }
 0x32b   :  { %v5813_v16 = vpack.c.bf16 %v6927_v54, %v6927_v54  ;;  %v3100_v5 = vpop.f32.mrb[47].mxu1  ;;  %v5351_v49 = vadd.f32 %v5350_v57, %v5349_v33  ;;  %v5155_v13 = vadd.f32 %v5154_v56, %v5153_v48  ;;  %v6929_v28 = vadd.f32 %v6864_v23, %v6600_v39 }
 0x32c   :  { %v5811_v41 = vpack.c.bf16 %v6928_v59, %v6928_v59  ;;  %v5156_v31 = vsel %vm355_vm1, %v6928_v59, 0.0  ;;  %v5247_v22 = vmul.f32 %v6928_v59, %v6928_v59  ;;  %v6930_v15 = vadd.f32 %v4608_v14, %v3100_v5 }
 0x32d   :  { %5051 = vst.msk [vmem:[%s9955_s4 + $0xb8] sm:$0xf] %vm5004_vm6, %v5813_v16  ;;  %v5249_v58 = vmul.f32 %v6927_v54, %v6927_v54  ;;  %v5157_v60 = vadd.f32 %v5156_v31, %v5155_v13  ;;  %v5353_v18 = vadd.f32 %v5352_v32, %v5351_v49  ;;  %v5814_v3 = vpack.c.bf16 %v6929_v28, %v6929_v28 }
 0x32e   :  { %5049 = vst.msk [vmem:[%s9955_s4 + $0xb0] sm:$0xf] %vm5004_vm6, %v5811_v41  ;;  %v5354_v27 = vsel %vm355_vm1, %v5247_v22, 0.0  ;;  %v6867_v7 = vpop.f32.mrb[48].mxu0  ;;  %v5812_v6 = vpack.c.bf16 %v6930_v15, %v6930_v15  ;;  %v5158_v1 = vsel %vm355_vm1, %v6930_v15, 0.0  ;;  %v5248_v47 = vmul.f32 %v6930_v15, %v6930_v15 }
 0x32f   :  { %v4621_v37 = vpop.f32.mrb[49].mxu0  ;;  %v5355_v55 = vadd.f32 %v5354_v27, %v5353_v18  ;;  %5052 = vst.msk [vmem:[%s9955_s4 + $0xbc] sm:$0xf] %vm5004_vm6, %v5814_v3  ;;  %v5159_v9 = vadd.f32 %v5158_v1, %v5157_v60  ;;  %v5160_v43 = vsel %vm355_vm1, %v6927_v54, 0.0  ;;  %v5250_v26 = vmul.f32 %v6929_v28, %v6929_v28 }
 0x330   :  { %v6603_v34 = vpop.f32.mrb[48].mxu1  ;;  %v6868_v17 = vpop.f32.mrb[50].mxu0  ;;  %5050 = vst.msk [vmem:[%s9955_s4 + $0xb4] sm:$0xf] %vm5004_vm6, %v5812_v6  ;;  %v5356_v63 = vsel %vm355_vm1, %v5248_v47, 0.0  ;;  %v5358_v38 = vsel %vm355_vm1, %v5249_v58, 0.0 }
 0x331   :  { %v3113_v61 = vpop.f32.mrb[49].mxu1  ;;  %v6931_v2 = vadd.f32 %v6867_v7, %v6603_v34  ;;  %v4624_v51 = vpop.f32.mrb[51].mxu0  ;;  %v5161_v10 = vadd.f32 %v5160_v43, %v5159_v9  ;;  %v5357_v45 = vadd.f32 %v5356_v63, %v5355_v55  ;;  %v5162_v44 = vsel %vm355_vm1, %v6929_v28, 0.0 }
 0x332   :  { %v6604_v8 = vpop.f32.mrb[50].mxu1  ;;  %v6932_v42 = vadd.f32 %v4621_v37, %v3113_v61  ;;  %v5360_v50 = vsel %vm355_vm1, %v5250_v26, 0.0 }
 0x333   :  { %v5817_v19 = vpack.c.bf16 %v6931_v2, %v6931_v2  ;;  %v3116_v12 = vpop.f32.mrb[51].mxu1  ;;  %v5359_v30 = vadd.f32 %v5358_v38, %v5357_v45  ;;  %v5163_v21 = vadd.f32 %v5162_v44, %v5161_v10  ;;  %v6933_v52 = vadd.f32 %v6868_v17, %v6604_v8 }
 0x334   :  { %v5815_v62 = vpack.c.bf16 %v6932_v42, %v6932_v42  ;;  %v5164_v11 = vsel %vm355_vm1, %v6932_v42, 0.0  ;;  %v5251_v36 = vmul.f32 %v6932_v42, %v6932_v42  ;;  %v6934_v40 = vadd.f32 %v4624_v51, %v3116_v12 }
 0x335   :  { %5055 = vst.msk [vmem:[%s9955_s4 + $0xc8] sm:$0xf] %vm5004_vm6, %v5817_v19  ;;  %v5253_v46 = vmul.f32 %v6931_v2, %v6931_v2  ;;  %v5165_v23 = vadd.f32 %v5164_v11, %v5163_v21  ;;  %v5361_v20 = vadd.f32 %v5360_v50, %v5359_v30  ;;  %v5818_v35 = vpack.c.bf16 %v6933_v52, %v6933_v52 }
 0x336   :  { %5053 = vst.msk [vmem:[%s9955_s4 + $0xc0] sm:$0xf] %vm5004_vm6, %v5815_v62  ;;  %v5362_v0 = vsel %vm355_vm1, %v5251_v36, 0.0  ;;  %v6871_v53 = vpop.f32.mrb[52].mxu0  ;;  %v5816_v54 = vpack.c.bf16 %v6934_v40, %v6934_v40  ;;  %v5166_v14 = vsel %vm355_vm1, %v6934_v40, 0.0  ;;  %v5252_v24 = vmul.f32 %v6934_v40, %v6934_v40 }
 0x337   :  { %v4637_v25 = vpop.f32.mrb[53].mxu0  ;;  %v5363_v39 = vadd.f32 %v5362_v0, %v5361_v20  ;;  %5056 = vst.msk [vmem:[%s9955_s4 + $0xcc] sm:$0xf] %vm5004_vm6, %v5818_v35  ;;  %v5167_v59 = vadd.f32 %v5166_v14, %v5165_v23  ;;  %v5168_v16 = vsel %vm355_vm1, %v6931_v2, 0.0  ;;  %v5254_v5 = vmul.f32 %v6933_v52, %v6933_v52 }
 0x338   :  { %v6607_v29 = vpop.f32.mrb[52].mxu1  ;;  %v6872_v4 = vpop.f32.mrb[54].mxu0  ;;  %5054 = vst.msk [vmem:[%s9955_s4 + $0xc4] sm:$0xf] %vm5004_vm6, %v5816_v54  ;;  %v5364_v56 = vsel %vm355_vm1, %v5252_v24, 0.0  ;;  %v5366_v22 = vsel %vm355_vm1, %v5253_v46, 0.0 }
 0x339   :  { %v3129_v57 = vpop.f32.mrb[53].mxu1  ;;  %v6935_v48 = vadd.f32 %v6871_v53, %v6607_v29  ;;  %v4640_v33 = vpop.f32.mrb[55].mxu0  ;;  %v5169_v49 = vadd.f32 %v5168_v16, %v5167_v59  ;;  %v5365_v13 = vadd.f32 %v5364_v56, %v5363_v39  ;;  %v5170_v32 = vsel %vm355_vm1, %v6933_v52, 0.0 }
 0x33a   :  { %v6608_v41 = vpop.f32.mrb[54].mxu1  ;;  %v6936_v31 = vadd.f32 %v4637_v25, %v3129_v57  ;;  %v5368_v6 = vsel %vm355_vm1, %v5254_v5, 0.0 }
 0x33b   :  { %v5821_v28 = vpack.c.bf16 %v6935_v48, %v6935_v48  ;;  %v3132_v15 = vpop.f32.mrb[55].mxu1  ;;  %v5367_v60 = vadd.f32 %v5366_v22, %v5365_v13  ;;  %v5171_v18 = vadd.f32 %v5170_v32, %v5169_v49  ;;  %v6937_v3 = vadd.f32 %v6872_v4, %v6608_v41 }
 0x33c   :  { %v5819_v27 = vpack.c.bf16 %v6936_v31, %v6936_v31  ;;  %v5172_v7 = vsel %vm355_vm1, %v6936_v31, 0.0  ;;  %v5255_v58 = vmul.f32 %v6936_v31, %v6936_v31  ;;  %v6938_v37 = vadd.f32 %v4640_v33, %v3132_v15 }
 0x33d   :  { %5059 = vst.msk [vmem:[%s9955_s4 + $0xd8] sm:$0xf] %vm5004_vm6, %v5821_v28  ;;  %v5257_v34 = vmul.f32 %v6935_v48, %v6935_v48  ;;  %v5173_v17 = vadd.f32 %v5172_v7, %v5171_v18  ;;  %v5369_v55 = vadd.f32 %v5368_v6, %v5367_v60  ;;  %v5822_v9 = vpack.c.bf16 %v6937_v3, %v6937_v3 }
 0x33e   :  { %5057 = vst.msk [vmem:[%s9955_s4 + $0xd0] sm:$0xf] %vm5004_vm6, %v5819_v27  ;;  %v5370_v1 = vsel %vm355_vm1, %v5255_v58, 0.0  ;;  %v6875_v47 = vpop.f32.mrb[56].mxu0  ;;  %v5820_v2 = vpack.c.bf16 %v6938_v37, %v6938_v37  ;;  %v5174_v51 = vsel %vm355_vm1, %v6938_v37, 0.0  ;;  %v5256_v43 = vmul.f32 %v6938_v37, %v6938_v37 }
 0x33f   :  { %v4653_v61 = vpop.f32.mrb[57].mxu0  ;;  %v5371_v8 = vadd.f32 %v5370_v1, %v5369_v55  ;;  %5060 = vst.msk [vmem:[%s9955_s4 + $0xdc] sm:$0xf] %vm5004_vm6, %v5822_v9  ;;  %v5175_v42 = vadd.f32 %v5174_v51, %v5173_v17  ;;  %v5176_v19 = vsel %vm355_vm1, %v6935_v48, 0.0  ;;  %v5258_v12 = vmul.f32 %v6937_v3, %v6937_v3 }
 0x340   :  { %v6611_v26 = vpop.f32.mrb[56].mxu1  ;;  %v6876_v63 = vpop.f32.mrb[58].mxu0  ;;  %5058 = vst.msk [vmem:[%s9955_s4 + $0xd4] sm:$0xf] %vm5004_vm6, %v5820_v2  ;;  %v5372_v44 = vsel %vm355_vm1, %v5256_v43, 0.0  ;;  %v5374_v36 = vsel %vm355_vm1, %v5257_v34, 0.0 }
 0x341   :  { %v3145_v38 = vpop.f32.mrb[57].mxu1  ;;  %v6939_v10 = vadd.f32 %v6875_v47, %v6611_v26  ;;  %v4656_v45 = vpop.f32.mrb[59].mxu0  ;;  %v5177_v30 = vadd.f32 %v5176_v19, %v5175_v42  ;;  %v5373_v21 = vadd.f32 %v5372_v44, %v5371_v8  ;;  %v5178_v50 = vsel %vm355_vm1, %v6937_v3, 0.0 }
 0x342   :  { %v6612_v62 = vpop.f32.mrb[58].mxu1  ;;  %v6940_v11 = vadd.f32 %v4653_v61, %v3145_v38  ;;  %v5376_v54 = vsel %vm355_vm1, %v5258_v12, 0.0 }
 0x343   :  { %v5825_v52 = vpack.c.bf16 %v6939_v10, %v6939_v10  ;;  %v3148_v40 = vpop.f32.mrb[59].mxu1  ;;  %v5375_v23 = vadd.f32 %v5374_v36, %v5373_v21  ;;  %v5179_v20 = vadd.f32 %v5178_v50, %v5177_v30  ;;  %v6941_v35 = vadd.f32 %v6876_v63, %v6612_v62 }
 0x344   :  { %v5823_v0 = vpack.c.bf16 %v6940_v11, %v6940_v11  ;;  %v5180_v53 = vsel %vm355_vm1, %v6940_v11, 0.0  ;;  %v5259_v46 = vmul.f32 %v6940_v11, %v6940_v11  ;;  %v6942_v25 = vadd.f32 %v4656_v45, %v3148_v40 }
 0x345   :  { %5063 = vst.msk [vmem:[%s9955_s4 + $0xe8] sm:$0xf] %vm5004_vm6, %v5825_v52  ;;  %v5261_v29 = vmul.f32 %v6939_v10, %v6939_v10  ;;  %v5181_v4 = vadd.f32 %v5180_v53, %v5179_v20  ;;  %v5377_v39 = vadd.f32 %v5376_v54, %v5375_v23  ;;  %v5826_v59 = vpack.c.bf16 %v6941_v35, %v6941_v35 }
 0x346   :  { %5061 = vst.msk [vmem:[%s9955_s4 + $0xe0] sm:$0xf] %vm5004_vm6, %v5823_v0  ;;  %v5378_v14 = vsel %vm355_vm1, %v5259_v46, 0.0  ;;  %v6879_v24 = vpop.f32.mrb[60].mxu0  ;;  %v5824_v48 = vpack.c.bf16 %v6942_v25, %v6942_v25  ;;  %v5182_v33 = vsel %vm355_vm1, %v6942_v25, 0.0  ;;  %v5260_v16 = vmul.f32 %v6942_v25, %v6942_v25 }
 0x347   :  { %v4669_v57 = vpop.f32.mrb[61].mxu0  ;;  %v5379_v41 = vadd.f32 %v5378_v14, %v5377_v39  ;;  %5064 = vst.msk [vmem:[%s9955_s4 + $0xec] sm:$0xf] %vm5004_vm6, %v5826_v59  ;;  %v5183_v31 = vadd.f32 %v5182_v33, %v5181_v4  ;;  %v5184_v28 = vsel %vm355_vm1, %v6939_v10, 0.0  ;;  %v5262_v15 = vmul.f32 %v6941_v35, %v6941_v35 }
 0x348   :  { %v6615_v5 = vpop.f32.mrb[60].mxu1  ;;  %v6880_v56 = vpop.f32.mrb[62].mxu0  ;;  %5062 = vst.msk [vmem:[%s9955_s4 + $0xe4] sm:$0xf] %vm5004_vm6, %v5824_v48  ;;  %v5380_v32 = vsel %vm355_vm1, %v5260_v16, 0.0  ;;  %v5382_v58 = vsel %vm355_vm1, %v5261_v29, 0.0 }
 0x349   :  { %v3161_v22 = vpop.f32.mrb[61].mxu1  ;;  %v6943_v49 = vadd.f32 %v6879_v24, %v6615_v5  ;;  %v4672_v13 = vpop.f32.mrb[63].mxu0  ;;  %v5185_v60 = vadd.f32 %v5184_v28, %v5183_v31  ;;  %v5381_v18 = vadd.f32 %v5380_v32, %v5379_v41  ;;  %v5186_v6 = vsel %vm355_vm1, %v6941_v35, 0.0 }
 0x34a   :  { %v6616_v27 = vpop.f32.mrb[62].mxu1  ;;  %v6944_v7 = vadd.f32 %v4669_v57, %v3161_v22  ;;  %v5384_v2 = vsel %vm355_vm1, %v5262_v15, 0.0 }
 0x34b   :  { %v5829_v3 = vpack.c.bf16 %v6943_v49, %v6943_v49  ;;  %v3164_v37 = vpop.f32.mrb[63].mxu1  ;;  %v5383_v17 = vadd.f32 %v5382_v58, %v5381_v18  ;;  %v5187_v55 = vadd.f32 %v5186_v6, %v5185_v60  ;;  %v6945_v9 = vadd.f32 %v6880_v56, %v6616_v27 }
 0x34c   :  { %v5827_v1 = vpack.c.bf16 %v6944_v7, %v6944_v7  ;;  %v5188_v47 = vsel %vm355_vm1, %v6944_v7, 0.0  ;;  %v5263_v34 = vmul.f32 %v6944_v7, %v6944_v7  ;;  %v6946_v61 = vadd.f32 %v4672_v13, %v3164_v37 }
 0x34d   :  { %5067 = vst.msk [vmem:[%s9955_s4 + $0xf8] sm:$0xf] %vm5004_vm6, %v5829_v3  ;;  %v5189_v43 = vadd.f32 %v5188_v47, %v5187_v55  ;;  %v5385_v26 = vadd.f32 %v5384_v2, %v5383_v17  ;;  %v5830_v63 = vpack.c.bf16 %v6945_v9, %v6945_v9  ;;  %v5265_v8 = vmul.f32 %v6943_v49, %v6943_v49 }
 0x34e   :  { %5065 = vst.msk [vmem:[%s9955_s4 + $0xf0] sm:$0xf] %vm5004_vm6, %v5827_v1  ;;  %v5386_v51 = vsel %vm355_vm1, %v5263_v34, 0.0  ;;  %v5828_v42 = vpack.c.bf16 %v6946_v61, %v6946_v61  ;;  %v5190_v38 = vsel %vm355_vm1, %v6946_v61, 0.0  ;;  %v5264_v10 = vmul.f32 %v6946_v61, %v6946_v61 }
 0x34f   :  { %v5387_v45 = vadd.f32 %v5386_v51, %v5385_v26  ;;  %5068 = vst.msk [vmem:[%s9955_s4 + $0xfc] sm:$0xf] %vm5004_vm6, %v5830_v63  ;;  %v5191_v19 = vadd.f32 %v5190_v38, %v5189_v43  ;;  %v5192_v12 = vsel %vm355_vm1, %v6943_v49, 0.0  ;;  %v5266_v44 = vmul.f32 %v6945_v9, %v6945_v9 }
 0x350   :  { %5066 = vst.msk [vmem:[%s9955_s4 + $0xf4] sm:$0xf] %vm5004_vm6, %v5828_v42  ;;  %v5388_v62 = vsel %vm355_vm1, %v5264_v10, 0.0  ;;  %v5390_v30 = vsel %vm355_vm1, %v5265_v8, 0.0  ;;  %v5194_v21 = vsel %vm355_vm1, %v6945_v9, 0.0 }
 0x351   :  { %v5193_v11 = vadd.f32 %v5192_v12, %v5191_v19  ;;  %v5389_v36 = vadd.f32 %v5388_v62, %v5387_v45  ;;  %v5392_v50 = vsel %vm355_vm1, %v5266_v44, 0.0 }
 0x353   :  { %v5195_v52 = vadd.f32 %v5194_v21, %v5193_v11  ;;  %v5391_v40 = vadd.f32 %v5390_v30, %v5389_v36 }
 0x355   :  { %v5196_v0 = vrot.slane %v5195_v52, 4  ;;  %v5393_v53 = vadd.f32 %v5392_v50, %v5391_v40 }
 0x357   :  { %v5197_v46 = vadd.f32 %v5196_v0, %v5195_v52  ;;  %v5394_v23 = vrot.slane %v5393_v53, 4 }
 0x359   :  { %v5198_v20 = vrot.slane %v5197_v46, 2  ;;  %v5395_v35 = vadd.f32 %v5394_v23, %v5393_v53 }
 0x35b   :  { %v5199_v25 = vadd.f32 %v5198_v20, %v5197_v46  ;;  %v5396_v54 = vrot.slane %v5395_v35, 2 }
 0x35d   :  { %v5200_v14 = vrot.slane %v5199_v25, 1  ;;  %v5397_v24 = vadd.f32 %v5396_v54, %v5395_v35 }
 0x35f   :  { %v5201_v29 = vadd.f32 %v5200_v14, %v5199_v25  ;;  %v5398_v4 = vrot.slane %v5397_v24, 1 }
 0x361   :  { %5202 = vst.msk [vmem:[%s9956_s5] sm:$0x1] %vm370_vm3, %v5201_v29  ;;  %v5399_v39 = vadd.f32 %v5398_v4, %v5397_v24 }
 0x363   :  { %5400 = vst.msk [vmem:[%s9957_s6] sm:$0x1] %vm370_vm3, %v5399_v39 }

</bundles_post_ra>
